<compile_context>
chip_gen: v5e
topology: v5e:2x2
jax: 0.10.0
libtpu: 0.0.40
codegen_flags: <defaults>
</compile_context>

<pallas_src>
import functools

import numpy as np
import jax
import jax.numpy as jnp
from jax.experimental import pallas as pl
from jax.experimental.pallas import tpu as pltpu

PRIMITIVES = (
    "none", "max_pool_3x3", "avg_pool_3x3", "skip_connect",
    "sep_conv_3x3", "sep_conv_5x5", "dil_conv_3x3", "dil_conv_5x5",
)
EPS = 1e-5    # PyTorch BatchNorm2d default eps
PMAX = 4      # max |spatial offset| of any tap (dil_conv_5x5: 4)
NOFF = 2 * PMAX + 1


def _mixed_op_kernel(C, H, W, P,
                     x_ref, w_ref, mask_ref, invc_ref,
                     s3_dw1, s3_pw1, s3_dw2, s3_pw2,
                     s5_dw1, s5_pw1, s5_dw2, s5_pw2,
                     d3_dw, d3_pw, d5_dw, d5_pw,
                     o_ref):
    inv_P = 1.0 / float(P)

    x = x_ref[...]                       # (C, P) lane-dense input slab
    xr = jnp.maximum(x, 0.0)             # shared ReLU(x) for all 4 conv branches

    def mask_row(dh, dw):
        # Trace-time-constant validity mask for spatial offset (dh, dw): (1, P).
        idx = (dh + PMAX) * NOFF + (dw + PMAX)
        return mask_ref[idx:idx + 1, :]

    def shift(src, dh, dw):
        # shift[:, p] = src[:, p + dh*W + dw]; wrap positions are masked by callers.
        off = dh * W + dw
        if off == 0:
            return src
        return pltpu.roll(src, (-off) % P, axis=1)     # XLU lane rotate

    def dw_conv(src, wt_ref, k, dil, pad):
        """Depthwise k x k conv (stride 1), all channels at once on the slab."""
        acc = None
        for kh in range(k):
            for kw in range(k):
                dh, dw = kh * dil - pad, kw * dil - pad
                t = shift(src, dh, dw)
                if not (dh == 0 and dw == 0):
                    t = mask_row(dh, dw) * t            # zero-padding semantics
                term = wt_ref[kh * k + kw] * t          # (C,1) per-channel tap weight
                acc = term if acc is None else acc + term
        return acc

    def pw_conv(y, pw_ref):
        """1x1 conv, no bias: (C_out, C_in) @ (C_in, P)."""
        if C % 8 == 0:
            # MXU path (all real DARTS channel counts).
            return jnp.dot(pw_ref[...], y, preferred_element_type=jnp.float32)
        # Toy-size fallback: C broadcast-FMAs on the lane-dense slab.
        acc = None
        for ci in range(C):
            term = pw_ref[:, ci:ci + 1] * y[ci:ci + 1, :]
            acc = term if acc is None else acc + term
        return acc

    def batch_norm(y, scale=None):
        """BatchNorm2d(affine=False), training mode: batch stats, biased variance."""
        mu = jnp.sum(y, axis=1, keepdims=True) * inv_P
        d = y - mu
        var = jnp.sum(d * d, axis=1, keepdims=True) * inv_P
        s = jax.lax.rsqrt(var + EPS)
        if scale is not None:
            s = s * scale           # fold the mixture weight into the BN scale
        return d * s

    def sep_conv(k, pad, dw1, pw1, dw2, pw2, wmix):
        # ReLU > dw(k) > 1x1 > BN > ReLU > dw(k) > 1x1 > BN
        y = dw_conv(xr, dw1, k, 1, pad)
        y = jnp.maximum(batch_norm(pw_conv(y, pw1)), 0.0)
        y = dw_conv(y, dw2, k, 1, pad)
        return batch_norm(pw_conv(y, pw2), scale=wmix)

    def dil_conv(k, pad, dwr, pwr, wmix):
        # ReLU > dilated dw(k, d=2) > 1x1 > BN
        y = dw_conv(xr, dwr, k, 2, pad)
        return batch_norm(pw_conv(y, pwr), scale=wmix)

    # ---- max_pool_3x3 / avg_pool_3x3 (stride 1, pad 1) ----
    # max pool: implicit -inf padding; avg pool: count_include_pad=False.
    mp = x                  # center tap (0,0) is always valid
    ap_sum = x
    for dy in (-1, 0, 1):
        for dx in (-1, 0, 1):
            if dy == 0 and dx == 0:
                continue
            t = shift(x, dy, dx)
            m = mask_row(dy, dx)
            mp = jnp.maximum(mp, jnp.where(m > 0.5, t, -jnp.inf))
            ap_sum = ap_sum + m * t            # excluded taps contribute 0

    # ---- weighted mixture ('none' (Zero) contributes w[0] * 0 and is omitted) ----
    acc = w_ref[1] * mp
    acc = acc + (w_ref[2] * invc_ref[...]) * ap_sum     # w2 / valid-count folded
    acc = acc + w_ref[3] * x                            # skip_connect (Identity)
    acc = acc + sep_conv(3, 1, s3_dw1, s3_pw1, s3_dw2, s3_pw2, w_ref[4])
    acc = acc + sep_conv(5, 2, s5_dw1, s5_pw1, s5_dw2, s5_pw2, w_ref[5])
    acc = acc + dil_conv(3, 2, d3_dw, d3_pw, w_ref[6])
    acc = acc + dil_conv(5, 4, d5_dw, d5_pw, w_ref[7])
    o_ref[...] = acc


def mixed_op(x, weights, params):
    """x: (N, C, H, W) f32; weights: (8,) f32 (softmaxed alphas);
    params: 12 conv weight arrays in order
      [sep3: dw1,pw1,dw2,pw2, sep5: dw1,pw1,dw2,pw2, dil3: dw,pw, dil5: dw,pw]."""
    N, C, H, W = x.shape
    P = N * H * W

    # Glue: NCHW -> lane-dense (C, N*H*W) slab (and back after the kernel).
    x_slab = jnp.transpose(x.astype(jnp.float32), (1, 0, 2, 3)).reshape(C, P)

    # Trace-time constants: tap-validity masks for every offset in [-PMAX, PMAX]^2
    # (shared by pooling and all depthwise taps), plus avg-pool 1/valid-count.
    hh = np.arange(H)[:, None]
    ww = np.arange(W)[None, :]
    bank = np.zeros((NOFF * NOFF, P), np.float32)
    for dh in range(-PMAX, PMAX + 1):
        for dw in range(-PMAX, PMAX + 1):
            valid = ((hh + dh >= 0) & (hh + dh < H)
                     & (ww + dw >= 0) & (ww + dw < W)).astype(np.float32)
            bank[(dh + PMAX) * NOFF + (dw + PMAX)] = np.tile(valid.reshape(-1), N)
    cnt = np.zeros((H, W), np.float32)
    for dy in (-1, 0, 1):
        for dx in (-1, 0, 1):
            cnt += ((hh + dy >= 0) & (hh + dy < H)
                    & (ww + dx >= 0) & (ww + dx < W)).astype(np.float32)
    inv_cnt = np.tile((1.0 / cnt).reshape(1, -1), (1, N)).astype(np.float32)

    # Conv weights -> broadcast / matmul ready layouts (pure glue).
    def dw_fmt(p, k):   # (C,k,k) or (C,1,k,k) -> (k*k, C, 1) per-tap channel columns
        p = jnp.asarray(p, jnp.float32).reshape(C, k * k)
        return jnp.transpose(p, (1, 0)).reshape(k * k, C, 1)

    def pw_fmt(p):      # (C_out, C_in[,1,1]) -> (C_out, C_in)
        return jnp.asarray(p, jnp.float32).reshape(C, C)

    dw_ks = {0: 3, 2: 3, 4: 5, 6: 5, 8: 3, 10: 5}   # depthwise params and kernel sizes
    packed = [dw_fmt(p, dw_ks[i]) if i in dw_ks else pw_fmt(p)
              for i, p in enumerate(params)]

    vmem = pl.BlockSpec(memory_space=pltpu.MemorySpace.VMEM)
    smem = pl.BlockSpec(memory_space=pltpu.MemorySpace.SMEM)
    kernel = functools.partial(_mixed_op_kernel, C, H, W, P)

    out_slab = pl.pallas_call(
        kernel,
        out_shape=jax.ShapeDtypeStruct((C, P), jnp.float32),
        in_specs=[vmem, smem, vmem, vmem] + [vmem] * len(packed),
        out_specs=vmem,
        compiler_params=pltpu.CompilerParams(vmem_limit_bytes=32 * 1024 * 1024),
    )(x_slab, jnp.asarray(weights, jnp.float32),
      jnp.asarray(bank), jnp.asarray(inv_cnt), *packed)

    return out_slab.reshape(C, N, H, W).transpose(1, 0, 2, 3)


if __name__ == "__main__":
    N, C, H, W = 2, 4, 16, 16
    key = jax.random.PRNGKey(0)
    keys = jax.random.split(key, 16)

    x = jax.random.normal(keys[0], (N, C, H, W), jnp.float32)
    alphas = jax.random.normal(keys[1], (len(PRIMITIVES),), jnp.float32)
    weights = jax.nn.softmax(alphas)

    def w(i, shape):
        return 0.1 * jax.random.normal(keys[i], shape, jnp.float32)

    # Deterministic synthetic parameters (shapes follow DARTS OPS with C=4, stride=1):
    params = [
        w(2, (C, 3, 3)), w(3, (C, C)), w(4, (C, 3, 3)), w(5, (C, C)),   # sep_conv_3x3
        w(6, (C, 5, 5)), w(7, (C, C)), w(8, (C, 5, 5)), w(9, (C, C)),   # sep_conv_5x5
        w(10, (C, 3, 3)), w(11, (C, C)),                                # dil_conv_3x3
        w(12, (C, 5, 5)), w(13, (C, C)),                                # dil_conv_5x5
    ]

    out = mixed_op(x, weights, params)
    out = jax.block_until_ready(out)
    assert out.shape == (N, C, H, W)
    assert bool(jnp.all(jnp.isfinite(out)))
    print("KERNEL_OK")
</pallas_src>

<mosaic_0001>
module attributes {stable_mosaic.version = 11 : i64} {
  func.func @_mixed_op_kernel(%arg0: memref<4x512xf32, #tpu.memory_space<vmem>>, %arg1: memref<8xf32, #tpu.memory_space<smem>>, %arg2: memref<81x512xf32, #tpu.memory_space<vmem>>, %arg3: memref<1x512xf32, #tpu.memory_space<vmem>>, %arg4: memref<9x4x1xf32, #tpu.memory_space<vmem>>, %arg5: memref<4x4xf32, #tpu.memory_space<vmem>>, %arg6: memref<9x4x1xf32, #tpu.memory_space<vmem>>, %arg7: memref<4x4xf32, #tpu.memory_space<vmem>>, %arg8: memref<25x4x1xf32, #tpu.memory_space<vmem>>, %arg9: memref<4x4xf32, #tpu.memory_space<vmem>>, %arg10: memref<25x4x1xf32, #tpu.memory_space<vmem>>, %arg11: memref<4x4xf32, #tpu.memory_space<vmem>>, %arg12: memref<9x4x1xf32, #tpu.memory_space<vmem>>, %arg13: memref<4x4xf32, #tpu.memory_space<vmem>>, %arg14: memref<25x4x1xf32, #tpu.memory_space<vmem>>, %arg15: memref<4x4xf32, #tpu.memory_space<vmem>>, %arg16: memref<4x512xf32, #tpu.memory_space<vmem>>) attributes {dimension_semantics = [], scalar_prefetch = 0 : i64, scratch_operands = 0 : i64, tpu.core_type = #tpu.core_type<tc>} {
    %c0 = arith.constant 0 : index
    %c0_0 = arith.constant 0 : index
    %0 = vector.load %arg0[%c0, %c0_0] : memref<4x512xf32, #tpu.memory_space<vmem>>, vector<4x512xf32>
    %cst = arith.constant 0.000000e+00 : f32
    %1 = vector.broadcast %cst : f32 to vector<4x512xf32>
    %2 = arith.maximumf %0, %1 : vector<4x512xf32>
    %c17_i32 = arith.constant 17 : i32
    %3 = tpu.dynamic_rotate %0 by %c17_i32 dim 1 : vector<4x512xf32>, i32 -> vector<4x512xf32>
    %c30 = arith.constant 30 : index
    %c0_1 = arith.constant 0 : index
    %4 = vector.load %arg2[%c30, %c0_1] : memref<81x512xf32, #tpu.memory_space<vmem>>, vector<1x512xf32>
    %cst_2 = arith.constant 5.000000e-01 : f32
    %5 = vector.broadcast %cst_2 : f32 to vector<1x512xf32>
    %6 = arith.cmpf ogt, %4, %5 : vector<1x512xf32>
    %cst_3 = arith.constant 0xFF800000 : f32
    %7 = vector.shape_cast %6 : vector<1x512xi1> to vector<1x512xi1>
    %8 = vector.broadcast %7 : vector<1x512xi1> to vector<4x512xi1>
    %9 = vector.broadcast %cst_3 : f32 to vector<4x512xf32>
    %10 = arith.select %8, %3, %9 : vector<4x512xi1>, vector<4x512xf32>
    %11 = arith.maximumf %0, %10 : vector<4x512xf32>
    %12 = vector.broadcast %4 : vector<1x512xf32> to vector<4x512xf32>
    %13 = arith.mulf %12, %3 : vector<4x512xf32>
    %14 = arith.addf %0, %13 : vector<4x512xf32>
    %c16_i32 = arith.constant 16 : i32
    %15 = tpu.dynamic_rotate %0 by %c16_i32 dim 1 : vector<4x512xf32>, i32 -> vector<4x512xf32>
    %c31 = arith.constant 31 : index
    %c0_4 = arith.constant 0 : index
    %16 = vector.load %arg2[%c31, %c0_4] : memref<81x512xf32, #tpu.memory_space<vmem>>, vector<1x512xf32>
    %cst_5 = arith.constant 5.000000e-01 : f32
    %17 = vector.broadcast %cst_5 : f32 to vector<1x512xf32>
    %18 = arith.cmpf ogt, %16, %17 : vector<1x512xf32>
    %cst_6 = arith.constant 0xFF800000 : f32
    %19 = vector.shape_cast %18 : vector<1x512xi1> to vector<1x512xi1>
    %20 = vector.broadcast %19 : vector<1x512xi1> to vector<4x512xi1>
    %21 = vector.broadcast %cst_6 : f32 to vector<4x512xf32>
    %22 = arith.select %20, %15, %21 : vector<4x512xi1>, vector<4x512xf32>
    %23 = arith.maximumf %11, %22 : vector<4x512xf32>
    %24 = vector.broadcast %16 : vector<1x512xf32> to vector<4x512xf32>
    %25 = arith.mulf %24, %15 : vector<4x512xf32>
    %26 = arith.addf %14, %25 : vector<4x512xf32>
    %c15_i32 = arith.constant 15 : i32
    %27 = tpu.dynamic_rotate %0 by %c15_i32 dim 1 : vector<4x512xf32>, i32 -> vector<4x512xf32>
    %c32 = arith.constant 32 : index
    %c0_7 = arith.constant 0 : index
    %28 = vector.load %arg2[%c32, %c0_7] : memref<81x512xf32, #tpu.memory_space<vmem>>, vector<1x512xf32>
    %cst_8 = arith.constant 5.000000e-01 : f32
    %29 = vector.broadcast %cst_8 : f32 to vector<1x512xf32>
    %30 = arith.cmpf ogt, %28, %29 : vector<1x512xf32>
    %cst_9 = arith.constant 0xFF800000 : f32
    %31 = vector.shape_cast %30 : vector<1x512xi1> to vector<1x512xi1>
    %32 = vector.broadcast %31 : vector<1x512xi1> to vector<4x512xi1>
    %33 = vector.broadcast %cst_9 : f32 to vector<4x512xf32>
    %34 = arith.select %32, %27, %33 : vector<4x512xi1>, vector<4x512xf32>
    %35 = arith.maximumf %23, %34 : vector<4x512xf32>
    %36 = vector.broadcast %28 : vector<1x512xf32> to vector<4x512xf32>
    %37 = arith.mulf %36, %27 : vector<4x512xf32>
    %38 = arith.addf %26, %37 : vector<4x512xf32>
    %c1_i32 = arith.constant 1 : i32
    %39 = tpu.dynamic_rotate %0 by %c1_i32 dim 1 : vector<4x512xf32>, i32 -> vector<4x512xf32>
    %c39 = arith.constant 39 : index
    %c0_10 = arith.constant 0 : index
    %40 = vector.load %arg2[%c39, %c0_10] : memref<81x512xf32, #tpu.memory_space<vmem>>, vector<1x512xf32>
    %cst_11 = arith.constant 5.000000e-01 : f32
    %41 = vector.broadcast %cst_11 : f32 to vector<1x512xf32>
    %42 = arith.cmpf ogt, %40, %41 : vector<1x512xf32>
    %cst_12 = arith.constant 0xFF800000 : f32
    %43 = vector.shape_cast %42 : vector<1x512xi1> to vector<1x512xi1>
    %44 = vector.broadcast %43 : vector<1x512xi1> to vector<4x512xi1>
    %45 = vector.broadcast %cst_12 : f32 to vector<4x512xf32>
    %46 = arith.select %44, %39, %45 : vector<4x512xi1>, vector<4x512xf32>
    %47 = arith.maximumf %35, %46 : vector<4x512xf32>
    %48 = vector.broadcast %40 : vector<1x512xf32> to vector<4x512xf32>
    %49 = arith.mulf %48, %39 : vector<4x512xf32>
    %50 = arith.addf %38, %49 : vector<4x512xf32>
    %c511_i32 = arith.constant 511 : i32
    %51 = tpu.dynamic_rotate %0 by %c511_i32 dim 1 : vector<4x512xf32>, i32 -> vector<4x512xf32>
    %c41 = arith.constant 41 : index
    %c0_13 = arith.constant 0 : index
    %52 = vector.load %arg2[%c41, %c0_13] : memref<81x512xf32, #tpu.memory_space<vmem>>, vector<1x512xf32>
    %cst_14 = arith.constant 5.000000e-01 : f32
    %53 = vector.broadcast %cst_14 : f32 to vector<1x512xf32>
    %54 = arith.cmpf ogt, %52, %53 : vector<1x512xf32>
    %cst_15 = arith.constant 0xFF800000 : f32
    %55 = vector.shape_cast %54 : vector<1x512xi1> to vector<1x512xi1>
    %56 = vector.broadcast %55 : vector<1x512xi1> to vector<4x512xi1>
    %57 = vector.broadcast %cst_15 : f32 to vector<4x512xf32>
    %58 = arith.select %56, %51, %57 : vector<4x512xi1>, vector<4x512xf32>
    %59 = arith.maximumf %47, %58 : vector<4x512xf32>
    %60 = vector.broadcast %52 : vector<1x512xf32> to vector<4x512xf32>
    %61 = arith.mulf %60, %51 : vector<4x512xf32>
    %62 = arith.addf %50, %61 : vector<4x512xf32>
    %c497_i32 = arith.constant 497 : i32
    %63 = tpu.dynamic_rotate %0 by %c497_i32 dim 1 : vector<4x512xf32>, i32 -> vector<4x512xf32>
    %c48 = arith.constant 48 : index
    %c0_16 = arith.constant 0 : index
    %64 = vector.load %arg2[%c48, %c0_16] : memref<81x512xf32, #tpu.memory_space<vmem>>, vector<1x512xf32>
    %cst_17 = arith.constant 5.000000e-01 : f32
    %65 = vector.broadcast %cst_17 : f32 to vector<1x512xf32>
    %66 = arith.cmpf ogt, %64, %65 : vector<1x512xf32>
    %cst_18 = arith.constant 0xFF800000 : f32
    %67 = vector.shape_cast %66 : vector<1x512xi1> to vector<1x512xi1>
    %68 = vector.broadcast %67 : vector<1x512xi1> to vector<4x512xi1>
    %69 = vector.broadcast %cst_18 : f32 to vector<4x512xf32>
    %70 = arith.select %68, %63, %69 : vector<4x512xi1>, vector<4x512xf32>
    %71 = arith.maximumf %59, %70 : vector<4x512xf32>
    %72 = vector.broadcast %64 : vector<1x512xf32> to vector<4x512xf32>
    %73 = arith.mulf %72, %63 : vector<4x512xf32>
    %74 = arith.addf %62, %73 : vector<4x512xf32>
    %c496_i32 = arith.constant 496 : i32
    %75 = tpu.dynamic_rotate %0 by %c496_i32 dim 1 : vector<4x512xf32>, i32 -> vector<4x512xf32>
    %c49 = arith.constant 49 : index
    %c0_19 = arith.constant 0 : index
    %76 = vector.load %arg2[%c49, %c0_19] : memref<81x512xf32, #tpu.memory_space<vmem>>, vector<1x512xf32>
    %cst_20 = arith.constant 5.000000e-01 : f32
    %77 = vector.broadcast %cst_20 : f32 to vector<1x512xf32>
    %78 = arith.cmpf ogt, %76, %77 : vector<1x512xf32>
    %cst_21 = arith.constant 0xFF800000 : f32
    %79 = vector.shape_cast %78 : vector<1x512xi1> to vector<1x512xi1>
    %80 = vector.broadcast %79 : vector<1x512xi1> to vector<4x512xi1>
    %81 = vector.broadcast %cst_21 : f32 to vector<4x512xf32>
    %82 = arith.select %80, %75, %81 : vector<4x512xi1>, vector<4x512xf32>
    %83 = arith.maximumf %71, %82 : vector<4x512xf32>
    %84 = vector.broadcast %76 : vector<1x512xf32> to vector<4x512xf32>
    %85 = arith.mulf %84, %75 : vector<4x512xf32>
    %86 = arith.addf %74, %85 : vector<4x512xf32>
    %c495_i32 = arith.constant 495 : i32
    %87 = tpu.dynamic_rotate %0 by %c495_i32 dim 1 : vector<4x512xf32>, i32 -> vector<4x512xf32>
    %c50 = arith.constant 50 : index
    %c0_22 = arith.constant 0 : index
    %88 = vector.load %arg2[%c50, %c0_22] : memref<81x512xf32, #tpu.memory_space<vmem>>, vector<1x512xf32>
    %cst_23 = arith.constant 5.000000e-01 : f32
    %89 = vector.broadcast %cst_23 : f32 to vector<1x512xf32>
    %90 = arith.cmpf ogt, %88, %89 : vector<1x512xf32>
    %cst_24 = arith.constant 0xFF800000 : f32
    %91 = vector.shape_cast %90 : vector<1x512xi1> to vector<1x512xi1>
    %92 = vector.broadcast %91 : vector<1x512xi1> to vector<4x512xi1>
    %93 = vector.broadcast %cst_24 : f32 to vector<4x512xf32>
    %94 = arith.select %92, %87, %93 : vector<4x512xi1>, vector<4x512xf32>
    %95 = arith.maximumf %83, %94 : vector<4x512xf32>
    %96 = vector.broadcast %88 : vector<1x512xf32> to vector<4x512xf32>
    %97 = arith.mulf %96, %87 : vector<4x512xf32>
    %98 = arith.addf %86, %97 : vector<4x512xf32>
    %c1 = arith.constant 1 : index
    %99 = memref.load %arg1[%c1] : memref<8xf32, #tpu.memory_space<smem>>
    %100 = vector.broadcast %99 : f32 to vector<4x512xf32>
    %101 = arith.mulf %100, %95 : vector<4x512xf32>
    %c2 = arith.constant 2 : index
    %102 = memref.load %arg1[%c2] : memref<8xf32, #tpu.memory_space<smem>>
    %c0_25 = arith.constant 0 : index
    %c0_26 = arith.constant 0 : index
    %103 = vector.load %arg3[%c0_25, %c0_26] : memref<1x512xf32, #tpu.memory_space<vmem>>, vector<1x512xf32>
    %104 = vector.broadcast %102 : f32 to vector<1x512xf32>
    %105 = arith.mulf %104, %103 : vector<1x512xf32>
    %106 = vector.broadcast %105 : vector<1x512xf32> to vector<4x512xf32>
    %107 = arith.mulf %106, %98 : vector<4x512xf32>
    %108 = arith.addf %101, %107 : vector<4x512xf32>
    %c3 = arith.constant 3 : index
    %109 = memref.load %arg1[%c3] : memref<8xf32, #tpu.memory_space<smem>>
    %110 = vector.broadcast %109 : f32 to vector<4x512xf32>
    %111 = arith.mulf %110, %0 : vector<4x512xf32>
    %112 = arith.addf %108, %111 : vector<4x512xf32>
    %c4 = arith.constant 4 : index
    %113 = memref.load %arg1[%c4] : memref<8xf32, #tpu.memory_space<smem>>
    %c17_i32_27 = arith.constant 17 : i32
    %114 = tpu.dynamic_rotate %2 by %c17_i32_27 dim 1 : vector<4x512xf32>, i32 -> vector<4x512xf32>
    %c30_28 = arith.constant 30 : index
    %c0_29 = arith.constant 0 : index
    %115 = vector.load %arg2[%c30_28, %c0_29] : memref<81x512xf32, #tpu.memory_space<vmem>>, vector<1x512xf32>
    %116 = vector.broadcast %115 : vector<1x512xf32> to vector<4x512xf32>
    %117 = arith.mulf %116, %114 : vector<4x512xf32>
    %c0_30 = arith.constant 0 : index
    %c0_31 = arith.constant 0 : index
    %c0_32 = arith.constant 0 : index
    %118 = vector.load %arg4[%c0_30, %c0_31, %c0_32] : memref<9x4x1xf32, #tpu.memory_space<vmem>>, vector<1x4x1xf32>
    %119 = vector.shape_cast %118 : vector<1x4x1xf32> to vector<4x1xf32>
    %120 = vector.broadcast %119 : vector<4x1xf32> to vector<4x512xf32>
    %121 = arith.mulf %120, %117 : vector<4x512xf32>
    %c16_i32_33 = arith.constant 16 : i32
    %122 = tpu.dynamic_rotate %2 by %c16_i32_33 dim 1 : vector<4x512xf32>, i32 -> vector<4x512xf32>
    %c31_34 = arith.constant 31 : index
    %c0_35 = arith.constant 0 : index
    %123 = vector.load %arg2[%c31_34, %c0_35] : memref<81x512xf32, #tpu.memory_space<vmem>>, vector<1x512xf32>
    %124 = vector.broadcast %123 : vector<1x512xf32> to vector<4x512xf32>
    %125 = arith.mulf %124, %122 : vector<4x512xf32>
    %c1_36 = arith.constant 1 : index
    %c0_37 = arith.constant 0 : index
    %c0_38 = arith.constant 0 : index
    %126 = vector.load %arg4[%c1_36, %c0_37, %c0_38] : memref<9x4x1xf32, #tpu.memory_space<vmem>>, vector<1x4x1xf32>
    %127 = vector.shape_cast %126 : vector<1x4x1xf32> to vector<4x1xf32>
    %128 = vector.broadcast %127 : vector<4x1xf32> to vector<4x512xf32>
    %129 = arith.mulf %128, %125 : vector<4x512xf32>
    %130 = arith.addf %121, %129 : vector<4x512xf32>
    %c15_i32_39 = arith.constant 15 : i32
    %131 = tpu.dynamic_rotate %2 by %c15_i32_39 dim 1 : vector<4x512xf32>, i32 -> vector<4x512xf32>
    %c32_40 = arith.constant 32 : index
    %c0_41 = arith.constant 0 : index
    %132 = vector.load %arg2[%c32_40, %c0_41] : memref<81x512xf32, #tpu.memory_space<vmem>>, vector<1x512xf32>
    %133 = vector.broadcast %132 : vector<1x512xf32> to vector<4x512xf32>
    %134 = arith.mulf %133, %131 : vector<4x512xf32>
    %c2_42 = arith.constant 2 : index
    %c0_43 = arith.constant 0 : index
    %c0_44 = arith.constant 0 : index
    %135 = vector.load %arg4[%c2_42, %c0_43, %c0_44] : memref<9x4x1xf32, #tpu.memory_space<vmem>>, vector<1x4x1xf32>
    %136 = vector.shape_cast %135 : vector<1x4x1xf32> to vector<4x1xf32>
    %137 = vector.broadcast %136 : vector<4x1xf32> to vector<4x512xf32>
    %138 = arith.mulf %137, %134 : vector<4x512xf32>
    %139 = arith.addf %130, %138 : vector<4x512xf32>
    %c1_i32_45 = arith.constant 1 : i32
    %140 = tpu.dynamic_rotate %2 by %c1_i32_45 dim 1 : vector<4x512xf32>, i32 -> vector<4x512xf32>
    %c39_46 = arith.constant 39 : index
    %c0_47 = arith.constant 0 : index
    %141 = vector.load %arg2[%c39_46, %c0_47] : memref<81x512xf32, #tpu.memory_space<vmem>>, vector<1x512xf32>
    %142 = vector.broadcast %141 : vector<1x512xf32> to vector<4x512xf32>
    %143 = arith.mulf %142, %140 : vector<4x512xf32>
    %c3_48 = arith.constant 3 : index
    %c0_49 = arith.constant 0 : index
    %c0_50 = arith.constant 0 : index
    %144 = vector.load %arg4[%c3_48, %c0_49, %c0_50] : memref<9x4x1xf32, #tpu.memory_space<vmem>>, vector<1x4x1xf32>
    %145 = vector.shape_cast %144 : vector<1x4x1xf32> to vector<4x1xf32>
    %146 = vector.broadcast %145 : vector<4x1xf32> to vector<4x512xf32>
    %147 = arith.mulf %146, %143 : vector<4x512xf32>
    %148 = arith.addf %139, %147 : vector<4x512xf32>
    %c4_51 = arith.constant 4 : index
    %c0_52 = arith.constant 0 : index
    %c0_53 = arith.constant 0 : index
    %149 = vector.load %arg4[%c4_51, %c0_52, %c0_53] : memref<9x4x1xf32, #tpu.memory_space<vmem>>, vector<1x4x1xf32>
    %150 = vector.shape_cast %149 : vector<1x4x1xf32> to vector<4x1xf32>
    %151 = vector.broadcast %150 : vector<4x1xf32> to vector<4x512xf32>
    %152 = arith.mulf %151, %2 : vector<4x512xf32>
    %153 = arith.addf %148, %152 : vector<4x512xf32>
    %c511_i32_54 = arith.constant 511 : i32
    %154 = tpu.dynamic_rotate %2 by %c511_i32_54 dim 1 : vector<4x512xf32>, i32 -> vector<4x512xf32>
    %c41_55 = arith.constant 41 : index
    %c0_56 = arith.constant 0 : index
    %155 = vector.load %arg2[%c41_55, %c0_56] : memref<81x512xf32, #tpu.memory_space<vmem>>, vector<1x512xf32>
    %156 = vector.broadcast %155 : vector<1x512xf32> to vector<4x512xf32>
    %157 = arith.mulf %156, %154 : vector<4x512xf32>
    %c5 = arith.constant 5 : index
    %c0_57 = arith.constant 0 : index
    %c0_58 = arith.constant 0 : index
    %158 = vector.load %arg4[%c5, %c0_57, %c0_58] : memref<9x4x1xf32, #tpu.memory_space<vmem>>, vector<1x4x1xf32>
    %159 = vector.shape_cast %158 : vector<1x4x1xf32> to vector<4x1xf32>
    %160 = vector.broadcast %159 : vector<4x1xf32> to vector<4x512xf32>
    %161 = arith.mulf %160, %157 : vector<4x512xf32>
    %162 = arith.addf %153, %161 : vector<4x512xf32>
    %c497_i32_59 = arith.constant 497 : i32
    %163 = tpu.dynamic_rotate %2 by %c497_i32_59 dim 1 : vector<4x512xf32>, i32 -> vector<4x512xf32>
    %c48_60 = arith.constant 48 : index
    %c0_61 = arith.constant 0 : index
    %164 = vector.load %arg2[%c48_60, %c0_61] : memref<81x512xf32, #tpu.memory_space<vmem>>, vector<1x512xf32>
    %165 = vector.broadcast %164 : vector<1x512xf32> to vector<4x512xf32>
    %166 = arith.mulf %165, %163 : vector<4x512xf32>
    %c6 = arith.constant 6 : index
    %c0_62 = arith.constant 0 : index
    %c0_63 = arith.constant 0 : index
    %167 = vector.load %arg4[%c6, %c0_62, %c0_63] : memref<9x4x1xf32, #tpu.memory_space<vmem>>, vector<1x4x1xf32>
    %168 = vector.shape_cast %167 : vector<1x4x1xf32> to vector<4x1xf32>
    %169 = vector.broadcast %168 : vector<4x1xf32> to vector<4x512xf32>
    %170 = arith.mulf %169, %166 : vector<4x512xf32>
    %171 = arith.addf %162, %170 : vector<4x512xf32>
    %c496_i32_64 = arith.constant 496 : i32
    %172 = tpu.dynamic_rotate %2 by %c496_i32_64 dim 1 : vector<4x512xf32>, i32 -> vector<4x512xf32>
    %c49_65 = arith.constant 49 : index
    %c0_66 = arith.constant 0 : index
    %173 = vector.load %arg2[%c49_65, %c0_66] : memref<81x512xf32, #tpu.memory_space<vmem>>, vector<1x512xf32>
    %174 = vector.broadcast %173 : vector<1x512xf32> to vector<4x512xf32>
    %175 = arith.mulf %174, %172 : vector<4x512xf32>
    %c7 = arith.constant 7 : index
    %c0_67 = arith.constant 0 : index
    %c0_68 = arith.constant 0 : index
    %176 = vector.load %arg4[%c7, %c0_67, %c0_68] : memref<9x4x1xf32, #tpu.memory_space<vmem>>, vector<1x4x1xf32>
    %177 = vector.shape_cast %176 : vector<1x4x1xf32> to vector<4x1xf32>
    %178 = vector.broadcast %177 : vector<4x1xf32> to vector<4x512xf32>
    %179 = arith.mulf %178, %175 : vector<4x512xf32>
    %180 = arith.addf %171, %179 : vector<4x512xf32>
    %c495_i32_69 = arith.constant 495 : i32
    %181 = tpu.dynamic_rotate %2 by %c495_i32_69 dim 1 : vector<4x512xf32>, i32 -> vector<4x512xf32>
    %c50_70 = arith.constant 50 : index
    %c0_71 = arith.constant 0 : index
    %182 = vector.load %arg2[%c50_70, %c0_71] : memref<81x512xf32, #tpu.memory_space<vmem>>, vector<1x512xf32>
    %183 = vector.broadcast %182 : vector<1x512xf32> to vector<4x512xf32>
    %184 = arith.mulf %183, %181 : vector<4x512xf32>
    %c8 = arith.constant 8 : index
    %c0_72 = arith.constant 0 : index
    %c0_73 = arith.constant 0 : index
    %185 = vector.load %arg4[%c8, %c0_72, %c0_73] : memref<9x4x1xf32, #tpu.memory_space<vmem>>, vector<1x4x1xf32>
    %186 = vector.shape_cast %185 : vector<1x4x1xf32> to vector<4x1xf32>
    %187 = vector.broadcast %186 : vector<4x1xf32> to vector<4x512xf32>
    %188 = arith.mulf %187, %184 : vector<4x512xf32>
    %189 = arith.addf %180, %188 : vector<4x512xf32>
    %c0_74 = arith.constant 0 : index
    %c0_75 = arith.constant 0 : index
    %190 = vector.load %arg5[%c0_74, %c0_75] : memref<4x4xf32, #tpu.memory_space<vmem>>, vector<4x1xf32>
    %191 = vector.extract_strided_slice %189 {offsets = [0, 0], sizes = [1, 512], strides = [1, 1]} : vector<4x512xf32> to vector<1x512xf32>
    %192 = vector.broadcast %190 : vector<4x1xf32> to vector<4x512xf32>
    %193 = vector.broadcast %191 : vector<1x512xf32> to vector<4x512xf32>
    %194 = arith.mulf %192, %193 : vector<4x512xf32>
    %c0_76 = arith.constant 0 : index
    %c1_77 = arith.constant 1 : index
    %195 = vector.load %arg5[%c0_76, %c1_77] : memref<4x4xf32, #tpu.memory_space<vmem>>, vector<4x1xf32>
    %196 = vector.extract_strided_slice %189 {offsets = [1, 0], sizes = [1, 512], strides = [1, 1]} : vector<4x512xf32> to vector<1x512xf32>
    %197 = vector.broadcast %195 : vector<4x1xf32> to vector<4x512xf32>
    %198 = vector.broadcast %196 : vector<1x512xf32> to vector<4x512xf32>
    %199 = arith.mulf %197, %198 : vector<4x512xf32>
    %200 = arith.addf %194, %199 : vector<4x512xf32>
    %c0_78 = arith.constant 0 : index
    %c2_79 = arith.constant 2 : index
    %201 = vector.load %arg5[%c0_78, %c2_79] : memref<4x4xf32, #tpu.memory_space<vmem>>, vector<4x1xf32>
    %202 = vector.extract_strided_slice %189 {offsets = [2, 0], sizes = [1, 512], strides = [1, 1]} : vector<4x512xf32> to vector<1x512xf32>
    %203 = vector.broadcast %201 : vector<4x1xf32> to vector<4x512xf32>
    %204 = vector.broadcast %202 : vector<1x512xf32> to vector<4x512xf32>
    %205 = arith.mulf %203, %204 : vector<4x512xf32>
    %206 = arith.addf %200, %205 : vector<4x512xf32>
    %c0_80 = arith.constant 0 : index
    %c3_81 = arith.constant 3 : index
    %207 = vector.load %arg5[%c0_80, %c3_81] : memref<4x4xf32, #tpu.memory_space<vmem>>, vector<4x1xf32>
    %208 = vector.extract_strided_slice %189 {offsets = [3, 0], sizes = [1, 512], strides = [1, 1]} : vector<4x512xf32> to vector<1x512xf32>
    %209 = vector.broadcast %207 : vector<4x1xf32> to vector<4x512xf32>
    %210 = vector.broadcast %208 : vector<1x512xf32> to vector<4x512xf32>
    %211 = arith.mulf %209, %210 : vector<4x512xf32>
    %212 = arith.addf %206, %211 : vector<4x512xf32>
    %cst_82 = arith.constant dense<0.000000e+00> : vector<4xf32>
    %213 = vector.multi_reduction <add>, %212, %cst_82 [1] : vector<4x512xf32> to vector<4xf32>
    %214 = vector.shape_cast %213 : vector<4xf32> to vector<4x1xf32>
    %cst_83 = arith.constant 0.001953125 : f32
    %215 = vector.broadcast %cst_83 : f32 to vector<4x1xf32>
    %216 = arith.mulf %214, %215 : vector<4x1xf32>
    %217 = vector.broadcast %216 : vector<4x1xf32> to vector<4x512xf32>
    %218 = arith.subf %212, %217 : vector<4x512xf32>
    %219 = arith.mulf %218, %218 : vector<4x512xf32>
    %cst_84 = arith.constant dense<0.000000e+00> : vector<4xf32>
    %220 = vector.multi_reduction <add>, %219, %cst_84 [1] : vector<4x512xf32> to vector<4xf32>
    %221 = vector.shape_cast %220 : vector<4xf32> to vector<4x1xf32>
    %cst_85 = arith.constant 0.001953125 : f32
    %222 = vector.broadcast %cst_85 : f32 to vector<4x1xf32>
    %223 = arith.mulf %221, %222 : vector<4x1xf32>
    %cst_86 = arith.constant 9.99999974E-6 : f32
    %224 = vector.broadcast %cst_86 : f32 to vector<4x1xf32>
    %225 = arith.addf %223, %224 : vector<4x1xf32>
    %226 = math.rsqrt %225 : vector<4x1xf32>
    %227 = vector.broadcast %226 : vector<4x1xf32> to vector<4x512xf32>
    %228 = arith.mulf %218, %227 : vector<4x512xf32>
    %cst_87 = arith.constant 0.000000e+00 : f32
    %229 = vector.broadcast %cst_87 : f32 to vector<4x512xf32>
    %230 = arith.maximumf %228, %229 : vector<4x512xf32>
    %c17_i32_88 = arith.constant 17 : i32
    %231 = tpu.dynamic_rotate %230 by %c17_i32_88 dim 1 : vector<4x512xf32>, i32 -> vector<4x512xf32>
    %c30_89 = arith.constant 30 : index
    %c0_90 = arith.constant 0 : index
    %232 = vector.load %arg2[%c30_89, %c0_90] : memref<81x512xf32, #tpu.memory_space<vmem>>, vector<1x512xf32>
    %233 = vector.broadcast %232 : vector<1x512xf32> to vector<4x512xf32>
    %234 = arith.mulf %233, %231 : vector<4x512xf32>
    %c0_91 = arith.constant 0 : index
    %c0_92 = arith.constant 0 : index
    %c0_93 = arith.constant 0 : index
    %235 = vector.load %arg6[%c0_91, %c0_92, %c0_93] : memref<9x4x1xf32, #tpu.memory_space<vmem>>, vector<1x4x1xf32>
    %236 = vector.shape_cast %235 : vector<1x4x1xf32> to vector<4x1xf32>
    %237 = vector.broadcast %236 : vector<4x1xf32> to vector<4x512xf32>
    %238 = arith.mulf %237, %234 : vector<4x512xf32>
    %c16_i32_94 = arith.constant 16 : i32
    %239 = tpu.dynamic_rotate %230 by %c16_i32_94 dim 1 : vector<4x512xf32>, i32 -> vector<4x512xf32>
    %c31_95 = arith.constant 31 : index
    %c0_96 = arith.constant 0 : index
    %240 = vector.load %arg2[%c31_95, %c0_96] : memref<81x512xf32, #tpu.memory_space<vmem>>, vector<1x512xf32>
    %241 = vector.broadcast %240 : vector<1x512xf32> to vector<4x512xf32>
    %242 = arith.mulf %241, %239 : vector<4x512xf32>
    %c1_97 = arith.constant 1 : index
    %c0_98 = arith.constant 0 : index
    %c0_99 = arith.constant 0 : index
    %243 = vector.load %arg6[%c1_97, %c0_98, %c0_99] : memref<9x4x1xf32, #tpu.memory_space<vmem>>, vector<1x4x1xf32>
    %244 = vector.shape_cast %243 : vector<1x4x1xf32> to vector<4x1xf32>
    %245 = vector.broadcast %244 : vector<4x1xf32> to vector<4x512xf32>
    %246 = arith.mulf %245, %242 : vector<4x512xf32>
    %247 = arith.addf %238, %246 : vector<4x512xf32>
    %c15_i32_100 = arith.constant 15 : i32
    %248 = tpu.dynamic_rotate %230 by %c15_i32_100 dim 1 : vector<4x512xf32>, i32 -> vector<4x512xf32>
    %c32_101 = arith.constant 32 : index
    %c0_102 = arith.constant 0 : index
    %249 = vector.load %arg2[%c32_101, %c0_102] : memref<81x512xf32, #tpu.memory_space<vmem>>, vector<1x512xf32>
    %250 = vector.broadcast %249 : vector<1x512xf32> to vector<4x512xf32>
    %251 = arith.mulf %250, %248 : vector<4x512xf32>
    %c2_103 = arith.constant 2 : index
    %c0_104 = arith.constant 0 : index
    %c0_105 = arith.constant 0 : index
    %252 = vector.load %arg6[%c2_103, %c0_104, %c0_105] : memref<9x4x1xf32, #tpu.memory_space<vmem>>, vector<1x4x1xf32>
    %253 = vector.shape_cast %252 : vector<1x4x1xf32> to vector<4x1xf32>
    %254 = vector.broadcast %253 : vector<4x1xf32> to vector<4x512xf32>
    %255 = arith.mulf %254, %251 : vector<4x512xf32>
    %256 = arith.addf %247, %255 : vector<4x512xf32>
    %c1_i32_106 = arith.constant 1 : i32
    %257 = tpu.dynamic_rotate %230 by %c1_i32_106 dim 1 : vector<4x512xf32>, i32 -> vector<4x512xf32>
    %c39_107 = arith.constant 39 : index
    %c0_108 = arith.constant 0 : index
    %258 = vector.load %arg2[%c39_107, %c0_108] : memref<81x512xf32, #tpu.memory_space<vmem>>, vector<1x512xf32>
    %259 = vector.broadcast %258 : vector<1x512xf32> to vector<4x512xf32>
    %260 = arith.mulf %259, %257 : vector<4x512xf32>
    %c3_109 = arith.constant 3 : index
    %c0_110 = arith.constant 0 : index
    %c0_111 = arith.constant 0 : index
    %261 = vector.load %arg6[%c3_109, %c0_110, %c0_111] : memref<9x4x1xf32, #tpu.memory_space<vmem>>, vector<1x4x1xf32>
    %262 = vector.shape_cast %261 : vector<1x4x1xf32> to vector<4x1xf32>
    %263 = vector.broadcast %262 : vector<4x1xf32> to vector<4x512xf32>
    %264 = arith.mulf %263, %260 : vector<4x512xf32>
    %265 = arith.addf %256, %264 : vector<4x512xf32>
    %c4_112 = arith.constant 4 : index
    %c0_113 = arith.constant 0 : index
    %c0_114 = arith.constant 0 : index
    %266 = vector.load %arg6[%c4_112, %c0_113, %c0_114] : memref<9x4x1xf32, #tpu.memory_space<vmem>>, vector<1x4x1xf32>
    %267 = vector.shape_cast %266 : vector<1x4x1xf32> to vector<4x1xf32>
    %268 = vector.broadcast %267 : vector<4x1xf32> to vector<4x512xf32>
    %269 = arith.mulf %268, %230 : vector<4x512xf32>
    %270 = arith.addf %265, %269 : vector<4x512xf32>
    %c511_i32_115 = arith.constant 511 : i32
    %271 = tpu.dynamic_rotate %230 by %c511_i32_115 dim 1 : vector<4x512xf32>, i32 -> vector<4x512xf32>
    %c41_116 = arith.constant 41 : index
    %c0_117 = arith.constant 0 : index
    %272 = vector.load %arg2[%c41_116, %c0_117] : memref<81x512xf32, #tpu.memory_space<vmem>>, vector<1x512xf32>
    %273 = vector.broadcast %272 : vector<1x512xf32> to vector<4x512xf32>
    %274 = arith.mulf %273, %271 : vector<4x512xf32>
    %c5_118 = arith.constant 5 : index
    %c0_119 = arith.constant 0 : index
    %c0_120 = arith.constant 0 : index
    %275 = vector.load %arg6[%c5_118, %c0_119, %c0_120] : memref<9x4x1xf32, #tpu.memory_space<vmem>>, vector<1x4x1xf32>
    %276 = vector.shape_cast %275 : vector<1x4x1xf32> to vector<4x1xf32>
    %277 = vector.broadcast %276 : vector<4x1xf32> to vector<4x512xf32>
    %278 = arith.mulf %277, %274 : vector<4x512xf32>
    %279 = arith.addf %270, %278 : vector<4x512xf32>
    %c497_i32_121 = arith.constant 497 : i32
    %280 = tpu.dynamic_rotate %230 by %c497_i32_121 dim 1 : vector<4x512xf32>, i32 -> vector<4x512xf32>
    %c48_122 = arith.constant 48 : index
    %c0_123 = arith.constant 0 : index
    %281 = vector.load %arg2[%c48_122, %c0_123] : memref<81x512xf32, #tpu.memory_space<vmem>>, vector<1x512xf32>
    %282 = vector.broadcast %281 : vector<1x512xf32> to vector<4x512xf32>
    %283 = arith.mulf %282, %280 : vector<4x512xf32>
    %c6_124 = arith.constant 6 : index
    %c0_125 = arith.constant 0 : index
    %c0_126 = arith.constant 0 : index
    %284 = vector.load %arg6[%c6_124, %c0_125, %c0_126] : memref<9x4x1xf32, #tpu.memory_space<vmem>>, vector<1x4x1xf32>
    %285 = vector.shape_cast %284 : vector<1x4x1xf32> to vector<4x1xf32>
    %286 = vector.broadcast %285 : vector<4x1xf32> to vector<4x512xf32>
    %287 = arith.mulf %286, %283 : vector<4x512xf32>
    %288 = arith.addf %279, %287 : vector<4x512xf32>
    %c496_i32_127 = arith.constant 496 : i32
    %289 = tpu.dynamic_rotate %230 by %c496_i32_127 dim 1 : vector<4x512xf32>, i32 -> vector<4x512xf32>
    %c49_128 = arith.constant 49 : index
    %c0_129 = arith.constant 0 : index
    %290 = vector.load %arg2[%c49_128, %c0_129] : memref<81x512xf32, #tpu.memory_space<vmem>>, vector<1x512xf32>
    %291 = vector.broadcast %290 : vector<1x512xf32> to vector<4x512xf32>
    %292 = arith.mulf %291, %289 : vector<4x512xf32>
    %c7_130 = arith.constant 7 : index
    %c0_131 = arith.constant 0 : index
    %c0_132 = arith.constant 0 : index
    %293 = vector.load %arg6[%c7_130, %c0_131, %c0_132] : memref<9x4x1xf32, #tpu.memory_space<vmem>>, vector<1x4x1xf32>
    %294 = vector.shape_cast %293 : vector<1x4x1xf32> to vector<4x1xf32>
    %295 = vector.broadcast %294 : vector<4x1xf32> to vector<4x512xf32>
    %296 = arith.mulf %295, %292 : vector<4x512xf32>
    %297 = arith.addf %288, %296 : vector<4x512xf32>
    %c495_i32_133 = arith.constant 495 : i32
    %298 = tpu.dynamic_rotate %230 by %c495_i32_133 dim 1 : vector<4x512xf32>, i32 -> vector<4x512xf32>
    %c50_134 = arith.constant 50 : index
    %c0_135 = arith.constant 0 : index
    %299 = vector.load %arg2[%c50_134, %c0_135] : memref<81x512xf32, #tpu.memory_space<vmem>>, vector<1x512xf32>
    %300 = vector.broadcast %299 : vector<1x512xf32> to vector<4x512xf32>
    %301 = arith.mulf %300, %298 : vector<4x512xf32>
    %c8_136 = arith.constant 8 : index
    %c0_137 = arith.constant 0 : index
    %c0_138 = arith.constant 0 : index
    %302 = vector.load %arg6[%c8_136, %c0_137, %c0_138] : memref<9x4x1xf32, #tpu.memory_space<vmem>>, vector<1x4x1xf32>
    %303 = vector.shape_cast %302 : vector<1x4x1xf32> to vector<4x1xf32>
    %304 = vector.broadcast %303 : vector<4x1xf32> to vector<4x512xf32>
    %305 = arith.mulf %304, %301 : vector<4x512xf32>
    %306 = arith.addf %297, %305 : vector<4x512xf32>
    %c0_139 = arith.constant 0 : index
    %c0_140 = arith.constant 0 : index
    %307 = vector.load %arg7[%c0_139, %c0_140] : memref<4x4xf32, #tpu.memory_space<vmem>>, vector<4x1xf32>
    %308 = vector.extract_strided_slice %306 {offsets = [0, 0], sizes = [1, 512], strides = [1, 1]} : vector<4x512xf32> to vector<1x512xf32>
    %309 = vector.broadcast %307 : vector<4x1xf32> to vector<4x512xf32>
    %310 = vector.broadcast %308 : vector<1x512xf32> to vector<4x512xf32>
    %311 = arith.mulf %309, %310 : vector<4x512xf32>
    %c0_141 = arith.constant 0 : index
    %c1_142 = arith.constant 1 : index
    %312 = vector.load %arg7[%c0_141, %c1_142] : memref<4x4xf32, #tpu.memory_space<vmem>>, vector<4x1xf32>
    %313 = vector.extract_strided_slice %306 {offsets = [1, 0], sizes = [1, 512], strides = [1, 1]} : vector<4x512xf32> to vector<1x512xf32>
    %314 = vector.broadcast %312 : vector<4x1xf32> to vector<4x512xf32>
    %315 = vector.broadcast %313 : vector<1x512xf32> to vector<4x512xf32>
    %316 = arith.mulf %314, %315 : vector<4x512xf32>
    %317 = arith.addf %311, %316 : vector<4x512xf32>
    %c0_143 = arith.constant 0 : index
    %c2_144 = arith.constant 2 : index
    %318 = vector.load %arg7[%c0_143, %c2_144] : memref<4x4xf32, #tpu.memory_space<vmem>>, vector<4x1xf32>
    %319 = vector.extract_strided_slice %306 {offsets = [2, 0], sizes = [1, 512], strides = [1, 1]} : vector<4x512xf32> to vector<1x512xf32>
    %320 = vector.broadcast %318 : vector<4x1xf32> to vector<4x512xf32>
    %321 = vector.broadcast %319 : vector<1x512xf32> to vector<4x512xf32>
    %322 = arith.mulf %320, %321 : vector<4x512xf32>
    %323 = arith.addf %317, %322 : vector<4x512xf32>
    %c0_145 = arith.constant 0 : index
    %c3_146 = arith.constant 3 : index
    %324 = vector.load %arg7[%c0_145, %c3_146] : memref<4x4xf32, #tpu.memory_space<vmem>>, vector<4x1xf32>
    %325 = vector.extract_strided_slice %306 {offsets = [3, 0], sizes = [1, 512], strides = [1, 1]} : vector<4x512xf32> to vector<1x512xf32>
    %326 = vector.broadcast %324 : vector<4x1xf32> to vector<4x512xf32>
    %327 = vector.broadcast %325 : vector<1x512xf32> to vector<4x512xf32>
    %328 = arith.mulf %326, %327 : vector<4x512xf32>
    %329 = arith.addf %323, %328 : vector<4x512xf32>
    %cst_147 = arith.constant dense<0.000000e+00> : vector<4xf32>
    %330 = vector.multi_reduction <add>, %329, %cst_147 [1] : vector<4x512xf32> to vector<4xf32>
    %331 = vector.shape_cast %330 : vector<4xf32> to vector<4x1xf32>
    %cst_148 = arith.constant 0.001953125 : f32
    %332 = vector.broadcast %cst_148 : f32 to vector<4x1xf32>
    %333 = arith.mulf %331, %332 : vector<4x1xf32>
    %334 = vector.broadcast %333 : vector<4x1xf32> to vector<4x512xf32>
    %335 = arith.subf %329, %334 : vector<4x512xf32>
    %336 = arith.mulf %335, %335 : vector<4x512xf32>
    %cst_149 = arith.constant dense<0.000000e+00> : vector<4xf32>
    %337 = vector.multi_reduction <add>, %336, %cst_149 [1] : vector<4x512xf32> to vector<4xf32>
    %338 = vector.shape_cast %337 : vector<4xf32> to vector<4x1xf32>
    %cst_150 = arith.constant 0.001953125 : f32
    %339 = vector.broadcast %cst_150 : f32 to vector<4x1xf32>
    %340 = arith.mulf %338, %339 : vector<4x1xf32>
    %cst_151 = arith.constant 9.99999974E-6 : f32
    %341 = vector.broadcast %cst_151 : f32 to vector<4x1xf32>
    %342 = arith.addf %340, %341 : vector<4x1xf32>
    %343 = math.rsqrt %342 : vector<4x1xf32>
    %344 = vector.broadcast %113 : f32 to vector<4x1xf32>
    %345 = arith.mulf %343, %344 : vector<4x1xf32>
    %346 = vector.broadcast %345 : vector<4x1xf32> to vector<4x512xf32>
    %347 = arith.mulf %335, %346 : vector<4x512xf32>
    %348 = arith.addf %112, %347 : vector<4x512xf32>
    %c5_152 = arith.constant 5 : index
    %349 = memref.load %arg1[%c5_152] : memref<8xf32, #tpu.memory_space<smem>>
    %c34_i32 = arith.constant 34 : i32
    %350 = tpu.dynamic_rotate %2 by %c34_i32 dim 1 : vector<4x512xf32>, i32 -> vector<4x512xf32>
    %c20 = arith.constant 20 : index
    %c0_153 = arith.constant 0 : index
    %351 = vector.load %arg2[%c20, %c0_153] : memref<81x512xf32, #tpu.memory_space<vmem>>, vector<1x512xf32>
    %352 = vector.broadcast %351 : vector<1x512xf32> to vector<4x512xf32>
    %353 = arith.mulf %352, %350 : vector<4x512xf32>
    %c0_154 = arith.constant 0 : index
    %c0_155 = arith.constant 0 : index
    %c0_156 = arith.constant 0 : index
    %354 = vector.load %arg8[%c0_154, %c0_155, %c0_156] : memref<25x4x1xf32, #tpu.memory_space<vmem>>, vector<1x4x1xf32>
    %355 = vector.shape_cast %354 : vector<1x4x1xf32> to vector<4x1xf32>
    %356 = vector.broadcast %355 : vector<4x1xf32> to vector<4x512xf32>
    %357 = arith.mulf %356, %353 : vector<4x512xf32>
    %c33_i32 = arith.constant 33 : i32
    %358 = tpu.dynamic_rotate %2 by %c33_i32 dim 1 : vector<4x512xf32>, i32 -> vector<4x512xf32>
    %c21 = arith.constant 21 : index
    %c0_157 = arith.constant 0 : index
    %359 = vector.load %arg2[%c21, %c0_157] : memref<81x512xf32, #tpu.memory_space<vmem>>, vector<1x512xf32>
    %360 = vector.broadcast %359 : vector<1x512xf32> to vector<4x512xf32>
    %361 = arith.mulf %360, %358 : vector<4x512xf32>
    %c1_158 = arith.constant 1 : index
    %c0_159 = arith.constant 0 : index
    %c0_160 = arith.constant 0 : index
    %362 = vector.load %arg8[%c1_158, %c0_159, %c0_160] : memref<25x4x1xf32, #tpu.memory_space<vmem>>, vector<1x4x1xf32>
    %363 = vector.shape_cast %362 : vector<1x4x1xf32> to vector<4x1xf32>
    %364 = vector.broadcast %363 : vector<4x1xf32> to vector<4x512xf32>
    %365 = arith.mulf %364, %361 : vector<4x512xf32>
    %366 = arith.addf %357, %365 : vector<4x512xf32>
    %c32_i32 = arith.constant 32 : i32
    %367 = tpu.dynamic_rotate %2 by %c32_i32 dim 1 : vector<4x512xf32>, i32 -> vector<4x512xf32>
    %c22 = arith.constant 22 : index
    %c0_161 = arith.constant 0 : index
    %368 = vector.load %arg2[%c22, %c0_161] : memref<81x512xf32, #tpu.memory_space<vmem>>, vector<1x512xf32>
    %369 = vector.broadcast %368 : vector<1x512xf32> to vector<4x512xf32>
    %370 = arith.mulf %369, %367 : vector<4x512xf32>
    %c2_162 = arith.constant 2 : index
    %c0_163 = arith.constant 0 : index
    %c0_164 = arith.constant 0 : index
    %371 = vector.load %arg8[%c2_162, %c0_163, %c0_164] : memref<25x4x1xf32, #tpu.memory_space<vmem>>, vector<1x4x1xf32>
    %372 = vector.shape_cast %371 : vector<1x4x1xf32> to vector<4x1xf32>
    %373 = vector.broadcast %372 : vector<4x1xf32> to vector<4x512xf32>
    %374 = arith.mulf %373, %370 : vector<4x512xf32>
    %375 = arith.addf %366, %374 : vector<4x512xf32>
    %c31_i32 = arith.constant 31 : i32
    %376 = tpu.dynamic_rotate %2 by %c31_i32 dim 1 : vector<4x512xf32>, i32 -> vector<4x512xf32>
    %c23 = arith.constant 23 : index
    %c0_165 = arith.constant 0 : index
    %377 = vector.load %arg2[%c23, %c0_165] : memref<81x512xf32, #tpu.memory_space<vmem>>, vector<1x512xf32>
    %378 = vector.broadcast %377 : vector<1x512xf32> to vector<4x512xf32>
    %379 = arith.mulf %378, %376 : vector<4x512xf32>
    %c3_166 = arith.constant 3 : index
    %c0_167 = arith.constant 0 : index
    %c0_168 = arith.constant 0 : index
    %380 = vector.load %arg8[%c3_166, %c0_167, %c0_168] : memref<25x4x1xf32, #tpu.memory_space<vmem>>, vector<1x4x1xf32>
    %381 = vector.shape_cast %380 : vector<1x4x1xf32> to vector<4x1xf32>
    %382 = vector.broadcast %381 : vector<4x1xf32> to vector<4x512xf32>
    %383 = arith.mulf %382, %379 : vector<4x512xf32>
    %384 = arith.addf %375, %383 : vector<4x512xf32>
    %c30_i32 = arith.constant 30 : i32
    %385 = tpu.dynamic_rotate %2 by %c30_i32 dim 1 : vector<4x512xf32>, i32 -> vector<4x512xf32>
    %c24 = arith.constant 24 : index
    %c0_169 = arith.constant 0 : index
    %386 = vector.load %arg2[%c24, %c0_169] : memref<81x512xf32, #tpu.memory_space<vmem>>, vector<1x512xf32>
    %387 = vector.broadcast %386 : vector<1x512xf32> to vector<4x512xf32>
    %388 = arith.mulf %387, %385 : vector<4x512xf32>
    %c4_170 = arith.constant 4 : index
    %c0_171 = arith.constant 0 : index
    %c0_172 = arith.constant 0 : index
    %389 = vector.load %arg8[%c4_170, %c0_171, %c0_172] : memref<25x4x1xf32, #tpu.memory_space<vmem>>, vector<1x4x1xf32>
    %390 = vector.shape_cast %389 : vector<1x4x1xf32> to vector<4x1xf32>
    %391 = vector.broadcast %390 : vector<4x1xf32> to vector<4x512xf32>
    %392 = arith.mulf %391, %388 : vector<4x512xf32>
    %393 = arith.addf %384, %392 : vector<4x512xf32>
    %c18_i32 = arith.constant 18 : i32
    %394 = tpu.dynamic_rotate %2 by %c18_i32 dim 1 : vector<4x512xf32>, i32 -> vector<4x512xf32>
    %c29 = arith.constant 29 : index
    %c0_173 = arith.constant 0 : index
    %395 = vector.load %arg2[%c29, %c0_173] : memref<81x512xf32, #tpu.memory_space<vmem>>, vector<1x512xf32>
    %396 = vector.broadcast %395 : vector<1x512xf32> to vector<4x512xf32>
    %397 = arith.mulf %396, %394 : vector<4x512xf32>
    %c5_174 = arith.constant 5 : index
    %c0_175 = arith.constant 0 : index
    %c0_176 = arith.constant 0 : index
    %398 = vector.load %arg8[%c5_174, %c0_175, %c0_176] : memref<25x4x1xf32, #tpu.memory_space<vmem>>, vector<1x4x1xf32>
    %399 = vector.shape_cast %398 : vector<1x4x1xf32> to vector<4x1xf32>
    %400 = vector.broadcast %399 : vector<4x1xf32> to vector<4x512xf32>
    %401 = arith.mulf %400, %397 : vector<4x512xf32>
    %402 = arith.addf %393, %401 : vector<4x512xf32>
    %c17_i32_177 = arith.constant 17 : i32
    %403 = tpu.dynamic_rotate %2 by %c17_i32_177 dim 1 : vector<4x512xf32>, i32 -> vector<4x512xf32>
    %c30_178 = arith.constant 30 : index
    %c0_179 = arith.constant 0 : index
    %404 = vector.load %arg2[%c30_178, %c0_179] : memref<81x512xf32, #tpu.memory_space<vmem>>, vector<1x512xf32>
    %405 = vector.broadcast %404 : vector<1x512xf32> to vector<4x512xf32>
    %406 = arith.mulf %405, %403 : vector<4x512xf32>
    %c6_180 = arith.constant 6 : index
    %c0_181 = arith.constant 0 : index
    %c0_182 = arith.constant 0 : index
    %407 = vector.load %arg8[%c6_180, %c0_181, %c0_182] : memref<25x4x1xf32, #tpu.memory_space<vmem>>, vector<1x4x1xf32>
    %408 = vector.shape_cast %407 : vector<1x4x1xf32> to vector<4x1xf32>
    %409 = vector.broadcast %408 : vector<4x1xf32> to vector<4x512xf32>
    %410 = arith.mulf %409, %406 : vector<4x512xf32>
    %411 = arith.addf %402, %410 : vector<4x512xf32>
    %c16_i32_183 = arith.constant 16 : i32
    %412 = tpu.dynamic_rotate %2 by %c16_i32_183 dim 1 : vector<4x512xf32>, i32 -> vector<4x512xf32>
    %c31_184 = arith.constant 31 : index
    %c0_185 = arith.constant 0 : index
    %413 = vector.load %arg2[%c31_184, %c0_185] : memref<81x512xf32, #tpu.memory_space<vmem>>, vector<1x512xf32>
    %414 = vector.broadcast %413 : vector<1x512xf32> to vector<4x512xf32>
    %415 = arith.mulf %414, %412 : vector<4x512xf32>
    %c7_186 = arith.constant 7 : index
    %c0_187 = arith.constant 0 : index
    %c0_188 = arith.constant 0 : index
    %416 = vector.load %arg8[%c7_186, %c0_187, %c0_188] : memref<25x4x1xf32, #tpu.memory_space<vmem>>, vector<1x4x1xf32>
    %417 = vector.shape_cast %416 : vector<1x4x1xf32> to vector<4x1xf32>
    %418 = vector.broadcast %417 : vector<4x1xf32> to vector<4x512xf32>
    %419 = arith.mulf %418, %415 : vector<4x512xf32>
    %420 = arith.addf %411, %419 : vector<4x512xf32>
    %c15_i32_189 = arith.constant 15 : i32
    %421 = tpu.dynamic_rotate %2 by %c15_i32_189 dim 1 : vector<4x512xf32>, i32 -> vector<4x512xf32>
    %c32_190 = arith.constant 32 : index
    %c0_191 = arith.constant 0 : index
    %422 = vector.load %arg2[%c32_190, %c0_191] : memref<81x512xf32, #tpu.memory_space<vmem>>, vector<1x512xf32>
    %423 = vector.broadcast %422 : vector<1x512xf32> to vector<4x512xf32>
    %424 = arith.mulf %423, %421 : vector<4x512xf32>
    %c8_192 = arith.constant 8 : index
    %c0_193 = arith.constant 0 : index
    %c0_194 = arith.constant 0 : index
    %425 = vector.load %arg8[%c8_192, %c0_193, %c0_194] : memref<25x4x1xf32, #tpu.memory_space<vmem>>, vector<1x4x1xf32>
    %426 = vector.shape_cast %425 : vector<1x4x1xf32> to vector<4x1xf32>
    %427 = vector.broadcast %426 : vector<4x1xf32> to vector<4x512xf32>
    %428 = arith.mulf %427, %424 : vector<4x512xf32>
    %429 = arith.addf %420, %428 : vector<4x512xf32>
    %c14_i32 = arith.constant 14 : i32
    %430 = tpu.dynamic_rotate %2 by %c14_i32 dim 1 : vector<4x512xf32>, i32 -> vector<4x512xf32>
    %c33 = arith.constant 33 : index
    %c0_195 = arith.constant 0 : index
    %431 = vector.load %arg2[%c33, %c0_195] : memref<81x512xf32, #tpu.memory_space<vmem>>, vector<1x512xf32>
    %432 = vector.broadcast %431 : vector<1x512xf32> to vector<4x512xf32>
    %433 = arith.mulf %432, %430 : vector<4x512xf32>
    %c9 = arith.constant 9 : index
    %c0_196 = arith.constant 0 : index
    %c0_197 = arith.constant 0 : index
    %434 = vector.load %arg8[%c9, %c0_196, %c0_197] : memref<25x4x1xf32, #tpu.memory_space<vmem>>, vector<1x4x1xf32>
    %435 = vector.shape_cast %434 : vector<1x4x1xf32> to vector<4x1xf32>
    %436 = vector.broadcast %435 : vector<4x1xf32> to vector<4x512xf32>
    %437 = arith.mulf %436, %433 : vector<4x512xf32>
    %438 = arith.addf %429, %437 : vector<4x512xf32>
    %c2_i32 = arith.constant 2 : i32
    %439 = tpu.dynamic_rotate %2 by %c2_i32 dim 1 : vector<4x512xf32>, i32 -> vector<4x512xf32>
    %c38 = arith.constant 38 : index
    %c0_198 = arith.constant 0 : index
    %440 = vector.load %arg2[%c38, %c0_198] : memref<81x512xf32, #tpu.memory_space<vmem>>, vector<1x512xf32>
    %441 = vector.broadcast %440 : vector<1x512xf32> to vector<4x512xf32>
    %442 = arith.mulf %441, %439 : vector<4x512xf32>
    %c10 = arith.constant 10 : index
    %c0_199 = arith.constant 0 : index
    %c0_200 = arith.constant 0 : index
    %443 = vector.load %arg8[%c10, %c0_199, %c0_200] : memref<25x4x1xf32, #tpu.memory_space<vmem>>, vector<1x4x1xf32>
    %444 = vector.shape_cast %443 : vector<1x4x1xf32> to vector<4x1xf32>
    %445 = vector.broadcast %444 : vector<4x1xf32> to vector<4x512xf32>
    %446 = arith.mulf %445, %442 : vector<4x512xf32>
    %447 = arith.addf %438, %446 : vector<4x512xf32>
    %c1_i32_201 = arith.constant 1 : i32
    %448 = tpu.dynamic_rotate %2 by %c1_i32_201 dim 1 : vector<4x512xf32>, i32 -> vector<4x512xf32>
    %c39_202 = arith.constant 39 : index
    %c0_203 = arith.constant 0 : index
    %449 = vector.load %arg2[%c39_202, %c0_203] : memref<81x512xf32, #tpu.memory_space<vmem>>, vector<1x512xf32>
    %450 = vector.broadcast %449 : vector<1x512xf32> to vector<4x512xf32>
    %451 = arith.mulf %450, %448 : vector<4x512xf32>
    %c11 = arith.constant 11 : index
    %c0_204 = arith.constant 0 : index
    %c0_205 = arith.constant 0 : index
    %452 = vector.load %arg8[%c11, %c0_204, %c0_205] : memref<25x4x1xf32, #tpu.memory_space<vmem>>, vector<1x4x1xf32>
    %453 = vector.shape_cast %452 : vector<1x4x1xf32> to vector<4x1xf32>
    %454 = vector.broadcast %453 : vector<4x1xf32> to vector<4x512xf32>
    %455 = arith.mulf %454, %451 : vector<4x512xf32>
    %456 = arith.addf %447, %455 : vector<4x512xf32>
    %c12 = arith.constant 12 : index
    %c0_206 = arith.constant 0 : index
    %c0_207 = arith.constant 0 : index
    %457 = vector.load %arg8[%c12, %c0_206, %c0_207] : memref<25x4x1xf32, #tpu.memory_space<vmem>>, vector<1x4x1xf32>
    %458 = vector.shape_cast %457 : vector<1x4x1xf32> to vector<4x1xf32>
    %459 = vector.broadcast %458 : vector<4x1xf32> to vector<4x512xf32>
    %460 = arith.mulf %459, %2 : vector<4x512xf32>
    %461 = arith.addf %456, %460 : vector<4x512xf32>
    %c511_i32_208 = arith.constant 511 : i32
    %462 = tpu.dynamic_rotate %2 by %c511_i32_208 dim 1 : vector<4x512xf32>, i32 -> vector<4x512xf32>
    %c41_209 = arith.constant 41 : index
    %c0_210 = arith.constant 0 : index
    %463 = vector.load %arg2[%c41_209, %c0_210] : memref<81x512xf32, #tpu.memory_space<vmem>>, vector<1x512xf32>
    %464 = vector.broadcast %463 : vector<1x512xf32> to vector<4x512xf32>
    %465 = arith.mulf %464, %462 : vector<4x512xf32>
    %c13 = arith.constant 13 : index
    %c0_211 = arith.constant 0 : index
    %c0_212 = arith.constant 0 : index
    %466 = vector.load %arg8[%c13, %c0_211, %c0_212] : memref<25x4x1xf32, #tpu.memory_space<vmem>>, vector<1x4x1xf32>
    %467 = vector.shape_cast %466 : vector<1x4x1xf32> to vector<4x1xf32>
    %468 = vector.broadcast %467 : vector<4x1xf32> to vector<4x512xf32>
    %469 = arith.mulf %468, %465 : vector<4x512xf32>
    %470 = arith.addf %461, %469 : vector<4x512xf32>
    %c510_i32 = arith.constant 510 : i32
    %471 = tpu.dynamic_rotate %2 by %c510_i32 dim 1 : vector<4x512xf32>, i32 -> vector<4x512xf32>
    %c42 = arith.constant 42 : index
    %c0_213 = arith.constant 0 : index
    %472 = vector.load %arg2[%c42, %c0_213] : memref<81x512xf32, #tpu.memory_space<vmem>>, vector<1x512xf32>
    %473 = vector.broadcast %472 : vector<1x512xf32> to vector<4x512xf32>
    %474 = arith.mulf %473, %471 : vector<4x512xf32>
    %c14 = arith.constant 14 : index
    %c0_214 = arith.constant 0 : index
    %c0_215 = arith.constant 0 : index
    %475 = vector.load %arg8[%c14, %c0_214, %c0_215] : memref<25x4x1xf32, #tpu.memory_space<vmem>>, vector<1x4x1xf32>
    %476 = vector.shape_cast %475 : vector<1x4x1xf32> to vector<4x1xf32>
    %477 = vector.broadcast %476 : vector<4x1xf32> to vector<4x512xf32>
    %478 = arith.mulf %477, %474 : vector<4x512xf32>
    %479 = arith.addf %470, %478 : vector<4x512xf32>
    %c498_i32 = arith.constant 498 : i32
    %480 = tpu.dynamic_rotate %2 by %c498_i32 dim 1 : vector<4x512xf32>, i32 -> vector<4x512xf32>
    %c47 = arith.constant 47 : index
    %c0_216 = arith.constant 0 : index
    %481 = vector.load %arg2[%c47, %c0_216] : memref<81x512xf32, #tpu.memory_space<vmem>>, vector<1x512xf32>
    %482 = vector.broadcast %481 : vector<1x512xf32> to vector<4x512xf32>
    %483 = arith.mulf %482, %480 : vector<4x512xf32>
    %c15 = arith.constant 15 : index
    %c0_217 = arith.constant 0 : index
    %c0_218 = arith.constant 0 : index
    %484 = vector.load %arg8[%c15, %c0_217, %c0_218] : memref<25x4x1xf32, #tpu.memory_space<vmem>>, vector<1x4x1xf32>
    %485 = vector.shape_cast %484 : vector<1x4x1xf32> to vector<4x1xf32>
    %486 = vector.broadcast %485 : vector<4x1xf32> to vector<4x512xf32>
    %487 = arith.mulf %486, %483 : vector<4x512xf32>
    %488 = arith.addf %479, %487 : vector<4x512xf32>
    %c497_i32_219 = arith.constant 497 : i32
    %489 = tpu.dynamic_rotate %2 by %c497_i32_219 dim 1 : vector<4x512xf32>, i32 -> vector<4x512xf32>
    %c48_220 = arith.constant 48 : index
    %c0_221 = arith.constant 0 : index
    %490 = vector.load %arg2[%c48_220, %c0_221] : memref<81x512xf32, #tpu.memory_space<vmem>>, vector<1x512xf32>
    %491 = vector.broadcast %490 : vector<1x512xf32> to vector<4x512xf32>
    %492 = arith.mulf %491, %489 : vector<4x512xf32>
    %c16 = arith.constant 16 : index
    %c0_222 = arith.constant 0 : index
    %c0_223 = arith.constant 0 : index
    %493 = vector.load %arg8[%c16, %c0_222, %c0_223] : memref<25x4x1xf32, #tpu.memory_space<vmem>>, vector<1x4x1xf32>
    %494 = vector.shape_cast %493 : vector<1x4x1xf32> to vector<4x1xf32>
    %495 = vector.broadcast %494 : vector<4x1xf32> to vector<4x512xf32>
    %496 = arith.mulf %495, %492 : vector<4x512xf32>
    %497 = arith.addf %488, %496 : vector<4x512xf32>
    %c496_i32_224 = arith.constant 496 : i32
    %498 = tpu.dynamic_rotate %2 by %c496_i32_224 dim 1 : vector<4x512xf32>, i32 -> vector<4x512xf32>
    %c49_225 = arith.constant 49 : index
    %c0_226 = arith.constant 0 : index
    %499 = vector.load %arg2[%c49_225, %c0_226] : memref<81x512xf32, #tpu.memory_space<vmem>>, vector<1x512xf32>
    %500 = vector.broadcast %499 : vector<1x512xf32> to vector<4x512xf32>
    %501 = arith.mulf %500, %498 : vector<4x512xf32>
    %c17 = arith.constant 17 : index
    %c0_227 = arith.constant 0 : index
    %c0_228 = arith.constant 0 : index
    %502 = vector.load %arg8[%c17, %c0_227, %c0_228] : memref<25x4x1xf32, #tpu.memory_space<vmem>>, vector<1x4x1xf32>
    %503 = vector.shape_cast %502 : vector<1x4x1xf32> to vector<4x1xf32>
    %504 = vector.broadcast %503 : vector<4x1xf32> to vector<4x512xf32>
    %505 = arith.mulf %504, %501 : vector<4x512xf32>
    %506 = arith.addf %497, %505 : vector<4x512xf32>
    %c495_i32_229 = arith.constant 495 : i32
    %507 = tpu.dynamic_rotate %2 by %c495_i32_229 dim 1 : vector<4x512xf32>, i32 -> vector<4x512xf32>
    %c50_230 = arith.constant 50 : index
    %c0_231 = arith.constant 0 : index
    %508 = vector.load %arg2[%c50_230, %c0_231] : memref<81x512xf32, #tpu.memory_space<vmem>>, vector<1x512xf32>
    %509 = vector.broadcast %508 : vector<1x512xf32> to vector<4x512xf32>
    %510 = arith.mulf %509, %507 : vector<4x512xf32>
    %c18 = arith.constant 18 : index
    %c0_232 = arith.constant 0 : index
    %c0_233 = arith.constant 0 : index
    %511 = vector.load %arg8[%c18, %c0_232, %c0_233] : memref<25x4x1xf32, #tpu.memory_space<vmem>>, vector<1x4x1xf32>
    %512 = vector.shape_cast %511 : vector<1x4x1xf32> to vector<4x1xf32>
    %513 = vector.broadcast %512 : vector<4x1xf32> to vector<4x512xf32>
    %514 = arith.mulf %513, %510 : vector<4x512xf32>
    %515 = arith.addf %506, %514 : vector<4x512xf32>
    %c494_i32 = arith.constant 494 : i32
    %516 = tpu.dynamic_rotate %2 by %c494_i32 dim 1 : vector<4x512xf32>, i32 -> vector<4x512xf32>
    %c51 = arith.constant 51 : index
    %c0_234 = arith.constant 0 : index
    %517 = vector.load %arg2[%c51, %c0_234] : memref<81x512xf32, #tpu.memory_space<vmem>>, vector<1x512xf32>
    %518 = vector.broadcast %517 : vector<1x512xf32> to vector<4x512xf32>
    %519 = arith.mulf %518, %516 : vector<4x512xf32>
    %c19 = arith.constant 19 : index
    %c0_235 = arith.constant 0 : index
    %c0_236 = arith.constant 0 : index
    %520 = vector.load %arg8[%c19, %c0_235, %c0_236] : memref<25x4x1xf32, #tpu.memory_space<vmem>>, vector<1x4x1xf32>
    %521 = vector.shape_cast %520 : vector<1x4x1xf32> to vector<4x1xf32>
    %522 = vector.broadcast %521 : vector<4x1xf32> to vector<4x512xf32>
    %523 = arith.mulf %522, %519 : vector<4x512xf32>
    %524 = arith.addf %515, %523 : vector<4x512xf32>
    %c482_i32 = arith.constant 482 : i32
    %525 = tpu.dynamic_rotate %2 by %c482_i32 dim 1 : vector<4x512xf32>, i32 -> vector<4x512xf32>
    %c56 = arith.constant 56 : index
    %c0_237 = arith.constant 0 : index
    %526 = vector.load %arg2[%c56, %c0_237] : memref<81x512xf32, #tpu.memory_space<vmem>>, vector<1x512xf32>
    %527 = vector.broadcast %526 : vector<1x512xf32> to vector<4x512xf32>
    %528 = arith.mulf %527, %525 : vector<4x512xf32>
    %c20_238 = arith.constant 20 : index
    %c0_239 = arith.constant 0 : index
    %c0_240 = arith.constant 0 : index
    %529 = vector.load %arg8[%c20_238, %c0_239, %c0_240] : memref<25x4x1xf32, #tpu.memory_space<vmem>>, vector<1x4x1xf32>
    %530 = vector.shape_cast %529 : vector<1x4x1xf32> to vector<4x1xf32>
    %531 = vector.broadcast %530 : vector<4x1xf32> to vector<4x512xf32>
    %532 = arith.mulf %531, %528 : vector<4x512xf32>
    %533 = arith.addf %524, %532 : vector<4x512xf32>
    %c481_i32 = arith.constant 481 : i32
    %534 = tpu.dynamic_rotate %2 by %c481_i32 dim 1 : vector<4x512xf32>, i32 -> vector<4x512xf32>
    %c57 = arith.constant 57 : index
    %c0_241 = arith.constant 0 : index
    %535 = vector.load %arg2[%c57, %c0_241] : memref<81x512xf32, #tpu.memory_space<vmem>>, vector<1x512xf32>
    %536 = vector.broadcast %535 : vector<1x512xf32> to vector<4x512xf32>
    %537 = arith.mulf %536, %534 : vector<4x512xf32>
    %c21_242 = arith.constant 21 : index
    %c0_243 = arith.constant 0 : index
    %c0_244 = arith.constant 0 : index
    %538 = vector.load %arg8[%c21_242, %c0_243, %c0_244] : memref<25x4x1xf32, #tpu.memory_space<vmem>>, vector<1x4x1xf32>
    %539 = vector.shape_cast %538 : vector<1x4x1xf32> to vector<4x1xf32>
    %540 = vector.broadcast %539 : vector<4x1xf32> to vector<4x512xf32>
    %541 = arith.mulf %540, %537 : vector<4x512xf32>
    %542 = arith.addf %533, %541 : vector<4x512xf32>
    %c480_i32 = arith.constant 480 : i32
    %543 = tpu.dynamic_rotate %2 by %c480_i32 dim 1 : vector<4x512xf32>, i32 -> vector<4x512xf32>
    %c58 = arith.constant 58 : index
    %c0_245 = arith.constant 0 : index
    %544 = vector.load %arg2[%c58, %c0_245] : memref<81x512xf32, #tpu.memory_space<vmem>>, vector<1x512xf32>
    %545 = vector.broadcast %544 : vector<1x512xf32> to vector<4x512xf32>
    %546 = arith.mulf %545, %543 : vector<4x512xf32>
    %c22_246 = arith.constant 22 : index
    %c0_247 = arith.constant 0 : index
    %c0_248 = arith.constant 0 : index
    %547 = vector.load %arg8[%c22_246, %c0_247, %c0_248] : memref<25x4x1xf32, #tpu.memory_space<vmem>>, vector<1x4x1xf32>
    %548 = vector.shape_cast %547 : vector<1x4x1xf32> to vector<4x1xf32>
    %549 = vector.broadcast %548 : vector<4x1xf32> to vector<4x512xf32>
    %550 = arith.mulf %549, %546 : vector<4x512xf32>
    %551 = arith.addf %542, %550 : vector<4x512xf32>
    %c479_i32 = arith.constant 479 : i32
    %552 = tpu.dynamic_rotate %2 by %c479_i32 dim 1 : vector<4x512xf32>, i32 -> vector<4x512xf32>
    %c59 = arith.constant 59 : index
    %c0_249 = arith.constant 0 : index
    %553 = vector.load %arg2[%c59, %c0_249] : memref<81x512xf32, #tpu.memory_space<vmem>>, vector<1x512xf32>
    %554 = vector.broadcast %553 : vector<1x512xf32> to vector<4x512xf32>
    %555 = arith.mulf %554, %552 : vector<4x512xf32>
    %c23_250 = arith.constant 23 : index
    %c0_251 = arith.constant 0 : index
    %c0_252 = arith.constant 0 : index
    %556 = vector.load %arg8[%c23_250, %c0_251, %c0_252] : memref<25x4x1xf32, #tpu.memory_space<vmem>>, vector<1x4x1xf32>
    %557 = vector.shape_cast %556 : vector<1x4x1xf32> to vector<4x1xf32>
    %558 = vector.broadcast %557 : vector<4x1xf32> to vector<4x512xf32>
    %559 = arith.mulf %558, %555 : vector<4x512xf32>
    %560 = arith.addf %551, %559 : vector<4x512xf32>
    %c478_i32 = arith.constant 478 : i32
    %561 = tpu.dynamic_rotate %2 by %c478_i32 dim 1 : vector<4x512xf32>, i32 -> vector<4x512xf32>
    %c60 = arith.constant 60 : index
    %c0_253 = arith.constant 0 : index
    %562 = vector.load %arg2[%c60, %c0_253] : memref<81x512xf32, #tpu.memory_space<vmem>>, vector<1x512xf32>
    %563 = vector.broadcast %562 : vector<1x512xf32> to vector<4x512xf32>
    %564 = arith.mulf %563, %561 : vector<4x512xf32>
    %c24_254 = arith.constant 24 : index
    %c0_255 = arith.constant 0 : index
    %c0_256 = arith.constant 0 : index
    %565 = vector.load %arg8[%c24_254, %c0_255, %c0_256] : memref<25x4x1xf32, #tpu.memory_space<vmem>>, vector<1x4x1xf32>
    %566 = vector.shape_cast %565 : vector<1x4x1xf32> to vector<4x1xf32>
    %567 = vector.broadcast %566 : vector<4x1xf32> to vector<4x512xf32>
    %568 = arith.mulf %567, %564 : vector<4x512xf32>
    %569 = arith.addf %560, %568 : vector<4x512xf32>
    %c0_257 = arith.constant 0 : index
    %c0_258 = arith.constant 0 : index
    %570 = vector.load %arg9[%c0_257, %c0_258] : memref<4x4xf32, #tpu.memory_space<vmem>>, vector<4x1xf32>
    %571 = vector.extract_strided_slice %569 {offsets = [0, 0], sizes = [1, 512], strides = [1, 1]} : vector<4x512xf32> to vector<1x512xf32>
    %572 = vector.broadcast %570 : vector<4x1xf32> to vector<4x512xf32>
    %573 = vector.broadcast %571 : vector<1x512xf32> to vector<4x512xf32>
    %574 = arith.mulf %572, %573 : vector<4x512xf32>
    %c0_259 = arith.constant 0 : index
    %c1_260 = arith.constant 1 : index
    %575 = vector.load %arg9[%c0_259, %c1_260] : memref<4x4xf32, #tpu.memory_space<vmem>>, vector<4x1xf32>
    %576 = vector.extract_strided_slice %569 {offsets = [1, 0], sizes = [1, 512], strides = [1, 1]} : vector<4x512xf32> to vector<1x512xf32>
    %577 = vector.broadcast %575 : vector<4x1xf32> to vector<4x512xf32>
    %578 = vector.broadcast %576 : vector<1x512xf32> to vector<4x512xf32>
    %579 = arith.mulf %577, %578 : vector<4x512xf32>
    %580 = arith.addf %574, %579 : vector<4x512xf32>
    %c0_261 = arith.constant 0 : index
    %c2_262 = arith.constant 2 : index
    %581 = vector.load %arg9[%c0_261, %c2_262] : memref<4x4xf32, #tpu.memory_space<vmem>>, vector<4x1xf32>
    %582 = vector.extract_strided_slice %569 {offsets = [2, 0], sizes = [1, 512], strides = [1, 1]} : vector<4x512xf32> to vector<1x512xf32>
    %583 = vector.broadcast %581 : vector<4x1xf32> to vector<4x512xf32>
    %584 = vector.broadcast %582 : vector<1x512xf32> to vector<4x512xf32>
    %585 = arith.mulf %583, %584 : vector<4x512xf32>
    %586 = arith.addf %580, %585 : vector<4x512xf32>
    %c0_263 = arith.constant 0 : index
    %c3_264 = arith.constant 3 : index
    %587 = vector.load %arg9[%c0_263, %c3_264] : memref<4x4xf32, #tpu.memory_space<vmem>>, vector<4x1xf32>
    %588 = vector.extract_strided_slice %569 {offsets = [3, 0], sizes = [1, 512], strides = [1, 1]} : vector<4x512xf32> to vector<1x512xf32>
    %589 = vector.broadcast %587 : vector<4x1xf32> to vector<4x512xf32>
    %590 = vector.broadcast %588 : vector<1x512xf32> to vector<4x512xf32>
    %591 = arith.mulf %589, %590 : vector<4x512xf32>
    %592 = arith.addf %586, %591 : vector<4x512xf32>
    %cst_265 = arith.constant dense<0.000000e+00> : vector<4xf32>
    %593 = vector.multi_reduction <add>, %592, %cst_265 [1] : vector<4x512xf32> to vector<4xf32>
    %594 = vector.shape_cast %593 : vector<4xf32> to vector<4x1xf32>
    %cst_266 = arith.constant 0.001953125 : f32
    %595 = vector.broadcast %cst_266 : f32 to vector<4x1xf32>
    %596 = arith.mulf %594, %595 : vector<4x1xf32>
    %597 = vector.broadcast %596 : vector<4x1xf32> to vector<4x512xf32>
    %598 = arith.subf %592, %597 : vector<4x512xf32>
    %599 = arith.mulf %598, %598 : vector<4x512xf32>
    %cst_267 = arith.constant dense<0.000000e+00> : vector<4xf32>
    %600 = vector.multi_reduction <add>, %599, %cst_267 [1] : vector<4x512xf32> to vector<4xf32>
    %601 = vector.shape_cast %600 : vector<4xf32> to vector<4x1xf32>
    %cst_268 = arith.constant 0.001953125 : f32
    %602 = vector.broadcast %cst_268 : f32 to vector<4x1xf32>
    %603 = arith.mulf %601, %602 : vector<4x1xf32>
    %cst_269 = arith.constant 9.99999974E-6 : f32
    %604 = vector.broadcast %cst_269 : f32 to vector<4x1xf32>
    %605 = arith.addf %603, %604 : vector<4x1xf32>
    %606 = math.rsqrt %605 : vector<4x1xf32>
    %607 = vector.broadcast %606 : vector<4x1xf32> to vector<4x512xf32>
    %608 = arith.mulf %598, %607 : vector<4x512xf32>
    %cst_270 = arith.constant 0.000000e+00 : f32
    %609 = vector.broadcast %cst_270 : f32 to vector<4x512xf32>
    %610 = arith.maximumf %608, %609 : vector<4x512xf32>
    %c34_i32_271 = arith.constant 34 : i32
    %611 = tpu.dynamic_rotate %610 by %c34_i32_271 dim 1 : vector<4x512xf32>, i32 -> vector<4x512xf32>
    %c20_272 = arith.constant 20 : index
    %c0_273 = arith.constant 0 : index
    %612 = vector.load %arg2[%c20_272, %c0_273] : memref<81x512xf32, #tpu.memory_space<vmem>>, vector<1x512xf32>
    %613 = vector.broadcast %612 : vector<1x512xf32> to vector<4x512xf32>
    %614 = arith.mulf %613, %611 : vector<4x512xf32>
    %c0_274 = arith.constant 0 : index
    %c0_275 = arith.constant 0 : index
    %c0_276 = arith.constant 0 : index
    %615 = vector.load %arg10[%c0_274, %c0_275, %c0_276] : memref<25x4x1xf32, #tpu.memory_space<vmem>>, vector<1x4x1xf32>
    %616 = vector.shape_cast %615 : vector<1x4x1xf32> to vector<4x1xf32>
    %617 = vector.broadcast %616 : vector<4x1xf32> to vector<4x512xf32>
    %618 = arith.mulf %617, %614 : vector<4x512xf32>
    %c33_i32_277 = arith.constant 33 : i32
    %619 = tpu.dynamic_rotate %610 by %c33_i32_277 dim 1 : vector<4x512xf32>, i32 -> vector<4x512xf32>
    %c21_278 = arith.constant 21 : index
    %c0_279 = arith.constant 0 : index
    %620 = vector.load %arg2[%c21_278, %c0_279] : memref<81x512xf32, #tpu.memory_space<vmem>>, vector<1x512xf32>
    %621 = vector.broadcast %620 : vector<1x512xf32> to vector<4x512xf32>
    %622 = arith.mulf %621, %619 : vector<4x512xf32>
    %c1_280 = arith.constant 1 : index
    %c0_281 = arith.constant 0 : index
    %c0_282 = arith.constant 0 : index
    %623 = vector.load %arg10[%c1_280, %c0_281, %c0_282] : memref<25x4x1xf32, #tpu.memory_space<vmem>>, vector<1x4x1xf32>
    %624 = vector.shape_cast %623 : vector<1x4x1xf32> to vector<4x1xf32>
    %625 = vector.broadcast %624 : vector<4x1xf32> to vector<4x512xf32>
    %626 = arith.mulf %625, %622 : vector<4x512xf32>
    %627 = arith.addf %618, %626 : vector<4x512xf32>
    %c32_i32_283 = arith.constant 32 : i32
    %628 = tpu.dynamic_rotate %610 by %c32_i32_283 dim 1 : vector<4x512xf32>, i32 -> vector<4x512xf32>
    %c22_284 = arith.constant 22 : index
    %c0_285 = arith.constant 0 : index
    %629 = vector.load %arg2[%c22_284, %c0_285] : memref<81x512xf32, #tpu.memory_space<vmem>>, vector<1x512xf32>
    %630 = vector.broadcast %629 : vector<1x512xf32> to vector<4x512xf32>
    %631 = arith.mulf %630, %628 : vector<4x512xf32>
    %c2_286 = arith.constant 2 : index
    %c0_287 = arith.constant 0 : index
    %c0_288 = arith.constant 0 : index
    %632 = vector.load %arg10[%c2_286, %c0_287, %c0_288] : memref<25x4x1xf32, #tpu.memory_space<vmem>>, vector<1x4x1xf32>
    %633 = vector.shape_cast %632 : vector<1x4x1xf32> to vector<4x1xf32>
    %634 = vector.broadcast %633 : vector<4x1xf32> to vector<4x512xf32>
    %635 = arith.mulf %634, %631 : vector<4x512xf32>
    %636 = arith.addf %627, %635 : vector<4x512xf32>
    %c31_i32_289 = arith.constant 31 : i32
    %637 = tpu.dynamic_rotate %610 by %c31_i32_289 dim 1 : vector<4x512xf32>, i32 -> vector<4x512xf32>
    %c23_290 = arith.constant 23 : index
    %c0_291 = arith.constant 0 : index
    %638 = vector.load %arg2[%c23_290, %c0_291] : memref<81x512xf32, #tpu.memory_space<vmem>>, vector<1x512xf32>
    %639 = vector.broadcast %638 : vector<1x512xf32> to vector<4x512xf32>
    %640 = arith.mulf %639, %637 : vector<4x512xf32>
    %c3_292 = arith.constant 3 : index
    %c0_293 = arith.constant 0 : index
    %c0_294 = arith.constant 0 : index
    %641 = vector.load %arg10[%c3_292, %c0_293, %c0_294] : memref<25x4x1xf32, #tpu.memory_space<vmem>>, vector<1x4x1xf32>
    %642 = vector.shape_cast %641 : vector<1x4x1xf32> to vector<4x1xf32>
    %643 = vector.broadcast %642 : vector<4x1xf32> to vector<4x512xf32>
    %644 = arith.mulf %643, %640 : vector<4x512xf32>
    %645 = arith.addf %636, %644 : vector<4x512xf32>
    %c30_i32_295 = arith.constant 30 : i32
    %646 = tpu.dynamic_rotate %610 by %c30_i32_295 dim 1 : vector<4x512xf32>, i32 -> vector<4x512xf32>
    %c24_296 = arith.constant 24 : index
    %c0_297 = arith.constant 0 : index
    %647 = vector.load %arg2[%c24_296, %c0_297] : memref<81x512xf32, #tpu.memory_space<vmem>>, vector<1x512xf32>
    %648 = vector.broadcast %647 : vector<1x512xf32> to vector<4x512xf32>
    %649 = arith.mulf %648, %646 : vector<4x512xf32>
    %c4_298 = arith.constant 4 : index
    %c0_299 = arith.constant 0 : index
    %c0_300 = arith.constant 0 : index
    %650 = vector.load %arg10[%c4_298, %c0_299, %c0_300] : memref<25x4x1xf32, #tpu.memory_space<vmem>>, vector<1x4x1xf32>
    %651 = vector.shape_cast %650 : vector<1x4x1xf32> to vector<4x1xf32>
    %652 = vector.broadcast %651 : vector<4x1xf32> to vector<4x512xf32>
    %653 = arith.mulf %652, %649 : vector<4x512xf32>
    %654 = arith.addf %645, %653 : vector<4x512xf32>
    %c18_i32_301 = arith.constant 18 : i32
    %655 = tpu.dynamic_rotate %610 by %c18_i32_301 dim 1 : vector<4x512xf32>, i32 -> vector<4x512xf32>
    %c29_302 = arith.constant 29 : index
    %c0_303 = arith.constant 0 : index
    %656 = vector.load %arg2[%c29_302, %c0_303] : memref<81x512xf32, #tpu.memory_space<vmem>>, vector<1x512xf32>
    %657 = vector.broadcast %656 : vector<1x512xf32> to vector<4x512xf32>
    %658 = arith.mulf %657, %655 : vector<4x512xf32>
    %c5_304 = arith.constant 5 : index
    %c0_305 = arith.constant 0 : index
    %c0_306 = arith.constant 0 : index
    %659 = vector.load %arg10[%c5_304, %c0_305, %c0_306] : memref<25x4x1xf32, #tpu.memory_space<vmem>>, vector<1x4x1xf32>
    %660 = vector.shape_cast %659 : vector<1x4x1xf32> to vector<4x1xf32>
    %661 = vector.broadcast %660 : vector<4x1xf32> to vector<4x512xf32>
    %662 = arith.mulf %661, %658 : vector<4x512xf32>
    %663 = arith.addf %654, %662 : vector<4x512xf32>
    %c17_i32_307 = arith.constant 17 : i32
    %664 = tpu.dynamic_rotate %610 by %c17_i32_307 dim 1 : vector<4x512xf32>, i32 -> vector<4x512xf32>
    %c30_308 = arith.constant 30 : index
    %c0_309 = arith.constant 0 : index
    %665 = vector.load %arg2[%c30_308, %c0_309] : memref<81x512xf32, #tpu.memory_space<vmem>>, vector<1x512xf32>
    %666 = vector.broadcast %665 : vector<1x512xf32> to vector<4x512xf32>
    %667 = arith.mulf %666, %664 : vector<4x512xf32>
    %c6_310 = arith.constant 6 : index
    %c0_311 = arith.constant 0 : index
    %c0_312 = arith.constant 0 : index
    %668 = vector.load %arg10[%c6_310, %c0_311, %c0_312] : memref<25x4x1xf32, #tpu.memory_space<vmem>>, vector<1x4x1xf32>
    %669 = vector.shape_cast %668 : vector<1x4x1xf32> to vector<4x1xf32>
    %670 = vector.broadcast %669 : vector<4x1xf32> to vector<4x512xf32>
    %671 = arith.mulf %670, %667 : vector<4x512xf32>
    %672 = arith.addf %663, %671 : vector<4x512xf32>
    %c16_i32_313 = arith.constant 16 : i32
    %673 = tpu.dynamic_rotate %610 by %c16_i32_313 dim 1 : vector<4x512xf32>, i32 -> vector<4x512xf32>
    %c31_314 = arith.constant 31 : index
    %c0_315 = arith.constant 0 : index
    %674 = vector.load %arg2[%c31_314, %c0_315] : memref<81x512xf32, #tpu.memory_space<vmem>>, vector<1x512xf32>
    %675 = vector.broadcast %674 : vector<1x512xf32> to vector<4x512xf32>
    %676 = arith.mulf %675, %673 : vector<4x512xf32>
    %c7_316 = arith.constant 7 : index
    %c0_317 = arith.constant 0 : index
    %c0_318 = arith.constant 0 : index
    %677 = vector.load %arg10[%c7_316, %c0_317, %c0_318] : memref<25x4x1xf32, #tpu.memory_space<vmem>>, vector<1x4x1xf32>
    %678 = vector.shape_cast %677 : vector<1x4x1xf32> to vector<4x1xf32>
    %679 = vector.broadcast %678 : vector<4x1xf32> to vector<4x512xf32>
    %680 = arith.mulf %679, %676 : vector<4x512xf32>
    %681 = arith.addf %672, %680 : vector<4x512xf32>
    %c15_i32_319 = arith.constant 15 : i32
    %682 = tpu.dynamic_rotate %610 by %c15_i32_319 dim 1 : vector<4x512xf32>, i32 -> vector<4x512xf32>
    %c32_320 = arith.constant 32 : index
    %c0_321 = arith.constant 0 : index
    %683 = vector.load %arg2[%c32_320, %c0_321] : memref<81x512xf32, #tpu.memory_space<vmem>>, vector<1x512xf32>
    %684 = vector.broadcast %683 : vector<1x512xf32> to vector<4x512xf32>
    %685 = arith.mulf %684, %682 : vector<4x512xf32>
    %c8_322 = arith.constant 8 : index
    %c0_323 = arith.constant 0 : index
    %c0_324 = arith.constant 0 : index
    %686 = vector.load %arg10[%c8_322, %c0_323, %c0_324] : memref<25x4x1xf32, #tpu.memory_space<vmem>>, vector<1x4x1xf32>
    %687 = vector.shape_cast %686 : vector<1x4x1xf32> to vector<4x1xf32>
    %688 = vector.broadcast %687 : vector<4x1xf32> to vector<4x512xf32>
    %689 = arith.mulf %688, %685 : vector<4x512xf32>
    %690 = arith.addf %681, %689 : vector<4x512xf32>
    %c14_i32_325 = arith.constant 14 : i32
    %691 = tpu.dynamic_rotate %610 by %c14_i32_325 dim 1 : vector<4x512xf32>, i32 -> vector<4x512xf32>
    %c33_326 = arith.constant 33 : index
    %c0_327 = arith.constant 0 : index
    %692 = vector.load %arg2[%c33_326, %c0_327] : memref<81x512xf32, #tpu.memory_space<vmem>>, vector<1x512xf32>
    %693 = vector.broadcast %692 : vector<1x512xf32> to vector<4x512xf32>
    %694 = arith.mulf %693, %691 : vector<4x512xf32>
    %c9_328 = arith.constant 9 : index
    %c0_329 = arith.constant 0 : index
    %c0_330 = arith.constant 0 : index
    %695 = vector.load %arg10[%c9_328, %c0_329, %c0_330] : memref<25x4x1xf32, #tpu.memory_space<vmem>>, vector<1x4x1xf32>
    %696 = vector.shape_cast %695 : vector<1x4x1xf32> to vector<4x1xf32>
    %697 = vector.broadcast %696 : vector<4x1xf32> to vector<4x512xf32>
    %698 = arith.mulf %697, %694 : vector<4x512xf32>
    %699 = arith.addf %690, %698 : vector<4x512xf32>
    %c2_i32_331 = arith.constant 2 : i32
    %700 = tpu.dynamic_rotate %610 by %c2_i32_331 dim 1 : vector<4x512xf32>, i32 -> vector<4x512xf32>
    %c38_332 = arith.constant 38 : index
    %c0_333 = arith.constant 0 : index
    %701 = vector.load %arg2[%c38_332, %c0_333] : memref<81x512xf32, #tpu.memory_space<vmem>>, vector<1x512xf32>
    %702 = vector.broadcast %701 : vector<1x512xf32> to vector<4x512xf32>
    %703 = arith.mulf %702, %700 : vector<4x512xf32>
    %c10_334 = arith.constant 10 : index
    %c0_335 = arith.constant 0 : index
    %c0_336 = arith.constant 0 : index
    %704 = vector.load %arg10[%c10_334, %c0_335, %c0_336] : memref<25x4x1xf32, #tpu.memory_space<vmem>>, vector<1x4x1xf32>
    %705 = vector.shape_cast %704 : vector<1x4x1xf32> to vector<4x1xf32>
    %706 = vector.broadcast %705 : vector<4x1xf32> to vector<4x512xf32>
    %707 = arith.mulf %706, %703 : vector<4x512xf32>
    %708 = arith.addf %699, %707 : vector<4x512xf32>
    %c1_i32_337 = arith.constant 1 : i32
    %709 = tpu.dynamic_rotate %610 by %c1_i32_337 dim 1 : vector<4x512xf32>, i32 -> vector<4x512xf32>
    %c39_338 = arith.constant 39 : index
    %c0_339 = arith.constant 0 : index
    %710 = vector.load %arg2[%c39_338, %c0_339] : memref<81x512xf32, #tpu.memory_space<vmem>>, vector<1x512xf32>
    %711 = vector.broadcast %710 : vector<1x512xf32> to vector<4x512xf32>
    %712 = arith.mulf %711, %709 : vector<4x512xf32>
    %c11_340 = arith.constant 11 : index
    %c0_341 = arith.constant 0 : index
    %c0_342 = arith.constant 0 : index
    %713 = vector.load %arg10[%c11_340, %c0_341, %c0_342] : memref<25x4x1xf32, #tpu.memory_space<vmem>>, vector<1x4x1xf32>
    %714 = vector.shape_cast %713 : vector<1x4x1xf32> to vector<4x1xf32>
    %715 = vector.broadcast %714 : vector<4x1xf32> to vector<4x512xf32>
    %716 = arith.mulf %715, %712 : vector<4x512xf32>
    %717 = arith.addf %708, %716 : vector<4x512xf32>
    %c12_343 = arith.constant 12 : index
    %c0_344 = arith.constant 0 : index
    %c0_345 = arith.constant 0 : index
    %718 = vector.load %arg10[%c12_343, %c0_344, %c0_345] : memref<25x4x1xf32, #tpu.memory_space<vmem>>, vector<1x4x1xf32>
    %719 = vector.shape_cast %718 : vector<1x4x1xf32> to vector<4x1xf32>
    %720 = vector.broadcast %719 : vector<4x1xf32> to vector<4x512xf32>
    %721 = arith.mulf %720, %610 : vector<4x512xf32>
    %722 = arith.addf %717, %721 : vector<4x512xf32>
    %c511_i32_346 = arith.constant 511 : i32
    %723 = tpu.dynamic_rotate %610 by %c511_i32_346 dim 1 : vector<4x512xf32>, i32 -> vector<4x512xf32>
    %c41_347 = arith.constant 41 : index
    %c0_348 = arith.constant 0 : index
    %724 = vector.load %arg2[%c41_347, %c0_348] : memref<81x512xf32, #tpu.memory_space<vmem>>, vector<1x512xf32>
    %725 = vector.broadcast %724 : vector<1x512xf32> to vector<4x512xf32>
    %726 = arith.mulf %725, %723 : vector<4x512xf32>
    %c13_349 = arith.constant 13 : index
    %c0_350 = arith.constant 0 : index
    %c0_351 = arith.constant 0 : index
    %727 = vector.load %arg10[%c13_349, %c0_350, %c0_351] : memref<25x4x1xf32, #tpu.memory_space<vmem>>, vector<1x4x1xf32>
    %728 = vector.shape_cast %727 : vector<1x4x1xf32> to vector<4x1xf32>
    %729 = vector.broadcast %728 : vector<4x1xf32> to vector<4x512xf32>
    %730 = arith.mulf %729, %726 : vector<4x512xf32>
    %731 = arith.addf %722, %730 : vector<4x512xf32>
    %c510_i32_352 = arith.constant 510 : i32
    %732 = tpu.dynamic_rotate %610 by %c510_i32_352 dim 1 : vector<4x512xf32>, i32 -> vector<4x512xf32>
    %c42_353 = arith.constant 42 : index
    %c0_354 = arith.constant 0 : index
    %733 = vector.load %arg2[%c42_353, %c0_354] : memref<81x512xf32, #tpu.memory_space<vmem>>, vector<1x512xf32>
    %734 = vector.broadcast %733 : vector<1x512xf32> to vector<4x512xf32>
    %735 = arith.mulf %734, %732 : vector<4x512xf32>
    %c14_355 = arith.constant 14 : index
    %c0_356 = arith.constant 0 : index
    %c0_357 = arith.constant 0 : index
    %736 = vector.load %arg10[%c14_355, %c0_356, %c0_357] : memref<25x4x1xf32, #tpu.memory_space<vmem>>, vector<1x4x1xf32>
    %737 = vector.shape_cast %736 : vector<1x4x1xf32> to vector<4x1xf32>
    %738 = vector.broadcast %737 : vector<4x1xf32> to vector<4x512xf32>
    %739 = arith.mulf %738, %735 : vector<4x512xf32>
    %740 = arith.addf %731, %739 : vector<4x512xf32>
    %c498_i32_358 = arith.constant 498 : i32
    %741 = tpu.dynamic_rotate %610 by %c498_i32_358 dim 1 : vector<4x512xf32>, i32 -> vector<4x512xf32>
    %c47_359 = arith.constant 47 : index
    %c0_360 = arith.constant 0 : index
    %742 = vector.load %arg2[%c47_359, %c0_360] : memref<81x512xf32, #tpu.memory_space<vmem>>, vector<1x512xf32>
    %743 = vector.broadcast %742 : vector<1x512xf32> to vector<4x512xf32>
    %744 = arith.mulf %743, %741 : vector<4x512xf32>
    %c15_361 = arith.constant 15 : index
    %c0_362 = arith.constant 0 : index
    %c0_363 = arith.constant 0 : index
    %745 = vector.load %arg10[%c15_361, %c0_362, %c0_363] : memref<25x4x1xf32, #tpu.memory_space<vmem>>, vector<1x4x1xf32>
    %746 = vector.shape_cast %745 : vector<1x4x1xf32> to vector<4x1xf32>
    %747 = vector.broadcast %746 : vector<4x1xf32> to vector<4x512xf32>
    %748 = arith.mulf %747, %744 : vector<4x512xf32>
    %749 = arith.addf %740, %748 : vector<4x512xf32>
    %c497_i32_364 = arith.constant 497 : i32
    %750 = tpu.dynamic_rotate %610 by %c497_i32_364 dim 1 : vector<4x512xf32>, i32 -> vector<4x512xf32>
    %c48_365 = arith.constant 48 : index
    %c0_366 = arith.constant 0 : index
    %751 = vector.load %arg2[%c48_365, %c0_366] : memref<81x512xf32, #tpu.memory_space<vmem>>, vector<1x512xf32>
    %752 = vector.broadcast %751 : vector<1x512xf32> to vector<4x512xf32>
    %753 = arith.mulf %752, %750 : vector<4x512xf32>
    %c16_367 = arith.constant 16 : index
    %c0_368 = arith.constant 0 : index
    %c0_369 = arith.constant 0 : index
    %754 = vector.load %arg10[%c16_367, %c0_368, %c0_369] : memref<25x4x1xf32, #tpu.memory_space<vmem>>, vector<1x4x1xf32>
    %755 = vector.shape_cast %754 : vector<1x4x1xf32> to vector<4x1xf32>
    %756 = vector.broadcast %755 : vector<4x1xf32> to vector<4x512xf32>
    %757 = arith.mulf %756, %753 : vector<4x512xf32>
    %758 = arith.addf %749, %757 : vector<4x512xf32>
    %c496_i32_370 = arith.constant 496 : i32
    %759 = tpu.dynamic_rotate %610 by %c496_i32_370 dim 1 : vector<4x512xf32>, i32 -> vector<4x512xf32>
    %c49_371 = arith.constant 49 : index
    %c0_372 = arith.constant 0 : index
    %760 = vector.load %arg2[%c49_371, %c0_372] : memref<81x512xf32, #tpu.memory_space<vmem>>, vector<1x512xf32>
    %761 = vector.broadcast %760 : vector<1x512xf32> to vector<4x512xf32>
    %762 = arith.mulf %761, %759 : vector<4x512xf32>
    %c17_373 = arith.constant 17 : index
    %c0_374 = arith.constant 0 : index
    %c0_375 = arith.constant 0 : index
    %763 = vector.load %arg10[%c17_373, %c0_374, %c0_375] : memref<25x4x1xf32, #tpu.memory_space<vmem>>, vector<1x4x1xf32>
    %764 = vector.shape_cast %763 : vector<1x4x1xf32> to vector<4x1xf32>
    %765 = vector.broadcast %764 : vector<4x1xf32> to vector<4x512xf32>
    %766 = arith.mulf %765, %762 : vector<4x512xf32>
    %767 = arith.addf %758, %766 : vector<4x512xf32>
    %c495_i32_376 = arith.constant 495 : i32
    %768 = tpu.dynamic_rotate %610 by %c495_i32_376 dim 1 : vector<4x512xf32>, i32 -> vector<4x512xf32>
    %c50_377 = arith.constant 50 : index
    %c0_378 = arith.constant 0 : index
    %769 = vector.load %arg2[%c50_377, %c0_378] : memref<81x512xf32, #tpu.memory_space<vmem>>, vector<1x512xf32>
    %770 = vector.broadcast %769 : vector<1x512xf32> to vector<4x512xf32>
    %771 = arith.mulf %770, %768 : vector<4x512xf32>
    %c18_379 = arith.constant 18 : index
    %c0_380 = arith.constant 0 : index
    %c0_381 = arith.constant 0 : index
    %772 = vector.load %arg10[%c18_379, %c0_380, %c0_381] : memref<25x4x1xf32, #tpu.memory_space<vmem>>, vector<1x4x1xf32>
    %773 = vector.shape_cast %772 : vector<1x4x1xf32> to vector<4x1xf32>
    %774 = vector.broadcast %773 : vector<4x1xf32> to vector<4x512xf32>
    %775 = arith.mulf %774, %771 : vector<4x512xf32>
    %776 = arith.addf %767, %775 : vector<4x512xf32>
    %c494_i32_382 = arith.constant 494 : i32
    %777 = tpu.dynamic_rotate %610 by %c494_i32_382 dim 1 : vector<4x512xf32>, i32 -> vector<4x512xf32>
    %c51_383 = arith.constant 51 : index
    %c0_384 = arith.constant 0 : index
    %778 = vector.load %arg2[%c51_383, %c0_384] : memref<81x512xf32, #tpu.memory_space<vmem>>, vector<1x512xf32>
    %779 = vector.broadcast %778 : vector<1x512xf32> to vector<4x512xf32>
    %780 = arith.mulf %779, %777 : vector<4x512xf32>
    %c19_385 = arith.constant 19 : index
    %c0_386 = arith.constant 0 : index
    %c0_387 = arith.constant 0 : index
    %781 = vector.load %arg10[%c19_385, %c0_386, %c0_387] : memref<25x4x1xf32, #tpu.memory_space<vmem>>, vector<1x4x1xf32>
    %782 = vector.shape_cast %781 : vector<1x4x1xf32> to vector<4x1xf32>
    %783 = vector.broadcast %782 : vector<4x1xf32> to vector<4x512xf32>
    %784 = arith.mulf %783, %780 : vector<4x512xf32>
    %785 = arith.addf %776, %784 : vector<4x512xf32>
    %c482_i32_388 = arith.constant 482 : i32
    %786 = tpu.dynamic_rotate %610 by %c482_i32_388 dim 1 : vector<4x512xf32>, i32 -> vector<4x512xf32>
    %c56_389 = arith.constant 56 : index
    %c0_390 = arith.constant 0 : index
    %787 = vector.load %arg2[%c56_389, %c0_390] : memref<81x512xf32, #tpu.memory_space<vmem>>, vector<1x512xf32>
    %788 = vector.broadcast %787 : vector<1x512xf32> to vector<4x512xf32>
    %789 = arith.mulf %788, %786 : vector<4x512xf32>
    %c20_391 = arith.constant 20 : index
    %c0_392 = arith.constant 0 : index
    %c0_393 = arith.constant 0 : index
    %790 = vector.load %arg10[%c20_391, %c0_392, %c0_393] : memref<25x4x1xf32, #tpu.memory_space<vmem>>, vector<1x4x1xf32>
    %791 = vector.shape_cast %790 : vector<1x4x1xf32> to vector<4x1xf32>
    %792 = vector.broadcast %791 : vector<4x1xf32> to vector<4x512xf32>
    %793 = arith.mulf %792, %789 : vector<4x512xf32>
    %794 = arith.addf %785, %793 : vector<4x512xf32>
    %c481_i32_394 = arith.constant 481 : i32
    %795 = tpu.dynamic_rotate %610 by %c481_i32_394 dim 1 : vector<4x512xf32>, i32 -> vector<4x512xf32>
    %c57_395 = arith.constant 57 : index
    %c0_396 = arith.constant 0 : index
    %796 = vector.load %arg2[%c57_395, %c0_396] : memref<81x512xf32, #tpu.memory_space<vmem>>, vector<1x512xf32>
    %797 = vector.broadcast %796 : vector<1x512xf32> to vector<4x512xf32>
    %798 = arith.mulf %797, %795 : vector<4x512xf32>
    %c21_397 = arith.constant 21 : index
    %c0_398 = arith.constant 0 : index
    %c0_399 = arith.constant 0 : index
    %799 = vector.load %arg10[%c21_397, %c0_398, %c0_399] : memref<25x4x1xf32, #tpu.memory_space<vmem>>, vector<1x4x1xf32>
    %800 = vector.shape_cast %799 : vector<1x4x1xf32> to vector<4x1xf32>
    %801 = vector.broadcast %800 : vector<4x1xf32> to vector<4x512xf32>
    %802 = arith.mulf %801, %798 : vector<4x512xf32>
    %803 = arith.addf %794, %802 : vector<4x512xf32>
    %c480_i32_400 = arith.constant 480 : i32
    %804 = tpu.dynamic_rotate %610 by %c480_i32_400 dim 1 : vector<4x512xf32>, i32 -> vector<4x512xf32>
    %c58_401 = arith.constant 58 : index
    %c0_402 = arith.constant 0 : index
    %805 = vector.load %arg2[%c58_401, %c0_402] : memref<81x512xf32, #tpu.memory_space<vmem>>, vector<1x512xf32>
    %806 = vector.broadcast %805 : vector<1x512xf32> to vector<4x512xf32>
    %807 = arith.mulf %806, %804 : vector<4x512xf32>
    %c22_403 = arith.constant 22 : index
    %c0_404 = arith.constant 0 : index
    %c0_405 = arith.constant 0 : index
    %808 = vector.load %arg10[%c22_403, %c0_404, %c0_405] : memref<25x4x1xf32, #tpu.memory_space<vmem>>, vector<1x4x1xf32>
    %809 = vector.shape_cast %808 : vector<1x4x1xf32> to vector<4x1xf32>
    %810 = vector.broadcast %809 : vector<4x1xf32> to vector<4x512xf32>
    %811 = arith.mulf %810, %807 : vector<4x512xf32>
    %812 = arith.addf %803, %811 : vector<4x512xf32>
    %c479_i32_406 = arith.constant 479 : i32
    %813 = tpu.dynamic_rotate %610 by %c479_i32_406 dim 1 : vector<4x512xf32>, i32 -> vector<4x512xf32>
    %c59_407 = arith.constant 59 : index
    %c0_408 = arith.constant 0 : index
    %814 = vector.load %arg2[%c59_407, %c0_408] : memref<81x512xf32, #tpu.memory_space<vmem>>, vector<1x512xf32>
    %815 = vector.broadcast %814 : vector<1x512xf32> to vector<4x512xf32>
    %816 = arith.mulf %815, %813 : vector<4x512xf32>
    %c23_409 = arith.constant 23 : index
    %c0_410 = arith.constant 0 : index
    %c0_411 = arith.constant 0 : index
    %817 = vector.load %arg10[%c23_409, %c0_410, %c0_411] : memref<25x4x1xf32, #tpu.memory_space<vmem>>, vector<1x4x1xf32>
    %818 = vector.shape_cast %817 : vector<1x4x1xf32> to vector<4x1xf32>
    %819 = vector.broadcast %818 : vector<4x1xf32> to vector<4x512xf32>
    %820 = arith.mulf %819, %816 : vector<4x512xf32>
    %821 = arith.addf %812, %820 : vector<4x512xf32>
    %c478_i32_412 = arith.constant 478 : i32
    %822 = tpu.dynamic_rotate %610 by %c478_i32_412 dim 1 : vector<4x512xf32>, i32 -> vector<4x512xf32>
    %c60_413 = arith.constant 60 : index
    %c0_414 = arith.constant 0 : index
    %823 = vector.load %arg2[%c60_413, %c0_414] : memref<81x512xf32, #tpu.memory_space<vmem>>, vector<1x512xf32>
    %824 = vector.broadcast %823 : vector<1x512xf32> to vector<4x512xf32>
    %825 = arith.mulf %824, %822 : vector<4x512xf32>
    %c24_415 = arith.constant 24 : index
    %c0_416 = arith.constant 0 : index
    %c0_417 = arith.constant 0 : index
    %826 = vector.load %arg10[%c24_415, %c0_416, %c0_417] : memref<25x4x1xf32, #tpu.memory_space<vmem>>, vector<1x4x1xf32>
    %827 = vector.shape_cast %826 : vector<1x4x1xf32> to vector<4x1xf32>
    %828 = vector.broadcast %827 : vector<4x1xf32> to vector<4x512xf32>
    %829 = arith.mulf %828, %825 : vector<4x512xf32>
    %830 = arith.addf %821, %829 : vector<4x512xf32>
    %c0_418 = arith.constant 0 : index
    %c0_419 = arith.constant 0 : index
    %831 = vector.load %arg11[%c0_418, %c0_419] : memref<4x4xf32, #tpu.memory_space<vmem>>, vector<4x1xf32>
    %832 = vector.extract_strided_slice %830 {offsets = [0, 0], sizes = [1, 512], strides = [1, 1]} : vector<4x512xf32> to vector<1x512xf32>
    %833 = vector.broadcast %831 : vector<4x1xf32> to vector<4x512xf32>
    %834 = vector.broadcast %832 : vector<1x512xf32> to vector<4x512xf32>
    %835 = arith.mulf %833, %834 : vector<4x512xf32>
    %c0_420 = arith.constant 0 : index
    %c1_421 = arith.constant 1 : index
    %836 = vector.load %arg11[%c0_420, %c1_421] : memref<4x4xf32, #tpu.memory_space<vmem>>, vector<4x1xf32>
    %837 = vector.extract_strided_slice %830 {offsets = [1, 0], sizes = [1, 512], strides = [1, 1]} : vector<4x512xf32> to vector<1x512xf32>
    %838 = vector.broadcast %836 : vector<4x1xf32> to vector<4x512xf32>
    %839 = vector.broadcast %837 : vector<1x512xf32> to vector<4x512xf32>
    %840 = arith.mulf %838, %839 : vector<4x512xf32>
    %841 = arith.addf %835, %840 : vector<4x512xf32>
    %c0_422 = arith.constant 0 : index
    %c2_423 = arith.constant 2 : index
    %842 = vector.load %arg11[%c0_422, %c2_423] : memref<4x4xf32, #tpu.memory_space<vmem>>, vector<4x1xf32>
    %843 = vector.extract_strided_slice %830 {offsets = [2, 0], sizes = [1, 512], strides = [1, 1]} : vector<4x512xf32> to vector<1x512xf32>
    %844 = vector.broadcast %842 : vector<4x1xf32> to vector<4x512xf32>
    %845 = vector.broadcast %843 : vector<1x512xf32> to vector<4x512xf32>
    %846 = arith.mulf %844, %845 : vector<4x512xf32>
    %847 = arith.addf %841, %846 : vector<4x512xf32>
    %c0_424 = arith.constant 0 : index
    %c3_425 = arith.constant 3 : index
    %848 = vector.load %arg11[%c0_424, %c3_425] : memref<4x4xf32, #tpu.memory_space<vmem>>, vector<4x1xf32>
    %849 = vector.extract_strided_slice %830 {offsets = [3, 0], sizes = [1, 512], strides = [1, 1]} : vector<4x512xf32> to vector<1x512xf32>
    %850 = vector.broadcast %848 : vector<4x1xf32> to vector<4x512xf32>
    %851 = vector.broadcast %849 : vector<1x512xf32> to vector<4x512xf32>
    %852 = arith.mulf %850, %851 : vector<4x512xf32>
    %853 = arith.addf %847, %852 : vector<4x512xf32>
    %cst_426 = arith.constant dense<0.000000e+00> : vector<4xf32>
    %854 = vector.multi_reduction <add>, %853, %cst_426 [1] : vector<4x512xf32> to vector<4xf32>
    %855 = vector.shape_cast %854 : vector<4xf32> to vector<4x1xf32>
    %cst_427 = arith.constant 0.001953125 : f32
    %856 = vector.broadcast %cst_427 : f32 to vector<4x1xf32>
    %857 = arith.mulf %855, %856 : vector<4x1xf32>
    %858 = vector.broadcast %857 : vector<4x1xf32> to vector<4x512xf32>
    %859 = arith.subf %853, %858 : vector<4x512xf32>
    %860 = arith.mulf %859, %859 : vector<4x512xf32>
    %cst_428 = arith.constant dense<0.000000e+00> : vector<4xf32>
    %861 = vector.multi_reduction <add>, %860, %cst_428 [1] : vector<4x512xf32> to vector<4xf32>
    %862 = vector.shape_cast %861 : vector<4xf32> to vector<4x1xf32>
    %cst_429 = arith.constant 0.001953125 : f32
    %863 = vector.broadcast %cst_429 : f32 to vector<4x1xf32>
    %864 = arith.mulf %862, %863 : vector<4x1xf32>
    %cst_430 = arith.constant 9.99999974E-6 : f32
    %865 = vector.broadcast %cst_430 : f32 to vector<4x1xf32>
    %866 = arith.addf %864, %865 : vector<4x1xf32>
    %867 = math.rsqrt %866 : vector<4x1xf32>
    %868 = vector.broadcast %349 : f32 to vector<4x1xf32>
    %869 = arith.mulf %867, %868 : vector<4x1xf32>
    %870 = vector.broadcast %869 : vector<4x1xf32> to vector<4x512xf32>
    %871 = arith.mulf %859, %870 : vector<4x512xf32>
    %872 = arith.addf %348, %871 : vector<4x512xf32>
    %c6_431 = arith.constant 6 : index
    %873 = memref.load %arg1[%c6_431] : memref<8xf32, #tpu.memory_space<smem>>
    %c34_i32_432 = arith.constant 34 : i32
    %874 = tpu.dynamic_rotate %2 by %c34_i32_432 dim 1 : vector<4x512xf32>, i32 -> vector<4x512xf32>
    %c20_433 = arith.constant 20 : index
    %c0_434 = arith.constant 0 : index
    %875 = vector.load %arg2[%c20_433, %c0_434] : memref<81x512xf32, #tpu.memory_space<vmem>>, vector<1x512xf32>
    %876 = vector.broadcast %875 : vector<1x512xf32> to vector<4x512xf32>
    %877 = arith.mulf %876, %874 : vector<4x512xf32>
    %c0_435 = arith.constant 0 : index
    %c0_436 = arith.constant 0 : index
    %c0_437 = arith.constant 0 : index
    %878 = vector.load %arg12[%c0_435, %c0_436, %c0_437] : memref<9x4x1xf32, #tpu.memory_space<vmem>>, vector<1x4x1xf32>
    %879 = vector.shape_cast %878 : vector<1x4x1xf32> to vector<4x1xf32>
    %880 = vector.broadcast %879 : vector<4x1xf32> to vector<4x512xf32>
    %881 = arith.mulf %880, %877 : vector<4x512xf32>
    %c32_i32_438 = arith.constant 32 : i32
    %882 = tpu.dynamic_rotate %2 by %c32_i32_438 dim 1 : vector<4x512xf32>, i32 -> vector<4x512xf32>
    %c22_439 = arith.constant 22 : index
    %c0_440 = arith.constant 0 : index
    %883 = vector.load %arg2[%c22_439, %c0_440] : memref<81x512xf32, #tpu.memory_space<vmem>>, vector<1x512xf32>
    %884 = vector.broadcast %883 : vector<1x512xf32> to vector<4x512xf32>
    %885 = arith.mulf %884, %882 : vector<4x512xf32>
    %c1_441 = arith.constant 1 : index
    %c0_442 = arith.constant 0 : index
    %c0_443 = arith.constant 0 : index
    %886 = vector.load %arg12[%c1_441, %c0_442, %c0_443] : memref<9x4x1xf32, #tpu.memory_space<vmem>>, vector<1x4x1xf32>
    %887 = vector.shape_cast %886 : vector<1x4x1xf32> to vector<4x1xf32>
    %888 = vector.broadcast %887 : vector<4x1xf32> to vector<4x512xf32>
    %889 = arith.mulf %888, %885 : vector<4x512xf32>
    %890 = arith.addf %881, %889 : vector<4x512xf32>
    %c30_i32_444 = arith.constant 30 : i32
    %891 = tpu.dynamic_rotate %2 by %c30_i32_444 dim 1 : vector<4x512xf32>, i32 -> vector<4x512xf32>
    %c24_445 = arith.constant 24 : index
    %c0_446 = arith.constant 0 : index
    %892 = vector.load %arg2[%c24_445, %c0_446] : memref<81x512xf32, #tpu.memory_space<vmem>>, vector<1x512xf32>
    %893 = vector.broadcast %892 : vector<1x512xf32> to vector<4x512xf32>
    %894 = arith.mulf %893, %891 : vector<4x512xf32>
    %c2_447 = arith.constant 2 : index
    %c0_448 = arith.constant 0 : index
    %c0_449 = arith.constant 0 : index
    %895 = vector.load %arg12[%c2_447, %c0_448, %c0_449] : memref<9x4x1xf32, #tpu.memory_space<vmem>>, vector<1x4x1xf32>
    %896 = vector.shape_cast %895 : vector<1x4x1xf32> to vector<4x1xf32>
    %897 = vector.broadcast %896 : vector<4x1xf32> to vector<4x512xf32>
    %898 = arith.mulf %897, %894 : vector<4x512xf32>
    %899 = arith.addf %890, %898 : vector<4x512xf32>
    %c2_i32_450 = arith.constant 2 : i32
    %900 = tpu.dynamic_rotate %2 by %c2_i32_450 dim 1 : vector<4x512xf32>, i32 -> vector<4x512xf32>
    %c38_451 = arith.constant 38 : index
    %c0_452 = arith.constant 0 : index
    %901 = vector.load %arg2[%c38_451, %c0_452] : memref<81x512xf32, #tpu.memory_space<vmem>>, vector<1x512xf32>
    %902 = vector.broadcast %901 : vector<1x512xf32> to vector<4x512xf32>
    %903 = arith.mulf %902, %900 : vector<4x512xf32>
    %c3_453 = arith.constant 3 : index
    %c0_454 = arith.constant 0 : index
    %c0_455 = arith.constant 0 : index
    %904 = vector.load %arg12[%c3_453, %c0_454, %c0_455] : memref<9x4x1xf32, #tpu.memory_space<vmem>>, vector<1x4x1xf32>
    %905 = vector.shape_cast %904 : vector<1x4x1xf32> to vector<4x1xf32>
    %906 = vector.broadcast %905 : vector<4x1xf32> to vector<4x512xf32>
    %907 = arith.mulf %906, %903 : vector<4x512xf32>
    %908 = arith.addf %899, %907 : vector<4x512xf32>
    %c4_456 = arith.constant 4 : index
    %c0_457 = arith.constant 0 : index
    %c0_458 = arith.constant 0 : index
    %909 = vector.load %arg12[%c4_456, %c0_457, %c0_458] : memref<9x4x1xf32, #tpu.memory_space<vmem>>, vector<1x4x1xf32>
    %910 = vector.shape_cast %909 : vector<1x4x1xf32> to vector<4x1xf32>
    %911 = vector.broadcast %910 : vector<4x1xf32> to vector<4x512xf32>
    %912 = arith.mulf %911, %2 : vector<4x512xf32>
    %913 = arith.addf %908, %912 : vector<4x512xf32>
    %c510_i32_459 = arith.constant 510 : i32
    %914 = tpu.dynamic_rotate %2 by %c510_i32_459 dim 1 : vector<4x512xf32>, i32 -> vector<4x512xf32>
    %c42_460 = arith.constant 42 : index
    %c0_461 = arith.constant 0 : index
    %915 = vector.load %arg2[%c42_460, %c0_461] : memref<81x512xf32, #tpu.memory_space<vmem>>, vector<1x512xf32>
    %916 = vector.broadcast %915 : vector<1x512xf32> to vector<4x512xf32>
    %917 = arith.mulf %916, %914 : vector<4x512xf32>
    %c5_462 = arith.constant 5 : index
    %c0_463 = arith.constant 0 : index
    %c0_464 = arith.constant 0 : index
    %918 = vector.load %arg12[%c5_462, %c0_463, %c0_464] : memref<9x4x1xf32, #tpu.memory_space<vmem>>, vector<1x4x1xf32>
    %919 = vector.shape_cast %918 : vector<1x4x1xf32> to vector<4x1xf32>
    %920 = vector.broadcast %919 : vector<4x1xf32> to vector<4x512xf32>
    %921 = arith.mulf %920, %917 : vector<4x512xf32>
    %922 = arith.addf %913, %921 : vector<4x512xf32>
    %c482_i32_465 = arith.constant 482 : i32
    %923 = tpu.dynamic_rotate %2 by %c482_i32_465 dim 1 : vector<4x512xf32>, i32 -> vector<4x512xf32>
    %c56_466 = arith.constant 56 : index
    %c0_467 = arith.constant 0 : index
    %924 = vector.load %arg2[%c56_466, %c0_467] : memref<81x512xf32, #tpu.memory_space<vmem>>, vector<1x512xf32>
    %925 = vector.broadcast %924 : vector<1x512xf32> to vector<4x512xf32>
    %926 = arith.mulf %925, %923 : vector<4x512xf32>
    %c6_468 = arith.constant 6 : index
    %c0_469 = arith.constant 0 : index
    %c0_470 = arith.constant 0 : index
    %927 = vector.load %arg12[%c6_468, %c0_469, %c0_470] : memref<9x4x1xf32, #tpu.memory_space<vmem>>, vector<1x4x1xf32>
    %928 = vector.shape_cast %927 : vector<1x4x1xf32> to vector<4x1xf32>
    %929 = vector.broadcast %928 : vector<4x1xf32> to vector<4x512xf32>
    %930 = arith.mulf %929, %926 : vector<4x512xf32>
    %931 = arith.addf %922, %930 : vector<4x512xf32>
    %c480_i32_471 = arith.constant 480 : i32
    %932 = tpu.dynamic_rotate %2 by %c480_i32_471 dim 1 : vector<4x512xf32>, i32 -> vector<4x512xf32>
    %c58_472 = arith.constant 58 : index
    %c0_473 = arith.constant 0 : index
    %933 = vector.load %arg2[%c58_472, %c0_473] : memref<81x512xf32, #tpu.memory_space<vmem>>, vector<1x512xf32>
    %934 = vector.broadcast %933 : vector<1x512xf32> to vector<4x512xf32>
    %935 = arith.mulf %934, %932 : vector<4x512xf32>
    %c7_474 = arith.constant 7 : index
    %c0_475 = arith.constant 0 : index
    %c0_476 = arith.constant 0 : index
    %936 = vector.load %arg12[%c7_474, %c0_475, %c0_476] : memref<9x4x1xf32, #tpu.memory_space<vmem>>, vector<1x4x1xf32>
    %937 = vector.shape_cast %936 : vector<1x4x1xf32> to vector<4x1xf32>
    %938 = vector.broadcast %937 : vector<4x1xf32> to vector<4x512xf32>
    %939 = arith.mulf %938, %935 : vector<4x512xf32>
    %940 = arith.addf %931, %939 : vector<4x512xf32>
    %c478_i32_477 = arith.constant 478 : i32
    %941 = tpu.dynamic_rotate %2 by %c478_i32_477 dim 1 : vector<4x512xf32>, i32 -> vector<4x512xf32>
    %c60_478 = arith.constant 60 : index
    %c0_479 = arith.constant 0 : index
    %942 = vector.load %arg2[%c60_478, %c0_479] : memref<81x512xf32, #tpu.memory_space<vmem>>, vector<1x512xf32>
    %943 = vector.broadcast %942 : vector<1x512xf32> to vector<4x512xf32>
    %944 = arith.mulf %943, %941 : vector<4x512xf32>
    %c8_480 = arith.constant 8 : index
    %c0_481 = arith.constant 0 : index
    %c0_482 = arith.constant 0 : index
    %945 = vector.load %arg12[%c8_480, %c0_481, %c0_482] : memref<9x4x1xf32, #tpu.memory_space<vmem>>, vector<1x4x1xf32>
    %946 = vector.shape_cast %945 : vector<1x4x1xf32> to vector<4x1xf32>
    %947 = vector.broadcast %946 : vector<4x1xf32> to vector<4x512xf32>
    %948 = arith.mulf %947, %944 : vector<4x512xf32>
    %949 = arith.addf %940, %948 : vector<4x512xf32>
    %c0_483 = arith.constant 0 : index
    %c0_484 = arith.constant 0 : index
    %950 = vector.load %arg13[%c0_483, %c0_484] : memref<4x4xf32, #tpu.memory_space<vmem>>, vector<4x1xf32>
    %951 = vector.extract_strided_slice %949 {offsets = [0, 0], sizes = [1, 512], strides = [1, 1]} : vector<4x512xf32> to vector<1x512xf32>
    %952 = vector.broadcast %950 : vector<4x1xf32> to vector<4x512xf32>
    %953 = vector.broadcast %951 : vector<1x512xf32> to vector<4x512xf32>
    %954 = arith.mulf %952, %953 : vector<4x512xf32>
    %c0_485 = arith.constant 0 : index
    %c1_486 = arith.constant 1 : index
    %955 = vector.load %arg13[%c0_485, %c1_486] : memref<4x4xf32, #tpu.memory_space<vmem>>, vector<4x1xf32>
    %956 = vector.extract_strided_slice %949 {offsets = [1, 0], sizes = [1, 512], strides = [1, 1]} : vector<4x512xf32> to vector<1x512xf32>
    %957 = vector.broadcast %955 : vector<4x1xf32> to vector<4x512xf32>
    %958 = vector.broadcast %956 : vector<1x512xf32> to vector<4x512xf32>
    %959 = arith.mulf %957, %958 : vector<4x512xf32>
    %960 = arith.addf %954, %959 : vector<4x512xf32>
    %c0_487 = arith.constant 0 : index
    %c2_488 = arith.constant 2 : index
    %961 = vector.load %arg13[%c0_487, %c2_488] : memref<4x4xf32, #tpu.memory_space<vmem>>, vector<4x1xf32>
    %962 = vector.extract_strided_slice %949 {offsets = [2, 0], sizes = [1, 512], strides = [1, 1]} : vector<4x512xf32> to vector<1x512xf32>
    %963 = vector.broadcast %961 : vector<4x1xf32> to vector<4x512xf32>
    %964 = vector.broadcast %962 : vector<1x512xf32> to vector<4x512xf32>
    %965 = arith.mulf %963, %964 : vector<4x512xf32>
    %966 = arith.addf %960, %965 : vector<4x512xf32>
    %c0_489 = arith.constant 0 : index
    %c3_490 = arith.constant 3 : index
    %967 = vector.load %arg13[%c0_489, %c3_490] : memref<4x4xf32, #tpu.memory_space<vmem>>, vector<4x1xf32>
    %968 = vector.extract_strided_slice %949 {offsets = [3, 0], sizes = [1, 512], strides = [1, 1]} : vector<4x512xf32> to vector<1x512xf32>
    %969 = vector.broadcast %967 : vector<4x1xf32> to vector<4x512xf32>
    %970 = vector.broadcast %968 : vector<1x512xf32> to vector<4x512xf32>
    %971 = arith.mulf %969, %970 : vector<4x512xf32>
    %972 = arith.addf %966, %971 : vector<4x512xf32>
    %cst_491 = arith.constant dense<0.000000e+00> : vector<4xf32>
    %973 = vector.multi_reduction <add>, %972, %cst_491 [1] : vector<4x512xf32> to vector<4xf32>
    %974 = vector.shape_cast %973 : vector<4xf32> to vector<4x1xf32>
    %cst_492 = arith.constant 0.001953125 : f32
    %975 = vector.broadcast %cst_492 : f32 to vector<4x1xf32>
    %976 = arith.mulf %974, %975 : vector<4x1xf32>
    %977 = vector.broadcast %976 : vector<4x1xf32> to vector<4x512xf32>
    %978 = arith.subf %972, %977 : vector<4x512xf32>
    %979 = arith.mulf %978, %978 : vector<4x512xf32>
    %cst_493 = arith.constant dense<0.000000e+00> : vector<4xf32>
    %980 = vector.multi_reduction <add>, %979, %cst_493 [1] : vector<4x512xf32> to vector<4xf32>
    %981 = vector.shape_cast %980 : vector<4xf32> to vector<4x1xf32>
    %cst_494 = arith.constant 0.001953125 : f32
    %982 = vector.broadcast %cst_494 : f32 to vector<4x1xf32>
    %983 = arith.mulf %981, %982 : vector<4x1xf32>
    %cst_495 = arith.constant 9.99999974E-6 : f32
    %984 = vector.broadcast %cst_495 : f32 to vector<4x1xf32>
    %985 = arith.addf %983, %984 : vector<4x1xf32>
    %986 = math.rsqrt %985 : vector<4x1xf32>
    %987 = vector.broadcast %873 : f32 to vector<4x1xf32>
    %988 = arith.mulf %986, %987 : vector<4x1xf32>
    %989 = vector.broadcast %988 : vector<4x1xf32> to vector<4x512xf32>
    %990 = arith.mulf %978, %989 : vector<4x512xf32>
    %991 = arith.addf %872, %990 : vector<4x512xf32>
    %c7_496 = arith.constant 7 : index
    %992 = memref.load %arg1[%c7_496] : memref<8xf32, #tpu.memory_space<smem>>
    %c68_i32 = arith.constant 68 : i32
    %993 = tpu.dynamic_rotate %2 by %c68_i32 dim 1 : vector<4x512xf32>, i32 -> vector<4x512xf32>
    %c0_497 = arith.constant 0 : index
    %c0_498 = arith.constant 0 : index
    %994 = vector.load %arg2[%c0_497, %c0_498] : memref<81x512xf32, #tpu.memory_space<vmem>>, vector<1x512xf32>
    %995 = vector.broadcast %994 : vector<1x512xf32> to vector<4x512xf32>
    %996 = arith.mulf %995, %993 : vector<4x512xf32>
    %c0_499 = arith.constant 0 : index
    %c0_500 = arith.constant 0 : index
    %c0_501 = arith.constant 0 : index
    %997 = vector.load %arg14[%c0_499, %c0_500, %c0_501] : memref<25x4x1xf32, #tpu.memory_space<vmem>>, vector<1x4x1xf32>
    %998 = vector.shape_cast %997 : vector<1x4x1xf32> to vector<4x1xf32>
    %999 = vector.broadcast %998 : vector<4x1xf32> to vector<4x512xf32>
    %1000 = arith.mulf %999, %996 : vector<4x512xf32>
    %c66_i32 = arith.constant 66 : i32
    %1001 = tpu.dynamic_rotate %2 by %c66_i32 dim 1 : vector<4x512xf32>, i32 -> vector<4x512xf32>
    %c2_502 = arith.constant 2 : index
    %c0_503 = arith.constant 0 : index
    %1002 = vector.load %arg2[%c2_502, %c0_503] : memref<81x512xf32, #tpu.memory_space<vmem>>, vector<1x512xf32>
    %1003 = vector.broadcast %1002 : vector<1x512xf32> to vector<4x512xf32>
    %1004 = arith.mulf %1003, %1001 : vector<4x512xf32>
    %c1_504 = arith.constant 1 : index
    %c0_505 = arith.constant 0 : index
    %c0_506 = arith.constant 0 : index
    %1005 = vector.load %arg14[%c1_504, %c0_505, %c0_506] : memref<25x4x1xf32, #tpu.memory_space<vmem>>, vector<1x4x1xf32>
    %1006 = vector.shape_cast %1005 : vector<1x4x1xf32> to vector<4x1xf32>
    %1007 = vector.broadcast %1006 : vector<4x1xf32> to vector<4x512xf32>
    %1008 = arith.mulf %1007, %1004 : vector<4x512xf32>
    %1009 = arith.addf %1000, %1008 : vector<4x512xf32>
    %c64_i32 = arith.constant 64 : i32
    %1010 = tpu.dynamic_rotate %2 by %c64_i32 dim 1 : vector<4x512xf32>, i32 -> vector<4x512xf32>
    %c4_507 = arith.constant 4 : index
    %c0_508 = arith.constant 0 : index
    %1011 = vector.load %arg2[%c4_507, %c0_508] : memref<81x512xf32, #tpu.memory_space<vmem>>, vector<1x512xf32>
    %1012 = vector.broadcast %1011 : vector<1x512xf32> to vector<4x512xf32>
    %1013 = arith.mulf %1012, %1010 : vector<4x512xf32>
    %c2_509 = arith.constant 2 : index
    %c0_510 = arith.constant 0 : index
    %c0_511 = arith.constant 0 : index
    %1014 = vector.load %arg14[%c2_509, %c0_510, %c0_511] : memref<25x4x1xf32, #tpu.memory_space<vmem>>, vector<1x4x1xf32>
    %1015 = vector.shape_cast %1014 : vector<1x4x1xf32> to vector<4x1xf32>
    %1016 = vector.broadcast %1015 : vector<4x1xf32> to vector<4x512xf32>
    %1017 = arith.mulf %1016, %1013 : vector<4x512xf32>
    %1018 = arith.addf %1009, %1017 : vector<4x512xf32>
    %c62_i32 = arith.constant 62 : i32
    %1019 = tpu.dynamic_rotate %2 by %c62_i32 dim 1 : vector<4x512xf32>, i32 -> vector<4x512xf32>
    %c6_512 = arith.constant 6 : index
    %c0_513 = arith.constant 0 : index
    %1020 = vector.load %arg2[%c6_512, %c0_513] : memref<81x512xf32, #tpu.memory_space<vmem>>, vector<1x512xf32>
    %1021 = vector.broadcast %1020 : vector<1x512xf32> to vector<4x512xf32>
    %1022 = arith.mulf %1021, %1019 : vector<4x512xf32>
    %c3_514 = arith.constant 3 : index
    %c0_515 = arith.constant 0 : index
    %c0_516 = arith.constant 0 : index
    %1023 = vector.load %arg14[%c3_514, %c0_515, %c0_516] : memref<25x4x1xf32, #tpu.memory_space<vmem>>, vector<1x4x1xf32>
    %1024 = vector.shape_cast %1023 : vector<1x4x1xf32> to vector<4x1xf32>
    %1025 = vector.broadcast %1024 : vector<4x1xf32> to vector<4x512xf32>
    %1026 = arith.mulf %1025, %1022 : vector<4x512xf32>
    %1027 = arith.addf %1018, %1026 : vector<4x512xf32>
    %c60_i32 = arith.constant 60 : i32
    %1028 = tpu.dynamic_rotate %2 by %c60_i32 dim 1 : vector<4x512xf32>, i32 -> vector<4x512xf32>
    %c8_517 = arith.constant 8 : index
    %c0_518 = arith.constant 0 : index
    %1029 = vector.load %arg2[%c8_517, %c0_518] : memref<81x512xf32, #tpu.memory_space<vmem>>, vector<1x512xf32>
    %1030 = vector.broadcast %1029 : vector<1x512xf32> to vector<4x512xf32>
    %1031 = arith.mulf %1030, %1028 : vector<4x512xf32>
    %c4_519 = arith.constant 4 : index
    %c0_520 = arith.constant 0 : index
    %c0_521 = arith.constant 0 : index
    %1032 = vector.load %arg14[%c4_519, %c0_520, %c0_521] : memref<25x4x1xf32, #tpu.memory_space<vmem>>, vector<1x4x1xf32>
    %1033 = vector.shape_cast %1032 : vector<1x4x1xf32> to vector<4x1xf32>
    %1034 = vector.broadcast %1033 : vector<4x1xf32> to vector<4x512xf32>
    %1035 = arith.mulf %1034, %1031 : vector<4x512xf32>
    %1036 = arith.addf %1027, %1035 : vector<4x512xf32>
    %c36_i32 = arith.constant 36 : i32
    %1037 = tpu.dynamic_rotate %2 by %c36_i32 dim 1 : vector<4x512xf32>, i32 -> vector<4x512xf32>
    %c18_522 = arith.constant 18 : index
    %c0_523 = arith.constant 0 : index
    %1038 = vector.load %arg2[%c18_522, %c0_523] : memref<81x512xf32, #tpu.memory_space<vmem>>, vector<1x512xf32>
    %1039 = vector.broadcast %1038 : vector<1x512xf32> to vector<4x512xf32>
    %1040 = arith.mulf %1039, %1037 : vector<4x512xf32>
    %c5_524 = arith.constant 5 : index
    %c0_525 = arith.constant 0 : index
    %c0_526 = arith.constant 0 : index
    %1041 = vector.load %arg14[%c5_524, %c0_525, %c0_526] : memref<25x4x1xf32, #tpu.memory_space<vmem>>, vector<1x4x1xf32>
    %1042 = vector.shape_cast %1041 : vector<1x4x1xf32> to vector<4x1xf32>
    %1043 = vector.broadcast %1042 : vector<4x1xf32> to vector<4x512xf32>
    %1044 = arith.mulf %1043, %1040 : vector<4x512xf32>
    %1045 = arith.addf %1036, %1044 : vector<4x512xf32>
    %c34_i32_527 = arith.constant 34 : i32
    %1046 = tpu.dynamic_rotate %2 by %c34_i32_527 dim 1 : vector<4x512xf32>, i32 -> vector<4x512xf32>
    %c20_528 = arith.constant 20 : index
    %c0_529 = arith.constant 0 : index
    %1047 = vector.load %arg2[%c20_528, %c0_529] : memref<81x512xf32, #tpu.memory_space<vmem>>, vector<1x512xf32>
    %1048 = vector.broadcast %1047 : vector<1x512xf32> to vector<4x512xf32>
    %1049 = arith.mulf %1048, %1046 : vector<4x512xf32>
    %c6_530 = arith.constant 6 : index
    %c0_531 = arith.constant 0 : index
    %c0_532 = arith.constant 0 : index
    %1050 = vector.load %arg14[%c6_530, %c0_531, %c0_532] : memref<25x4x1xf32, #tpu.memory_space<vmem>>, vector<1x4x1xf32>
    %1051 = vector.shape_cast %1050 : vector<1x4x1xf32> to vector<4x1xf32>
    %1052 = vector.broadcast %1051 : vector<4x1xf32> to vector<4x512xf32>
    %1053 = arith.mulf %1052, %1049 : vector<4x512xf32>
    %1054 = arith.addf %1045, %1053 : vector<4x512xf32>
    %c32_i32_533 = arith.constant 32 : i32
    %1055 = tpu.dynamic_rotate %2 by %c32_i32_533 dim 1 : vector<4x512xf32>, i32 -> vector<4x512xf32>
    %c22_534 = arith.constant 22 : index
    %c0_535 = arith.constant 0 : index
    %1056 = vector.load %arg2[%c22_534, %c0_535] : memref<81x512xf32, #tpu.memory_space<vmem>>, vector<1x512xf32>
    %1057 = vector.broadcast %1056 : vector<1x512xf32> to vector<4x512xf32>
    %1058 = arith.mulf %1057, %1055 : vector<4x512xf32>
    %c7_536 = arith.constant 7 : index
    %c0_537 = arith.constant 0 : index
    %c0_538 = arith.constant 0 : index
    %1059 = vector.load %arg14[%c7_536, %c0_537, %c0_538] : memref<25x4x1xf32, #tpu.memory_space<vmem>>, vector<1x4x1xf32>
    %1060 = vector.shape_cast %1059 : vector<1x4x1xf32> to vector<4x1xf32>
    %1061 = vector.broadcast %1060 : vector<4x1xf32> to vector<4x512xf32>
    %1062 = arith.mulf %1061, %1058 : vector<4x512xf32>
    %1063 = arith.addf %1054, %1062 : vector<4x512xf32>
    %c30_i32_539 = arith.constant 30 : i32
    %1064 = tpu.dynamic_rotate %2 by %c30_i32_539 dim 1 : vector<4x512xf32>, i32 -> vector<4x512xf32>
    %c24_540 = arith.constant 24 : index
    %c0_541 = arith.constant 0 : index
    %1065 = vector.load %arg2[%c24_540, %c0_541] : memref<81x512xf32, #tpu.memory_space<vmem>>, vector<1x512xf32>
    %1066 = vector.broadcast %1065 : vector<1x512xf32> to vector<4x512xf32>
    %1067 = arith.mulf %1066, %1064 : vector<4x512xf32>
    %c8_542 = arith.constant 8 : index
    %c0_543 = arith.constant 0 : index
    %c0_544 = arith.constant 0 : index
    %1068 = vector.load %arg14[%c8_542, %c0_543, %c0_544] : memref<25x4x1xf32, #tpu.memory_space<vmem>>, vector<1x4x1xf32>
    %1069 = vector.shape_cast %1068 : vector<1x4x1xf32> to vector<4x1xf32>
    %1070 = vector.broadcast %1069 : vector<4x1xf32> to vector<4x512xf32>
    %1071 = arith.mulf %1070, %1067 : vector<4x512xf32>
    %1072 = arith.addf %1063, %1071 : vector<4x512xf32>
    %c28_i32 = arith.constant 28 : i32
    %1073 = tpu.dynamic_rotate %2 by %c28_i32 dim 1 : vector<4x512xf32>, i32 -> vector<4x512xf32>
    %c26 = arith.constant 26 : index
    %c0_545 = arith.constant 0 : index
    %1074 = vector.load %arg2[%c26, %c0_545] : memref<81x512xf32, #tpu.memory_space<vmem>>, vector<1x512xf32>
    %1075 = vector.broadcast %1074 : vector<1x512xf32> to vector<4x512xf32>
    %1076 = arith.mulf %1075, %1073 : vector<4x512xf32>
    %c9_546 = arith.constant 9 : index
    %c0_547 = arith.constant 0 : index
    %c0_548 = arith.constant 0 : index
    %1077 = vector.load %arg14[%c9_546, %c0_547, %c0_548] : memref<25x4x1xf32, #tpu.memory_space<vmem>>, vector<1x4x1xf32>
    %1078 = vector.shape_cast %1077 : vector<1x4x1xf32> to vector<4x1xf32>
    %1079 = vector.broadcast %1078 : vector<4x1xf32> to vector<4x512xf32>
    %1080 = arith.mulf %1079, %1076 : vector<4x512xf32>
    %1081 = arith.addf %1072, %1080 : vector<4x512xf32>
    %c4_i32 = arith.constant 4 : i32
    %1082 = tpu.dynamic_rotate %2 by %c4_i32 dim 1 : vector<4x512xf32>, i32 -> vector<4x512xf32>
    %c36 = arith.constant 36 : index
    %c0_549 = arith.constant 0 : index
    %1083 = vector.load %arg2[%c36, %c0_549] : memref<81x512xf32, #tpu.memory_space<vmem>>, vector<1x512xf32>
    %1084 = vector.broadcast %1083 : vector<1x512xf32> to vector<4x512xf32>
    %1085 = arith.mulf %1084, %1082 : vector<4x512xf32>
    %c10_550 = arith.constant 10 : index
    %c0_551 = arith.constant 0 : index
    %c0_552 = arith.constant 0 : index
    %1086 = vector.load %arg14[%c10_550, %c0_551, %c0_552] : memref<25x4x1xf32, #tpu.memory_space<vmem>>, vector<1x4x1xf32>
    %1087 = vector.shape_cast %1086 : vector<1x4x1xf32> to vector<4x1xf32>
    %1088 = vector.broadcast %1087 : vector<4x1xf32> to vector<4x512xf32>
    %1089 = arith.mulf %1088, %1085 : vector<4x512xf32>
    %1090 = arith.addf %1081, %1089 : vector<4x512xf32>
    %c2_i32_553 = arith.constant 2 : i32
    %1091 = tpu.dynamic_rotate %2 by %c2_i32_553 dim 1 : vector<4x512xf32>, i32 -> vector<4x512xf32>
    %c38_554 = arith.constant 38 : index
    %c0_555 = arith.constant 0 : index
    %1092 = vector.load %arg2[%c38_554, %c0_555] : memref<81x512xf32, #tpu.memory_space<vmem>>, vector<1x512xf32>
    %1093 = vector.broadcast %1092 : vector<1x512xf32> to vector<4x512xf32>
    %1094 = arith.mulf %1093, %1091 : vector<4x512xf32>
    %c11_556 = arith.constant 11 : index
    %c0_557 = arith.constant 0 : index
    %c0_558 = arith.constant 0 : index
    %1095 = vector.load %arg14[%c11_556, %c0_557, %c0_558] : memref<25x4x1xf32, #tpu.memory_space<vmem>>, vector<1x4x1xf32>
    %1096 = vector.shape_cast %1095 : vector<1x4x1xf32> to vector<4x1xf32>
    %1097 = vector.broadcast %1096 : vector<4x1xf32> to vector<4x512xf32>
    %1098 = arith.mulf %1097, %1094 : vector<4x512xf32>
    %1099 = arith.addf %1090, %1098 : vector<4x512xf32>
    %c12_559 = arith.constant 12 : index
    %c0_560 = arith.constant 0 : index
    %c0_561 = arith.constant 0 : index
    %1100 = vector.load %arg14[%c12_559, %c0_560, %c0_561] : memref<25x4x1xf32, #tpu.memory_space<vmem>>, vector<1x4x1xf32>
    %1101 = vector.shape_cast %1100 : vector<1x4x1xf32> to vector<4x1xf32>
    %1102 = vector.broadcast %1101 : vector<4x1xf32> to vector<4x512xf32>
    %1103 = arith.mulf %1102, %2 : vector<4x512xf32>
    %1104 = arith.addf %1099, %1103 : vector<4x512xf32>
    %c510_i32_562 = arith.constant 510 : i32
    %1105 = tpu.dynamic_rotate %2 by %c510_i32_562 dim 1 : vector<4x512xf32>, i32 -> vector<4x512xf32>
    %c42_563 = arith.constant 42 : index
    %c0_564 = arith.constant 0 : index
    %1106 = vector.load %arg2[%c42_563, %c0_564] : memref<81x512xf32, #tpu.memory_space<vmem>>, vector<1x512xf32>
    %1107 = vector.broadcast %1106 : vector<1x512xf32> to vector<4x512xf32>
    %1108 = arith.mulf %1107, %1105 : vector<4x512xf32>
    %c13_565 = arith.constant 13 : index
    %c0_566 = arith.constant 0 : index
    %c0_567 = arith.constant 0 : index
    %1109 = vector.load %arg14[%c13_565, %c0_566, %c0_567] : memref<25x4x1xf32, #tpu.memory_space<vmem>>, vector<1x4x1xf32>
    %1110 = vector.shape_cast %1109 : vector<1x4x1xf32> to vector<4x1xf32>
    %1111 = vector.broadcast %1110 : vector<4x1xf32> to vector<4x512xf32>
    %1112 = arith.mulf %1111, %1108 : vector<4x512xf32>
    %1113 = arith.addf %1104, %1112 : vector<4x512xf32>
    %c508_i32 = arith.constant 508 : i32
    %1114 = tpu.dynamic_rotate %2 by %c508_i32 dim 1 : vector<4x512xf32>, i32 -> vector<4x512xf32>
    %c44 = arith.constant 44 : index
    %c0_568 = arith.constant 0 : index
    %1115 = vector.load %arg2[%c44, %c0_568] : memref<81x512xf32, #tpu.memory_space<vmem>>, vector<1x512xf32>
    %1116 = vector.broadcast %1115 : vector<1x512xf32> to vector<4x512xf32>
    %1117 = arith.mulf %1116, %1114 : vector<4x512xf32>
    %c14_569 = arith.constant 14 : index
    %c0_570 = arith.constant 0 : index
    %c0_571 = arith.constant 0 : index
    %1118 = vector.load %arg14[%c14_569, %c0_570, %c0_571] : memref<25x4x1xf32, #tpu.memory_space<vmem>>, vector<1x4x1xf32>
    %1119 = vector.shape_cast %1118 : vector<1x4x1xf32> to vector<4x1xf32>
    %1120 = vector.broadcast %1119 : vector<4x1xf32> to vector<4x512xf32>
    %1121 = arith.mulf %1120, %1117 : vector<4x512xf32>
    %1122 = arith.addf %1113, %1121 : vector<4x512xf32>
    %c484_i32 = arith.constant 484 : i32
    %1123 = tpu.dynamic_rotate %2 by %c484_i32 dim 1 : vector<4x512xf32>, i32 -> vector<4x512xf32>
    %c54 = arith.constant 54 : index
    %c0_572 = arith.constant 0 : index
    %1124 = vector.load %arg2[%c54, %c0_572] : memref<81x512xf32, #tpu.memory_space<vmem>>, vector<1x512xf32>
    %1125 = vector.broadcast %1124 : vector<1x512xf32> to vector<4x512xf32>
    %1126 = arith.mulf %1125, %1123 : vector<4x512xf32>
    %c15_573 = arith.constant 15 : index
    %c0_574 = arith.constant 0 : index
    %c0_575 = arith.constant 0 : index
    %1127 = vector.load %arg14[%c15_573, %c0_574, %c0_575] : memref<25x4x1xf32, #tpu.memory_space<vmem>>, vector<1x4x1xf32>
    %1128 = vector.shape_cast %1127 : vector<1x4x1xf32> to vector<4x1xf32>
    %1129 = vector.broadcast %1128 : vector<4x1xf32> to vector<4x512xf32>
    %1130 = arith.mulf %1129, %1126 : vector<4x512xf32>
    %1131 = arith.addf %1122, %1130 : vector<4x512xf32>
    %c482_i32_576 = arith.constant 482 : i32
    %1132 = tpu.dynamic_rotate %2 by %c482_i32_576 dim 1 : vector<4x512xf32>, i32 -> vector<4x512xf32>
    %c56_577 = arith.constant 56 : index
    %c0_578 = arith.constant 0 : index
    %1133 = vector.load %arg2[%c56_577, %c0_578] : memref<81x512xf32, #tpu.memory_space<vmem>>, vector<1x512xf32>
    %1134 = vector.broadcast %1133 : vector<1x512xf32> to vector<4x512xf32>
    %1135 = arith.mulf %1134, %1132 : vector<4x512xf32>
    %c16_579 = arith.constant 16 : index
    %c0_580 = arith.constant 0 : index
    %c0_581 = arith.constant 0 : index
    %1136 = vector.load %arg14[%c16_579, %c0_580, %c0_581] : memref<25x4x1xf32, #tpu.memory_space<vmem>>, vector<1x4x1xf32>
    %1137 = vector.shape_cast %1136 : vector<1x4x1xf32> to vector<4x1xf32>
    %1138 = vector.broadcast %1137 : vector<4x1xf32> to vector<4x512xf32>
    %1139 = arith.mulf %1138, %1135 : vector<4x512xf32>
    %1140 = arith.addf %1131, %1139 : vector<4x512xf32>
    %c480_i32_582 = arith.constant 480 : i32
    %1141 = tpu.dynamic_rotate %2 by %c480_i32_582 dim 1 : vector<4x512xf32>, i32 -> vector<4x512xf32>
    %c58_583 = arith.constant 58 : index
    %c0_584 = arith.constant 0 : index
    %1142 = vector.load %arg2[%c58_583, %c0_584] : memref<81x512xf32, #tpu.memory_space<vmem>>, vector<1x512xf32>
    %1143 = vector.broadcast %1142 : vector<1x512xf32> to vector<4x512xf32>
    %1144 = arith.mulf %1143, %1141 : vector<4x512xf32>
    %c17_585 = arith.constant 17 : index
    %c0_586 = arith.constant 0 : index
    %c0_587 = arith.constant 0 : index
    %1145 = vector.load %arg14[%c17_585, %c0_586, %c0_587] : memref<25x4x1xf32, #tpu.memory_space<vmem>>, vector<1x4x1xf32>
    %1146 = vector.shape_cast %1145 : vector<1x4x1xf32> to vector<4x1xf32>
    %1147 = vector.broadcast %1146 : vector<4x1xf32> to vector<4x512xf32>
    %1148 = arith.mulf %1147, %1144 : vector<4x512xf32>
    %1149 = arith.addf %1140, %1148 : vector<4x512xf32>
    %c478_i32_588 = arith.constant 478 : i32
    %1150 = tpu.dynamic_rotate %2 by %c478_i32_588 dim 1 : vector<4x512xf32>, i32 -> vector<4x512xf32>
    %c60_589 = arith.constant 60 : index
    %c0_590 = arith.constant 0 : index
    %1151 = vector.load %arg2[%c60_589, %c0_590] : memref<81x512xf32, #tpu.memory_space<vmem>>, vector<1x512xf32>
    %1152 = vector.broadcast %1151 : vector<1x512xf32> to vector<4x512xf32>
    %1153 = arith.mulf %1152, %1150 : vector<4x512xf32>
    %c18_591 = arith.constant 18 : index
    %c0_592 = arith.constant 0 : index
    %c0_593 = arith.constant 0 : index
    %1154 = vector.load %arg14[%c18_591, %c0_592, %c0_593] : memref<25x4x1xf32, #tpu.memory_space<vmem>>, vector<1x4x1xf32>
    %1155 = vector.shape_cast %1154 : vector<1x4x1xf32> to vector<4x1xf32>
    %1156 = vector.broadcast %1155 : vector<4x1xf32> to vector<4x512xf32>
    %1157 = arith.mulf %1156, %1153 : vector<4x512xf32>
    %1158 = arith.addf %1149, %1157 : vector<4x512xf32>
    %c476_i32 = arith.constant 476 : i32
    %1159 = tpu.dynamic_rotate %2 by %c476_i32 dim 1 : vector<4x512xf32>, i32 -> vector<4x512xf32>
    %c62 = arith.constant 62 : index
    %c0_594 = arith.constant 0 : index
    %1160 = vector.load %arg2[%c62, %c0_594] : memref<81x512xf32, #tpu.memory_space<vmem>>, vector<1x512xf32>
    %1161 = vector.broadcast %1160 : vector<1x512xf32> to vector<4x512xf32>
    %1162 = arith.mulf %1161, %1159 : vector<4x512xf32>
    %c19_595 = arith.constant 19 : index
    %c0_596 = arith.constant 0 : index
    %c0_597 = arith.constant 0 : index
    %1163 = vector.load %arg14[%c19_595, %c0_596, %c0_597] : memref<25x4x1xf32, #tpu.memory_space<vmem>>, vector<1x4x1xf32>
    %1164 = vector.shape_cast %1163 : vector<1x4x1xf32> to vector<4x1xf32>
    %1165 = vector.broadcast %1164 : vector<4x1xf32> to vector<4x512xf32>
    %1166 = arith.mulf %1165, %1162 : vector<4x512xf32>
    %1167 = arith.addf %1158, %1166 : vector<4x512xf32>
    %c452_i32 = arith.constant 452 : i32
    %1168 = tpu.dynamic_rotate %2 by %c452_i32 dim 1 : vector<4x512xf32>, i32 -> vector<4x512xf32>
    %c72 = arith.constant 72 : index
    %c0_598 = arith.constant 0 : index
    %1169 = vector.load %arg2[%c72, %c0_598] : memref<81x512xf32, #tpu.memory_space<vmem>>, vector<1x512xf32>
    %1170 = vector.broadcast %1169 : vector<1x512xf32> to vector<4x512xf32>
    %1171 = arith.mulf %1170, %1168 : vector<4x512xf32>
    %c20_599 = arith.constant 20 : index
    %c0_600 = arith.constant 0 : index
    %c0_601 = arith.constant 0 : index
    %1172 = vector.load %arg14[%c20_599, %c0_600, %c0_601] : memref<25x4x1xf32, #tpu.memory_space<vmem>>, vector<1x4x1xf32>
    %1173 = vector.shape_cast %1172 : vector<1x4x1xf32> to vector<4x1xf32>
    %1174 = vector.broadcast %1173 : vector<4x1xf32> to vector<4x512xf32>
    %1175 = arith.mulf %1174, %1171 : vector<4x512xf32>
    %1176 = arith.addf %1167, %1175 : vector<4x512xf32>
    %c450_i32 = arith.constant 450 : i32
    %1177 = tpu.dynamic_rotate %2 by %c450_i32 dim 1 : vector<4x512xf32>, i32 -> vector<4x512xf32>
    %c74 = arith.constant 74 : index
    %c0_602 = arith.constant 0 : index
    %1178 = vector.load %arg2[%c74, %c0_602] : memref<81x512xf32, #tpu.memory_space<vmem>>, vector<1x512xf32>
    %1179 = vector.broadcast %1178 : vector<1x512xf32> to vector<4x512xf32>
    %1180 = arith.mulf %1179, %1177 : vector<4x512xf32>
    %c21_603 = arith.constant 21 : index
    %c0_604 = arith.constant 0 : index
    %c0_605 = arith.constant 0 : index
    %1181 = vector.load %arg14[%c21_603, %c0_604, %c0_605] : memref<25x4x1xf32, #tpu.memory_space<vmem>>, vector<1x4x1xf32>
    %1182 = vector.shape_cast %1181 : vector<1x4x1xf32> to vector<4x1xf32>
    %1183 = vector.broadcast %1182 : vector<4x1xf32> to vector<4x512xf32>
    %1184 = arith.mulf %1183, %1180 : vector<4x512xf32>
    %1185 = arith.addf %1176, %1184 : vector<4x512xf32>
    %c448_i32 = arith.constant 448 : i32
    %1186 = tpu.dynamic_rotate %2 by %c448_i32 dim 1 : vector<4x512xf32>, i32 -> vector<4x512xf32>
    %c76 = arith.constant 76 : index
    %c0_606 = arith.constant 0 : index
    %1187 = vector.load %arg2[%c76, %c0_606] : memref<81x512xf32, #tpu.memory_space<vmem>>, vector<1x512xf32>
    %1188 = vector.broadcast %1187 : vector<1x512xf32> to vector<4x512xf32>
    %1189 = arith.mulf %1188, %1186 : vector<4x512xf32>
    %c22_607 = arith.constant 22 : index
    %c0_608 = arith.constant 0 : index
    %c0_609 = arith.constant 0 : index
    %1190 = vector.load %arg14[%c22_607, %c0_608, %c0_609] : memref<25x4x1xf32, #tpu.memory_space<vmem>>, vector<1x4x1xf32>
    %1191 = vector.shape_cast %1190 : vector<1x4x1xf32> to vector<4x1xf32>
    %1192 = vector.broadcast %1191 : vector<4x1xf32> to vector<4x512xf32>
    %1193 = arith.mulf %1192, %1189 : vector<4x512xf32>
    %1194 = arith.addf %1185, %1193 : vector<4x512xf32>
    %c446_i32 = arith.constant 446 : i32
    %1195 = tpu.dynamic_rotate %2 by %c446_i32 dim 1 : vector<4x512xf32>, i32 -> vector<4x512xf32>
    %c78 = arith.constant 78 : index
    %c0_610 = arith.constant 0 : index
    %1196 = vector.load %arg2[%c78, %c0_610] : memref<81x512xf32, #tpu.memory_space<vmem>>, vector<1x512xf32>
    %1197 = vector.broadcast %1196 : vector<1x512xf32> to vector<4x512xf32>
    %1198 = arith.mulf %1197, %1195 : vector<4x512xf32>
    %c23_611 = arith.constant 23 : index
    %c0_612 = arith.constant 0 : index
    %c0_613 = arith.constant 0 : index
    %1199 = vector.load %arg14[%c23_611, %c0_612, %c0_613] : memref<25x4x1xf32, #tpu.memory_space<vmem>>, vector<1x4x1xf32>
    %1200 = vector.shape_cast %1199 : vector<1x4x1xf32> to vector<4x1xf32>
    %1201 = vector.broadcast %1200 : vector<4x1xf32> to vector<4x512xf32>
    %1202 = arith.mulf %1201, %1198 : vector<4x512xf32>
    %1203 = arith.addf %1194, %1202 : vector<4x512xf32>
    %c444_i32 = arith.constant 444 : i32
    %1204 = tpu.dynamic_rotate %2 by %c444_i32 dim 1 : vector<4x512xf32>, i32 -> vector<4x512xf32>
    %c80 = arith.constant 80 : index
    %c0_614 = arith.constant 0 : index
    %1205 = vector.load %arg2[%c80, %c0_614] : memref<81x512xf32, #tpu.memory_space<vmem>>, vector<1x512xf32>
    %1206 = vector.broadcast %1205 : vector<1x512xf32> to vector<4x512xf32>
    %1207 = arith.mulf %1206, %1204 : vector<4x512xf32>
    %c24_615 = arith.constant 24 : index
    %c0_616 = arith.constant 0 : index
    %c0_617 = arith.constant 0 : index
    %1208 = vector.load %arg14[%c24_615, %c0_616, %c0_617] : memref<25x4x1xf32, #tpu.memory_space<vmem>>, vector<1x4x1xf32>
    %1209 = vector.shape_cast %1208 : vector<1x4x1xf32> to vector<4x1xf32>
    %1210 = vector.broadcast %1209 : vector<4x1xf32> to vector<4x512xf32>
    %1211 = arith.mulf %1210, %1207 : vector<4x512xf32>
    %1212 = arith.addf %1203, %1211 : vector<4x512xf32>
    %c0_618 = arith.constant 0 : index
    %c0_619 = arith.constant 0 : index
    %1213 = vector.load %arg15[%c0_618, %c0_619] : memref<4x4xf32, #tpu.memory_space<vmem>>, vector<4x1xf32>
    %1214 = vector.extract_strided_slice %1212 {offsets = [0, 0], sizes = [1, 512], strides = [1, 1]} : vector<4x512xf32> to vector<1x512xf32>
    %1215 = vector.broadcast %1213 : vector<4x1xf32> to vector<4x512xf32>
    %1216 = vector.broadcast %1214 : vector<1x512xf32> to vector<4x512xf32>
    %1217 = arith.mulf %1215, %1216 : vector<4x512xf32>
    %c0_620 = arith.constant 0 : index
    %c1_621 = arith.constant 1 : index
    %1218 = vector.load %arg15[%c0_620, %c1_621] : memref<4x4xf32, #tpu.memory_space<vmem>>, vector<4x1xf32>
    %1219 = vector.extract_strided_slice %1212 {offsets = [1, 0], sizes = [1, 512], strides = [1, 1]} : vector<4x512xf32> to vector<1x512xf32>
    %1220 = vector.broadcast %1218 : vector<4x1xf32> to vector<4x512xf32>
    %1221 = vector.broadcast %1219 : vector<1x512xf32> to vector<4x512xf32>
    %1222 = arith.mulf %1220, %1221 : vector<4x512xf32>
    %1223 = arith.addf %1217, %1222 : vector<4x512xf32>
    %c0_622 = arith.constant 0 : index
    %c2_623 = arith.constant 2 : index
    %1224 = vector.load %arg15[%c0_622, %c2_623] : memref<4x4xf32, #tpu.memory_space<vmem>>, vector<4x1xf32>
    %1225 = vector.extract_strided_slice %1212 {offsets = [2, 0], sizes = [1, 512], strides = [1, 1]} : vector<4x512xf32> to vector<1x512xf32>
    %1226 = vector.broadcast %1224 : vector<4x1xf32> to vector<4x512xf32>
    %1227 = vector.broadcast %1225 : vector<1x512xf32> to vector<4x512xf32>
    %1228 = arith.mulf %1226, %1227 : vector<4x512xf32>
    %1229 = arith.addf %1223, %1228 : vector<4x512xf32>
    %c0_624 = arith.constant 0 : index
    %c3_625 = arith.constant 3 : index
    %1230 = vector.load %arg15[%c0_624, %c3_625] : memref<4x4xf32, #tpu.memory_space<vmem>>, vector<4x1xf32>
    %1231 = vector.extract_strided_slice %1212 {offsets = [3, 0], sizes = [1, 512], strides = [1, 1]} : vector<4x512xf32> to vector<1x512xf32>
    %1232 = vector.broadcast %1230 : vector<4x1xf32> to vector<4x512xf32>
    %1233 = vector.broadcast %1231 : vector<1x512xf32> to vector<4x512xf32>
    %1234 = arith.mulf %1232, %1233 : vector<4x512xf32>
    %1235 = arith.addf %1229, %1234 : vector<4x512xf32>
    %cst_626 = arith.constant dense<0.000000e+00> : vector<4xf32>
    %1236 = vector.multi_reduction <add>, %1235, %cst_626 [1] : vector<4x512xf32> to vector<4xf32>
    %1237 = vector.shape_cast %1236 : vector<4xf32> to vector<4x1xf32>
    %cst_627 = arith.constant 0.001953125 : f32
    %1238 = vector.broadcast %cst_627 : f32 to vector<4x1xf32>
    %1239 = arith.mulf %1237, %1238 : vector<4x1xf32>
    %1240 = vector.broadcast %1239 : vector<4x1xf32> to vector<4x512xf32>
    %1241 = arith.subf %1235, %1240 : vector<4x512xf32>
    %1242 = arith.mulf %1241, %1241 : vector<4x512xf32>
    %cst_628 = arith.constant dense<0.000000e+00> : vector<4xf32>
    %1243 = vector.multi_reduction <add>, %1242, %cst_628 [1] : vector<4x512xf32> to vector<4xf32>
    %1244 = vector.shape_cast %1243 : vector<4xf32> to vector<4x1xf32>
    %cst_629 = arith.constant 0.001953125 : f32
    %1245 = vector.broadcast %cst_629 : f32 to vector<4x1xf32>
    %1246 = arith.mulf %1244, %1245 : vector<4x1xf32>
    %cst_630 = arith.constant 9.99999974E-6 : f32
    %1247 = vector.broadcast %cst_630 : f32 to vector<4x1xf32>
    %1248 = arith.addf %1246, %1247 : vector<4x1xf32>
    %1249 = math.rsqrt %1248 : vector<4x1xf32>
    %1250 = vector.broadcast %992 : f32 to vector<4x1xf32>
    %1251 = arith.mulf %1249, %1250 : vector<4x1xf32>
    %1252 = vector.broadcast %1251 : vector<4x1xf32> to vector<4x512xf32>
    %1253 = arith.mulf %1241, %1252 : vector<4x512xf32>
    %1254 = arith.addf %991, %1253 : vector<4x512xf32>
    %c0_631 = arith.constant 0 : index
    %c0_632 = arith.constant 0 : index
    %1255 = vector.load %arg16[%c0_631, %c0_632] : memref<4x512xf32, #tpu.memory_space<vmem>>, vector<4x512xf32>
    tpu.vector_store %arg16[%c0_631, %c0_632], %1254 {strides = array<i32>} : memref<4x512xf32, #tpu.memory_space<vmem>>, vector<4x512xf32>,
    return
  }
}

</mosaic_0001>

<bundles_post_ra>
// kernel: tpu_custom_call.1
= control target key start
LH: loop header
LB: loop body
LE: loop exit
PB: predicated region body
PF: predicated region fallthrough
CT: control target
= control target key end

     0   :  { %s10679_s0 = inlined_call_operand.vmem [shape: f32[4,512], index: 0, kind: input, shape index: {}]   ;;  %s10680_s1 = inlined_call_operand.vmem [shape: f32[8], index: 1, kind: input, shape index: {}]   ;;  %s10681_s2 = inlined_call_operand.hbm [shape: f32[81,512], index: 2, kind: input, shape index: {}]   ;;  %s10682_s3 = inlined_call_operand.vmem [shape: f32[1,512], index: 3, kind: input, shape index: {}]   ;;  %s10683_s4 = inlined_call_operand.vmem [shape: f32[9,4,1], index: 4, kind: input, shape index: {}]   ;;  %s10684_s5 = inlined_call_operand.vmem [shape: f32[4,4], index: 5, kind: input, shape index: {}]   ;;  %s10685_s6 = inlined_call_operand.vmem [shape: f32[9,4,1], index: 6, kind: input, shape index: {}]   ;;  %s10686_s7 = inlined_call_operand.vmem [shape: f32[4,4], index: 7, kind: input, shape index: {}]   ;;  %s10687_s8 = inlined_call_operand.vmem [shape: f32[25,4,1], index: 8, kind: input, shape index: {}]   ;;  %s10688_s9 = inlined_call_operand.vmem [shape: f32[4,4], index: 9, kind: input, shape index: {}]   ;;  %s10689_s10 = inlined_call_operand.vmem [shape: f32[25,4,1], index: 10, kind: input, shape index: {}]   ;;  %s10690_s11 = inlined_call_operand.vmem [shape: f32[4,4], index: 11, kind: input, shape index: {}]   ;;  %s10691_s12 = inlined_call_operand.vmem [shape: f32[9,4,1], index: 12, kind: input, shape index: {}]   ;;  %s10692_s13 = inlined_call_operand.vmem [shape: f32[4,4], index: 13, kind: input, shape index: {}]   ;;  %s10693_s14 = inlined_call_operand.vmem [shape: f32[25,4,1], index: 14, kind: input, shape index: {}]   ;;  %s10694_s15 = inlined_call_operand.vmem [shape: f32[4,4], index: 15, kind: input, shape index: {}]   ;;  %s10695_s16 = inlined_call_operand.hbm [shape: f32[4,512], index: 16, kind: output, shape index: {}]  }
   0x1   :  { %11040 = sst [smem:[#allocation167_spill]] %s10679_s0 }
   0x2   :  { %21 = vsyncpa [#allocation5], 0 }
   0x3   :  { %22 = vsyncpa [#allocation3], 0 }
   0x4   :  { %23 = vsyncpa [#allocation4], 0  ;;  %s31_s23 = sshll.u32 %s10680_s1, 4  ;;  %s39_s26 = sshll.u32 %s10681_s2, 4  ;;  %s32_s23 = int_to_ptr.vmem [resolvable:$true] %s31_s23  ;;  %s40_s26 = int_to_ptr.hbm [resolvable:$true] %s39_s26 }
   0x5   :  { %s5253_s27 = smov [#allocation2]   ;;  %s5254_s28 = smov [#allocation6]  }
   0x6   :  { %34 = dma.vmem_to_smem %s32_s23, 16, %s5253_s27, [#allocation5]  }
   0x7   :  { %s41_s29 = sshll.u32 %s5254_s28, 4  ;;  %s5255_s30 = smov 512   ;;  %s42_s29 = int_to_ptr.vmem [resolvable:$true] %s41_s29 }
   0x8   :  { %s10817_s0 = smov 32  }
   0x9   :  { %47 = dma.hbm_to_vmem [thread:$0]  %s40_s26, 5632, %s42_s29, [#allocation3], %s5255_s30, %s5255_s30, %s10817_s0  }
   0xa   :  { %5247 = dma.done.wait [#allocation5], 16  }
   0xb   :  { %5248 = vsyncadd [#allocation5], 4294967280 }
   0xc   :  { %5249 = dma.done.wait [#allocation3], 5632  }
   0xd   :  { %5250 = vsyncadd [#allocation3], 4294961664 }
   0xe   :  { %82 = sfence }
   0xf   :  { %s11041_s18 = sld [smem:[#allocation167_spill]]  ;;  %s5257_s20 = smov 17   ;;  %v10701_v34 = vmov 0   ;;  %v5449_v35 = vld [vmem:[#allocation6 + $0x67] ss:$8 sm:$0xf]  ;;  %v108_v37 = vlaneseq }
  0x10   :  { %s5258_s21 = smov 16   ;;  %s5259_s22 = smov 15   ;;  %5141 = vset.pattern.permute.xlu2 %v10701_v34  ;;  %5142 = vset.pattern.permute.xlu1 %v10701_v34  ;;  %vm195_vm0 = vcmp.gt.f32.partialorder %v5449_v35, 0.5  ;;  %v4999_v36 = vld [vmem:[%s10683_s4 + $0x8] sm:$0xf]  ;;  %vm137_vm11 = vcmask 1043456  }
  0x11   :  { %s5260_s23 = smov 1   ;;  %s5261_s24 = smov 127   ;;  %5140 = vset.pattern.permute.xlu0 %v10701_v34  ;;  %v5458_v39 = vsel %vm195_vm0, 1, %v10701_v34  ;;  %v5460_v40 = vand.u32 127, %v108_v37  ;;  %v5001_v42 = vld [vmem:[%s10683_s4 + $0x10] sm:$0xf] }
  0x12   :  { %s5262_s25 = smov 113   ;;  %s5263_s26 = smov 112   ;;  %v198_v41 = vperm.slane %v5458_v39, 1  ;;  %v5473_v45 = vld [vmem:[#allocation6 + $0x66] ss:$8 sm:$0xf] }
  0x13   :  { %s5264_s27 = smov 111   ;;  %vm188_vm1 = vcmp.lt.s32.totalorder %v5460_v40, 16  ;;  %vm117_vm3 = vcmp.gt.f32.partialorder %v5473_v45, 0.5  ;;  %v5485_v48 = vld [vmem:[#allocation6 + $0x80] ss:$8 sm:$0xf] }
  0x14   :  { %vm5467_vm2 = vcmp.eq.s32.totalorder %v198_v41, 1  ;;  %v5004_v49 = vld [vmem:[%s10683_s4 + $0x1c] sm:$0xf]  ;;  %v5000_v50 = vld [vmem:[%s10683_s4 + $0xc] sm:$0xf]  ;;  %v118_v52 = vsel %vm117_vm3, 1, %v10701_v34 }
  0x15   :  { %v5391_v0 = vld [vmem:[%s11041_s18 + $0x8] sm:$0xff]  ;;  %v5396_v1 = vld [vmem:[%s11041_s18] sm:$0xff]  ;;  %vm272_vm4 = vcmp.gt.f32.partialorder %v5485_v48, 0.5  ;;  %v119_v55 = vperm.slane %v118_v52, 0  ;;  %v122_v56 = vperm.slane %v118_v52, 3  ;;  %v120_v58 = vperm.slane %v118_v52, 1 }
  0x16   :  { %11042 = vst [vmem:[#allocation11_spill] sm:$0xff] %v5391_v0  ;;  %v5498_v57 = vsel %vm272_vm4, 1, %v10701_v34  ;;  %v121_v59 = vperm.slane %v118_v52, 2  ;;  %v5503_v60 = vld [vmem:[%s10684_s5] sm:$0xf]  ;;  %vm110_vm5 = vcmp.lt.s32.totalorder %v5460_v40, 17 }
  0x17   :  { %11043 = vst [vmem:[#allocation12_spill] sm:$0xff] %v5396_v1  ;;  %v5002_v61 = vld [vmem:[%s10683_s4 + $0x14] sm:$0xf]  ;;  %v274_v62 = vperm.slane %v5498_v57, 0  ;;  %vm5510_vm6 = vcmp.eq.s32.totalorder %v119_v55, 1  ;;  %vm5514_vm7 = vcmp.eq.s32.totalorder %v122_v56, 1 }
  0x18   :  { %91 = vst [vmem:[#allocation1 + $0x10] ss:$2 sm:$0xff] %v5391_v0  ;;  %vm5518_vm8 = vcmp.eq.s32.totalorder %v120_v58, 1  ;;  %vm265_vm9 = vcmp.lt.s32.totalorder %v5460_v40, 15  ;;  %vm5532_vm10 = vcmp.eq.s32.totalorder %v121_v59, 1  ;;  %v276_v55 = vperm.slane %v5498_v57, 2 }
  0x19   :  { %89 = vst [vmem:[#allocation1] ss:$2 sm:$0xff] %v5396_v1  ;;  %vm5543_vm12 = vcmp.eq.s32.totalorder %v274_v62, 1  ;;  %v5609_v43 = vld [vmem:[#allocation6 + $0x87] ss:$8 sm:$0xf] }
  0x1a   :  { %vm349_vm0 = vcmp.gt.f32.partialorder %v5609_v43, 0.5  ;;  %vm5637_vm4 = vcmp.eq.s32.totalorder %v276_v55, 1  ;;  %s10821_s1 = smov 33   ;;  %s10819_s5 = smov 34  }
  0x1b   :  { %s10815_s17 = smov 31   ;;  %s10811_s18 = smov 30  }
  0x1c   :  { %s10785_s2 = smov 18   ;;  %s10783_s30 = smov 14  }
  0x1d   :  { %s10809_s19 = smov 2   ;;  %s10813_s29 = smov 126  }
  0x1e   :  { %s5278_s28 = smov 110  }
  0x1f   :  { %v94_v2 = vld.sshfl [vmem:[#allocation1 + $0x10] sm:$0xff pattern:$0x75316420]  ;;  %v95_v3 = vld.sshfl [vmem:[#allocation1 + $0x18] sm:$0xff pattern:$0x75316420] }
  0x20   :  { %104 = vrot.lane.b32.xlu1 %v94_v2, %s5257_s20  ;;  %v92_v4 = vld.sshfl [vmem:[#allocation1] sm:$0xff pattern:$0x75316420]  ;;  %171 = vst [vmem:[#allocation1 + $0x10] ss:$2 sm:$0xff] %v5391_v0 }
  0x21   :  { %100 = vrot.lane.b32.xlu0 %v92_v4, %s5257_s20  ;;  %v93_v5 = vld.sshfl [vmem:[#allocation1 + $0x8] sm:$0xff pattern:$0x75316420]  ;;  %v790_v4 = vld [vmem:[%s10683_s4] sm:$0xf] }
  0x22   :  { %169 = vst [vmem:[#allocation1] ss:$2 sm:$0xff] %v5396_v1  ;;  %v5008_v2 = vld [vmem:[%s10685_s6 + $0xc] sm:$0xf] }
  0x27   :  { %v175_v6 = vld.sshfl [vmem:[#allocation1 + $0x18] sm:$0xff pattern:$0x75316420]  ;;  %v174_v7 = vld.sshfl [vmem:[#allocation1 + $0x10] sm:$0xff pattern:$0x75316420] }
  0x28   :  { %106 = vrot.lane.b32.xlu1 %v95_v3, %s5257_s20  ;;  %248 = vst [vmem:[#allocation1 + $0x10] ss:$2 sm:$0xff] %v5391_v0 }
  0x29   :  { %102 = vrot.lane.b32.xlu0 %v93_v5, %s5257_s20  ;;  %v172_v8 = vld.sshfl [vmem:[#allocation1] sm:$0xff pattern:$0x75316420]  ;;  %v173_v9 = vld.sshfl [vmem:[#allocation1 + $0x8] sm:$0xff pattern:$0x75316420] }
  0x2a   :  { %180 = vrot.lane.b32.xlu2 %v172_v8, %s5258_s21  ;;  %246 = vst [vmem:[#allocation1] ss:$2 sm:$0xff] %v5396_v1 }
  0x2f   :  { %v251_v10 = vld.sshfl [vmem:[#allocation1 + $0x10] sm:$0xff pattern:$0x75316420]  ;;  %v252_v11 = vld.sshfl [vmem:[#allocation1 + $0x18] sm:$0xff pattern:$0x75316420] }
  0x30   :  { %186 = vrot.lane.b32.xlu1 %v175_v6, %s5258_s21  ;;  %325 = vst [vmem:[#allocation1 + $0x10] ss:$2 sm:$0xff] %v5391_v0 }
  0x31   :  { %184 = vrot.lane.b32.xlu0 %v174_v7, %s5258_s21  ;;  %v250_v12 = vld.sshfl [vmem:[#allocation1 + $0x8] sm:$0xff pattern:$0x75316420]  ;;  %v249_v13 = vld.sshfl [vmem:[#allocation1] sm:$0xff pattern:$0x75316420] }
  0x32   :  { %323 = vst [vmem:[#allocation1] ss:$2 sm:$0xff] %v5396_v1  ;;  %182 = vrot.lane.b32.xlu2 %v173_v9, %s5258_s21 }
  0x37   :  { %v328_v14 = vld.sshfl [vmem:[#allocation1 + $0x10] sm:$0xff pattern:$0x75316420]  ;;  %v329_v15 = vld.sshfl [vmem:[#allocation1 + $0x18] sm:$0xff pattern:$0x75316420] }
  0x38   :  { %261 = vrot.lane.b32.xlu1 %v251_v10, %s5259_s22  ;;  %402 = vst [vmem:[#allocation1 + $0x10] ss:$2 sm:$0xff] %v5391_v0 }
  0x39   :  { %259 = vrot.lane.b32.xlu0 %v250_v12, %s5259_s22  ;;  %v327_v16 = vld.sshfl [vmem:[#allocation1 + $0x8] sm:$0xff pattern:$0x75316420]  ;;  %v326_v17 = vld.sshfl [vmem:[#allocation1] sm:$0xff pattern:$0x75316420] }
  0x3a   :  { %400 = vst [vmem:[#allocation1] ss:$2 sm:$0xff] %v5396_v1  ;;  %257 = vrot.lane.b32.xlu2 %v249_v13, %s5259_s22 }
  0x3f   :  { %v405_v18 = vld.sshfl [vmem:[#allocation1 + $0x10] sm:$0xff pattern:$0x75316420]  ;;  %v406_v19 = vld.sshfl [vmem:[#allocation1 + $0x18] sm:$0xff pattern:$0x75316420] }
  0x40   :  { %336 = vrot.lane.b32.xlu1 %v327_v16, %s5260_s23  ;;  %479 = vst [vmem:[#allocation1 + $0x10] ss:$2 sm:$0xff] %v5391_v0 }
  0x41   :  { %334 = vrot.lane.b32.xlu0 %v326_v17, %s5260_s23  ;;  %v403_v20 = vld.sshfl [vmem:[#allocation1] sm:$0xff pattern:$0x75316420]  ;;  %v404_v21 = vld.sshfl [vmem:[#allocation1 + $0x8] sm:$0xff pattern:$0x75316420] }
  0x42   :  { %477 = vst [vmem:[#allocation1] ss:$2 sm:$0xff] %v5396_v1  ;;  %263 = vrot.lane.b32.xlu2 %v252_v11, %s5259_s22  ;;  %v197_v11 = vperm.slane %v5458_v39, 0 }
  0x44   :  { %vm5573_vm13 = vcmp.eq.s32.totalorder %v197_v11, 1 }
  0x47   :  { %v482_v22 = vld.sshfl [vmem:[#allocation1 + $0x10] sm:$0xff pattern:$0x75316420]  ;;  %v483_v23 = vld.sshfl [vmem:[#allocation1 + $0x18] sm:$0xff pattern:$0x75316420] }
  0x48   :  { %411 = vrot.lane.b32.xlu1 %v403_v20, %s5261_s24  ;;  %556 = vst [vmem:[#allocation1 + $0x10] ss:$2 sm:$0xff] %v5391_v0  ;;  %v199_v20 = vperm.slane %v5458_v39, 2 }
  0x49   :  { %340 = vrot.lane.b32.xlu0 %v329_v15, %s5260_s23  ;;  %v481_v24 = vld.sshfl [vmem:[#allocation1 + $0x8] sm:$0xff pattern:$0x75316420]  ;;  %v480_v25 = vld.sshfl [vmem:[#allocation1] sm:$0xff pattern:$0x75316420] }
  0x4a   :  { %338 = vrot.lane.b32.xlu2 %v328_v14, %s5260_s23  ;;  %554 = vst [vmem:[#allocation1] ss:$2 sm:$0xff] %v5396_v1  ;;  %vm5580_vm14 = vcmp.eq.s32.totalorder %v199_v20, 1 }
  0x4f   :  { %v559_v26 = vld.sshfl [vmem:[#allocation1 + $0x10] sm:$0xff pattern:$0x75316420]  ;;  %v560_v27 = vld.sshfl [vmem:[#allocation1 + $0x18] sm:$0xff pattern:$0x75316420] }
  0x50   :  { %417 = vrot.lane.b32.xlu1 %v406_v19, %s5261_s24  ;;  %633 = vst [vmem:[#allocation1 + $0x10] ss:$2 sm:$0xff] %v5391_v0 }
  0x51   :  { %415 = vrot.lane.b32.xlu0 %v405_v18, %s5261_s24  ;;  %v558_v28 = vld.sshfl [vmem:[#allocation1 + $0x8] sm:$0xff pattern:$0x75316420]  ;;  %v557_v29 = vld.sshfl [vmem:[#allocation1] sm:$0xff pattern:$0x75316420] }
  0x52   :  { %413 = vrot.lane.b32.xlu2 %v404_v21, %s5261_s24  ;;  %631 = vst [vmem:[#allocation1] ss:$2 sm:$0xff] %v5396_v1  ;;  %v200_v21 = vperm.slane %v5458_v39, 3 }
  0x54   :  { %vm5584_vm15 = vcmp.eq.s32.totalorder %v200_v21, 1 }
  0x57   :  { %v637_v31 = vld.sshfl [vmem:[#allocation1 + $0x18] sm:$0xff pattern:$0x75316420]  ;;  %v636_v32 = vld.sshfl [vmem:[#allocation1 + $0x10] sm:$0xff pattern:$0x75316420] }
  0x58   :  { %492 = vrot.lane.b32.xlu1 %v482_v22, %s5262_s25 }
  0x59   :  { %490 = vrot.lane.b32.xlu0 %v481_v24, %s5262_s25  ;;  %v634_v30 = vld.sshfl [vmem:[#allocation1] sm:$0xff pattern:$0x75316420]  ;;  %v635_v33 = vld.sshfl [vmem:[#allocation1 + $0x8] sm:$0xff pattern:$0x75316420] }
  0x5a   :  { %488 = vrot.lane.b32.xlu2 %v480_v25, %s5262_s25 }
  0x60   :  { %567 = vrot.lane.b32.xlu1 %v558_v28, %s5263_s26 }
  0x61   :  { %565 = vrot.lane.b32.xlu0 %v557_v29, %s5263_s26  ;;  %v5693_v29 = vperm.slane %v5473_v45, 0 }
  0x62   :  { %494 = vrot.lane.b32.xlu2 %v483_v23, %s5262_s25 }
  0x63   :  { %11071 = vst [vmem:[#allocation16_spill] sm:$0xff] %v5693_v29 }
  0x68   :  { %642 = vrot.lane.b32.xlu1 %v634_v30, %s5264_s27 }
  0x69   :  { %571 = vrot.lane.b32.xlu0 %v560_v27, %s5263_s26  ;;  %v5005_v27 = vld [vmem:[%s10683_s4 + $0x20] sm:$0xf] }
  0x6a   :  { %569 = vrot.lane.b32.xlu2 %v559_v26, %s5263_s26 }
  0x70   :  { %648 = vrot.lane.b32.xlu1 %v637_v31, %s5264_s27 }
  0x71   :  { %646 = vrot.lane.b32.xlu0 %v636_v32, %s5264_s27 }
  0x72   :  { %644 = vrot.lane.b32.xlu2 %v635_v33, %s5264_s27 }
  0x78   :  { %915 = vperm.xlu1 %5142, %v5000_v50  }
  0x79   :  { %793 = vperm.xlu0 %5140, %v790_v4  }
  0x7a   :  { %873 = vperm.xlu2 %5141, %v4999_v36   ;;  %v10697_v36 = vmov 3  }
  0x80   :  { %983 = vperm.xlu1 %5142, %v5002_v61  }
  0x82   :  { %930 = vperm.xlu2 %5141, %v5001_v42  }
  0x84   :  { %v5455_v38 = vpop.permute.xlu2 %180 }
  0x88   :  { %1109 = vperm.xlu1 %5142, %v5005_v27   ;;  %v5687_v27 = vld [vmem:[#allocation6 + $0xc0] ss:$8 sm:$0xf] }
  0x8a   :  { %1067 = vperm.xlu2 %5141, %v5004_v49  }
  0x8c   :  { %v5471_v44 = vpop.permute.xlu2 %182 }
  0x8d   :  { %v5479_v46 = vsel %vm188_vm1, %v5455_v38, %v5471_v44 }
  0x8e   :  { %v206_v47 = vsel %vm5467_vm2, %v5479_v46, -inf }
  0x8f   :  { %v213_v31 = vrot.slane %v206_v47, 4 }
  0x92   :  { %v105_v51 = vpop.permute.xlu1 %104  ;;  %1123 = vperm.xlu2 %5141, %v5503_v60  }
  0x93   :  { %v101_v53 = vpop.permute.xlu0 %100 }
  0x94   :  { %v5495_v54 = vpop.permute.xlu2 %257 }
  0x9a   :  { %v107_v3 = vpop.permute.xlu1 %106  ;;  %5145 = vset.pattern.permute.xlu2 %v10697_v36  ;;  %v5010_v36 = vld [vmem:[%s10685_s6 + $0x14] sm:$0xf] }
  0x9b   :  { %v5526_v5 = vsel %vm110_vm5, %v105_v51, %v107_v3  ;;  %v5530_v6 = vsel %vm110_vm5, %v107_v3, %v101_v53  ;;  %v103_v8 = vpop.permute.xlu0 %102  ;;  %1167 = vperm.xlu2 %5145, %v5503_v60   ;;  %v10699_v3 = vmov 2  }
  0x9c   :  { %v127_v9 = vsel %vm5510_vm6, %v5530_v6, -inf  ;;  %v130_v10 = vsel %vm5514_vm7, %v5526_v5, -inf  ;;  %v264_v13 = vpop.permute.xlu2 %263  ;;  %v5549_v15 = vsel %vm110_vm5, %v103_v8, %v105_v51  ;;  %v5553_v16 = vsel %vm110_vm5, %v101_v53, %v103_v8  ;;  %5144 = vset.pattern.permute.xlu1 %v10699_v3 }
  0x9d   :  { %v136_v14 = vrot.slane %v130_v10, 4  ;;  %v5558_v17 = vsel %vm265_vm9, %v264_v13, %v5495_v54  ;;  %v128_v18 = vsel %vm5518_vm8, %v5553_v16, -inf  ;;  %v129_v19 = vsel %vm5532_vm10, %v5549_v15, -inf  ;;  %1151 = vperm.xlu1 %5144, %v5503_v60  }
  0x9e   :  { %v135_v22 = vrot.slane %v128_v18, 4  ;;  %v282_v24 = vsel %vm5543_vm12, %v5558_v17, -inf  ;;  %v277_v51 = vperm.slane %v5498_v57, 3  ;;  %v275_v53 = vperm.slane %v5498_v57, 1 }
  0x9f   :  { %v139_v23 = vsel %vm137_vm11, %v129_v19, %v136_v14  ;;  %v5642_v57 = vsel %vm349_vm0, 1, %v10701_v34  ;;  %v5657_v10 = vperm.slane %v5473_v45, 3  ;;  %v5673_v19 = vld [vmem:[#allocation6 + $0xa1] ss:$8 sm:$0xf]  ;;  %vm342_vm7 = vcmp.lt.s32.totalorder %v5460_v40, 1 }
  0xa0   :  { %v138_v25 = vsel %vm137_vm11, %v127_v9, %v135_v22  ;;  %v143_v56 = vmax.f32 %v5391_v0, %v139_v23  ;;  %vm5629_vm2 = vcmp.eq.s32.totalorder %v277_v51, 1  ;;  %vm5633_vm3 = vcmp.eq.s32.totalorder %v275_v53, 1  ;;  %v5006_v9 = vld [vmem:[%s10685_s6 + $0x4] sm:$0xf] }
  0xa1   :  { %v142_v37 = vmax.f32 %v5396_v1, %v138_v25  ;;  %11068 = vst [vmem:[#allocation13_spill] sm:$0xff] %v5657_v10  ;;  %v353_v23 = vperm.slane %v5642_v57, 2  ;;  %v352_v26 = vperm.slane %v5642_v57, 1  ;;  %vm426_vm6 = vcmp.gt.f32.partialorder %v5673_v19, 0.5 }
  0xa2   :  { %v187_v28 = vpop.permute.xlu1 %186  ;;  %vm503_vm10 = vcmp.gt.f32.partialorder %v5687_v27, 0.5  ;;  %v156_v12 = vmul.f32 %v5657_v10, %v5526_v5  ;;  %v5731_v51 = vsel %vm426_vm6, 1, %v10701_v34  ;;  %v5738_v53 = vperm.slane %v5449_v35, 2 }
  0xa3   :  { %v5591_v32 = vsel %vm188_vm1, %v187_v28, %v5455_v38  ;;  %v185_v33 = vpop.permute.xlu0 %184  ;;  %5146 = vset.pattern.permute.xlu2 %v10701_v34  ;;  %vm5715_vm8 = vcmp.eq.s32.totalorder %v353_v23, 1  ;;  %vm5726_vm12 = vcmp.eq.s32.totalorder %v352_v26, 1  ;;  %v5741_v5 = vperm.slane %v5449_v35, 3 }
  0xa4   :  { %v205_v39 = vsel %vm5573_vm13, %v5591_v32, -inf  ;;  %v5600_v41 = vsel %vm188_vm1, %v185_v33, %v187_v28  ;;  %v5605_v42 = vsel %vm188_vm1, %v5471_v44, %v185_v33  ;;  %v5607_v38 = vpop.permute.xlu2 %338  ;;  %1275 = vperm.xlu2 %5146, %v5006_v9   ;;  %v5690_v28 = vperm.slane %v5449_v35, 1  ;;  %11078 = vst [vmem:[#allocation19_spill] sm:$0xff] %v5738_v53 }
  0xa5   :  { %v215_v47 = vsel %vm137_vm11, %v205_v39, %v213_v31  ;;  %v207_v49 = vsel %vm5580_vm14, %v5605_v42, -inf  ;;  %v208_v50 = vsel %vm5584_vm15, %v5600_v41, -inf  ;;  %v5700_v31 = vperm.slane %v5473_v45, 2  ;;  %11079 = vst [vmem:[#allocation20_spill] sm:$0xff] %v5741_v5  ;;  %5147 = vset.pattern.permute.xlu1 %v10701_v34 }
  0xa6   :  { %v5620_v44 = vmax.f32 %v142_v37, %v215_v47  ;;  %v214_v52 = vrot.slane %v208_v50, 4  ;;  %11070 = vst [vmem:[#allocation15_spill] sm:$0xff] %v5690_v28  ;;  %v5713_v39 = vperm.slane %v5449_v35, 0  ;;  %v5770_v63 = vsel %vm503_vm10, 1, %v10701_v34  ;;  %1337 = vperm.xlu1 %5147, %v5008_v2  }
  0xa7   :  { %11072 = vst [vmem:[#allocation17_spill] sm:$0xff] %v5700_v31  ;;  %v354_v9 = vperm.slane %v5642_v57, 3  ;;  %v5785_v23 = vperm.slane %v5485_v48, 1  ;;  %v5789_v26 = vperm.slane %v5485_v48, 2  ;;  %v5800_v50 = vperm.slane %v5609_v43, 1 }
  0xa8   :  { %v216_v58 = vsel %vm137_vm11, %v207_v49, %v214_v52  ;;  %11073 = vst [vmem:[#allocation18_spill] sm:$0xff] %v5713_v39  ;;  %v5735_v52 = vmul.f32 %v5690_v28, %v5479_v46  ;;  %v5011_v46 = vld [vmem:[%s10685_s6 + $0x18] sm:$0xf]  ;;  %vm419_vm13 = vcmp.lt.s32.totalorder %v5460_v40, 127  ;;  %v430_v35 = vperm.slane %v5731_v51, 2 }
  0xa9   :  { %v5627_v59 = vmax.f32 %v143_v56, %v216_v58  ;;  %v4998_v56 = vld [vmem:[%s10683_s4 + $0x4] sm:$0xf]  ;;  %v5756_v58 = vperm.slane %v5485_v48, 0  ;;  %11082 = vst [vmem:[#allocation23_spill] sm:$0xff] %v5785_v23  ;;  %vm5807_vm15 = vcmp.eq.s32.totalorder %v354_v9, 1  ;;  %v232_v47 = vmul.f32 %v5738_v53, %v5605_v42 }
  0xaa   :  { %v262_v62 = vpop.permute.xlu1 %261  ;;  %831 = vperm.xlu0 %5140, %v4998_v56   ;;  %11083 = vst [vmem:[#allocation24_spill] sm:$0xff] %v5789_v26  ;;  %v5812_v56 = vperm.slane %v5609_v43, 0  ;;  %v5930_v42 = vperm.slane %v5673_v19, 1 }
  0xab   :  { %v5650_v7 = vsel %vm265_vm9, %v262_v62, %v264_v13  ;;  %v260_v8 = vpop.permute.xlu0 %259  ;;  %11080 = vst [vmem:[#allocation21_spill] sm:$0xff] %v5756_v58 }
  0xac   :  { %v285_v11 = vsel %vm5629_vm2, %v5650_v7, -inf  ;;  %v5664_v14 = vsel %vm265_vm9, %v260_v8, %v262_v62  ;;  %v5669_v13 = vsel %vm265_vm9, %v5495_v54, %v260_v8  ;;  %v5671_v18 = vpop.permute.xlu2 %413  ;;  %v5684_v54 = vperm.slane %v5473_v45, 1  ;;  %1414 = vperm.xlu2 %5146, %v5011_v46   ;;  %11085 = vst [vmem:[#allocation26_spill] sm:$0xff] %v5800_v50 }
  0xad   :  { %v291_v20 = vrot.slane %v285_v11, 4  ;;  %v283_v21 = vsel %vm5633_vm3, %v5669_v13, -inf  ;;  %v284_v22 = vsel %vm5637_vm4, %v5664_v14, -inf  ;;  %v351_v8 = vperm.slane %v5642_v57, 0  ;;  %11090 = vst [vmem:[#allocation27_spill] sm:$0xff] %v5812_v56 }
  0xae   :  { %11069 = vst [vmem:[#allocation14_spill] sm:$0xff] %v5684_v54  ;;  %v290_v25 = vrot.slane %v283_v21, 4  ;;  %v428_v11 = vperm.slane %v5731_v51, 0  ;;  %v508_v57 = vperm.slane %v5770_v63, 3  ;;  %vm496_vm2 = vcmp.lt.s32.totalorder %v5460_v40, 113  ;;  %1383 = vperm.xlu1 %5147, %v5010_v36  }
  0xaf   :  { %v5696_v30 = vsel %vm137_vm11, %v284_v22, %v291_v20  ;;  %v162_v20 = vrot.slane %v156_v12, 4  ;;  %v5782_v22 = vperm.slane %v5485_v48, 3  ;;  %v153_v12 = vmul.f32 %v5693_v29, %v5530_v6  ;;  %11106 = vst [vmem:[#allocation30_spill] sm:$0xff] %v5930_v42 }
  0xb0   :  { %v5707_v33 = vsel %vm137_vm11, %v282_v24, %v290_v25  ;;  %v154_v24 = vmul.f32 %v5684_v54, %v5553_v16  ;;  %v238_v25 = vrot.slane %v5735_v52, 4  ;;  %vm5803_vm14 = vcmp.eq.s32.totalorder %v351_v8, 1 }
  0xb1   :  { %11081 = vst [vmem:[#allocation22_spill] sm:$0xff] %v5782_v22  ;;  %vm5814_vm0 = vcmp.eq.s32.totalorder %v428_v11, 1  ;;  %v230_v8 = vmul.f32 %v5713_v39, %v5591_v32  ;;  %v233_v11 = vmul.f32 %v5741_v5, %v5600_v41  ;;  %vm5836_vm3 = vcmp.eq.s32.totalorder %v508_v57, 1 }
  0xb2   :  { %v337_v49 = vpop.permute.xlu1 %336  ;;  %v161_v21 = vrot.slane %v154_v24, 4  ;;  %v155_v24 = vmul.f32 %v5700_v31, %v5549_v15  ;;  %v5003_v15 = vld [vmem:[%s10683_s4 + $0x18] sm:$0xf]  ;;  %v431_v57 = vperm.slane %v5731_v51, 3  ;;  %v5879_v45 = vperm.slane %v5609_v43, 3  ;;  %s5282_s4 = smov 95  }
  0xb3   :  { %v5746_v16 = vsel %vm342_vm7, %v337_v49, %v5607_v38  ;;  %v335_v55 = vpop.permute.xlu0 %334  ;;  %1025 = vperm.xlu0 %5140, %v5003_v15   ;;  %v240_v48 = vsel %vm137_vm11, %v230_v8, %v238_v25  ;;  %v11096_v36 = vmax.f32 %v5620_v44, %v5707_v33  ;;  %v5899_v33 = vperm.slane %v5673_v19, 0 }
  0xb4   :  { %v5763_v61 = vsel %vm342_vm7, %v335_v55, %v337_v49  ;;  %v5765_v62 = vpop.permute.xlu2 %488  ;;  %v5792_v49 = vperm.slane %v5609_v43, 2  ;;  %v163_v46 = vsel %vm137_vm11, %v153_v12, %v161_v21  ;;  %v164_v2 = vsel %vm137_vm11, %v155_v24, %v162_v20  ;;  %11095 = vst [vmem:[#allocation28_spill] sm:$0xff] %v5879_v45 }
  0xb5   :  { %v360_v4 = vsel %vm5726_vm12, %v5763_v61, -inf  ;;  %v10703_v12 = vmov 1   ;;  %v11097_v43 = vsel %vm5715_vm8, %v5746_v16, -inf  ;;  %v168_v44 = vadd.f32 %v164_v2, %v5391_v0  ;;  %11098 = vst [vmem:[#allocation29_spill] sm:$0xff] %v5899_v33 }
  0xb6   :  { %11084 = vst [vmem:[#allocation25_spill] sm:$0xff] %v5792_v49  ;;  %v367_v32 = vrot.slane %v360_v4, 4  ;;  %v5857_v4 = vld [vmem:[%s10686_s7] sm:$0xf]  ;;  %5148 = vset.pattern.permute.xlu2 %v10703_v12  ;;  %v307_v12 = vmul.f32 %v5756_v58, %v5558_v17  ;;  %vm5906_vm4 = vcmp.eq.s32.totalorder %v431_v57, 1  ;;  %vm5918_vm8 = vcmp.eq.s32.totalorder %v430_v35, 1 }
  0xb7   :  { %1502 = vperm.xlu2 %5148, %v5857_v4   ;;  %v310_v20 = vmul.f32 %v5782_v22, %v5650_v7  ;;  %v308_v57 = vmul.f32 %v5785_v23, %v5669_v13  ;;  %v11109_v2 = vmov 0   ;;  %v5988_v6 = vperm.slane %v5687_v27, 3 }
  0xb9   :  { %11114 = vst [vmem:[#allocation33_spill] sm:$0xff] %v5988_v6 }
  0xba   :  { %v412_v9 = vpop.permute.xlu1 %411 }
  0xbb   :  { %v341_v3 = vpop.permute.xlu0 %340  ;;  %v5833_v34 = vsel %vm419_vm13, %v412_v9, %v5671_v18 }
  0xbc   :  { %v5843_v21 = vsel %vm342_vm7, %v5607_v38, %v341_v3  ;;  %v5847_v41 = vsel %vm342_vm7, %v341_v3, %v335_v55  ;;  %v5852_v24 = vpop.permute.xlu2 %494  ;;  %v429_v55 = vperm.slane %v5731_v51, 1 }
  0xbd   :  { %v359_v38 = vsel %vm5803_vm14, %v5847_v41, -inf  ;;  %v362_v3 = vsel %vm5807_vm15, %v5843_v21, -inf  ;;  %v5874_v52 = vsel %vm496_vm2, %v5852_v24, %v5765_v62 }
  0xbe   :  { %v368_v15 = vrot.slane %v362_v3, 4  ;;  %v369_v37 = vsel %vm137_vm11, %v359_v38, %v367_v32  ;;  %v516_v51 = vsel %vm5836_vm3, %v5874_v52, -inf  ;;  %v167_v32 = vadd.f32 %v163_v46, %v5396_v1 }
  0xbf   :  { %v5884_v3 = vmax.f32 %v11096_v36, %v369_v37  ;;  %v239_v38 = vrot.slane %v233_v11, 4  ;;  %v11099_v37 = vmax.f32 %v5627_v59, %v5696_v30  ;;  %vm5914_vm6 = vcmp.eq.s32.totalorder %v429_v55, 1  ;;  %v5013_v30 = vld [vmem:[%s10685_s6 + $0x20] sm:$0xf]  ;;  %5151 = vset.pattern.permute.xlu2 %v11109_v2 }
  0xc0   :  { %v370_v25 = vsel %vm137_vm11, %v11097_v43, %v368_v15  ;;  %v5910_v17 = vadd.f32 %v240_v48, %v167_v32  ;;  %v5949_v36 = vld [vmem:[#allocation6 + $0xc1] ss:$8 sm:$0xf]  ;;  %v11107_v32 = vmov 1   ;;  %v507_v43 = vperm.slane %v5770_v63, 2  ;;  %1476 = vperm.xlu1 %5147, %v5013_v30  }
  0xc1   :  { %v5904_v8 = vmax.f32 %v11099_v37, %v370_v25  ;;  %v241_v15 = vsel %vm137_vm11, %v232_v47, %v239_v38  ;;  %5143 = vset.pattern.permute.xlu0 %v11107_v32  ;;  %v1646_v25 = vld [vmem:[%s10687_s8] sm:$0xf]  ;;  %v5964_v46 = vperm.slane %v5673_v19, 2  ;;  %v505_v47 = vperm.slane %v5770_v63, 0 }
  0xc2   :  { %v418_v59 = vpop.permute.xlu1 %417  ;;  %1135 = vperm.xlu0 %5143, %v5503_v60   ;;  %v506_v11 = vperm.slane %v5770_v63, 1  ;;  %vm580_vm10 = vcmp.gt.f32.partialorder %v5949_v36, 0.5  ;;  %1649 = vperm.xlu2 %5151, %v1646_v25   ;;  %v11110_v60 = vsel %vm5814_vm0, %v5833_v34, -inf  ;;  %v5977_v32 = vperm.slane %v5673_v19, 3 }
  0xc3   :  { %v416_v55 = vpop.permute.xlu0 %415  ;;  %v5934_v35 = vsel %vm419_vm13, %v418_v59, %v412_v9  ;;  %11108 = vst [vmem:[#allocation31_spill] sm:$0xff] %v5964_v46  ;;  %vm5982_vm12 = vcmp.eq.s32.totalorder %v507_v43, 1  ;;  %vm5990_vm14 = vcmp.eq.s32.totalorder %v505_v47, 1  ;;  %vm573_vm3 = vcmp.lt.s32.totalorder %v5460_v40, 112 }
  0xc4   :  { %v5940_v48 = vsel %vm419_vm13, %v5671_v18, %v416_v55  ;;  %v5944_v7 = vsel %vm419_vm13, %v416_v55, %v418_v59  ;;  %v439_v13 = vsel %vm5906_vm4, %v5934_v35, -inf  ;;  %v316_v59 = vrot.slane %v310_v20, 4  ;;  %11111 = vst [vmem:[#allocation32_spill] sm:$0xff] %v5977_v32 }
  0xc5   :  { %v437_v9 = vsel %vm5914_vm6, %v5940_v48, -inf  ;;  %v438_v18 = vsel %vm5918_vm8, %v5944_v7, -inf  ;;  %v445_v38 = vrot.slane %v439_v13, 4  ;;  %v315_v55 = vrot.slane %v308_v57, 4 }
  0xc6   :  { %v444_v37 = vrot.slane %v437_v9, 4  ;;  %v245_v13 = vadd.f32 %v241_v15, %v168_v44  ;;  %v309_v20 = vmul.f32 %v5789_v26, %v5664_v14  ;;  %v522_v57 = vrot.slane %v516_v51, 4 }
  0xc7   :  { %v447_v30 = vsel %vm137_vm11, %v438_v18, %v445_v38  ;;  %vm5994_vm15 = vcmp.eq.s32.totalorder %v506_v11, 1  ;;  %v5999_v14 = vsel %vm580_vm10, 1, %v11109_v2  ;;  %v317_v51 = vsel %vm137_vm11, %v307_v12, %v315_v55  ;;  %v6024_v11 = vld [vmem:[#allocation6 + $0xc2] ss:$8 sm:$0xf]  ;;  %v6044_v18 = vpop.permute.xlu2 %569 }
  0xc8   :  { %v446_v9 = vsel %vm137_vm11, %v11110_v60, %v444_v37  ;;  %v451_v63 = vmax.f32 %v5904_v8, %v447_v30  ;;  %v318_v8 = vsel %vm137_vm11, %v309_v20, %v316_v59  ;;  %v387_v37 = vmul.f32 %v5879_v45, %v5843_v21 }
  0xc9   :  { %v450_v44 = vmax.f32 %v5884_v3, %v446_v9  ;;  %v385_v3 = vmul.f32 %v5800_v50, %v5763_v61  ;;  %v583_v55 = vperm.slane %v5999_v14, 1  ;;  %v11119_v30 = vmov 2  }
  0xca   :  { %v493_v15 = vpop.permute.xlu1 %492  ;;  %5149 = vset.pattern.permute.xlu1 %v11119_v30  ;;  %v11120_v60 = vmov 3   ;;  %v6040_v9 = vperm.slane %v5687_v27, 2  ;;  %v321_v38 = vadd.f32 %v317_v51, %v5910_v17  ;;  %v322_v19 = vadd.f32 %v318_v8, %v245_v13 }
  0xcb   :  { %v6008_v43 = vsel %vm496_vm2, %v493_v15, %v5852_v24  ;;  %v491_v25 = vpop.permute.xlu0 %490  ;;  %5150 = vset.pattern.permute.xlu0 %v11120_v60  ;;  %1518 = vperm.xlu1 %5149, %v5857_v4   ;;  %vm657_vm0 = vcmp.gt.f32.partialorder %v6024_v11, 0.5  ;;  %vm6063_vm4 = vcmp.eq.s32.totalorder %v583_v55, 1  ;;  %v6070_v51 = vperm.slane %v5949_v36, 1 }
  0xcc   :  { %v515_v47 = vsel %vm5982_vm12, %v6008_v43, -inf  ;;  %v6017_v12 = vsel %vm496_vm2, %v491_v25, %v493_v15  ;;  %v6022_v61 = vsel %vm496_vm2, %v5765_v62, %v491_v25  ;;  %v5015_v62 = vld [vmem:[%s10687_s8 + $0x4] sm:$0xf]  ;;  %11121 = vst [vmem:[#allocation34_spill] sm:$0xff] %v6040_v9  ;;  %v582_v15 = vperm.slane %v5999_v14, 0  ;;  %1534 = vperm.xlu0 %5150, %v5857_v4  }
  0xcd   :  { %v524_v24 = vsel %vm137_vm11, %v515_v47, %v522_v57  ;;  %v513_v21 = vsel %vm5990_vm14, %v6022_v61, -inf  ;;  %v514_v59 = vsel %vm5994_vm15, %v6017_v12, -inf  ;;  %v384_v25 = vmul.f32 %v5812_v56, %v5847_v41  ;;  %1699 = vperm.xlu2 %5151, %v5015_v62   ;;  %11126 = vst [vmem:[#allocation37_spill] sm:$0xff] %v6070_v51 }
  0xce   :  { %v6042_v20 = vmax.f32 %v451_v63, %v524_v24  ;;  %v521_v57 = vrot.slane %v514_v59, 4  ;;  %v393_v63 = vrot.slane %v387_v37, 4  ;;  %v6054_v47 = vperm.slane %v5687_v27, 0 }
  0xcf   :  { %v392_v59 = vrot.slane %v385_v3, 4  ;;  %v6059_v4 = vperm.slane %v5687_v27, 1  ;;  %v386_v41 = vmul.f32 %v5792_v49, %v5746_v16  ;;  %vm6072_vm6 = vcmp.eq.s32.totalorder %v582_v15, 1 }
  0xd0   :  { %11122 = vst [vmem:[#allocation35_spill] sm:$0xff] %v6054_v47  ;;  %v523_v24 = vsel %vm137_vm11, %v513_v21, %v521_v57  ;;  %v6077_v27 = vsel %vm657_vm0, 1, %v11109_v2  ;;  %v584_v16 = vperm.slane %v5999_v14, 2  ;;  %v585_v55 = vperm.slane %v5999_v14, 3 }
  0xd1   :  { %11123 = vst [vmem:[#allocation36_spill] sm:$0xff] %v6059_v4  ;;  %v6061_v17 = vmax.f32 %v450_v44, %v523_v24  ;;  %v394_v44 = vsel %vm137_vm11, %v384_v25, %v392_v59  ;;  %v395_v62 = vsel %vm137_vm11, %v386_v41, %v393_v63  ;;  %v541_v57 = vmul.f32 %v5988_v6, %v5874_v52  ;;  %v5019_v63 = vld [vmem:[%s10687_s8 + $0x14] sm:$0xf] }
  0xd2   :  { %v568_v8 = vpop.permute.xlu1 %567  ;;  %v464_v24 = vmul.f32 %v5977_v32, %v5934_v35  ;;  %v659_v14 = vperm.slane %v6077_v27, 0  ;;  %v462_v52 = vmul.f32 %v5930_v42, %v5940_v48  ;;  %v6103_v13 = vperm.slane %v5949_v36, 0  ;;  %v645_v32 = vpop.permute.xlu2 %644 }
  0xd3   :  { %v575_v3 = vsel %vm573_vm3, %v568_v8, %v6044_v18  ;;  %v566_v21 = vpop.permute.xlu0 %565  ;;  %v6106_v41 = vperm.slane %v5949_v36, 2  ;;  %v6109_v35 = vperm.slane %v5949_v36, 3  ;;  %5152 = vset.pattern.permute.xlu1 %v11109_v2  ;;  %v461_v48 = vmul.f32 %v5899_v33, %v5833_v34 }
  0xd4   :  { %v591_v15 = vsel %vm6063_vm4, %v575_v3, -inf  ;;  %v576_v25 = vsel %vm573_vm3, %v566_v21, %v568_v8  ;;  %11129 = vst [vmem:[#allocation38_spill] sm:$0xff] %v6103_v13  ;;  %v5018_v8 = vld [vmem:[%s10687_s8 + $0x10] sm:$0xf]  ;;  %5154 = vset.pattern.permute.xlu0 %v11119_v30  ;;  %vm6121_vm8 = vcmp.eq.s32.totalorder %v584_v16, 1  ;;  %vm6125_vm10 = vcmp.eq.s32.totalorder %v585_v55, 1 }
  0xd5   :  { %v598_v59 = vrot.slane %v591_v15, 4  ;;  %v590_v60 = vsel %vm6072_vm6, %v576_v25, -inf  ;;  %11130 = vst [vmem:[#allocation39_spill] sm:$0xff] %v6106_v41  ;;  %1915 = vperm.xlu2 %5151, %v5019_v63   ;;  %1861 = vperm.xlu1 %5152, %v5018_v8   ;;  %v398_v2 = vadd.f32 %v394_v44, %v321_v38  ;;  %v399_v6 = vadd.f32 %v395_v62, %v322_v19 }
  0xd6   :  { %11131 = vst [vmem:[#allocation40_spill] sm:$0xff] %v6109_v35  ;;  %vm650_vm12 = vcmp.lt.s32.totalorder %v5460_v40, 111  ;;  %v470_v34 = vrot.slane %v464_v24, 4  ;;  %vm6132_vm14 = vcmp.eq.s32.totalorder %v659_v14, 1  ;;  %v6137_v55 = vperm.slane %v6024_v11, 0 }
  0xd7   :  { %v6119_v37 = vsel %vm137_vm11, %v590_v60, %v598_v59  ;;  %v547_v60 = vrot.slane %v541_v57, 4  ;;  %v469_v59 = vrot.slane %v462_v52, 4  ;;  %v463_v38 = vmul.f32 %v5964_v46, %v5944_v7 }
  0xd8   :  { %11138 = vst [vmem:[#allocation41_spill] sm:$0xff] %v6137_v55  ;;  %v660_v44 = vperm.slane %v6077_v27, 1  ;;  %v6143_v62 = vperm.slane %v6024_v11, 1  ;;  %v540_v57 = vmul.f32 %v6040_v9, %v6008_v43  ;;  %v539_v24 = vmul.f32 %v6059_v4, %v6017_v12 }
  0xd9   :  { %v616_v14 = vmul.f32 %v6070_v51, %v575_v3  ;;  %v662_v43 = vperm.slane %v6077_v27, 3  ;;  %v472_v12 = vsel %vm137_vm11, %v463_v38, %v470_v34  ;;  %v661_v16 = vperm.slane %v6077_v27, 2 }
  0xda   :  { %v643_v19 = vpop.permute.xlu1 %642  ;;  %11139 = vst [vmem:[#allocation42_spill] sm:$0xff] %v6143_v62  ;;  %vm6167_vm15 = vcmp.eq.s32.totalorder %v660_v44, 1  ;;  %v546_v34 = vrot.slane %v539_v24, 4  ;;  %v476_v46 = vadd.f32 %v472_v12, %v399_v6  ;;  %v615_v27 = vmul.f32 %v6103_v13, %v576_v25 }
  0xdb   :  { %v572_v63 = vpop.permute.xlu0 %571  ;;  %v653_v52 = vsel %vm650_vm12, %v643_v19, %v645_v32  ;;  %v623_v38 = vrot.slane %v616_v14, 4  ;;  %vm6174_vm0 = vcmp.eq.s32.totalorder %v662_v43, 1  ;;  %vm6186_vm4 = vcmp.eq.s32.totalorder %v661_v16, 1 }
  0xdc   :  { %v574_v7 = vsel %vm573_vm3, %v6044_v18, %v572_v63  ;;  %v577_v8 = vsel %vm573_vm3, %v572_v63, %v566_v21  ;;  %v667_v30 = vsel %vm6132_vm14, %v653_v52, -inf  ;;  %v471_v18 = vsel %vm137_vm11, %v461_v48, %v469_v59 }
  0xdd   :  { %v592_v3 = vsel %vm6121_vm8, %v574_v7, -inf  ;;  %v593_v51 = vsel %vm6125_vm10, %v577_v8, -inf  ;;  %v618_v9 = vmul.f32 %v6109_v35, %v577_v8  ;;  %v549_v63 = vsel %vm137_vm11, %v540_v57, %v547_v60 }
  0xde   :  { %v599_v4 = vrot.slane %v593_v51, 4  ;;  %v6179_v51 = vperm.slane %v6024_v11, 3  ;;  %v538_v48 = vmul.f32 %v6054_v47, %v6022_v61  ;;  %v617_v59 = vmul.f32 %v6106_v41, %v574_v7 }
  0xdf   :  { %v624_v15 = vrot.slane %v618_v9, 4  ;;  %v475_v9 = vadd.f32 %v471_v18, %v398_v2  ;;  %v553_v6 = vadd.f32 %v549_v63, %v476_v46  ;;  %v6191_v44 = vperm.slane %v6024_v11, 2 }
  0xe0   :  { %v601_v36 = vsel %vm137_vm11, %v592_v3, %v599_v4  ;;  %11144 = vst [vmem:[#allocation43_spill] sm:$0xff] %v6179_v51  ;;  %v548_v24 = vsel %vm137_vm11, %v538_v48, %v546_v34  ;;  %v625_v61 = vsel %vm137_vm11, %v615_v27, %v623_v38  ;;  %v692_v42 = vmul.f32 %v6137_v55, %v653_v52  ;;  %v6223_v52 = vpop.permute.xlu2 %873 }
  0xe1   :  { %v605_v60 = vmax.f32 %v6042_v20, %v601_v36  ;;  %11147 = vst [vmem:[#allocation44_spill] sm:$0xff] %v6191_v44  ;;  %v626_v25 = vsel %vm137_vm11, %v617_v59, %v624_v15  ;;  %v552_v3 = vadd.f32 %v548_v24, %v475_v9  ;;  %v11149_v27 = vmax.f32 %v6061_v17, %v6119_v37 }
  0xe2   :  { %v649_v57 = vpop.permute.xlu1 %648  ;;  %v630_v63 = vadd.f32 %v626_v25, %v553_v6  ;;  %vm10946_vm6 = vcmp.lt.s32.totalorder %v5460_v40, 34  ;;  %vm10900_vm8 = vcmp.lt.s32.totalorder %v5460_v40, 30  ;;  %vm10934_vm10 = vcmp.lt.s32.totalorder %v5460_v40, 32 }
  0xe3   :  { %v647_v14 = vpop.permute.xlu0 %646  ;;  %v654_v20 = vsel %vm650_vm12, %v649_v57, %v643_v19  ;;  %v629_v15 = vadd.f32 %v625_v61, %v552_v3  ;;  %vm10893_vm14 = vcmp.lt.s32.totalorder %v5460_v40, 31 }
  0xe4   :  { %v652_v46 = vsel %vm650_vm12, %v645_v32, %v647_v14  ;;  %v651_v2 = vsel %vm650_vm12, %v647_v14, %v649_v57  ;;  %v670_v11 = vsel %vm6174_vm0, %v654_v20, -inf  ;;  %v695_v7 = vmul.f32 %v6179_v51, %v654_v20 }
  0xe5   :  { %v668_v8 = vsel %vm6167_vm15, %v652_v46, -inf  ;;  %v693_v43 = vmul.f32 %v6143_v62, %v652_v46  ;;  %v669_v12 = vsel %vm6186_vm4, %v651_v2, -inf  ;;  %v676_v19 = vrot.slane %v670_v11, 4 }
  0xe6   :  { %v675_v18 = vrot.slane %v668_v8, 4  ;;  %v694_v32 = vmul.f32 %v6191_v44, %v651_v2  ;;  %v701_v16 = vrot.slane %v695_v7, 4  ;;  %v6226_v57 = vmax.f32 %v5396_v1, 0.0 }
  0xe7   :  { %v700_v34 = vrot.slane %v693_v43, 4  ;;  %v678_v38 = vsel %vm137_vm11, %v669_v12, %v676_v19  ;;  %vm10933_vm15 = vcmp.lt.s32.totalorder %v5460_v40, 33  ;;  %vm10903_vm0 = vcmp.lt.s32.totalorder %v5460_v40, 18 }
  0xe8   :  { %v677_v21 = vsel %vm137_vm11, %v667_v30, %v675_v18  ;;  %v6214_v36 = vmax.f32 %v605_v60, %v678_v38  ;;  %v703_v48 = vsel %vm137_vm11, %v694_v32, %v701_v16  ;;  %11151 = vst [vmem:[#allocation47_spill] sm:$0xff] %v6226_v57  ;;  %v6229_v30 = vmax.f32 %v5391_v0, 0.0  ;;  %v6241_v61 = vpop.permute.xlu2 %930 }
  0xe9   :  { %v6220_v59 = vmax.f32 %v11149_v27, %v677_v21  ;;  %v702_v9 = vsel %vm137_vm11, %v692_v42, %v700_v34  ;;  %v707_v6 = vadd.f32 %v703_v48, %v630_v63  ;;  %vm10925_vm4 = vcmp.lt.s32.totalorder %v5460_v40, 2 }
  0xea   :  { %11148 = vst [vmem:[#allocation45_spill] sm:$0xff] %v6214_v36  ;;  %v706_v4 = vadd.f32 %v702_v9, %v629_v15  ;;  %v6266_v15 = vpop.permute.xlu1 %915 }
  0xeb   :  { %11150 = vst [vmem:[#allocation46_spill] sm:$0xff] %v6220_v59 }
  0xec   :  { %729 = vst [vmem:[#allocation1 + $0x10] ss:$2 sm:$0xff] %v707_v6 }
  0xed   :  { %727 = vst [vmem:[#allocation1] ss:$2 sm:$0xff] %v706_v4 }
  0xee   :  { %11152 = vst [vmem:[#allocation48_spill] sm:$0xff] %v6229_v30 }
  0xf0   :  { %v6248_v2 = vpop.permute.xlu2 %1067 }
  0xf1   :  { %11157 = vst [vmem:[#allocation53_spill] sm:$0xff] %v6248_v2 }
  0xf2   :  { %v6285_v4 = vpop.permute.xlu1 %983 }
  0xf3   :  { %v6231_v60 = vld.sshfl [vmem:[#allocation1 + $0x10] sm:$0xff pattern:$0x75316420]  ;;  %v6233_v24 = vld.sshfl [vmem:[#allocation1 + $0x18] sm:$0xff pattern:$0x75316420] }
  0xf4   :  { %11153 = vst [vmem:[#allocation49_spill] sm:$0xff] %v6231_v60  ;;  %v6235_v17 = vld.sshfl [vmem:[#allocation1] sm:$0xff pattern:$0x75316420] }
  0xf5   :  { %11154 = vst [vmem:[#allocation50_spill] sm:$0xff] %v6233_v24  ;;  %v6237_v37 = vld.sshfl [vmem:[#allocation1 + $0x8] sm:$0xff pattern:$0x75316420] }
  0xf6   :  { %11155 = vst [vmem:[#allocation51_spill] sm:$0xff] %v6235_v17 }
  0xf7   :  { %11156 = vst [vmem:[#allocation52_spill] sm:$0xff] %v6237_v37 }
  0xf8   :  { %763 = vst [vmem:[#allocation1] ss:$2 sm:$0xff] %v6226_v57  ;;  %v6254_v12 = vpop.permute.xlu2 %1123 }
  0xf9   :  { %765 = vst [vmem:[#allocation1 + $0x10] ss:$2 sm:$0xff] %v6229_v30 }
  0xfa   :  { %11158 = vst [vmem:[#allocation54_spill] sm:$0xff] %v6254_v12 }
  0xfb   :  { %11161 = vst [vmem:[#allocation57_spill] sm:$0xff] %v6285_v4 }
  0xff   :  { %v766_v25 = vld.sshfl [vmem:[#allocation1] sm:$0xff pattern:$0x75316420]  ;;  %v767_v14 = vld.sshfl [vmem:[#allocation1 + $0x8] sm:$0xff pattern:$0x75316420] }
 0x100   :  { %800 = vst [vmem:[#allocation1] ss:$2 sm:$0xff] %v6226_v57  ;;  %v768_v20 = vld.sshfl [vmem:[#allocation1 + $0x10] sm:$0xff pattern:$0x75316420]  ;;  %776 = vrot.lane.b32.xlu0 %v767_v14, %s5257_s20  ;;  %774 = vrot.lane.b32.xlu2 %v766_v25, %s5257_s20  ;;  %v6261_v42 = vpop.permute.xlu2 %1167 }
 0x101   :  { %v769_v46 = vld.sshfl [vmem:[#allocation1 + $0x18] sm:$0xff pattern:$0x75316420]  ;;  %778 = vrot.lane.b32.xlu1 %v768_v20, %s5257_s20  ;;  %11159 = vst [vmem:[#allocation55_spill] sm:$0xff] %v6261_v42 }
 0x102   :  { %802 = vst [vmem:[#allocation1 + $0x10] ss:$2 sm:$0xff] %v6229_v30 }
 0x107   :  { %v803_v11 = vld.sshfl [vmem:[#allocation1] sm:$0xff pattern:$0x75316420]  ;;  %v804_v7 = vld.sshfl [vmem:[#allocation1 + $0x8] sm:$0xff pattern:$0x75316420] }
 0x108   :  { %842 = vst [vmem:[#allocation1] ss:$2 sm:$0xff] %v6226_v57  ;;  %780 = vrot.lane.b32.xlu2 %v769_v46, %s5257_s20  ;;  %v6281_v6 = vpop.permute.xlu2 %1275 }
 0x109   :  { %v805_v8 = vld.sshfl [vmem:[#allocation1 + $0x10] sm:$0xff pattern:$0x75316420]  ;;  %v806_v43 = vld.sshfl [vmem:[#allocation1 + $0x18] sm:$0xff pattern:$0x75316420]  ;;  %811 = vrot.lane.b32.xlu1 %v803_v11, %s5258_s21 }
 0x10a   :  { %844 = vst [vmem:[#allocation1 + $0x10] ss:$2 sm:$0xff] %v6229_v30 }
 0x10b   :  { %11160 = vst [vmem:[#allocation56_spill] sm:$0xff] %v6281_v6 }
 0x10f   :  { %v845_v19 = vld.sshfl [vmem:[#allocation1] sm:$0xff pattern:$0x75316420]  ;;  %v846_v3 = vld.sshfl [vmem:[#allocation1 + $0x8] sm:$0xff pattern:$0x75316420] }
 0x110   :  { %884 = vst [vmem:[#allocation1] ss:$2 sm:$0xff] %v6226_v57  ;;  %813 = vrot.lane.b32.xlu2 %v804_v7, %s5258_s21  ;;  %v6292_v11 = vpop.permute.xlu2 %1414  ;;  %v6294_v7 = vpop.permute.xlu1 %1109 }
 0x111   :  { %v847_v18 = vld.sshfl [vmem:[#allocation1 + $0x10] sm:$0xff pattern:$0x75316420]  ;;  %v848_v32 = vld.sshfl [vmem:[#allocation1 + $0x18] sm:$0xff pattern:$0x75316420]  ;;  %815 = vrot.lane.b32.xlu1 %v805_v8, %s5258_s21 }
 0x112   :  { %886 = vst [vmem:[#allocation1 + $0x10] ss:$2 sm:$0xff] %v6229_v30  ;;  %857 = vrot.lane.b32.xlu0 %v847_v18, %s5259_s22 }
 0x113   :  { %11162 = vst [vmem:[#allocation58_spill] sm:$0xff] %v6292_v11 }
 0x114   :  { %11163 = vst [vmem:[#allocation59_spill] sm:$0xff] %v6294_v7 }
 0x117   :  { %v887_v16 = vld.sshfl [vmem:[#allocation1] sm:$0xff pattern:$0x75316420]  ;;  %v888_v63 = vld.sshfl [vmem:[#allocation1 + $0x8] sm:$0xff pattern:$0x75316420] }
 0x118   :  { %933 = vst [vmem:[#allocation1] ss:$2 sm:$0xff] %v6226_v57  ;;  %817 = vrot.lane.b32.xlu2 %v806_v43, %s5258_s21  ;;  %v6301_v18 = vpop.permute.xlu2 %1502 }
 0x119   :  { %v889_v34 = vld.sshfl [vmem:[#allocation1 + $0x10] sm:$0xff pattern:$0x75316420]  ;;  %v890_v38 = vld.sshfl [vmem:[#allocation1 + $0x18] sm:$0xff pattern:$0x75316420]  ;;  %853 = vrot.lane.b32.xlu1 %v845_v19, %s5259_s22 }
 0x11a   :  { %935 = vst [vmem:[#allocation1 + $0x10] ss:$2 sm:$0xff] %v6229_v30  ;;  %895 = vrot.lane.b32.xlu0 %v887_v16, %s5260_s23  ;;  %v6303_v16 = vpop.permute.xlu1 %1151 }
 0x11b   :  { %11164 = vst [vmem:[#allocation60_spill] sm:$0xff] %v6301_v18 }
 0x11c   :  { %11165 = vst [vmem:[#allocation61_spill] sm:$0xff] %v6303_v16 }
 0x11f   :  { %v6270_v21 = vld.sshfl [vmem:[#allocation1] sm:$0xff pattern:$0x75316420]  ;;  %v6272_v48 = vld.sshfl [vmem:[#allocation1 + $0x8] sm:$0xff pattern:$0x75316420] }
 0x120   :  { %952 = vst [vmem:[#allocation1] ss:$2 sm:$0xff] %v6226_v57  ;;  %855 = vrot.lane.b32.xlu2 %v846_v3, %s5259_s22 }
 0x121   :  { %v6276_v27 = vld.sshfl [vmem:[#allocation1 + $0x10] sm:$0xff pattern:$0x75316420]  ;;  %v6278_v9 = vld.sshfl [vmem:[#allocation1 + $0x18] sm:$0xff pattern:$0x75316420]  ;;  %859 = vrot.lane.b32.xlu1 %v848_v32, %s5259_s22 }
 0x122   :  { %954 = vst [vmem:[#allocation1 + $0x10] ss:$2 sm:$0xff] %v6229_v30  ;;  %901 = vrot.lane.b32.xlu0 %v890_v38, %s5260_s23 }
 0x127   :  { %v955_v25 = vld.sshfl [vmem:[#allocation1] sm:$0xff pattern:$0x75316420]  ;;  %v956_v14 = vld.sshfl [vmem:[#allocation1 + $0x8] sm:$0xff pattern:$0x75316420] }
 0x128   :  { %899 = vrot.lane.b32.xlu2 %v889_v34, %s5260_s23  ;;  %994 = vst [vmem:[#allocation1] ss:$2 sm:$0xff] %v6226_v57 }
 0x129   :  { %897 = vrot.lane.b32.xlu1 %v888_v63, %s5260_s23  ;;  %v957_v20 = vld.sshfl [vmem:[#allocation1 + $0x10] sm:$0xff pattern:$0x75316420]  ;;  %v958_v46 = vld.sshfl [vmem:[#allocation1 + $0x18] sm:$0xff pattern:$0x75316420] }
 0x12a   :  { %963 = vrot.lane.b32.xlu0 %v955_v25, %s5261_s24  ;;  %996 = vst [vmem:[#allocation1 + $0x10] ss:$2 sm:$0xff] %v6229_v30  ;;  %v6310_v25 = vpop.permute.xlu2 %1649 }
 0x12b   :  { %11166 = vst [vmem:[#allocation62_spill] sm:$0xff] %v6310_v25 }
 0x12f   :  { %v998_v8 = vld.sshfl [vmem:[#allocation1 + $0x8] sm:$0xff pattern:$0x75316420]  ;;  %v997_v43 = vld.sshfl [vmem:[#allocation1] sm:$0xff pattern:$0x75316420] }
 0x130   :  { %967 = vrot.lane.b32.xlu2 %v957_v20, %s5261_s24  ;;  %1036 = vst [vmem:[#allocation1] ss:$2 sm:$0xff] %v6226_v57 }
 0x131   :  { %965 = vrot.lane.b32.xlu1 %v956_v14, %s5261_s24  ;;  %v999_v19 = vld.sshfl [vmem:[#allocation1 + $0x10] sm:$0xff pattern:$0x75316420]  ;;  %v1000_v3 = vld.sshfl [vmem:[#allocation1 + $0x18] sm:$0xff pattern:$0x75316420] }
 0x132   :  { %969 = vrot.lane.b32.xlu0 %v958_v46, %s5261_s24  ;;  %1038 = vst [vmem:[#allocation1 + $0x10] ss:$2 sm:$0xff] %v6229_v30  ;;  %v6315_v46 = vpop.permute.xlu1 %1337 }
 0x133   :  { %11167 = vst [vmem:[#allocation63_spill] sm:$0xff] %v6315_v46 }
 0x137   :  { %v1039_v32 = vld.sshfl [vmem:[#allocation1] sm:$0xff pattern:$0x75316420]  ;;  %v1040_v63 = vld.sshfl [vmem:[#allocation1 + $0x8] sm:$0xff pattern:$0x75316420] }
 0x138   :  { %1005 = vrot.lane.b32.xlu2 %v997_v43, %s5262_s25  ;;  %1078 = vst [vmem:[#allocation1] ss:$2 sm:$0xff] %v6226_v57 }
 0x139   :  { %1009 = vrot.lane.b32.xlu1 %v999_v19, %s5262_s25  ;;  %v1041_v34 = vld.sshfl [vmem:[#allocation1 + $0x10] sm:$0xff pattern:$0x75316420]  ;;  %v1042_v38 = vld.sshfl [vmem:[#allocation1 + $0x18] sm:$0xff pattern:$0x75316420] }
 0x13a   :  { %1007 = vrot.lane.b32.xlu0 %v998_v8, %s5262_s25  ;;  %1080 = vst [vmem:[#allocation1 + $0x10] ss:$2 sm:$0xff] %v6229_v30  ;;  %v6326_v36 = vpop.permute.xlu1 %1383 }
 0x13b   :  { %11169 = vst [vmem:[#allocation65_spill] sm:$0xff] %v6326_v36 }
 0x13f   :  { %v1081_v14 = vld.sshfl [vmem:[#allocation1] sm:$0xff pattern:$0x75316420]  ;;  %v1082_v20 = vld.sshfl [vmem:[#allocation1 + $0x8] sm:$0xff pattern:$0x75316420] }
 0x140   :  { %1011 = vrot.lane.b32.xlu2 %v1000_v3, %s5262_s25  ;;  %1607 = vst [vmem:[#allocation1] ss:$2 sm:$0xff] %v6226_v57  ;;  %v6322_v3 = vpop.permute.xlu2 %1699 }
 0x141   :  { %1047 = vrot.lane.b32.xlu1 %v1039_v32, %s5263_s26  ;;  %v1083_v43 = vld.sshfl [vmem:[#allocation1 + $0x10] sm:$0xff pattern:$0x75316420]  ;;  %v1084_v19 = vld.sshfl [vmem:[#allocation1 + $0x18] sm:$0xff pattern:$0x75316420] }
 0x142   :  { %1051 = vrot.lane.b32.xlu0 %v1041_v34, %s5263_s26  ;;  %1609 = vst [vmem:[#allocation1 + $0x10] ss:$2 sm:$0xff] %v6229_v30  ;;  %v6328_v34 = vpop.permute.xlu0 %793  ;;  %v6343_v17 = vpop.permute.xlu1 %1476 }
 0x143   :  { %11168 = vst [vmem:[#allocation64_spill] sm:$0xff] %v6322_v3 }
 0x144   :  { %11171 = vst [vmem:[#allocation67_spill] sm:$0xff] %v6343_v17 }
 0x147   :  { %v1610_v8 = vld.sshfl [vmem:[#allocation1] sm:$0xff pattern:$0x75316420]  ;;  %v1611_v0 = vld.sshfl [vmem:[#allocation1 + $0x8] sm:$0xff pattern:$0x75316420] }
 0x148   :  { %1049 = vrot.lane.b32.xlu2 %v1040_v63, %s5263_s26  ;;  %1656 = vst [vmem:[#allocation1] ss:$2 sm:$0xff] %v6226_v57 }
 0x149   :  { %1053 = vrot.lane.b32.xlu1 %v1042_v38, %s5263_s26  ;;  %v1612_v1 = vld.sshfl [vmem:[#allocation1 + $0x10] sm:$0xff pattern:$0x75316420]  ;;  %v1613_v32 = vld.sshfl [vmem:[#allocation1 + $0x18] sm:$0xff pattern:$0x75316420] }
 0x14a   :  { %1089 = vrot.lane.b32.xlu0 %v1081_v14, %s5264_s27  ;;  %1658 = vst [vmem:[#allocation1 + $0x10] ss:$2 sm:$0xff] %v6229_v30  ;;  %v6341_v14 = vpop.permute.xlu2 %1915  ;;  %v6345_v24 = vpop.permute.xlu0 %831 }
 0x14b   :  { %11170 = vst [vmem:[#allocation66_spill] sm:$0xff] %v6341_v14  ;;  %v6356_v11 = vpop.permute.xlu1 %1518 }
 0x14c   :  { %11172 = vst [vmem:[#allocation68_spill] sm:$0xff] %v6356_v11 }
 0x14f   :  { %v1659_v59 = vld.sshfl [vmem:[#allocation1] sm:$0xff pattern:$0x75316420]  ;;  %v6330_v60 = vld.sshfl [vmem:[#allocation1 + $0x8] sm:$0xff pattern:$0x75316420] }
 0x150   :  { %1093 = vrot.lane.b32.xlu2 %v1083_v43, %s5264_s27  ;;  %1710 = vst [vmem:[#allocation1] ss:$2 sm:$0xff] %v6226_v57 }
 0x151   :  { %1091 = vrot.lane.b32.xlu1 %v1082_v20, %s5264_s27  ;;  %v6335_v63 = vld.sshfl [vmem:[#allocation1 + $0x10] sm:$0xff pattern:$0x75316420]  ;;  %v6337_v38 = vld.sshfl [vmem:[#allocation1 + $0x18] sm:$0xff pattern:$0x75316420] }
 0x152   :  { %1095 = vrot.lane.b32.xlu0 %v1084_v19, %s5264_s27  ;;  %1712 = vst [vmem:[#allocation1 + $0x10] ss:$2 sm:$0xff] %v6229_v30  ;;  %v6358_v46 = vpop.permute.xlu0 %1025 }
 0x153   :  { %11173 = vst [vmem:[#allocation69_spill] sm:$0xff] %v6358_v46 }
 0x157   :  { %v1713_v37 = vld.sshfl [vmem:[#allocation1] sm:$0xff pattern:$0x75316420]  ;;  %v6347_v43 = vld.sshfl [vmem:[#allocation1 + $0x8] sm:$0xff pattern:$0x75316420] }
 0x158   :  { %1764 = vst [vmem:[#allocation1] ss:$2 sm:$0xff] %v6226_v57 }
 0x159   :  { %v1715_v20 = vld.sshfl [vmem:[#allocation1 + $0x10] sm:$0xff pattern:$0x75316420]  ;;  %1667 = vrot.lane.b32.xlu1 %v1659_v59, %s10821_s1  ;;  %v1716_v18 = vld.sshfl [vmem:[#allocation1 + $0x18] sm:$0xff pattern:$0x75316420] }
 0x15a   :  { %1725 = vrot.lane.b32.xlu2 %v1715_v20, %s10817_s0  ;;  %1618 = vrot.lane.b32.xlu0 %v1610_v8, %s10819_s5  ;;  %1766 = vst [vmem:[#allocation1 + $0x10] ss:$2 sm:$0xff] %v6229_v30  ;;  %v6354_v19 = vpop.permute.xlu2 %774  ;;  %v6367_v14 = vpop.permute.xlu0 %1135 }
 0x15b   :  { %11174 = vst [vmem:[#allocation70_spill] sm:$0xff] %v6367_v14 }
 0x15f   :  { %v1767_v17 = vld.sshfl [vmem:[#allocation1] sm:$0xff pattern:$0x75316420]  ;;  %v1768_v36 = vld.sshfl [vmem:[#allocation1 + $0x8] sm:$0xff pattern:$0x75316420] }
 0x160   :  { %1818 = vst [vmem:[#allocation1] ss:$2 sm:$0xff] %v6226_v57 }
 0x161   :  { %1721 = vrot.lane.b32.xlu1 %v1713_v37, %s10817_s0  ;;  %v1769_v59 = vld.sshfl [vmem:[#allocation1 + $0x10] sm:$0xff pattern:$0x75316420]  ;;  %v1770_v6 = vld.sshfl [vmem:[#allocation1 + $0x18] sm:$0xff pattern:$0x75316420]  ;;  %v6371_v37 = vpop.permute.xlu1 %1861 }
 0x162   :  { %1620 = vrot.lane.b32.xlu0 %v1611_v0, %s10819_s5  ;;  %1775 = vrot.lane.b32.xlu2 %v1767_v17, %s10815_s17  ;;  %1820 = vst [vmem:[#allocation1 + $0x10] ss:$2 sm:$0xff] %v6229_v30  ;;  %v6365_v8 = vpop.permute.xlu2 %780  ;;  %v6386_v16 = vpop.permute.xlu0 %1534 }
 0x163   :  { %11175 = vst [vmem:[#allocation71_spill] sm:$0xff] %v6371_v37 }
 0x164   :  { %11176 = vst [vmem:[#allocation72_spill] sm:$0xff] %v6386_v16 }
 0x167   :  { %v1821_v20 = vld.sshfl [vmem:[#allocation1] sm:$0xff pattern:$0x75316420]  ;;  %v1822_v11 = vld.sshfl [vmem:[#allocation1 + $0x8] sm:$0xff pattern:$0x75316420] }
 0x168   :  { %1872 = vst [vmem:[#allocation1] ss:$2 sm:$0xff] %v6226_v57 }
 0x169   :  { %1727 = vrot.lane.b32.xlu1 %v1716_v18, %s10817_s0  ;;  %v6373_v3 = vld.sshfl [vmem:[#allocation1 + $0x10] sm:$0xff pattern:$0x75316420]  ;;  %v1824_v0 = vld.sshfl [vmem:[#allocation1 + $0x18] sm:$0xff pattern:$0x75316420] }
 0x16a   :  { %1622 = vrot.lane.b32.xlu0 %v1612_v1, %s10819_s5  ;;  %1779 = vrot.lane.b32.xlu2 %v1769_v59, %s10815_s17  ;;  %1874 = vst [vmem:[#allocation1 + $0x10] ss:$2 sm:$0xff] %v6229_v30  ;;  %v6381_v42 = vpop.permute.xlu2 %813 }
 0x16f   :  { %v1876_v17 = vld.sshfl [vmem:[#allocation1 + $0x8] sm:$0xff pattern:$0x75316420]  ;;  %v6378_v25 = vld.sshfl [vmem:[#allocation1] sm:$0xff pattern:$0x75316420] }
 0x170   :  { %1971 = vst [vmem:[#allocation1] ss:$2 sm:$0xff] %v6226_v57 }
 0x171   :  { %1777 = vrot.lane.b32.xlu1 %v1768_v36, %s10815_s17  ;;  %v1877_v18 = vld.sshfl [vmem:[#allocation1 + $0x10] sm:$0xff pattern:$0x75316420]  ;;  %v6384_v37 = vld.sshfl [vmem:[#allocation1 + $0x18] sm:$0xff pattern:$0x75316420] }
 0x172   :  { %1624 = vrot.lane.b32.xlu0 %v1613_v32, %s10819_s5  ;;  %1829 = vrot.lane.b32.xlu2 %v1821_v20, %s10811_s18  ;;  %1973 = vst [vmem:[#allocation1 + $0x10] ss:$2 sm:$0xff] %v6229_v30  ;;  %v6401_v32 = vpop.permute.xlu2 %817  ;;  %v6405_v16 = vpop.permute.xlu0 %776  ;;  %s11510_s5 = smov 33  }
 0x173   :  { %v6391_v1 = vpop.permute.xlu1 %778  ;;  %v784_v47 = vsel %vm110_vm5, %v6354_v19, %v6405_v16 }
 0x177   :  { %v1974_v59 = vld.sshfl [vmem:[#allocation1] sm:$0xff pattern:$0x75316420]  ;;  %v6393_v14 = vld.sshfl [vmem:[#allocation1 + $0x8] sm:$0xff pattern:$0x75316420] }
 0x178   :  { %2025 = vst [vmem:[#allocation1] ss:$2 sm:$0xff] %v6226_v57 }
 0x179   :  { %1781 = vrot.lane.b32.xlu1 %v1770_v6, %s10815_s17  ;;  %v1976_v36 = vld.sshfl [vmem:[#allocation1 + $0x10] sm:$0xff pattern:$0x75316420]  ;;  %v1977_v12 = vld.sshfl [vmem:[#allocation1 + $0x18] sm:$0xff pattern:$0x75316420] }
 0x17a   :  { %1669 = vrot.lane.b32.xlu0 %v6330_v60, %s10821_s1  ;;  %1835 = vrot.lane.b32.xlu2 %v1824_v0, %s10811_s18  ;;  %2027 = vst [vmem:[#allocation1 + $0x10] ss:$2 sm:$0xff] %v6229_v30  ;;  %v6416_v0 = vpop.permute.xlu2 %855  ;;  %s11542_s17 = smov 14  }
 0x17b   :  { %v6403_v20 = vpop.permute.xlu1 %811 }
 0x17f   :  { %v2028_v7 = vld.sshfl [vmem:[#allocation1] sm:$0xff pattern:$0x75316420]  ;;  %v6408_v51 = vld.sshfl [vmem:[#allocation1 + $0x8] sm:$0xff pattern:$0x75316420] }
 0x180   :  { %2101 = vst [vmem:[#allocation1] ss:$2 sm:$0xff] %v6226_v57 }
 0x181   :  { %1831 = vrot.lane.b32.xlu1 %v1822_v11, %s10811_s18  ;;  %v5022_v11 = vld [vmem:[%s10687_s8 + $0x20] sm:$0xf]  ;;  %v6429_v55 = vld.sshfl [vmem:[#allocation1 + $0x10] sm:$0xff pattern:$0x75316420] }
 0x182   :  { %1671 = vrot.lane.b32.xlu0 %v6335_v63, %s10821_s1  ;;  %1885 = vrot.lane.b32.xlu2 %v1876_v17, %s10785_s2  ;;  %v2031_v17 = vld.sshfl [vmem:[#allocation1 + $0x18] sm:$0xff pattern:$0x75316420] }
 0x183   :  { %v816_v60 = vpop.permute.xlu1 %815  ;;  %2103 = vst [vmem:[#allocation1 + $0x10] ss:$2 sm:$0xff] %v6229_v30 }
 0x184   :  { %v6414_v6 = vpop.permute.xlu0 %857  ;;  %v819_v13 = vsel %vm188_vm1, %v816_v60, %v6401_v32 }
 0x187   :  { %v6422_v44 = vld.sshfl [vmem:[#allocation1] sm:$0xff pattern:$0x75316420]  ;;  %v6424_v62 = vld.sshfl [vmem:[#allocation1 + $0x8] sm:$0xff pattern:$0x75316420] }
 0x188   :  { %11177 = vst [vmem:[#allocation73_spill] sm:$0xff] %v6422_v44  ;;  %v6437_v44 = vpop.permute.xlu2 %899 }
 0x189   :  { %1887 = vrot.lane.b32.xlu1 %v1877_v18, %s10785_s2  ;;  %11178 = vst [vmem:[#allocation74_spill] sm:$0xff] %v6424_v62  ;;  %v5020_v18 = vld [vmem:[%s10687_s8 + $0x18] sm:$0xf] }
 0x18a   :  { %1673 = vrot.lane.b32.xlu0 %v6337_v38, %s10821_s1  ;;  %1960 = vperm.xlu2 %5151, %v5022_v11   ;;  %2135 = vst [vmem:[#allocation1] ss:$2 sm:$0xff] %v6226_v57  ;;  %v6442_v11 = vld.sshfl [vmem:[#allocation1 + $0x10] sm:$0xff pattern:$0x75316420]  ;;  %s5283_s1 = smov 94  }
 0x18b   :  { %v854_v63 = vpop.permute.xlu1 %853  ;;  %11179 = vst [vmem:[#allocation75_spill] sm:$0xff] %v6442_v11  ;;  %v6444_v62 = vld.sshfl [vmem:[#allocation1 + $0x18] sm:$0xff pattern:$0x75316420] }
 0x18c   :  { %v6431_v2 = vpop.permute.xlu0 %895  ;;  %11180 = vst [vmem:[#allocation76_spill] sm:$0xff] %v6444_v62 }
 0x18d   :  { %2137 = vst [vmem:[#allocation1 + $0x10] ss:$2 sm:$0xff] %v6229_v30 }
 0x190   :  { %v6449_v41 = vpop.permute.xlu2 %967 }
 0x191   :  { %1930 = vperm.xlu1 %5152, %v5020_v18   ;;  %v6465_v11 = vld.sshfl [vmem:[#allocation1 + $0x8] sm:$0xff pattern:$0x75316420] }
 0x192   :  { %1723 = vrot.lane.b32.xlu0 %v6347_v43, %s10817_s0  ;;  %1986 = vrot.lane.b32.xlu2 %v1976_v36, %s10783_s30 }
 0x193   :  { %v860_v38 = vpop.permute.xlu1 %859 }
 0x194   :  { %v6446_v35 = vpop.permute.xlu0 %901  ;;  %v6457_v36 = vld.sshfl [vmem:[#allocation1 + $0x10] sm:$0xff pattern:$0x75316420]  ;;  %v6459_v18 = vld.sshfl [vmem:[#allocation1 + $0x18] sm:$0xff pattern:$0x75316420]  ;;  %v864_v46 = vsel %vm265_vm9, %v860_v38, %v854_v63 }
 0x195   :  { %11181 = vst [vmem:[#allocation77_spill] sm:$0xff] %v6457_v36 }
 0x196   :  { %11182 = vst [vmem:[#allocation78_spill] sm:$0xff] %v6459_v18 }
 0x197   :  { %2191 = vst [vmem:[#allocation1 + $0x10] ss:$2 sm:$0xff] %v6229_v30 }
 0x199   :  { %1982 = vrot.lane.b32.xlu1 %v1974_v59, %s10783_s30  ;;  %v6467_v59 = vld.sshfl [vmem:[#allocation1] sm:$0xff pattern:$0x75316420] }
 0x19a   :  { %1833 = vrot.lane.b32.xlu0 %v6373_v3, %s10811_s18  ;;  %2036 = vrot.lane.b32.xlu2 %v2028_v7, %s10809_s19  ;;  %11183 = vst [vmem:[#allocation79_spill] sm:$0xff] %v6467_v59  ;;  %v6473_v7 = vpop.permute.xlu2 %1005  ;;  %v5026_v59 = vld [vmem:[%s10687_s8 + $0x30] sm:$0xf]  ;;  %s5280_s18 = smov 97  }
 0x19b   :  { %v6455_v43 = vpop.permute.xlu1 %897  ;;  %2189 = vst [vmem:[#allocation1] ss:$2 sm:$0xff] %v6226_v57 }
 0x19c   :  { %v6461_v62 = vpop.permute.xlu0 %963 }
 0x19e   :  { %v6477_v36 = vld.sshfl [vmem:[#allocation1 + $0x10] sm:$0xff pattern:$0x75316420]  ;;  %v6479_v18 = vld.sshfl [vmem:[#allocation1 + $0x18] sm:$0xff pattern:$0x75316420] }
 0x19f   :  { %11184 = vst [vmem:[#allocation80_spill] sm:$0xff] %v6477_v36 }
 0x1a0   :  { %11185 = vst [vmem:[#allocation81_spill] sm:$0xff] %v6479_v18  ;;  %v782_v18 = vsel %vm110_vm5, %v6391_v1, %v6365_v8 }
 0x1a1   :  { %1988 = vrot.lane.b32.xlu1 %v1977_v12, %s10783_s30  ;;  %2290 = vst [vmem:[#allocation1 + $0x10] ss:$2 sm:$0xff] %v6229_v30 }
 0x1a2   :  { %1883 = vrot.lane.b32.xlu0 %v6378_v25, %s10785_s2  ;;  %2042 = vrot.lane.b32.xlu2 %v2031_v17, %s10809_s19  ;;  %v822_v25 = vsel %vm188_vm1, %v6401_v32, %v6403_v20  ;;  %v785_v17 = vsel %vm110_vm5, %v6365_v8, %v6354_v19  ;;  %v821_v8 = vsel %vm188_vm1, %v6403_v20, %v6381_v42  ;;  %v6520_v32 = vld.sshfl [vmem:[#allocation1 + $0x8] sm:$0xff pattern:$0x75316420] }
 0x1a3   :  { %v6475_v3 = vpop.permute.xlu1 %965  ;;  %v6500_v36 = vmul.f32 %v822_v25, %v5713_v39  ;;  %v6508_v4 = vmul.f32 %v785_v17, %v5693_v29  ;;  %v783_v25 = vsel %vm110_vm5, %v6405_v16, %v6391_v1  ;;  %v820_v17 = vsel %vm188_vm1, %v6381_v42, %v816_v60 }
 0x1a4   :  { %v6481_v12 = vpop.permute.xlu0 %969  ;;  %v861_v19 = vsel %vm265_vm9, %v6414_v6, %v860_v38  ;;  %v6537_v20 = vmul.f32 %v782_v18, %v5657_v10  ;;  %v6540_v29 = vmul.f32 %v819_v13, %v5741_v5  ;;  %v863_v42 = vsel %vm265_vm9, %v854_v63, %v6416_v0 }
 0x1a5   :  { %11186 = vst [vmem:[#allocation82_spill] sm:$0xff] %v6500_v36  ;;  %v6546_v16 = vmul.f32 %v864_v46, %v5756_v58  ;;  %v6557_v60 = vmul.f32 %v6272_v48, %v6241_v61  ;;  %v6560_v13 = vmul.f32 %v821_v8, %v5690_v28  ;;  %v834_v63 = vmul.f32 %v6345_v24, %v6500_v36 }
 0x1a6   :  { %11187 = vst [vmem:[#allocation83_spill] sm:$0xff] %v6540_v29  ;;  %v796_v38 = vmul.f32 %v6328_v34, %v6508_v4  ;;  %v6571_v18 = vmul.f32 %v820_v17, %v5738_v53  ;;  %v6574_v48 = vmul.f32 %v861_v19, %v5782_v22  ;;  %v6579_v8 = vmul.f32 %v784_v47, %v5684_v54  ;;  %v11199_v54 = vld [vmem:[#allocation32_spill] sm:$0xff] }
 0x1a7   :  { %11188 = vst [vmem:[#allocation84_spill] sm:$0xff] %v6560_v13  ;;  %v6582_v58 = vmul.f32 %v783_v25, %v5700_v31  ;;  %v6585_v5 = vmul.f32 %v863_v42, %v5785_v23  ;;  %v799_v17 = vmul.f32 %v6328_v34, %v6537_v20  ;;  %v837_v47 = vmul.f32 %v6345_v24, %v6540_v29 }
 0x1a8   :  { %11189 = vst [vmem:[#allocation85_spill] sm:$0xff] %v6571_v18  ;;  %v876_v25 = vmul.f32 %v6223_v52, %v6546_v16  ;;  %v905_v19 = vsel %vm342_vm7, %v6431_v2, %v6455_v43  ;;  %v835_v42 = vmul.f32 %v6345_v24, %v6560_v13  ;;  %v838_v22 = vadd.f32 %v834_v63, %v796_v38 }
 0x1a9   :  { %2038 = vrot.lane.b32.xlu1 %v6408_v51, %s10809_s19  ;;  %v6534_v51 = vld.sshfl [vmem:[#allocation1] sm:$0xff pattern:$0x75316420]  ;;  %v903_v53 = vsel %vm342_vm7, %v6437_v44, %v6446_v35  ;;  %v836_v10 = vmul.f32 %v6345_v24, %v6571_v18  ;;  %v879_v31 = vmul.f32 %v6223_v52, %v6574_v48  ;;  %v904_v63 = vsel %vm342_vm7, %v6455_v43, %v6437_v44 }
 0x1aa   :  { %1889 = vrot.lane.b32.xlu0 %v6384_v37, %s10785_s2  ;;  %2098 = vperm.xlu2 %5151, %v5026_v59   ;;  %2288 = vst [vmem:[#allocation1] ss:$2 sm:$0xff] %v6226_v57  ;;  %v6553_v37 = vmul.f32 %v6270_v21, %v6241_v61  ;;  %v862_v21 = vsel %vm265_vm9, %v6416_v0, %v6414_v6  ;;  %v6576_v59 = vpop.permute.xlu2 %1011  ;;  %v5024_v0 = vld [vmem:[%s10687_s8 + $0x28] sm:$0xf]  ;;  %s10823_s2 = smov 114  }
 0x1ab   :  { %v6548_v1 = vpop.permute.xlu1 %1009  ;;  %v906_v6 = vsel %vm342_vm7, %v6446_v35, %v6431_v2  ;;  %v6607_v23 = vmul.f32 %v862_v21, %v5789_v26  ;;  %v797_v38 = vmul.f32 %v6328_v34, %v6579_v8  ;;  %v877_v35 = vmul.f32 %v6223_v52, %v6585_v5 }
 0x1ac   :  { %v1008_v46 = vpop.permute.xlu0 %1007  ;;  %v6618_v2 = vmul.f32 %v906_v6, %v5812_v56  ;;  %v6629_v24 = vmul.f32 %v905_v19, %v5800_v50  ;;  %v798_v43 = vmul.f32 %v6328_v34, %v6582_v58  ;;  %v841_v6 = vadd.f32 %v837_v47, %v799_v17 }
 0x1ad   :  { %v6642_v56 = vmul.f32 %v903_v53, %v5879_v45  ;;  %v839_v50 = vadd.f32 %v835_v42, %v797_v38  ;;  %v6650_v26 = vmul.f32 %v904_v63, %v5792_v49  ;;  %v1016_v38 = vsel %vm496_vm2, %v6576_v59, %v6473_v7  ;;  %v11197_v49 = vld [vmem:[#allocation31_spill] sm:$0xff] }
 0x1ae   :  { %11190 = vst [vmem:[#allocation86_spill] sm:$0xff] %v6618_v2  ;;  %v840_v34 = vadd.f32 %v836_v10, %v798_v43  ;;  %v883_v53 = vadd.f32 %v879_v31, %v841_v6  ;;  %v918_v17 = vmul.f32 %v6266_v15, %v6618_v2  ;;  %v5027_v10 = vld [vmem:[%s10687_s8 + $0x34] sm:$0xf] }
 0x1af   :  { %11191 = vst [vmem:[#allocation87_spill] sm:$0xff] %v6629_v24  ;;  %v881_v47 = vadd.f32 %v877_v35, %v839_v50  ;;  %v921_v31 = vmul.f32 %v6266_v15, %v6642_v56  ;;  %v920_v63 = vmul.f32 %v6266_v15, %v6650_v26  ;;  %v11195_v6 = vld [vmem:[#allocation30_spill] sm:$0xff] }
 0x1b0   :  { %11192 = vst [vmem:[#allocation88_spill] sm:$0xff] %v6642_v56 }
 0x1b1   :  { %2068 = vperm.xlu1 %5152, %v5024_v0   ;;  %v6635_v21 = vld.sshfl [vmem:[#allocation1] sm:$0xff pattern:$0x75316420]  ;;  %v6637_v44 = vld.sshfl [vmem:[#allocation1 + $0x8] sm:$0xff pattern:$0x75316420]  ;;  %v880_v0 = vadd.f32 %v876_v25, %v838_v22  ;;  %v878_v22 = vmul.f32 %v6223_v52, %v6607_v23  ;;  %v971_v52 = vsel %vm419_vm13, %v6449_v41, %v6481_v12  ;;  %v974_v25 = vsel %vm419_vm13, %v6481_v12, %v6461_v62 }
 0x1b2   :  { %1984 = vrot.lane.b32.xlu0 %v6393_v14, %s10783_s30  ;;  %2148 = vrot.lane.b32.xlu2 %v6465_v11, %s10813_s29  ;;  %2342 = vst [vmem:[#allocation1] ss:$2 sm:$0xff] %v6226_v57  ;;  %v946_v14 = vmul.f32 %v6276_v27, %v6241_v61  ;;  %v947_v11 = vmul.f32 %v6278_v9, %v6241_v61  ;;  %v1050_v42 = vpop.permute.xlu2 %1049  ;;  %s5279_s30 = smov 98  }
 0x1b3   :  { %v1048_v19 = vpop.permute.xlu1 %1047  ;;  %11193 = vst [vmem:[#allocation89_spill] sm:$0xff] %v6650_v26  ;;  %v919_v27 = vmul.f32 %v6266_v15, %v6629_v24  ;;  %v972_v61 = vsel %vm419_vm13, %v6475_v3, %v6449_v41  ;;  %v973_v9 = vsel %vm419_vm13, %v6461_v62, %v6475_v3  ;;  %v922_v50 = vadd.f32 %v918_v17, %v880_v0  ;;  %v5028_v3 = vld [vmem:[%s10687_s8 + $0x38] sm:$0xf]  ;;  %v6700_v0 = vld.sshfl [vmem:[#allocation1 + $0x10] sm:$0xff pattern:$0x75316420] }
 0x1b4   :  { %v1052_v28 = vpop.permute.xlu0 %1051  ;;  %v1014_v41 = vsel %vm496_vm2, %v1008_v46, %v6548_v1  ;;  %v1015_v62 = vsel %vm496_vm2, %v6473_v7, %v1008_v46  ;;  %v925_v12 = vadd.f32 %v921_v31, %v883_v53  ;;  %v882_v35 = vadd.f32 %v878_v22, %v840_v34  ;;  %v6702_v17 = vld.sshfl [vmem:[#allocation1 + $0x18] sm:$0xff pattern:$0x75316420]  ;;  %v11201_v7 = vld [vmem:[#allocation33_spill] sm:$0xff] }
 0x1b5   :  { %v6695_v43 = vmul.f32 %v973_v9, %v5899_v33  ;;  %v6698_v15 = vmul.f32 %v972_v61, %v11195_v6  ;;  %v923_v45 = vadd.f32 %v919_v27, %v881_v47  ;;  %v6705_v39 = vmul.f32 %v971_v52, %v11197_v49  ;;  %2344 = vst [vmem:[#allocation1 + $0x10] ss:$2 sm:$0xff] %v6229_v30  ;;  %v11203_v34 = vld [vmem:[#allocation35_spill] sm:$0xff]  ;;  %v11205_v47 = vld [vmem:[#allocation36_spill] sm:$0xff] }
 0x1b6   :  { %v6708_v56 = vmul.f32 %v974_v25, %v11199_v54  ;;  %v6714_v46 = vmul.f32 %v1016_v38, %v11201_v7  ;;  %v1013_v22 = vsel %vm496_vm2, %v6548_v1, %v6576_v59  ;;  %v6721_v53 = vmul.f32 %v1015_v62, %v11203_v34  ;;  %v11207_v25 = vld [vmem:[#allocation57_spill] sm:$0xff]  ;;  %v11208_v38 = vld [vmem:[#allocation34_spill] sm:$0xff] }
 0x1b7   :  { %11194 = vst [vmem:[#allocation90_spill] sm:$0xff] %v6695_v43  ;;  %v6724_v27 = vmul.f32 %v1014_v41, %v11205_v47  ;;  %v924_v9 = vadd.f32 %v920_v63, %v882_v35  ;;  %v1057_v31 = vsel %vm573_vm3, %v1048_v19, %v1050_v42  ;;  %v986_v1 = vmul.f32 %v11207_v25, %v6695_v43  ;;  %v11210_v62 = vld [vmem:[#allocation69_spill] sm:$0xff]  ;;  %v11215_v47 = vld [vmem:[#allocation39_spill] sm:$0xff] }
 0x1b8   :  { %11196 = vst [vmem:[#allocation91_spill] sm:$0xff] %v6698_v15  ;;  %v987_v59 = vmul.f32 %v11207_v25, %v6698_v15  ;;  %v6745_v41 = vmul.f32 %v1013_v22, %v11208_v38  ;;  %v1028_v35 = vmul.f32 %v11210_v62, %v6721_v53  ;;  %v11211_v7 = vld [vmem:[#allocation37_spill] sm:$0xff]  ;;  %v1031_v38 = vmul.f32 %v11210_v62, %v6714_v46  ;;  %v5009_v15 = vld [vmem:[%s10685_s6 + $0x10] sm:$0xf] }
 0x1b9   :  { %2124 = vperm.xlu1 %5152, %v5027_v10   ;;  %11198 = vst [vmem:[#allocation92_spill] sm:$0xff] %v6705_v39  ;;  %v1056_v10 = vsel %vm573_vm3, %v1050_v42, %v1052_v28  ;;  %v989_v42 = vmul.f32 %v11207_v25, %v6708_v56 }
 0x1ba   :  { %11200 = vst [vmem:[#allocation93_spill] sm:$0xff] %v6708_v56  ;;  %2040 = vrot.lane.b32.xlu0 %v6429_v55, %s10809_s19  ;;  %2178 = vperm.xlu2 %5151, %v5028_v3   ;;  %v948_v55 = vadd.f32 %v6553_v37, %v922_v50  ;;  %v949_v37 = vadd.f32 %v6557_v60, %v923_v45  ;;  %v1094_v6 = vpop.permute.xlu2 %1093  ;;  %s5281_s19 = smov 96   ;;  %v11240_v56 = vmov 3  }
 0x1bb   :  { %11202 = vst [vmem:[#allocation94_spill] sm:$0xff] %v6714_v46  ;;  %v1054_v61 = vpop.permute.xlu1 %1053  ;;  %v988_v50 = vmul.f32 %v11207_v25, %v6705_v39  ;;  %v6752_v54 = vmul.f32 %v1056_v10, %v11211_v7  ;;  %v950_v60 = vadd.f32 %v946_v14, %v924_v9  ;;  %v11217_v25 = vld [vmem:[#allocation40_spill] sm:$0xff] }
 0x1bc   :  { %11204 = vst [vmem:[#allocation95_spill] sm:$0xff] %v6721_v53  ;;  %v1090_v52 = vpop.permute.xlu0 %1089  ;;  %v1055_v3 = vsel %vm573_vm3, %v1052_v28, %v1054_v61  ;;  %v1058_v63 = vsel %vm573_vm3, %v1054_v61, %v1048_v19  ;;  %v1029_v28 = vmul.f32 %v11210_v62, %v6724_v27  ;;  %v11213_v19 = vld [vmem:[#allocation38_spill] sm:$0xff]  ;;  %v951_v61 = vadd.f32 %v947_v11, %v925_v12  ;;  %v11219_v14 = vld [vmem:[#allocation80_spill] sm:$0xff]  ;;  %v11220_v11 = vld [vmem:[#allocation79_spill] sm:$0xff] }
 0x1bd   :  { %11206 = vst [vmem:[#allocation96_spill] sm:$0xff] %v6724_v27  ;;  %v6755_v45 = vmul.f32 %v1057_v31, %v11213_v19  ;;  %v6758_v49 = vmul.f32 %v1055_v3, %v11215_v47  ;;  %v6761_v22 = vmul.f32 %v1058_v63, %v11217_v25  ;;  %v990_v34 = vadd.f32 %v986_v1, %v948_v55  ;;  %v6771_v12 = vld.sshfl [vmem:[#allocation1 + $0x8] sm:$0xff pattern:$0x75316420]  ;;  %v11226_v47 = vld [vmem:[#allocation44_spill] sm:$0xff]  ;;  %v11228_v19 = vld [vmem:[#allocation43_spill] sm:$0xff] }
 0x1be   :  { %11209 = vst [vmem:[#allocation57_spill] sm:$0xff] %v6745_v41  ;;  %v991_v33 = vadd.f32 %v987_v59, %v949_v37  ;;  %v992_v26 = vadd.f32 %v988_v50, %v950_v60  ;;  %v993_v10 = vadd.f32 %v989_v42, %v951_v61  ;;  %v1030_v31 = vmul.f32 %v11210_v62, %v6745_v41  ;;  %v6773_v9 = vld.sshfl [vmem:[#allocation1] sm:$0xff pattern:$0x75316420]  ;;  %v11221_v1 = vld [vmem:[#allocation53_spill] sm:$0xff]  ;;  %v11224_v60 = vld [vmem:[#allocation42_spill] sm:$0xff] }
 0x1bf   :  { %11212 = vst [vmem:[#allocation69_spill] sm:$0xff] %v6752_v54  ;;  %v1032_v3 = vadd.f32 %v1028_v35, %v990_v34  ;;  %v1071_v59 = vmul.f32 %v11221_v1, %v6752_v54  ;;  %v1070_v63 = vmul.f32 %v11221_v1, %v6755_v45  ;;  %v1072_v50 = vmul.f32 %v11221_v1, %v6758_v49  ;;  %v11222_v35 = vld [vmem:[#allocation41_spill] sm:$0xff] }
 0x1c0   :  { %11214 = vst [vmem:[#allocation97_spill] sm:$0xff] %v6755_v45  ;;  %v1033_v55 = vadd.f32 %v1029_v28, %v991_v33  ;;  %v1073_v42 = vmul.f32 %v11221_v1, %v6761_v22  ;;  %v1034_v1 = vadd.f32 %v1030_v31, %v992_v26  ;;  %v1035_v25 = vadd.f32 %v1031_v38, %v993_v10  ;;  %v11234_v54 = vld [vmem:[#allocation61_spill] sm:$0xff] }
 0x1c1   :  { %11216 = vst [vmem:[#allocation98_spill] sm:$0xff] %v6758_v49 }
 0x1c2   :  { %11218 = vst [vmem:[#allocation99_spill] sm:$0xff] %v6761_v22  ;;  %2204 = vrot.lane.b32.xlu2 %v11219_v14, %s10823_s2  ;;  %2146 = vrot.lane.b32.xlu0 %v11220_v11, %s10813_s29  ;;  %v1075_v24 = vadd.f32 %v1071_v59, %v1033_v55  ;;  %v1076_v26 = vadd.f32 %v1072_v50, %v1034_v1 }
 0x1c3   :  { %v1092_v37 = vpop.permute.xlu1 %1091  ;;  %2396 = vst [vmem:[#allocation1] ss:$2 sm:$0xff] %v6226_v57 }
 0x1c4   :  { %v1098_v62 = vsel %vm650_vm12, %v1092_v37, %v1094_v6  ;;  %v1099_v33 = vsel %vm650_vm12, %v1090_v52, %v1092_v37  ;;  %v1096_v34 = vpop.permute.xlu0 %1095 }
 0x1c5   :  { %v6789_v28 = vmul.f32 %v1099_v33, %v11222_v35  ;;  %v6792_v61 = vmul.f32 %v1098_v62, %v11224_v60  ;;  %v1097_v14 = vsel %vm650_vm12, %v1094_v6, %v1096_v34  ;;  %v1100_v11 = vsel %vm650_vm12, %v1096_v34, %v1090_v52  ;;  %v11230_v35 = vld [vmem:[#allocation59_spill] sm:$0xff]  ;;  %v5030_v6 = vld [vmem:[%s10687_s8 + $0x40] sm:$0xf]  ;;  %v6819_v34 = vld.sshfl [vmem:[#allocation1 + $0x10] sm:$0xff pattern:$0x75316420] }
 0x1c6   :  { %v6799_v7 = vmul.f32 %v1097_v14, %v11226_v47  ;;  %v6802_v37 = vmul.f32 %v1100_v11, %v11228_v19  ;;  %v1074_v33 = vadd.f32 %v1070_v63, %v1032_v3  ;;  %v1077_v52 = vadd.f32 %v1073_v42, %v1035_v25  ;;  %v11231_v63 = vld [vmem:[#allocation78_spill] sm:$0xff]  ;;  %v6821_v14 = vld.sshfl [vmem:[#allocation1 + $0x18] sm:$0xff pattern:$0x75316420]  ;;  %v6823_v25 = vpop.permute.xlu2 %1725 }
 0x1c7   :  { %11223 = vst [vmem:[#allocation80_spill] sm:$0xff] %v6789_v28  ;;  %v1112_v62 = vmul.f32 %v11230_v35, %v6789_v28  ;;  %v1113_v60 = vmul.f32 %v11230_v35, %v6792_v61 }
 0x1c8   :  { %11225 = vst [vmem:[#allocation79_spill] sm:$0xff] %v6792_v61  ;;  %v1114_v38 = vmul.f32 %v11230_v35, %v6799_v7  ;;  %v1115_v10 = vmul.f32 %v11230_v35, %v6802_v37 }
 0x1c9   :  { %11227 = vst [vmem:[#allocation53_spill] sm:$0xff] %v6799_v7  ;;  %v1116_v31 = vadd.f32 %v1112_v62, %v1074_v33  ;;  %v1117_v3 = vadd.f32 %v1113_v60, %v1075_v24 }
 0x1ca   :  { %11229 = vst [vmem:[#allocation100_spill] sm:$0xff] %v6802_v37  ;;  %v1118_v55 = vadd.f32 %v1114_v38, %v1076_v26  ;;  %v6815_v59 = vadd.f32 %v1115_v10, %v1077_v52  ;;  %2247 = vperm.xlu2 %5151, %v5030_v6   ;;  %2152 = vrot.lane.b32.xlu0 %v11231_v63, %s10813_s29  ;;  %v11232_v6 = vld [vmem:[#allocation54_spill] sm:$0xff] }
 0x1cb   :  { %v1126_v50 = vperm.slane %v1116_v31, 0  ;;  %v1127_v42 = vperm.slane %v1117_v3, 0  ;;  %v1138_v11 = vperm.slane %v1116_v31, 1  ;;  %v1139_v1 = vperm.slane %v1117_v3, 1  ;;  %2398 = vst [vmem:[#allocation1 + $0x10] ss:$2 sm:$0xff] %v6229_v30 }
 0x1cc   :  { %v6826_v24 = vpop.permute.xlu0 %1618  ;;  %v1128_v35 = vperm.slane %v1118_v55, 0  ;;  %v1129_v60 = vperm.slane %v6815_v59, 0  ;;  %v1140_v33 = vperm.slane %v1118_v55, 1  ;;  %v1141_v62 = vperm.slane %v6815_v59, 1  ;;  %v11233_v38 = vld [vmem:[#allocation70_spill] sm:$0xff] }
 0x1cd   :  { %v1130_v26 = vmul.f32 %v1126_v50, %v11232_v6  ;;  %v1131_v52 = vmul.f32 %v1127_v42, %v11232_v6  ;;  %v1142_v10 = vmul.f32 %v1138_v11, %v11233_v38  ;;  %v1143_v63 = vmul.f32 %v1139_v1, %v11233_v38 }
 0x1ce   :  { %v1132_v19 = vmul.f32 %v1128_v35, %v11232_v6  ;;  %v1144_v47 = vmul.f32 %v1140_v33, %v11233_v38  ;;  %v1154_v61 = vperm.slane %v1116_v31, 2  ;;  %v1155_v28 = vperm.slane %v1117_v3, 2 }
 0x1cf   :  { %v1146_v37 = vadd.f32 %v1142_v10, %v1130_v26  ;;  %v1147_v7 = vadd.f32 %v1143_v63, %v1131_v52  ;;  %v1133_v2 = vmul.f32 %v1129_v60, %v11232_v6  ;;  %v1145_v22 = vmul.f32 %v1141_v62, %v11233_v38  ;;  %v6855_v38 = vpop.permute.xlu2 %1775 }
 0x1d0   :  { %v1148_v49 = vadd.f32 %v1144_v47, %v1132_v19  ;;  %v1156_v50 = vperm.slane %v1118_v55, 2  ;;  %v1158_v42 = vmul.f32 %v1154_v61, %v11234_v54  ;;  %v1159_v11 = vmul.f32 %v1155_v28, %v11234_v54  ;;  %v11235_v61 = vld [vmem:[#allocation55_spill] sm:$0xff] }
 0x1d1   :  { %v1170_v45 = vperm.slane %v1116_v31, 3  ;;  %v1171_v1 = vperm.slane %v1117_v3, 3  ;;  %v1157_v35 = vperm.slane %v6815_v59, 2  ;;  %v1172_v33 = vperm.slane %v1118_v55, 3  ;;  %v6863_v55 = vpop.permute.xlu1 %1667 }
 0x1d2   :  { %2202 = vrot.lane.b32.xlu0 %v6520_v32, %s10823_s2  ;;  %2299 = vrot.lane.b32.xlu2 %v6635_v21, %s5278_s28  ;;  %v1160_v60 = vmul.f32 %v1156_v50, %v11234_v54  ;;  %v2401_v47 = vld.sshfl [vmem:[#allocation1 + $0x10] sm:$0xff pattern:$0x75316420]  ;;  %v1162_v19 = vadd.f32 %v1158_v42, %v1146_v37  ;;  %v1163_v62 = vadd.f32 %v1159_v11, %v1147_v7  ;;  %v6848_v31 = vld.sshfl [vmem:[#allocation1 + $0x18] sm:$0xff pattern:$0x75316420] }
 0x1d3   :  { %v1174_v6 = vmul.f32 %v1170_v45, %v11235_v61  ;;  %v1175_v28 = vmul.f32 %v1171_v1, %v11235_v61  ;;  %v2400_v3 = vld.sshfl [vmem:[#allocation1 + $0x8] sm:$0xff pattern:$0x75316420]  ;;  %v1149_v26 = vadd.f32 %v1145_v22, %v1133_v2  ;;  %2452 = vst [vmem:[#allocation1 + $0x10] ss:$2 sm:$0xff] %v6229_v30  ;;  %v1176_v37 = vmul.f32 %v1172_v33, %v11235_v61 }
 0x1d4   :  { %v6850_v32 = vpop.permute.xlu0 %1620  ;;  %v1164_v52 = vadd.f32 %v1160_v60, %v1148_v49  ;;  %v6853_v21 = vld.sshfl [vmem:[#allocation1] sm:$0xff pattern:$0x75316420]  ;;  %v1161_v10 = vmul.f32 %v1157_v35, %v11234_v54  ;;  %v1173_v49 = vperm.slane %v6815_v59, 3 }
 0x1d5   :  { %v6858_v7 = vadd.f32 %v1174_v6, %v1162_v19  ;;  %v6860_v45 = vadd.f32 %v1175_v28, %v1163_v62  ;;  %2450 = vst [vmem:[#allocation1] ss:$2 sm:$0xff] %v6226_v57 }
 0x1d6   :  { %v6867_v2 = vadd.f32 %v1176_v37, %v1164_v52  ;;  %v1165_v50 = vadd.f32 %v1161_v10, %v1149_v26  ;;  %v1177_v54 = vmul.f32 %v1173_v49, %v11235_v61  ;;  %v5034_v37 = vld [vmem:[%s10687_s8 + $0x50] sm:$0xf] }
 0x1d7   :  { %v1182_v22 = vsel %vm137_vm11, %v6858_v7, 0.0  ;;  %v1183_v63 = vsel %vm137_vm11, %v6860_v45, 0.0  ;;  %v6887_v19 = vpop.permute.xlu2 %1779 }
 0x1d8   :  { %v1184_v42 = vadd.f32 %v1183_v63, %v1182_v22  ;;  %v1185_v59 = vsel %vm137_vm11, %v6867_v2, 0.0  ;;  %v6882_v1 = vadd.f32 %v1177_v54, %v1165_v50  ;;  %v11236_v54 = vld [vmem:[#allocation77_spill] sm:$0xff] }
 0x1da   :  { %2303 = vrot.lane.b32.xlu0 %v6700_v0, %s5278_s28  ;;  %2305 = vrot.lane.b32.xlu2 %v6702_v17, %s5278_s28  ;;  %v1186_v33 = vadd.f32 %v1185_v59, %v1184_v42  ;;  %v6889_v0 = vpop.permute.xlu1 %1721  ;;  %v1187_v17 = vsel %vm137_vm11, %v6882_v1, 0.0  ;;  %v2455_v61 = vld.sshfl [vmem:[#allocation1 + $0x10] sm:$0xff pattern:$0x75316420] }
 0x1db   :  { %v2456_v6 = vld.sshfl [vmem:[#allocation1 + $0x18] sm:$0xff pattern:$0x75316420] }
 0x1dc   :  { %v6880_v11 = vpop.permute.xlu0 %1622  ;;  %v6884_v35 = vld.sshfl [vmem:[#allocation1 + $0x8] sm:$0xff pattern:$0x75316420]  ;;  %v2453_v60 = vld.sshfl [vmem:[#allocation1] sm:$0xff pattern:$0x75316420]  ;;  %v1188_v62 = vadd.f32 %v1187_v17, %v1186_v33 }
 0x1dd   :  { %2504 = vst [vmem:[#allocation1] ss:$2 sm:$0xff] %v6226_v57 }
 0x1de   :  { %2506 = vst [vmem:[#allocation1 + $0x10] ss:$2 sm:$0xff] %v6229_v30 }
 0x1df   :  { %v6904_v10 = vpop.permute.xlu2 %1829 }
 0x1e2   :  { %2355 = vrot.lane.b32.xlu2 %v6771_v12, %s5279_s30  ;;  %2353 = vrot.lane.b32.xlu0 %v6773_v9, %s5279_s30  ;;  %v6906_v12 = vpop.permute.xlu1 %1727 }
 0x1e3   :  { %1189 = vadd.xlane.f32.xlu1 %v1188_v62  ;;  %v11237_v62 = vld [vmem:[#allocation81_spill] sm:$0xff] }
 0x1e4   :  { %v6897_v28 = vpop.permute.xlu0 %1624  ;;  %v2507_v26 = vld.sshfl [vmem:[#allocation1] sm:$0xff pattern:$0x75316420]  ;;  %v2508_v52 = vld.sshfl [vmem:[#allocation1 + $0x8] sm:$0xff pattern:$0x75316420] }
 0x1e5   :  { %2558 = vst [vmem:[#allocation1] ss:$2 sm:$0xff] %v6226_v57  ;;  %v6910_v9 = vld.sshfl [vmem:[#allocation1 + $0x10] sm:$0xff pattern:$0x75316420] }
 0x1e6   :  { %v2510_v49 = vld.sshfl [vmem:[#allocation1 + $0x18] sm:$0xff pattern:$0x75316420] }
 0x1e7   :  { %2560 = vst [vmem:[#allocation1 + $0x10] ss:$2 sm:$0xff] %v6229_v30  ;;  %v6917_v63 = vpop.permute.xlu2 %1835 }
 0x1ea   :  { %2385 = vperm.xlu2 %5151, %v5034_v37   ;;  %2359 = vrot.lane.b32.xlu0 %v6821_v14, %s5279_s30  ;;  %v6919_v50 = vpop.permute.xlu1 %1777 }
 0x1ec   :  { %v6912_v22 = vpop.permute.xlu0 %1669 }
 0x1ef   :  { %v6929_v59 = vpop.permute.xlu2 %1885 }
 0x1f2   :  { %2411 = vrot.lane.b32.xlu2 %v2401_v47, %s5280_s18  ;;  %2409 = vrot.lane.b32.xlu0 %v2400_v3, %s5280_s18  ;;  %v6931_v47 = vpop.permute.xlu1 %1781 }
 0x1f4   :  { %v6921_v42 = vpop.permute.xlu0 %1671 }
 0x1fa   :  { %2465 = vrot.lane.b32.xlu0 %v2455_v61, %s5281_s19  ;;  %2461 = vrot.lane.b32.xlu2 %v2453_v60, %s5281_s19  ;;  %v6939_v60 = vpop.permute.xlu2 %1960  ;;  %v6941_v33 = vpop.permute.xlu1 %1831  ;;  %v5037_v61 = vld [vmem:[%s10687_s8 + $0x5c] sm:$0xf] }
 0x1fc   :  { %v6925_v14 = vpop.permute.xlu0 %1673  ;;  %2150 = vrot.lane.b32.xlu1 %v11236_v54, %s10813_s29  ;;  %v6965_v54 = vld [vmem:[%s10688_s9] sm:$0xf]  ;;  %s11511_s29 = smov 34   ;;  %s11514_s9 = smov 30  }
 0x202   :  { %2467 = vrot.lane.b32.xlu2 %v2456_v6, %s5281_s19  ;;  %2515 = vrot.lane.b32.xlu0 %v2507_v26, %s5282_s4  ;;  %v2562_v6 = vld.sshfl [vmem:[#allocation1 + $0x8] sm:$0xff pattern:$0x75316420]  ;;  %v6952_v26 = vpop.permute.xlu2 %1986  ;;  %v6957_v37 = vpop.permute.xlu1 %1887 }
 0x204   :  { %v6935_v3 = vpop.permute.xlu0 %1723  ;;  %2200 = vrot.lane.b32.xlu1 %v6534_v51, %s10823_s2  ;;  %v5031_v51 = vld [vmem:[%s10687_s8 + $0x44] sm:$0xf] }
 0x20a   :  { %2517 = vrot.lane.b32.xlu2 %v2508_v52, %s5282_s4  ;;  %2521 = vrot.lane.b32.xlu0 %v2510_v49, %s5282_s4  ;;  %v2563_v49 = vld.sshfl [vmem:[#allocation1 + $0x10] sm:$0xff pattern:$0x75316420]  ;;  %v6971_v29 = vpop.permute.xlu1 %1930 }
 0x20c   :  { %v6945_v17 = vpop.permute.xlu0 %1833  ;;  %2206 = vrot.lane.b32.xlu1 %v11237_v62, %s10823_s2  ;;  %v6969_v62 = vpop.permute.xlu2 %2036  ;;  %s11515_s2 = smov 18  }
 0x212   :  { %2547 = vperm.xlu2 %5151, %v5037_v61   ;;  %2571 = vrot.lane.b32.xlu0 %v2562_v6, %s5283_s1  ;;  %v1245_v6 = vld [vmem:[%s10685_s6] sm:$0xf]  ;;  %v6989_v36 = vpop.permute.xlu1 %1982 }
 0x214   :  { %v6960_v52 = vpop.permute.xlu0 %1883  ;;  %2262 = vperm.xlu1 %5152, %v5031_v51   ;;  %v5033_v51 = vld [vmem:[%s10687_s8 + $0x4c] sm:$0xf]  ;;  %v6987_v13 = vpop.permute.xlu2 %2042 }
 0x21a   :  { %2573 = vrot.lane.b32.xlu2 %v2563_v49, %s5283_s1  ;;  %2643 = vperm.xlu0 %5154, %v6965_v54   ;;  %v11238_v49 = vmov 0  }
 0x21c   :  { %v6973_v61 = vpop.permute.xlu0 %1889  ;;  %2301 = vrot.lane.b32.xlu1 %v6637_v44, %s5278_s28  ;;  %v5007_v44 = vld [vmem:[%s10685_s6 + $0x8] sm:$0xf] }
 0x222   :  { %2615 = vperm.xlu2 %5151, %v6965_v54   ;;  %5155 = vset.pattern.permute.xlu0 %v11238_v49 }
 0x223   :  { %1248 = vperm.xlu0 %5155, %v1245_v6   ;;  %v7000_v6 = vpop.permute.xlu2 %2098 }
 0x224   :  { %v6985_v18 = vpop.permute.xlu0 %1984  ;;  %2331 = vperm.xlu1 %5152, %v5033_v51   ;;  %v7002_v51 = vpop.permute.xlu1 %1988 }
 0x225   :  { %11239 = vst [vmem:[#allocation59_spill] sm:$0xff] %v6985_v18  ;;  %v7238_v18 = vld [vmem:[#allocation6 + $0x86] ss:$8 sm:$0xf] }
 0x226   :  { %11300 = vst [vmem:[#allocation143_spill] sm:$0xff] %v7238_v18 }
 0x22a   :  { %5156 = vset.pattern.permute.xlu2 %v11240_v56 }
 0x22b   :  { %1306 = vperm.xlu0 %5155, %v5007_v44   ;;  %2659 = vperm.xlu2 %5156, %v6965_v54   ;;  %v7015_v44 = vpop.permute.xlu2 %2148 }
 0x22c   :  { %v6996_v39 = vpop.permute.xlu0 %2040  ;;  %2357 = vrot.lane.b32.xlu1 %v6819_v34, %s5279_s30  ;;  %v5012_v34 = vld [vmem:[%s10685_s6 + $0x1c] sm:$0xf]  ;;  %11242 = vst [vmem:[#allocation54_spill] sm:$0xff] %v7015_v44  ;;  %v7017_v43 = vpop.permute.xlu1 %2038  ;;  %s9504_s6 = sld [smem:[#allocation2 + $0x4]] }
 0x233   :  { %1352 = vperm.xlu0 %5155, %v5009_v15   ;;  %5158 = vset.pattern.permute.xlu2 %v11238_v49  ;;  %v2561_v15 = vld.sshfl [vmem:[#allocation1] sm:$0xff pattern:$0x75316420]  ;;  %v7024_v41 = vpop.permute.xlu2 %2178 }
 0x234   :  { %v7008_v56 = vpop.permute.xlu0 %2146  ;;  %2407 = vrot.lane.b32.xlu1 %v6853_v21, %s5280_s18  ;;  %3657 = vst [vmem:[#allocation1] ss:$2 sm:$0xff] %v6226_v57  ;;  %v5186_v21 = vld [vmem:[%s10686_s7] sm:$0xf]  ;;  %v7029_v27 = vpop.permute.xlu1 %2068  ;;  %s11513_s7 = smov 31  }
 0x235   :  { %11241 = vst [vmem:[#allocation78_spill] sm:$0xff] %v7008_v56  ;;  %v5017_v56 = vld [vmem:[%s10687_s8 + $0xc] sm:$0xf] }
 0x236   :  { %11244 = vst [vmem:[#allocation61_spill] sm:$0xff] %v7024_v41 }
 0x237   :  { %11245 = vst [vmem:[#allocation55_spill] sm:$0xff] %v7029_v27 }
 0x23b   :  { %1445 = vperm.xlu0 %5155, %v5012_v34   ;;  %v5036_v34 = vld [vmem:[%s10687_s8 + $0x58] sm:$0xf]  ;;  %v7041_v41 = vld.sshfl [vmem:[#allocation1] sm:$0xff pattern:$0x75316420] }
 0x23c   :  { %v7019_v46 = vpop.permute.xlu0 %2152  ;;  %2413 = vrot.lane.b32.xlu1 %v6848_v31, %s5280_s18  ;;  %v5016_v31 = vld [vmem:[%s10687_s8 + $0x8] sm:$0xf]  ;;  %11247 = vst [vmem:[#allocation81_spill] sm:$0xff] %v7041_v41 }
 0x23d   :  { %11243 = vst [vmem:[#allocation70_spill] sm:$0xff] %v7019_v46  ;;  %v7043_v46 = vld.sshfl [vmem:[#allocation1 + $0x8] sm:$0xff pattern:$0x75316420] }
 0x23e   :  { %11248 = vst [vmem:[#allocation101_spill] sm:$0xff] %v7043_v46  ;;  %v11253_v46 = vmov 1  }
 0x23f   :  { %3856 = vst [vmem:[#allocation1] ss:$2 sm:$0xff] %v6226_v57  ;;  %v5021_v57 = vld [vmem:[%s10687_s8 + $0x1c] sm:$0xf] }
 0x243   :  { %1490 = vperm.xlu0 %5155, %v5186_v21  }
 0x244   :  { %v7031_v53 = vpop.permute.xlu0 %2202  ;;  %2463 = vrot.lane.b32.xlu1 %v6884_v35, %s5281_s19  ;;  %v7050_v35 = vpop.permute.xlu1 %2124 }
 0x245   :  { %11246 = vst [vmem:[#allocation77_spill] sm:$0xff] %v7031_v53  ;;  %v7048_v53 = vpop.permute.xlu2 %2204 }
 0x246   :  { %11250 = vst [vmem:[#allocation103_spill] sm:$0xff] %v7048_v53 }
 0x247   :  { %11251 = vst [vmem:[#allocation104_spill] sm:$0xff] %v7050_v35 }
 0x24b   :  { %1753 = vperm.xlu0 %5155, %v5016_v31  }
 0x24c   :  { %v7046_v21 = vpop.permute.xlu0 %2303  ;;  %2493 = vperm.xlu1 %5152, %v5036_v34  }
 0x24d   :  { %11249 = vst [vmem:[#allocation102_spill] sm:$0xff] %v7046_v21  ;;  %v7060_v41 = vpop.permute.xlu2 %2247 }
 0x24e   :  { %11254 = vst [vmem:[#allocation106_spill] sm:$0xff] %v7060_v41 }
 0x253   :  { %1807 = vperm.xlu0 %5155, %v5017_v56  }
 0x254   :  { %v7055_v44 = vpop.permute.xlu0 %2353  ;;  %2519 = vrot.lane.b32.xlu1 %v6910_v9, %s5282_s4 }
 0x255   :  { %11252 = vst [vmem:[#allocation105_spill] sm:$0xff] %v7055_v44  ;;  %5153 = vset.pattern.permute.xlu1 %v11253_v46  ;;  %v7094_v35 = vpop.permute.xlu2 %2299 }
 0x256   :  { %v1190_v31 = vpop.xlane.xlu1 %1189  ;;  %11260 = vst [vmem:[#allocation112_spill] sm:$0xff] %v7094_v35 }
 0x257   :  { %v1191_v34 = vmul.f32 0.001953125, %v1190_v31 }
 0x259   :  { %v7066_v21 = vsub.f32 %v6858_v7, %v1191_v34  ;;  %v7069_v56 = vsub.f32 %v6860_v45, %v1191_v34  ;;  %v7072_v44 = vsub.f32 %v6867_v2, %v1191_v34  ;;  %v7075_v9 = vsub.f32 %v6882_v1, %v1191_v34 }
 0x25b   :  { %11255 = vst [vmem:[#allocation107_spill] sm:$0xff] %v7066_v21  ;;  %1945 = vperm.xlu0 %5155, %v5021_v57   ;;  %v1196_v31 = vmul.f32 %v7066_v21, %v7066_v21  ;;  %v1197_v46 = vmul.f32 %v7069_v56, %v7069_v56  ;;  %v1198_v7 = vmul.f32 %v7072_v44, %v7072_v44 }
 0x25c   :  { %11256 = vst [vmem:[#allocation108_spill] sm:$0xff] %v7069_v56  ;;  %v7083_v53 = vpop.permute.xlu0 %2359  ;;  %2569 = vrot.lane.b32.xlu1 %v2561_v15, %s5283_s1  ;;  %v1199_v45 = vmul.f32 %v7075_v9, %v7075_v9  ;;  %v5023_v56 = vld [vmem:[%s10687_s8 + $0x24] sm:$0xf] }
 0x25d   :  { %11257 = vst [vmem:[#allocation109_spill] sm:$0xff] %v7072_v44  ;;  %v1200_v2 = vsel %vm137_vm11, %v1196_v31, 0.0  ;;  %v1201_v57 = vsel %vm137_vm11, %v1197_v46, 0.0  ;;  %v1203_v34 = vsel %vm137_vm11, %v1198_v7, 0.0  ;;  %v5025_v46 = vld [vmem:[%s10687_s8 + $0x2c] sm:$0xf] }
 0x25e   :  { %11258 = vst [vmem:[#allocation110_spill] sm:$0xff] %v7075_v9  ;;  %v1202_v1 = vadd.f32 %v1201_v57, %v1200_v2  ;;  %v2564_v44 = vld.sshfl [vmem:[#allocation1 + $0x18] sm:$0xff pattern:$0x75316420]  ;;  %v1205_v15 = vsel %vm137_vm11, %v1199_v45, 0.0  ;;  %v7109_v45 = vpop.permute.xlu2 %2305 }
 0x25f   :  { %11259 = vst [vmem:[#allocation111_spill] sm:$0xff] %v7083_v53 }
 0x260   :  { %v1204_v21 = vadd.f32 %v1203_v34, %v1202_v1  ;;  %3659 = vst [vmem:[#allocation1 + $0x10] ss:$2 sm:$0xff] %v6229_v30  ;;  %v5032_v1 = vld [vmem:[%s10687_s8 + $0x48] sm:$0xf] }
 0x261   :  { %11264 = vst [vmem:[#allocation116_spill] sm:$0xff] %v7109_v45 }
 0x262   :  { %v1206_v9 = vadd.f32 %v1205_v15, %v1204_v21 }
 0x263   :  { %2014 = vperm.xlu0 %5155, %v5023_v56  }
 0x264   :  { %v7098_v31 = vpop.permute.xlu0 %2409  ;;  %1207 = vadd.xlane.f32.xlu2 %v1206_v9  ;;  %2575 = vrot.lane.b32.xlu1 %v2564_v44, %s5283_s1  ;;  %v5029_v44 = vld [vmem:[%s10687_s8 + $0x3c] sm:$0xf] }
 0x265   :  { %11261 = vst [vmem:[#allocation113_spill] sm:$0xff] %v7098_v31  ;;  %v7172_v31 = vld [vmem:[#allocation6 + $0x47] ss:$8 sm:$0xf] }
 0x266   :  { %v7120_v9 = vpop.permute.xlu2 %2355  ;;  %11282 = vst [vmem:[#allocation134_spill] sm:$0xff] %v7172_v31 }
 0x267   :  { %v7104_v7 = vld.sshfl [vmem:[#allocation1 + $0x10] sm:$0xff pattern:$0x75316420]  ;;  %v7106_v2 = vld.sshfl [vmem:[#allocation1 + $0x18] sm:$0xff pattern:$0x75316420] }
 0x268   :  { %11262 = vst [vmem:[#allocation114_spill] sm:$0xff] %v7104_v7 }
 0x269   :  { %11263 = vst [vmem:[#allocation115_spill] sm:$0xff] %v7106_v2  ;;  %v5038_v2 = vld [vmem:[%s10687_s8 + $0x60] sm:$0xf] }
 0x26a   :  { %3858 = vst [vmem:[#allocation1 + $0x10] ss:$2 sm:$0xff] %v6229_v30 }
 0x26b   :  { %2083 = vperm.xlu0 %5155, %v5025_v46   ;;  %11267 = vst [vmem:[#allocation119_spill] sm:$0xff] %v7120_v9  ;;  %v5035_v46 = vld [vmem:[%s10687_s8 + $0x54] sm:$0xf]  ;;  %s11512_s8 = smov 32  }
 0x26c   :  { %v7111_v21 = vpop.permute.xlu0 %2465  ;;  %2627 = vperm.xlu1 %5153, %v6965_v54   ;;  %v7218_v9 = vld [vmem:[#allocation6 + $0x65] ss:$8 sm:$0xf] }
 0x26d   :  { %11265 = vst [vmem:[#allocation117_spill] sm:$0xff] %v7111_v21  ;;  %v7169_v21 = vld [vmem:[#allocation6 + $0x46] ss:$8 sm:$0xf] }
 0x26e   :  { %v7122_v57 = vpop.permute.xlu1 %2150  ;;  %v7129_v54 = vpop.permute.xlu2 %2385  ;;  %11281 = vst [vmem:[#allocation133_spill] sm:$0xff] %v7169_v21 }
 0x26f   :  { %11268 = vst [vmem:[#allocation120_spill] sm:$0xff] %v7122_v57 }
 0x270   :  { %11270 = vst [vmem:[#allocation122_spill] sm:$0xff] %v7129_v54  ;;  %v1628_v54 = vsel %vm10946_vm6, %v6850_v32, %v6880_v11 }
 0x273   :  { %2232 = vperm.xlu0 %5155, %v5029_v44  }
 0x274   :  { %v7117_v56 = vpop.permute.xlu0 %2515  ;;  %5157 = vset.pattern.permute.xlu1 %v11238_v49  ;;  %v7147_v49 = vld [vmem:[#allocation6 + $0x44] ss:$8 sm:$0xf] }
 0x275   :  { %11266 = vst [vmem:[#allocation118_spill] sm:$0xff] %v7117_v56 }
 0x276   :  { %v7131_v15 = vpop.permute.xlu1 %2200  ;;  %v7141_v7 = vpop.permute.xlu2 %2411  ;;  %11276 = vst [vmem:[#allocation128_spill] sm:$0xff] %v7147_v49 }
 0x277   :  { %11271 = vst [vmem:[#allocation123_spill] sm:$0xff] %v7131_v15  ;;  %v11283_v15 = vperm.slane %v7147_v49, 1 }
 0x278   :  { %11273 = vst [vmem:[#allocation125_spill] sm:$0xff] %v7141_v7 }
 0x27b   :  { %2277 = vperm.xlu0 %5155, %v5032_v1  }
 0x27c   :  { %v7127_v34 = vpop.permute.xlu0 %2521 }
 0x27d   :  { %11269 = vst [vmem:[#allocation121_spill] sm:$0xff] %v7127_v34  ;;  %v7149_v34 = vld [vmem:[#allocation6 + $0x60] ss:$8 sm:$0xf] }
 0x27e   :  { %v7143_v1 = vpop.permute.xlu1 %2206  ;;  %11277 = vst [vmem:[#allocation129_spill] sm:$0xff] %v7149_v34  ;;  %v11285_v7 = vperm.slane %v7149_v34, 0 }
 0x27f   :  { %11274 = vst [vmem:[#allocation126_spill] sm:$0xff] %v7143_v1 }
 0x283   :  { %2439 = vperm.xlu0 %5155, %v5035_v46   ;;  %v7153_v46 = vpop.permute.xlu2 %2461 }
 0x284   :  { %v7136_v44 = vpop.permute.xlu0 %2571  ;;  %11278 = vst [vmem:[#allocation130_spill] sm:$0xff] %v7153_v46  ;;  %v7189_v46 = vld [vmem:[#allocation6 + $0x45] ss:$8 sm:$0xf] }
 0x285   :  { %11272 = vst [vmem:[#allocation124_spill] sm:$0xff] %v7136_v44  ;;  %v11290_v44 = vld [vmem:[#allocation62_spill] sm:$0xff] }
 0x286   :  { %v7157_v56 = vpop.permute.xlu1 %2262  ;;  %11287 = vst [vmem:[#allocation137_spill] sm:$0xff] %v7189_v46 }
 0x287   :  { %11279 = vst [vmem:[#allocation131_spill] sm:$0xff] %v7157_v56 }
 0x28b   :  { %2601 = vperm.xlu0 %5155, %v5038_v2   ;;  %v1629_v2 = vsel %vm10946_vm6, %v6826_v24, %v6850_v32  ;;  %v1730_v32 = vsel %vm10934_vm10, %v6823_v25, %v6906_v12 }
 0x28c   :  { %v7145_v30 = vpop.permute.xlu0 %2643  ;;  %v7176_v56 = vmul.f32 %v11283_v15, %v1629_v2  ;;  %v1733_v15 = vsel %vm10934_vm10, %v6906_v12, %v6889_v0  ;;  %v1677_v12 = vsel %vm10933_vm15, %v6912_v22, %v6921_v42 }
 0x28d   :  { %11275 = vst [vmem:[#allocation127_spill] sm:$0xff] %v7145_v30  ;;  %v1841_v30 = vsel %vm10900_vm8, %v6917_v63, %v6904_v10 }
 0x28e   :  { %11284 = vst [vmem:[#allocation135_spill] sm:$0xff] %v7176_v56  ;;  %v7180_v57 = vmul.f32 %v11285_v7, %v1841_v30  ;;  %v11288_v7 = vperm.slane %v7147_v49, 2  ;;  %v11291_v30 = vld [vmem:[#allocation71_spill] sm:$0xff]  ;;  %v7240_v2 = vpop.permute.xlu1 %2301 }
 0x28f   :  { %11293 = vst [vmem:[#allocation71_spill] sm:$0xff] %v7218_v9 }
 0x290   :  { %11286 = vst [vmem:[#allocation136_spill] sm:$0xff] %v7180_v57  ;;  %v7197_v53 = vmul.f32 %v11288_v7, %v1628_v54  ;;  %v7214_v54 = vmul.f32 %v11291_v30, %v7180_v57  ;;  %v11296_v57 = vperm.slane %v7169_v21, 0  ;;  %v11298_v7 = vperm.slane %v7169_v21, 3 }
 0x291   :  { %11301 = vst [vmem:[#allocation144_spill] sm:$0xff] %v7240_v2  ;;  %v11309_v2 = vperm.slane %v7172_v31, 2 }
 0x292   :  { %11289 = vst [vmem:[#allocation138_spill] sm:$0xff] %v7197_v53  ;;  %v7234_v27 = vmul.f32 %v11298_v7, %v1730_v32  ;;  %v1654_v35 = vmul.f32 %v11290_v44, %v7197_v53  ;;  %v1627_v32 = vsel %vm10946_vm6, %v6880_v11, %v6897_v28  ;;  %v1630_v7 = vsel %vm10946_vm6, %v6897_v28, %v6826_v24 }
 0x293   :  { %11292 = vst [vmem:[#allocation62_spill] sm:$0xff] %v7214_v54  ;;  %v7230_v54 = vmul.f32 %v11296_v57, %v1733_v15  ;;  %v1678_v57 = vsel %vm10933_vm15, %v6863_v55, %v6912_v22  ;;  %v1785_v15 = vsel %vm10893_vm14, %v6919_v50, %v6887_v19  ;;  %v1786_v11 = vsel %vm10893_vm14, %v6855_v38, %v6919_v50 }
 0x294   :  { %11299 = vst [vmem:[#allocation142_spill] sm:$0xff] %v7234_v27  ;;  %v11302_v28 = vperm.slane %v7189_v46, 1  ;;  %v1676_v22 = vsel %vm10933_vm15, %v6921_v42, %v6925_v14  ;;  %v11303_v50 = vperm.slane %v7147_v49, 0  ;;  %v11305_v24 = vperm.slane %v7147_v49, 3 }
 0x295   :  { %v7167_v1 = vpop.permute.xlu0 %1248  ;;  %11297 = vst [vmem:[#allocation141_spill] sm:$0xff] %v7230_v54  ;;  %v1840_v42 = vsel %vm10900_vm8, %v6904_v10, %v6941_v33  ;;  %v1787_v10 = vsel %vm10893_vm14, %v6931_v47, %v6855_v38  ;;  %v11314_v38 = vperm.slane %v7149_v34, 1  ;;  %v11322_v49 = vperm.slane %v7238_v18, 0 }
 0x296   :  { %11280 = vst [vmem:[#allocation132_spill] sm:$0xff] %v7167_v1  ;;  %v7210_v1 = vmul.f32 %v11290_v44, %v7176_v56  ;;  %v7224_v56 = vpop.permute.xlu2 %2467  ;;  %v1692_v53 = vmul.f32 %v11302_v28, %v1678_v57  ;;  %v7286_v45 = vmul.f32 %v11303_v50, %v1630_v7  ;;  %v11307_v57 = vperm.slane %v7189_v46, 2 }
 0x297   :  { %11294 = vst [vmem:[#allocation139_spill] sm:$0xff] %v7224_v56  ;;  %v7290_v56 = vmul.f32 %v11305_v24, %v1627_v32  ;;  %v7304_v7 = vmul.f32 %v11309_v2, %v1785_v15  ;;  %v7308_v32 = vmul.f32 %v6939_v60, %v6546_v16  ;;  %v11311_v50 = vperm.slane %v7189_v46, 3 }
 0x298   :  { %11304 = vst [vmem:[#allocation145_spill] sm:$0xff] %v7286_v45  ;;  %v1693_v28 = vmul.f32 %v11307_v57, %v1677_v12  ;;  %v7312_v12 = vmul.f32 %v6939_v60, %v6585_v5  ;;  %v1893_v16 = vsel %vm10903_vm0, %v6929_v59, %v6957_v37  ;;  %v7330_v5 = vmul.f32 %v6939_v60, %v6607_v23  ;;  %v11313_v57 = vld [vmem:[#allocation64_spill] sm:$0xff] }
 0x299   :  { %11306 = vst [vmem:[#allocation146_spill] sm:$0xff] %v7290_v56  ;;  %v1694_v2 = vmul.f32 %v11311_v50, %v1676_v22  ;;  %v7339_v22 = vmul.f32 %v11314_v38, %v1840_v42  ;;  %v1655_v50 = vmul.f32 %v11290_v44, %v7290_v56  ;;  %v7347_v23 = vmul.f32 %v6939_v60, %v6574_v48 }
 0x29a   :  { %v11317_v42 = vperm.slane %v7218_v9, 2  ;;  %v11319_v48 = vperm.slane %v7172_v31, 3  ;;  %vm2523_vm6 = vcmp.lt.s32.totalorder %v5460_v40, 95 }
 0x29b   :  { %11315 = vst [vmem:[#allocation64_spill] sm:$0xff] %v7339_v22  ;;  %v1705_v56 = vmul.f32 %v11313_v57, %v1694_v2 }
 0x29c   :  { %v1909_v38 = vmul.f32 %v11317_v42, %v1893_v16  ;;  %v10902_v42 = vperm.slane %v7218_v9, 3 }
 0x29d   :  { %v7226_v41 = vpop.permute.xlu0 %1306 }
 0x29e   :  { %11295 = vst [vmem:[#allocation140_spill] sm:$0xff] %v7226_v41  ;;  %v1679_v41 = vsel %vm10933_vm15, %v6925_v14, %v6863_v55  ;;  %v11308_v55 = vperm.slane %v7172_v31, 1  ;;  %vm2469_vm15 = vcmp.lt.s32.totalorder %v5460_v40, 96 }
 0x2a0   :  { %v7300_v14 = vmul.f32 %v11308_v55, %v1786_v11  ;;  %v11310_v11 = vperm.slane %v7189_v46, 0  ;;  %v1703_v55 = vmul.f32 %v11313_v57, %v1692_v53  ;;  %v1704_v53 = vmul.f32 %v11313_v57, %v1693_v28  ;;  %v7350_v46 = vpop.permute.xlu2 %2517 }
 0x2a2   :  { %v1691_v24 = vmul.f32 %v11310_v11, %v1679_v41  ;;  %v1784_v41 = vsel %vm10893_vm14, %v6887_v19, %v6931_v47  ;;  %v1652_v11 = vmul.f32 %v11290_v44, %v7286_v45  ;;  %v11316_v19 = vperm.slane %v7172_v31, 0  ;;  %v7360_v44 = vpop.permute.xlu1 %2331 }
 0x2a3   :  { %11318 = vst [vmem:[#allocation148_spill] sm:$0xff] %v7360_v44  ;;  %v7364_v60 = vmul.f32 %v11319_v48, %v1784_v41  ;;  %v7373_v16 = vadd.f32 %v1703_v55, %v7210_v1  ;;  %vm10908_vm14 = vcmp.lt.s32.totalorder %v5460_v40, 14  ;;  %v7381_v41 = vld [vmem:[#allocation6 + $0x81] ss:$8 sm:$0xf]  ;;  %v10901_v48 = vperm.slane %v7218_v9, 0 }
 0x2a4   :  { %v7354_v47 = vmul.f32 %v11316_v19, %v1787_v10  ;;  %v1702_v28 = vmul.f32 %v11313_v57, %v1691_v24  ;;  %v2048_v10 = vsel %vm10925_vm4, %v6987_v13, %v6969_v62  ;;  %v7377_v19 = vmul.f32 %v11291_v30, %v7339_v22  ;;  %11320 = vst [vmem:[#allocation149_spill] sm:$0xff] %v7381_v41  ;;  %v11321_v1 = vld [vmem:[#allocation66_spill] sm:$0xff] }
 0x2a5   :  { %v7326_v15 = vpop.permute.xlu0 %1352  ;;  %v7383_v24 = vadd.f32 %v1704_v53, %v1654_v35  ;;  %v7389_v55 = vmul.f32 %v11321_v1, %v1909_v38  ;;  %v7393_v45 = vmul.f32 %v11322_v49, %v2048_v10  ;;  %v7399_v35 = vadd.f32 %v1705_v56, %v1655_v50 }
 0x2a6   :  { %11312 = vst [vmem:[#allocation147_spill] sm:$0xff] %v7326_v15  ;;  %v7397_v31 = vadd.f32 %v1702_v28, %v1652_v11  ;;  %v1839_v53 = vsel %vm10900_vm8, %v6941_v33, %v6945_v17  ;;  %v1732_v49 = vsel %vm10934_vm10, %v6889_v0, %v6935_v3  ;;  %v7414_v11 = vmul.f32 %v6971_v29, %v6508_v4 }
 0x2a7   :  { %11323 = vst [vmem:[#allocation66_spill] sm:$0xff] %v7393_v45  ;;  %v1838_v56 = vsel %vm10900_vm8, %v6945_v17, %v6917_v63  ;;  %v1731_v50 = vsel %vm10934_vm10, %v6935_v3, %v6823_v25  ;;  %v7427_v28 = vmul.f32 %v6971_v29, %v6579_v8  ;;  %v7431_v4 = vmul.f32 %v6971_v29, %v6582_v58  ;;  %v11325_v17 = vld [vmem:[#allocation73_spill] sm:$0xff] }
 0x2a8   :  { %v1894_v0 = vsel %vm10903_vm0, %v6960_v52, %v6929_v59  ;;  %v7439_v63 = vmul.f32 %v6971_v29, %v6537_v20  ;;  %v7443_v25 = vmul.f32 %v11325_v17, %v7000_v6  ;;  %v11327_v8 = vperm.slane %v7149_v34, 2  ;;  %v11331_v29 = vld [vmem:[#allocation74_spill] sm:$0xff] }
 0x2a9   :  { %v1895_v58 = vsel %vm10903_vm0, %v6973_v61, %v6960_v52  ;;  %v11329_v10 = vperm.slane %v7169_v21, 1  ;;  %v7459_v20 = vmul.f32 %v11331_v29, %v7000_v6  ;;  %v11333_v17 = vperm.slane %v7149_v34, 3 }
 0x2aa   :  { %11326 = vst [vmem:[#allocation73_spill] sm:$0xff] %v7443_v25  ;;  %v7447_v3 = vmul.f32 %v11327_v8, %v1839_v53  ;;  %v1892_v53 = vsel %vm10903_vm0, %v6957_v37, %v6973_v61  ;;  %v7469_v8 = vpop.permute.xlu2 %2547  ;;  %v11335_v52 = vperm.slane %v7169_v21, 2  ;;  %v11339_v29 = vperm.slane %v7218_v9, 1  ;;  %v7487_v37 = vpop.permute.xlu1 %2357  ;;  %v11341_v61 = vld [vmem:[#allocation76_spill] sm:$0xff] }
 0x2ab   :  { %v7455_v59 = vmul.f32 %v11329_v10, %v1732_v49  ;;  %11332 = vst [vmem:[#allocation74_spill] sm:$0xff] %v7459_v20  ;;  %v7463_v33 = vmul.f32 %v11333_v17, %v1838_v56  ;;  %v11337_v49 = vld [vmem:[#allocation75_spill] sm:$0xff]  ;;  %v2047_v56 = vsel %vm10925_vm4, %v6969_v62, %v7017_v43  ;;  %v1907_v62 = vmul.f32 %v10901_v48, %v1895_v58  ;;  %v11386_v20 = vld [vmem:[#allocation93_spill] sm:$0xff] }
 0x2ac   :  { %11328 = vst [vmem:[#allocation151_spill] sm:$0xff] %v7447_v3  ;;  %v7473_v38 = vmul.f32 %v11335_v52, %v1731_v50  ;;  %v7477_v10 = vmul.f32 %v11337_v49, %v7000_v6  ;;  %v1908_v2 = vmul.f32 %v11339_v29, %v1894_v0  ;;  %v7485_v17 = vld [vmem:[#allocation6 + $0xa2] ss:$8 sm:$0xf]  ;;  %v7491_v50 = vmul.f32 %v11341_v61, %v7000_v6 }
 0x2ad   :  { %v7406_v57 = vpop.permute.xlu0 %1445  ;;  %11330 = vst [vmem:[#allocation152_spill] sm:$0xff] %v7455_v59  ;;  %v1991_v52 = vsel %vm10908_vm14, %v6952_v26, %v7002_v51  ;;  %v1994_v0 = vsel %vm10908_vm14, %v7002_v51, %v6989_v36  ;;  %v7505_v49 = vmul.f32 %v11291_v30, %v7447_v3  ;;  %v1910_v6 = vmul.f32 %v10902_v42, %v1892_v53  ;;  %v11351_v58 = vld [vmem:[#allocation55_spill] sm:$0xff] }
 0x2ae   :  { %11324 = vst [vmem:[#allocation150_spill] sm:$0xff] %v7406_v57  ;;  %v7513_v22 = vmul.f32 %v11291_v30, %v7463_v33  ;;  %v11343_v51 = vperm.slane %v7238_v18, 1  ;;  %vm10952_vm8 = vcmp.lt.s32.totalorder %v5460_v40, 126  ;;  %v7524_v53 = vmul.f32 %v11321_v1, %v1908_v2 }
 0x2af   :  { %11334 = vst [vmem:[#allocation153_spill] sm:$0xff] %v7463_v33  ;;  %v11346_v42 = vperm.slane %v7381_v41, 0  ;;  %v11347_v30 = vperm.slane %v7381_v41, 3  ;;  %vm10971_vm0 = vcmp.lt.s32.totalorder %v5460_v40, 110  ;;  %v2046_v2 = vsel %vm10925_vm4, %v7017_v43, %v6996_v39 }
 0x2b0   :  { %11336 = vst [vmem:[#allocation154_spill] sm:$0xff] %v7473_v38  ;;  %v7517_v34 = vmul.f32 %v11343_v51, %v2047_v56  ;;  %v7535_v56 = vld [vmem:[#allocation6 + $0xc3] ss:$8 sm:$0xf]  ;;  %v7538_v51 = vmul.f32 %v11321_v1, %v1907_v62  ;;  %v2045_v43 = vsel %vm10925_vm4, %v6996_v39, %v6987_v13  ;;  %v11364_v15 = vperm.slane %v7381_v41, 2 }
 0x2b1   :  { %11338 = vst [vmem:[#allocation75_spill] sm:$0xff] %v7477_v10  ;;  %v7528_v61 = vmul.f32 %v11346_v42, %v1994_v0  ;;  %v7532_v29 = vmul.f32 %v11347_v30, %v1991_v52  ;;  %v7546_v0 = vld [vmem:[#allocation6 + $0xa7] ss:$8 sm:$0xf]  ;;  %v7549_v52 = vmul.f32 %v11321_v1, %v1910_v6  ;;  %v7565_v42 = vmul.f32 %v11351_v58, %v7393_v45 }
 0x2b2   :  { %11340 = vst [vmem:[#allocation155_spill] sm:$0xff] %v7485_v17  ;;  %v11350_v30 = vld [vmem:[#allocation59_spill] sm:$0xff]  ;;  %v7569_v1 = vmul.f32 %v11351_v58, %v7517_v34  ;;  %v11354_v6 = vld [vmem:[#allocation54_spill] sm:$0xff]  ;;  %v11359_v39 = vld [vmem:[#allocation96_spill] sm:$0xff]  ;;  %v11361_v45 = vperm.slane %v7238_v18, 2  ;;  %vm10970_vm4 = vcmp.lt.s32.totalorder %v5460_v40, 98 }
 0x2b3   :  { %11342 = vst [vmem:[#allocation76_spill] sm:$0xff] %v7491_v50  ;;  %v1992_v62 = vsel %vm10908_vm14, %v11350_v30, %v6952_v26  ;;  %v1993_v33 = vsel %vm10908_vm14, %v6989_v36, %v11350_v30  ;;  %v11355_v26 = vld [vmem:[#allocation78_spill] sm:$0xff]  ;;  %vm2208_vm14 = vcmp.lt.s32.totalorder %v5460_v40, 114  ;;  %v11356_v36 = vld [vmem:[#allocation95_spill] sm:$0xff]  ;;  %vm10972_vm10 = vcmp.lt.s32.totalorder %v5460_v40, 97 }
 0x2b4   :  { %11344 = vst [vmem:[#allocation156_spill] sm:$0xff] %v7517_v34  ;;  %v2157_v3 = vsel %vm10952_vm8, %v11355_v26, %v11354_v6  ;;  %v11357_v30 = vld [vmem:[#allocation106_spill] sm:$0xff]  ;;  %v7586_v21 = vmul.f32 %v11361_v45, %v2046_v2  ;;  %v7595_v44 = vmul.f32 %v11364_v15, %v1992_v62  ;;  %v7605_v2 = vpop.permute.xlu2 %2573  ;;  %v11368_v34 = vld [vmem:[#allocation57_spill] sm:$0xff]  ;;  %v11372_v15 = vperm.slane %v7485_v17, 0  ;;  %v11381_v10 = vld [vmem:[#allocation91_spill] sm:$0xff] }
 0x2b5   :  { %v7521_v48 = vpop.permute.xlu0 %1490  ;;  %11348 = vst [vmem:[#allocation158_spill] sm:$0xff] %v7535_v56  ;;  %v7578_v9 = vmul.f32 %v11357_v30, %v11356_v36  ;;  %v7582_v13 = vmul.f32 %v11357_v30, %v11359_v39  ;;  %v11365_v36 = vperm.slane %v7238_v18, 3  ;;  %v11367_v39 = vld [vmem:[#allocation70_spill] sm:$0xff] }
 0x2b6   :  { %11345 = vst [vmem:[#allocation157_spill] sm:$0xff] %v7521_v48  ;;  %v11363_v48 = vperm.slane %v7381_v41, 1  ;;  %v2158_v45 = vsel %vm10952_vm8, %v11367_v39, %v11355_v26  ;;  %v7617_v62 = vmul.f32 %v11372_v15, %v2157_v3  ;;  %v7623_v26 = vld [vmem:[#allocation6 + $0xe0] ss:$8 sm:$0xf]  ;;  %v7625_v41 = vpop.permute.xlu1 %2407  ;;  %v7639_v15 = vmul.f32 %v11351_v58, %v7586_v21 }
 0x2b7   :  { %11349 = vst [vmem:[#allocation159_spill] sm:$0xff] %v7546_v0  ;;  %v11378_v50 = vld [vmem:[#allocation90_spill] sm:$0xff] }
 0x2b8   :  { %11352 = vst [vmem:[#allocation59_spill] sm:$0xff] %v7565_v42  ;;  %v7591_v57 = vmul.f32 %v11363_v48, %v1993_v33  ;;  %v11370_v48 = vld [vmem:[#allocation94_spill] sm:$0xff] }
 0x2b9   :  { %11353 = vst [vmem:[#allocation55_spill] sm:$0xff] %v7569_v1  ;;  %v7613_v33 = vmul.f32 %v11357_v30, %v11370_v48  ;;  %v11403_v1 = vperm.slane %v7546_v0, 1 }
 0x2ba   :  { %11358 = vst [vmem:[#allocation54_spill] sm:$0xff] %v7578_v9  ;;  %v7599_v9 = vmul.f32 %v11365_v36, %v2045_v43  ;;  %v11374_v43 = vld [vmem:[#allocation112_spill] sm:$0xff] }
 0x2bb   :  { %11360 = vst [vmem:[#allocation78_spill] sm:$0xff] %v7582_v13  ;;  %v7609_v13 = vmul.f32 %v11357_v30, %v11368_v34  ;;  %v11375_v36 = vld [vmem:[#allocation116_spill] sm:$0xff] }
 0x2bc   :  { %11362 = vst [vmem:[#allocation95_spill] sm:$0xff] %v7586_v21  ;;  %v2311_v18 = vsel %vm10971_vm0, %v11375_v36, %v11374_v43  ;;  %v11379_v34 = vld [vmem:[#allocation104_spill] sm:$0xff]  ;;  %v7655_v3 = vmul.f32 %v11351_v58, %v7599_v9  ;;  %v11397_v58 = vld [vmem:[#allocation102_spill] sm:$0xff] }
 0x2bd   :  { %11366 = vst [vmem:[#allocation106_spill] sm:$0xff] %v7599_v9  ;;  %v7633_v30 = vmul.f32 %v11379_v34, %v11381_v10  ;;  %v1754_v48 = vpop.permute.xlu0 %1753  ;;  %v11388_v10 = vperm.slane %v7485_v17, 3  ;;  %v7681_v9 = vld [vmem:[#allocation6 + $0xe1] ss:$8 sm:$0xf] }
 0x2be   :  { %11369 = vst [vmem:[#allocation96_spill] sm:$0xff] %v7609_v13  ;;  %v7629_v13 = vmul.f32 %v11379_v34, %v11378_v50  ;;  %v7647_v50 = vmul.f32 %v11379_v34, %v11386_v20 }
 0x2bf   :  { %11371 = vst [vmem:[#allocation70_spill] sm:$0xff] %v7613_v33  ;;  %v11384_v33 = vld [vmem:[#allocation92_spill] sm:$0xff] }
 0x2c0   :  { %11373 = vst [vmem:[#allocation57_spill] sm:$0xff] %v7617_v62 }
 0x2c1   :  { %11376 = vst [vmem:[#allocation94_spill] sm:$0xff] %v7623_v26 }
 0x2c2   :  { %11377 = vst [vmem:[#allocation112_spill] sm:$0xff] %v7625_v41  ;;  %v7643_v41 = vmul.f32 %v11379_v34, %v11384_v33  ;;  %v11395_v34 = vld [vmem:[#allocation103_spill] sm:$0xff] }
 0x2c3   :  { %11380 = vst [vmem:[#allocation116_spill] sm:$0xff] %v7629_v13  ;;  %v7651_v13 = vmul.f32 %v11388_v10, %v2158_v45  ;;  %v2308_v10 = vsel %vm10971_vm0, %v11397_v58, %v11375_v36  ;;  %v7679_v33 = vld [vmem:[#allocation6 + $0xe2] ss:$8 sm:$0xf] }
 0x2c4   :  { %11382 = vst [vmem:[#allocation90_spill] sm:$0xff] %v7633_v30  ;;  %v11391_v30 = vperm.slane %v7535_v56, 3 }
 0x2c5   :  { %11383 = vst [vmem:[#allocation104_spill] sm:$0xff] %v7639_v15  ;;  %v11409_v15 = vld [vmem:[#allocation111_spill] sm:$0xff] }
 0x2c6   :  { %11385 = vst [vmem:[#allocation91_spill] sm:$0xff] %v7643_v41  ;;  %v7659_v21 = vmul.f32 %v11391_v30, %v2311_v18  ;;  %v11393_v41 = vld [vmem:[#allocation61_spill] sm:$0xff]  ;;  %v11398_v18 = vld [vmem:[#allocation119_spill] sm:$0xff] }
 0x2c7   :  { %11387 = vst [vmem:[#allocation92_spill] sm:$0xff] %v7647_v50  ;;  %v7665_v20 = vmul.f32 %v11393_v41, %v7617_v62  ;;  %v11396_v50 = vld [vmem:[#allocation77_spill] sm:$0xff]  ;;  %v1756_v62 = vmul.f32 %v1754_v48, %v7230_v54  ;;  %v7689_v36 = vmul.f32 %v11393_v41, %v7651_v13 }
 0x2c8   :  { %11389 = vst [vmem:[#allocation93_spill] sm:$0xff] %v7651_v13  ;;  %v2210_v45 = vsel %vm2208_vm14, %v11396_v50, %v11395_v34  ;;  %v11399_v30 = vld [vmem:[#allocation105_spill] sm:$0xff]  ;;  %v11407_v13 = vperm.slane %v7623_v26, 0 }
 0x2c9   :  { %11390 = vst [vmem:[#allocation160_spill] sm:$0xff] %v7655_v3  ;;  %v2364_v25 = vsel %vm10970_vm4, %v11399_v30, %v11398_v18  ;;  %v1759_v3 = vmul.f32 %v1754_v48, %v7234_v27  ;;  %v7696_v42 = vmul.f32 %v11403_v1, %v2210_v45 }
 0x2ca   :  { %11392 = vst [vmem:[#allocation161_spill] sm:$0xff] %v7659_v21  ;;  %v1758_v21 = vmul.f32 %v1754_v48, %v7473_v38  ;;  %v7706_v38 = vmul.f32 %v11407_v13, %v2364_v25 }
 0x2cb   :  { %11394 = vst [vmem:[#allocation61_spill] sm:$0xff] %v7665_v20  ;;  %v1757_v20 = vmul.f32 %v1754_v48, %v7455_v59  ;;  %v11405_v59 = vperm.slane %v7535_v56, 2  ;;  %v1763_v13 = vadd.f32 %v1759_v3, %v7399_v35  ;;  %v1808_v48 = vpop.permute.xlu0 %1807 }
 0x2cc   :  { %11400 = vst [vmem:[#allocation103_spill] sm:$0xff] %v7679_v33  ;;  %v1762_v25 = vadd.f32 %v1758_v21, %v7383_v24  ;;  %v1811_v1 = vmul.f32 %v1808_v48, %v7300_v14  ;;  %v1812_v45 = vmul.f32 %v1808_v48, %v7304_v7  ;;  %v1813_v18 = vmul.f32 %v1808_v48, %v7364_v60  ;;  %v11417_v7 = vld [vmem:[#allocation122_spill] sm:$0xff] }
 0x2cd   :  { %11401 = vst [vmem:[#allocation77_spill] sm:$0xff] %v7681_v9  ;;  %v7700_v54 = vmul.f32 %v11405_v59, %v2308_v10  ;;  %v7716_v59 = vpop.permute.xlu2 %2615  ;;  %v1760_v10 = vadd.f32 %v1756_v62, %v7397_v31  ;;  %v1761_v27 = vadd.f32 %v1757_v20, %v7373_v16  ;;  %v11415_v16 = vld [vmem:[#allocation130_spill] sm:$0xff]  ;;  %v11416_v62 = vld [vmem:[#allocation139_spill] sm:$0xff]  ;;  %v7740_v60 = vmul.f32 %v11417_v7, %v7706_v38  ;;  %v11418_v20 = vld [vmem:[#allocation120_spill] sm:$0xff] }
 0x2ce   :  { %11402 = vst [vmem:[#allocation102_spill] sm:$0xff] %v7689_v36  ;;  %v2365_v36 = vsel %vm10970_vm4, %v11409_v15, %v11399_v30  ;;  %v1810_v30 = vmul.f32 %v1808_v48, %v7354_v47  ;;  %v2473_v21 = vsel %vm2469_vm15, %v11416_v62, %v11415_v16  ;;  %v1816_v14 = vadd.f32 %v1812_v45, %v1762_v25  ;;  %v11419_v16 = vld [vmem:[#allocation62_spill] sm:$0xff]  ;;  %v11432_v48 = vld [vmem:[#allocation83_spill] sm:$0xff] }
 0x2cf   :  { %11404 = vst [vmem:[#allocation105_spill] sm:$0xff] %v7696_v42  ;;  %v7714_v42 = vld [vmem:[#allocation6 + $0xe3] ss:$8 sm:$0xf]  ;;  %v1815_v35 = vadd.f32 %v1811_v1, %v1761_v27  ;;  %v1817_v3 = vadd.f32 %v1813_v18, %v1763_v13  ;;  %v11420_v45 = vperm.slane %v7679_v33, 3 }
 0x2d0   :  { %11406 = vst [vmem:[#allocation162_spill] sm:$0xff] %v7700_v54  ;;  %v7722_v54 = vpop.permute.xlu1 %2413  ;;  %v1814_v47 = vadd.f32 %v1810_v30, %v1760_v10  ;;  %v1870_v27 = vadd.f32 %v7505_v49, %v1816_v14  ;;  %v11423_v13 = vld [vmem:[#allocation113_spill] sm:$0xff]  ;;  %v2155_v14 = vsel %vm10952_vm8, %v11418_v20, %v11367_v39 }
 0x2d1   :  { %11408 = vst [vmem:[#allocation163_spill] sm:$0xff] %v7706_v38  ;;  %v1869_v10 = vadd.f32 %v7377_v19, %v1815_v35  ;;  %v1871_v18 = vadd.f32 %v7513_v22, %v1817_v3  ;;  %v7758_v25 = vmul.f32 %v11420_v45, %v2473_v21  ;;  %v11424_v35 = vld [vmem:[#allocation117_spill] sm:$0xff]  ;;  %v11425_v3 = vperm.slane %v7485_v17, 1 }
 0x2d2   :  { %11410 = vst [vmem:[#allocation111_spill] sm:$0xff] %v7714_v42  ;;  %v1924_v22 = vadd.f32 %v7389_v55, %v1870_v27  ;;  %v2470_v21 = vsel %vm2469_vm15, %v11424_v35, %v11416_v62 }
 0x2d3   :  { %11411 = vst [vmem:[#allocation164_spill] sm:$0xff] %v7716_v59  ;;  %v11413_v59 = vperm.slane %v7623_v26, 3  ;;  %v1923_v49 = vadd.f32 %v7524_v53, %v1869_v10  ;;  %v1946_v53 = vpop.permute.xlu0 %1945 }
 0x2d4   :  { %11412 = vst [vmem:[#allocation165_spill] sm:$0xff] %v7722_v54  ;;  %v1868_v54 = vadd.f32 %v11419_v16, %v1814_v47  ;;  %v1925_v47 = vadd.f32 %v7549_v52, %v1871_v18  ;;  %v7787_v52 = vld [vmem:[#allocation6 + $0xe4] ss:$8 sm:$0xf]  ;;  %v1939_v39 = vadd.f32 %v7431_v4, %v1924_v22  ;;  %v1951_v24 = vmul.f32 %v1946_v53, %v11432_v48 }
 0x2d5   :  { %v7730_v31 = vmul.f32 %v11413_v59, %v2365_v36  ;;  %v2156_v36 = vsel %vm10952_vm8, %v11354_v6, %v11418_v20  ;;  %11421 = vst [vmem:[#allocation139_spill] sm:$0xff] %v7758_v25  ;;  %v11422_v6 = vld [vmem:[#allocation125_spill] sm:$0xff]  ;;  %v1938_v10 = vadd.f32 %v7427_v28, %v1923_v49  ;;  %v11430_v18 = vld [vmem:[#allocation84_spill] sm:$0xff]  ;;  %v10953_v28 = vperm.slane %v7546_v0, 3 }
 0x2d6   :  { %v2417_v30 = vsel %vm10972_vm10, %v11423_v13, %v11422_v6  ;;  %v1922_v19 = vadd.f32 %v7538_v51, %v1868_v54  ;;  %v7779_v45 = vmul.f32 %v11425_v3, %v2156_v36  ;;  %v11427_v54 = vld [vmem:[#allocation118_spill] sm:$0xff]  ;;  %v7785_v51 = vpop.permute.xlu2 %2659  ;;  %11428 = vst [vmem:[#allocation120_spill] sm:$0xff] %v7787_v52  ;;  %v1940_v20 = vadd.f32 %v7439_v63, %v1925_v47  ;;  %v11431_v16 = vld [vmem:[#allocation85_spill] sm:$0xff]  ;;  %v11436_v63 = vld [vmem:[#allocation123_spill] sm:$0xff] }
 0x2d7   :  { %11414 = vst [vmem:[#allocation166_spill] sm:$0xff] %v7730_v31  ;;  %v7754_v1 = vmul.f32 %v11417_v7, %v7730_v31  ;;  %v2526_v55 = vsel %vm2523_vm6, %v11427_v54, %v7350_v46  ;;  %v11429_v36 = vld [vmem:[#allocation82_spill] sm:$0xff]  ;;  %v1949_v3 = vmul.f32 %v1946_v53, %v11430_v18  ;;  %v1950_v59 = vmul.f32 %v1946_v53, %v11431_v16  ;;  %v11437_v48 = vld [vmem:[#allocation121_spill] sm:$0xff] }
 0x2d8   :  { %11426 = vst [vmem:[#allocation122_spill] sm:$0xff] %v7779_v45  ;;  %v1937_v62 = vadd.f32 %v7414_v11, %v1922_v19  ;;  %v1948_v27 = vmul.f32 %v1946_v53, %v11429_v36  ;;  %v11433_v31 = vperm.slane %v7485_v17, 2  ;;  %v11435_v11 = vperm.slane %v7714_v42, 0  ;;  %v7805_v4 = vpop.permute.xlu1 %2463  ;;  %v11458_v36 = vld [vmem:[#allocation87_spill] sm:$0xff] }
 0x2d9   :  { %vm2577_vm8 = vcmp.lt.s32.totalorder %v5460_v40, 94  ;;  %v2211_v16 = vsel %vm2208_vm14, %v11436_v63, %v11396_v50  ;;  %v11438_v47 = vperm.slane %v7681_v9, 1  ;;  %v7828_v18 = vmul.f32 %v11393_v41, %v7779_v45  ;;  %v11443_v50 = vld [vmem:[#allocation126_spill] sm:$0xff] }
 0x2da   :  { %v7799_v38 = vmul.f32 %v11433_v31, %v2155_v14  ;;  %v2539_v19 = vmul.f32 %v11435_v11, %v2526_v55  ;;  %v2527_v31 = vsel %vm2523_vm6, %v11437_v48, %v11427_v54  ;;  %v1952_v22 = vadd.f32 %v1948_v27, %v1937_v62 }
 0x2db   :  { %v7818_v14 = vmul.f32 %v11438_v47, %v2417_v30  ;;  %v11439_v55 = vperm.slane %v7679_v33, 2  ;;  %v1953_v54 = vadd.f32 %v1949_v3, %v1938_v10  ;;  %v1954_v11 = vadd.f32 %v1950_v59, %v1939_v39  ;;  %v2015_v39 = vpop.permute.xlu0 %2014 }
 0x2dc   :  { %11434 = vst [vmem:[#allocation62_spill] sm:$0xff] %v7799_v38  ;;  %v1955_v49 = vadd.f32 %v1951_v24, %v1940_v20  ;;  %v7832_v62 = vmul.f32 %v11393_v41, %v7799_v38  ;;  %v7835_v30 = vmul.f32 %v7469_v8, %v2539_v19  ;;  %v11442_v47 = vperm.slane %v7714_v42, 3  ;;  %v11459_v38 = vld [vmem:[#allocation89_spill] sm:$0xff] }
 0x2dd   :  { %v7822_v53 = vmul.f32 %v11439_v55, %v2470_v21  ;;  %v11441_v21 = vperm.slane %v7546_v0, 0  ;;  %v2209_v59 = vsel %vm2208_vm14, %v11395_v34, %v11443_v50  ;;  %v2212_v41 = vsel %vm2208_vm14, %v11443_v50, %v11436_v63  ;;  %v11457_v34 = vld [vmem:[#allocation86_spill] sm:$0xff] }
 0x2de   :  { %v2542_v55 = vmul.f32 %v11442_v47, %v2527_v31  ;;  %v1967_v10 = vadd.f32 %v7308_v32, %v1952_v22  ;;  %v2017_v20 = vmul.f32 %v2015_v39, %v7528_v61  ;;  %v2018_v3 = vmul.f32 %v2015_v39, %v7591_v57  ;;  %v1208_v50 = vpop.xlane.xlu2 %1207 }
 0x2df   :  { %11440 = vst [vmem:[#allocation125_spill] sm:$0xff] %v7822_v53  ;;  %v7839_v27 = vmul.f32 %v11441_v21, %v2211_v16  ;;  %v2019_v19 = vmul.f32 %v2015_v39, %v7595_v44  ;;  %v2020_v16 = vmul.f32 %v2015_v39, %v7532_v29  ;;  %v1968_v31 = vadd.f32 %v7312_v12, %v1953_v54 }
 0x2e0   :  { %v1969_v21 = vadd.f32 %v7330_v5, %v1954_v11  ;;  %v1970_v63 = vadd.f32 %v7347_v23, %v1955_v49  ;;  %v7862_v32 = vmul.f32 %v7469_v8, %v2542_v55  ;;  %v11444_v61 = vperm.slane %v7546_v0, 2  ;;  %v11445_v5 = vld [vmem:[#allocation124_spill] sm:$0xff]  ;;  %v11446_v49 = vld [vmem:[#allocation97_spill] sm:$0xff]  ;;  %v11447_v11 = vld [vmem:[#allocation131_spill] sm:$0xff] }
 0x2e1   :  { %v7870_v44 = vmul.f32 %v10953_v28, %v2212_v41  ;;  %v2021_v57 = vadd.f32 %v2017_v20, %v1967_v10  ;;  %v2022_v29 = vadd.f32 %v2018_v3, %v1968_v31  ;;  %v1209_v54 = vmul.f32 0.001953125, %v1208_v50  ;;  %v7887_v10 = vpop.permute.xlu1 %2493  ;;  %v11449_v20 = vld [vmem:[#allocation98_spill] sm:$0xff]  ;;  %v11451_v31 = vld [vmem:[#allocation144_spill] sm:$0xff] }
 0x2e2   :  { %v7866_v22 = vmul.f32 %v11444_v61, %v2209_v59  ;;  %v2023_v47 = vadd.f32 %v2019_v19, %v1969_v21  ;;  %v2024_v12 = vadd.f32 %v2020_v16, %v1970_v63  ;;  %v7876_v23 = vsel %vm2577_vm8, %v11445_v5, %v7605_v2  ;;  %v11448_v59 = vld [vmem:[#allocation69_spill] sm:$0xff]  ;;  %v11450_v19 = vld [vmem:[#allocation99_spill] sm:$0xff]  ;;  %v11456_v41 = vld [vmem:[#allocation160_spill] sm:$0xff] }
 0x2e3   :  { %v7880_v55 = vmul.f32 %v11447_v11, %v11446_v49  ;;  %v7884_v39 = vmul.f32 %v11447_v11, %v11448_v59  ;;  %v7891_v3 = vmul.f32 %v11447_v11, %v11449_v20  ;;  %v7895_v16 = vmul.f32 %v11447_v11, %v11450_v19  ;;  %v11452_v49 = vld [vmem:[#allocation119_spill] sm:$0xff]  ;;  %v11455_v19 = vld [vmem:[#allocation104_spill] sm:$0xff] }
 0x2e4   :  { %v2309_v21 = vsel %vm10971_vm0, %v11451_v31, %v11397_v58  ;;  %v7901_v63 = vadd.f32 1e-05, %v1209_v54  ;;  %v2310_v50 = vsel %vm10971_vm0, %v11374_v43, %v11451_v31  ;;  %v2362_v61 = vsel %vm10970_vm4, %v7487_v37, %v11409_v15  ;;  %v11453_v59 = vld [vmem:[#allocation59_spill] sm:$0xff]  ;;  %v2084_v31 = vpop.permute.xlu0 %2083  ;;  %v11460_v0 = vld [vmem:[#allocation88_spill] sm:$0xff] }
 0x2e5   :  { %v2363_v11 = vsel %vm10970_vm4, %v11452_v49, %v7487_v37  ;;  %v2075_v20 = vadd.f32 %v11453_v59, %v2021_v57  ;;  %v11454_v58 = vld [vmem:[#allocation55_spill] sm:$0xff]  ;;  %v2077_v28 = vadd.f32 %v11455_v19, %v2023_v47  ;;  %v2078_v43 = vadd.f32 %v11456_v41, %v2024_v12 }
 0x2e6   :  { %5174 = vrsqrt.f32 %v7901_v63  ;;  %v2076_v54 = vadd.f32 %v11454_v58, %v2022_v29  ;;  %v2086_v24 = vmul.f32 %v2084_v31, %v11457_v34  ;;  %v2087_v15 = vmul.f32 %v2084_v31, %v11458_v36  ;;  %v11469_v47 = vld [vmem:[#allocation75_spill] sm:$0xff] }
 0x2e7   :  { %v2088_v45 = vmul.f32 %v2084_v31, %v11459_v38  ;;  %v2089_v17 = vmul.f32 %v2084_v31, %v11460_v0  ;;  %v11461_v37 = vperm.slane %v7535_v56, 0  ;;  %v11462_v49 = vperm.slane %v7623_v26, 1  ;;  %v11467_v31 = vld [vmem:[#allocation73_spill] sm:$0xff] }
 0x2e8   :  { %v2090_v12 = vadd.f32 %v2086_v24, %v2075_v20  ;;  %v2091_v41 = vadd.f32 %v2087_v15, %v2076_v54  ;;  %v11464_v36 = vperm.slane %v7535_v56, 1  ;;  %v11465_v0 = vperm.slane %v7623_v26, 2  ;;  %v11470_v20 = vld [vmem:[#allocation76_spill] sm:$0xff]  ;;  %v11473_v15 = vld [vmem:[#allocation161_spill] sm:$0xff] }
 0x2e9   :  { %v2323_v57 = vmul.f32 %v11461_v37, %v2310_v50  ;;  %v7928_v59 = vmul.f32 %v11462_v49, %v2363_v11  ;;  %v2092_v34 = vadd.f32 %v2088_v45, %v2077_v28  ;;  %v2093_v58 = vadd.f32 %v2089_v17, %v2078_v43  ;;  %v11468_v49 = vld [vmem:[#allocation74_spill] sm:$0xff]  ;;  %v11471_v28 = vld [vmem:[#allocation148_spill] sm:$0xff]  ;;  %v11481_v26 = vld [vmem:[#allocation105_spill] sm:$0xff] }
 0x2ea   :  { %v2324_v38 = vmul.f32 %v11464_v36, %v2309_v21  ;;  %v7936_v19 = vmul.f32 %v11465_v0, %v2362_v61  ;;  %v2116_v37 = vadd.f32 %v11467_v31, %v2090_v12  ;;  %v2117_v29 = vadd.f32 %v11468_v49, %v2091_v41  ;;  %v11472_v61 = vld [vmem:[#allocation162_spill] sm:$0xff]  ;;  %v2520_v41 = vpop.permute.xlu1 %2519  ;;  %v11475_v36 = vld [vmem:[#allocation91_spill] sm:$0xff]  ;;  %v11476_v31 = vld [vmem:[#allocation112_spill] sm:$0xff] }
 0x2eb   :  { %11463 = vst [vmem:[#allocation113_spill] sm:$0xff] %v7928_v59  ;;  %v2118_v24 = vadd.f32 %v11469_v47, %v2092_v34  ;;  %v2119_v45 = vadd.f32 %v11470_v20, %v2093_v58  ;;  %v7945_v54 = vmul.f32 %v11471_v28, %v2323_v57  ;;  %v7952_v43 = vmul.f32 %v11471_v28, %v11472_v61  ;;  %v11474_v57 = vld [vmem:[#allocation90_spill] sm:$0xff]  ;;  %v11477_v20 = vld [vmem:[#allocation92_spill] sm:$0xff] }
 0x2ec   :  { %11466 = vst [vmem:[#allocation117_spill] sm:$0xff] %v7936_v19  ;;  %v5175_v17 = vpop.eup %5174  ;;  %v7948_v21 = vmul.f32 %v11471_v28, %v2324_v38  ;;  %v7956_v12 = vmul.f32 %v11471_v28, %v11473_v15  ;;  %v7960_v47 = vmul.f32 %v11417_v7, %v7928_v59  ;;  %v2132_v58 = vadd.f32 %v11474_v57, %v2117_v29  ;;  %v2233_v61 = vpop.permute.xlu0 %2232  ;;  %v11478_v15 = vld [vmem:[#allocation116_spill] sm:$0xff]  ;;  %v11479_v57 = vld [vmem:[#allocation102_spill] sm:$0xff] }
 0x2ed   :  { %v1212_v34 = vmul.f32 %v5175_v17, %v7901_v63  ;;  %v2133_v38 = vadd.f32 %v11475_v36, %v2118_v24  ;;  %v7967_v0 = vmul.f32 %v11417_v7, %v7936_v19  ;;  %v2418_v49 = vsel %vm10972_vm10, %v11476_v31, %v11423_v13  ;;  %v11480_v36 = vld [vmem:[#allocation61_spill] sm:$0xff] }
 0x2ee   :  { %v2134_v28 = vadd.f32 %v11477_v20, %v2119_v45  ;;  %v2131_v11 = vadd.f32 %v11478_v15, %v2116_v37  ;;  %v2186_v59 = vadd.f32 %v7828_v18, %v2132_v58  ;;  %v2235_v24 = vmul.f32 %v2233_v61, %v7839_v27 }
 0x2ef   :  { %v1213_v50 = vmul.f32 %v5175_v17, %v1212_v34  ;;  %v2187_v29 = vadd.f32 %v7832_v62, %v2133_v38  ;;  %v2236_v56 = vmul.f32 %v2233_v61, %v11481_v26  ;;  %v2237_v13 = vmul.f32 %v2233_v61, %v7866_v22  ;;  %v11483_v62 = vld [vmem:[#allocation165_spill] sm:$0xff] }
 0x2f0   :  { %v2188_v7 = vadd.f32 %v11479_v57, %v2134_v28  ;;  %v2185_v19 = vadd.f32 %v11480_v36, %v2131_v11  ;;  %v11482_v45 = vperm.slane %v7681_v9, 0  ;;  %v10976_v37 = vperm.slane %v7714_v42, 1  ;;  %v11484_v28 = vld [vmem:[#allocation54_spill] sm:$0xff]  ;;  %v11486_v57 = vld [vmem:[#allocation96_spill] sm:$0xff] }
 0x2f1   :  { %v1214_v34 = vmul.f32 0.5, %v1213_v50  ;;  %v2238_v18 = vmul.f32 %v2233_v61, %v7870_v44  ;;  %v2416_v27 = vsel %vm10972_vm10, %v11422_v6, %v11483_v62  ;;  %v2240_v11 = vadd.f32 %v2236_v56, %v2186_v59  ;;  %v11485_v61 = vld [vmem:[#allocation78_spill] sm:$0xff] }
 0x2f2   :  { %v7984_v20 = vmul.f32 %v11482_v45, %v2418_v49  ;;  %v2239_v58 = vadd.f32 %v2235_v24, %v2185_v19  ;;  %v2241_v38 = vadd.f32 %v2237_v13, %v2187_v29  ;;  %v2419_v26 = vsel %vm10972_vm10, %v11483_v62, %v11476_v31  ;;  %v11487_v6 = vld [vmem:[#allocation130_spill] sm:$0xff]  ;;  %v2570_v62 = vpop.permute.xlu1 %2569 }
 0x2f3   :  { %v1215_v22 = vsub.f32 1.5, %v1214_v34  ;;  %vm1218_vm4 = vweird.f32 %v5175_v17  ;;  %v2242_v49 = vadd.f32 %v2238_v18, %v2188_v7  ;;  %v10977_v50 = vperm.slane %v7714_v42, 2  ;;  %v11488_v19 = vld [vmem:[#allocation70_spill] sm:$0xff] }
 0x2f4   :  { %v2254_v44 = vadd.f32 %v11484_v28, %v2239_v58  ;;  %v2255_v15 = vadd.f32 %v11485_v61, %v2240_v11  ;;  %v2256_v36 = vadd.f32 %v11486_v57, %v2241_v38  ;;  %v2472_v56 = vsel %vm2469_vm15, %v11487_v6, %v7805_v4  ;;  %v2278_v34 = vpop.permute.xlu0 %2277  ;;  %v11491_v11 = vld [vmem:[#allocation80_spill] sm:$0xff]  ;;  %v11495_v28 = vld [vmem:[#allocation107_spill] sm:$0xff]  ;;  %v11496_v57 = vld [vmem:[#allocation53_spill] sm:$0xff] }
 0x2f5   :  { %v1216_v59 = vmul.f32 %v5175_v17, %v1215_v22  ;;  %vm1217_vm0 = vweird.f32 %v7901_v63  ;;  %v2257_v31 = vadd.f32 %v11488_v19, %v2242_v49  ;;  %v11489_v29 = vperm.slane %v7681_v9, 2  ;;  %v11492_v22 = vld [vmem:[#allocation79_spill] sm:$0xff]  ;;  %v11530_v42 = vld [vmem:[#allocation26_spill] sm:$0xff] }
 0x2f6   :  { %v11490_v7 = vperm.slane %v7681_v9, 3  ;;  %v2471_v45 = vsel %vm2469_vm15, %v7805_v4, %v11424_v35  ;;  %vm1219_vm10 = vmor %vm1217_vm0, %vm1218_vm4  ;;  %v2269_v18 = vadd.f32 %v7880_v55, %v2254_v44  ;;  %v2270_v63 = vadd.f32 %v7884_v39, %v2255_v15  ;;  %v11497_v44 = vld [vmem:[#allocation100_spill] sm:$0xff]  ;;  %v11531_v9 = vld [vmem:[#allocation27_spill] sm:$0xff] }
 0x2f7   :  { %v2433_v24 = vmul.f32 %v11489_v29, %v2416_v27  ;;  %v1220_v58 = vsel %vm1219_vm10, %v5175_v17, %v1216_v59  ;;  %v2280_v38 = vmul.f32 %v2278_v34, %v11491_v11  ;;  %v2281_v27 = vmul.f32 %v2278_v34, %v11492_v22  ;;  %v11500_v11 = vld [vmem:[#allocation108_spill] sm:$0xff] }
 0x2f8   :  { %v2434_v13 = vmul.f32 %v11490_v7, %v2419_v26  ;;  %v11493_v49 = vperm.slane %v7679_v33, 0  ;;  %v1221_v61 = vmul.f32 %v1220_v58, %v11495_v28  ;;  %v2271_v35 = vadd.f32 %v7891_v3, %v2256_v36 }
 0x2f9   :  { %v2272_v4 = vadd.f32 %v7895_v16, %v2257_v31  ;;  %v2282_v55 = vmul.f32 %v2278_v34, %v11496_v57  ;;  %v2283_v17 = vmul.f32 %v2278_v34, %v11497_v44  ;;  %v2284_v6 = vadd.f32 %v2280_v38, %v2269_v18 }
 0x2fa   :  { %v8020_v26 = vmul.f32 %v11493_v49, %v2472_v56  ;;  %v2285_v39 = vadd.f32 %v2281_v27, %v2270_v63  ;;  %v11498_v15 = vperm.slane %v7679_v33, 1  ;;  %v2524_v56 = vsel %vm2523_vm6, %v2520_v41, %v11437_v48 }
 0x2fb   :  { %v2525_v3 = vsel %vm2523_vm6, %v7350_v46, %v2520_v41  ;;  %v8037_v36 = vmax.f32 %v1221_v61, 0.0  ;;  %v2286_v16 = vadd.f32 %v2282_v55, %v2271_v35  ;;  %v2287_v19 = vadd.f32 %v2283_v17, %v2272_v4 }
 0x2fc   :  { %11494 = vst [vmem:[#allocation118_spill] sm:$0xff] %v8020_v26  ;;  %v8029_v59 = vmul.f32 %v11498_v15, %v2471_v45  ;;  %v2338_v31 = vadd.f32 %v7945_v54, %v2284_v6  ;;  %v2339_v29 = vadd.f32 %v7948_v21, %v2285_v39  ;;  %v2496_v7 = vmul.f32 %v7887_v10, %v8020_v26  ;;  %v2440_v27 = vpop.permute.xlu0 %2439  ;;  %v11528_v26 = vld [vmem:[#allocation21_spill] sm:$0xff] }
 0x2fd   :  { %v2498_v48 = vmul.f32 %v7887_v10, %v7822_v53  ;;  %v10973_v34 = vperm.slane %v7787_v52, 0  ;;  %1229 = vrot.lane.b32.xlu0 %v8037_v36, %s5257_s20  ;;  %v2499_v46 = vmul.f32 %v7887_v10, %v7758_v25  ;;  %v2540_v54 = vmul.f32 %v10976_v37, %v2525_v3 }
 0x2fe   :  { %11499 = vst [vmem:[#allocation82_spill] sm:$0xff] %v8029_v59  ;;  %v2497_v45 = vmul.f32 %v7887_v10, %v8029_v59  ;;  %v2340_v21 = vadd.f32 %v7952_v43, %v2286_v16  ;;  %v2341_v41 = vadd.f32 %v7956_v12, %v2287_v19  ;;  %v2541_v18 = vmul.f32 %v10977_v50, %v2524_v56  ;;  %v2576_v10 = vpop.permute.xlu1 %2575  ;;  %v11505_v16 = vld [vmem:[#allocation110_spill] sm:$0xff]  ;;  %v11524_v50 = vld [vmem:[#allocation20_spill] sm:$0xff] }
 0x2ff   :  { %v2580_v63 = vsel %vm2577_vm8, %v2570_v62, %v11445_v5  ;;  %v1222_v38 = vmul.f32 %v1220_v58, %v11500_v11  ;;  %v10974_v22 = vperm.slane %v7787_v52, 2  ;;  %v2392_v49 = vadd.f32 %v7740_v60, %v2338_v31 }
 0x300   :  { %v2393_v28 = vadd.f32 %v7960_v47, %v2339_v29  ;;  %v2442_v43 = vmul.f32 %v2440_v27, %v7984_v20  ;;  %v2443_v12 = vmul.f32 %v2440_v27, %v7818_v14  ;;  %v2394_v61 = vadd.f32 %v7967_v0, %v2340_v21 }
 0x301   :  { %v2395_v35 = vadd.f32 %v7754_v1, %v2341_v41  ;;  %v2444_v4 = vmul.f32 %v2440_v27, %v2433_v24  ;;  %v2445_v5 = vmul.f32 %v2440_v27, %v2434_v13  ;;  %v10975_v57 = vperm.slane %v7787_v52, 3 }
 0x302   :  { %v2578_v55 = vsel %vm2577_vm8, %v7605_v2, %v2576_v10  ;;  %v2446_v44 = vadd.f32 %v2442_v43, %v2392_v49  ;;  %v2447_v60 = vadd.f32 %v2443_v12, %v2393_v28  ;;  %v8073_v17 = vmax.f32 %v1222_v38, 0.0 }
 0x303   :  { %v2581_v47 = vsel %vm2577_vm8, %v2576_v10, %v2570_v62  ;;  %v2448_v14 = vadd.f32 %v2444_v4, %v2394_v61  ;;  %v2449_v20 = vadd.f32 %v2445_v5, %v2395_v35  ;;  %v11501_v1 = vperm.slane %v7787_v52, 1  ;;  %v11504_v62 = vld [vmem:[#allocation109_spill] sm:$0xff]  ;;  %v11508_v4 = vld [vmem:[#allocation164_spill] sm:$0xff] }
 0x304   :  { %v2551_v24 = vmul.f32 %v7469_v8, %v2540_v54  ;;  %v2500_v13 = vadd.f32 %v2496_v7, %v2446_v44  ;;  %v2501_v6 = vadd.f32 %v2497_v45, %v2447_v60  ;;  %v2552_v2 = vmul.f32 %v7469_v8, %v2541_v18  ;;  %v2602_v31 = vpop.permute.xlu0 %2601 }
 0x305   :  { %v8080_v0 = vmul.f32 %v11501_v1, %v7876_v23  ;;  %v8086_v39 = vmul.f32 %v10973_v34, %v2580_v63  ;;  %v2502_v15 = vadd.f32 %v2498_v48, %v2448_v14  ;;  %v2503_v56 = vadd.f32 %v2499_v46, %v2449_v20  ;;  %1231 = vrot.lane.b32.xlu0 %v8073_v17, %s5257_s20 }
 0x306   :  { %v1223_v3 = vmul.f32 %v1220_v58, %v11504_v62  ;;  %v1224_v23 = vmul.f32 %v1220_v58, %v11505_v16  ;;  %v8094_v19 = vmul.f32 %v10974_v22, %v2578_v55  ;;  %v8098_v8 = vmul.f32 %v10975_v57, %v2581_v47  ;;  %v2628_v28 = vpop.permute.xlu1 %2627 }
 0x307   :  { %11502 = vst [vmem:[#allocation84_spill] sm:$0xff] %v8080_v0  ;;  %v2554_v29 = vadd.f32 %v7835_v30, %v2500_v13  ;;  %v2555_v7 = vadd.f32 %v2551_v24, %v2501_v6  ;;  %v2556_v45 = vadd.f32 %v2552_v2, %v2502_v15  ;;  %v2557_v48 = vadd.f32 %v7862_v32, %v2503_v56  ;;  %v11509_v15 = vld [vmem:[#allocation127_spill] sm:$0xff] }
 0x308   :  { %11503 = vst [vmem:[#allocation85_spill] sm:$0xff] %v8086_v39  ;;  %v2604_v46 = vmul.f32 %v2602_v31, %v8086_v39  ;;  %v2605_v54 = vmul.f32 %v2602_v31, %v8080_v0  ;;  %v2606_v58 = vmul.f32 %v2602_v31, %v8094_v19  ;;  %v2607_v21 = vmul.f32 %v2602_v31, %v8098_v8  ;;  %v11526_v39 = vld [vmem:[#allocation23_spill] sm:$0xff] }
 0x309   :  { %11506 = vst [vmem:[#allocation83_spill] sm:$0xff] %v8094_v19  ;;  %v8106_v38 = vmax.f32 %v1223_v3, 0.0  ;;  %v8108_v27 = vmax.f32 %v1224_v23, 0.0  ;;  %v11525_v19 = vld [vmem:[#allocation19_spill] sm:$0xff] }
 0x30a   :  { %11507 = vst [vmem:[#allocation123_spill] sm:$0xff] %v8098_v8  ;;  %v2608_v41 = vadd.f32 %v2604_v46, %v2554_v29  ;;  %v2609_v18 = vadd.f32 %v2605_v54, %v2555_v7  ;;  %v2610_v63 = vadd.f32 %v2606_v58, %v2556_v45  ;;  %v2611_v11 = vadd.f32 %v2607_v21, %v2557_v48 }
 0x30c   :  { %v2618_v30 = vperm.slane %v2608_v41, 0  ;;  %v2619_v10 = vperm.slane %v2609_v18, 0  ;;  %v2620_v49 = vperm.slane %v2610_v63, 0  ;;  %v2621_v32 = vperm.slane %v2611_v11, 0 }
 0x30d   :  { %1233 = vrot.lane.b32.xlu0 %v8106_v38, %s5257_s20  ;;  %v2630_v43 = vperm.slane %v2608_v41, 1  ;;  %v2631_v12 = vperm.slane %v2609_v18, 1  ;;  %v2632_v61 = vperm.slane %v2610_v63, 1  ;;  %v2633_v35 = vperm.slane %v2611_v11, 1 }
 0x30e   :  { %v2622_v5 = vmul.f32 %v2618_v30, %v11508_v4  ;;  %v2623_v55 = vmul.f32 %v2619_v10, %v11508_v4  ;;  %v2624_v44 = vmul.f32 %v2620_v49, %v11508_v4  ;;  %v2625_v60 = vmul.f32 %v2621_v32, %v11508_v4 }
 0x30f   :  { %v2646_v47 = vperm.slane %v2608_v41, 2  ;;  %v2647_v14 = vperm.slane %v2609_v18, 2  ;;  %v2634_v20 = vmul.f32 %v2630_v43, %v2628_v28  ;;  %v2635_v1 = vmul.f32 %v2631_v12, %v2628_v28 }
 0x310   :  { %v2636_v24 = vmul.f32 %v2632_v61, %v2628_v28  ;;  %v2637_v13 = vmul.f32 %v2633_v35, %v2628_v28  ;;  %v2648_v6 = vperm.slane %v2610_v63, 2  ;;  %v2649_v2 = vperm.slane %v2611_v11, 2 }
 0x311   :  { %v2650_v56 = vmul.f32 %v2646_v47, %v11509_v15  ;;  %v2651_v62 = vmul.f32 %v2647_v14, %v11509_v15  ;;  %v2638_v3 = vadd.f32 %v2634_v20, %v2622_v5  ;;  %v2639_v16 = vadd.f32 %v2635_v1, %v2623_v55  ;;  %v5043_v47 = vld [vmem:[%s10689_s10 + $0x14] sm:$0xf] }
 0x312   :  { %v2640_v23 = vadd.f32 %v2636_v24, %v2624_v44  ;;  %v2641_v31 = vadd.f32 %v2637_v13, %v2625_v60  ;;  %v2652_v29 = vmul.f32 %v2648_v6, %v11509_v15  ;;  %v2653_v7 = vmul.f32 %v2649_v2, %v11509_v15  ;;  %v5040_v60 = vld [vmem:[%s10689_s10 + $0x8] sm:$0xf] }
 0x313   :  { %v2654_v45 = vadd.f32 %v2650_v56, %v2638_v3  ;;  %v2655_v48 = vadd.f32 %v2651_v62, %v2639_v16  ;;  %v2662_v46 = vperm.slane %v2608_v41, 3  ;;  %v2663_v54 = vperm.slane %v2609_v18, 3 }
 0x314   :  { %v2656_v58 = vadd.f32 %v2652_v29, %v2640_v23  ;;  %v2664_v21 = vperm.slane %v2610_v63, 3  ;;  %v2665_v30 = vperm.slane %v2611_v11, 3  ;;  %v2657_v10 = vadd.f32 %v2653_v7, %v2641_v31 }
 0x315   :  { %1235 = vrot.lane.b32.xlu0 %v8108_v27, %s5257_s20  ;;  %v2666_v49 = vmul.f32 %v2662_v46, %v7785_v51  ;;  %v2667_v32 = vmul.f32 %v2663_v54, %v7785_v51  ;;  %v5042_v46 = vld [vmem:[%s10689_s10 + $0x10] sm:$0xf]  ;;  %v5041_v54 = vld [vmem:[%s10689_s10 + $0xc] sm:$0xf] }
 0x316   :  { %v2668_v28 = vmul.f32 %v2664_v21, %v7785_v51  ;;  %v2669_v43 = vmul.f32 %v2665_v30, %v7785_v51  ;;  %v2737_v51 = vld [vmem:[%s10689_s10] sm:$0xf]  ;;  %v5044_v30 = vld [vmem:[%s10689_s10 + $0x18] sm:$0xf] }
 0x317   :  { %v2670_v12 = vadd.f32 %v2666_v49, %v2654_v45  ;;  %v2671_v61 = vadd.f32 %v2667_v32, %v2655_v48  ;;  %v5039_v48 = vld [vmem:[%s10689_s10 + $0x4] sm:$0xf] }
 0x318   :  { %v2672_v35 = vadd.f32 %v2668_v28, %v2656_v58  ;;  %v2673_v41 = vadd.f32 %v2669_v43, %v2657_v10  ;;  %v5045_v58 = vld [vmem:[%s10689_s10 + $0x1c] sm:$0xf] }
 0x319   :  { %v2674_v18 = vsel %vm137_vm11, %v2670_v12, 0.0  ;;  %v2675_v63 = vsel %vm137_vm11, %v2671_v61, 0.0 }
 0x31a   :  { %v2676_v11 = vadd.f32 %v2675_v63, %v2674_v18  ;;  %v2677_v4 = vsel %vm137_vm11, %v2672_v35, 0.0  ;;  %v2679_v55 = vsel %vm137_vm11, %v2673_v41, 0.0 }
 0x31c   :  { %v2678_v5 = vadd.f32 %v2677_v4, %v2676_v11 }
 0x31d   :  { %1259 = vrot.lane.b32.xlu0 %v8106_v38, %s5258_s21 }
 0x31e   :  { %v2680_v44 = vadd.f32 %v2679_v55, %v2678_v5 }
 0x320   :  { %2681 = vadd.xlane.f32.xlu1 %v2680_v44 }
 0x325   :  { %1261 = vrot.lane.b32.xlu0 %v8108_v27, %s5258_s21 }
 0x32d   :  { %1288 = vrot.lane.b32.xlu0 %v8073_v17, %s5259_s22 }
 0x335   :  { %1321 = vrot.lane.b32.xlu0 %v8106_v38, %s5260_s23 }
 0x339   :  { %1257 = vrot.lane.b32.xlu1 %v8073_v17, %s5258_s21 }
 0x33d   :  { %1367 = vrot.lane.b32.xlu0 %v8106_v38, %s5261_s24 }
 0x341   :  { %1286 = vrot.lane.b32.xlu1 %v8037_v36, %s5259_s22 }
 0x345   :  { %1394 = vrot.lane.b32.xlu0 %v8037_v36, %s5262_s25 }
 0x349   :  { %1292 = vrot.lane.b32.xlu1 %v8108_v27, %s5259_s22 }
 0x34d   :  { %1400 = vrot.lane.b32.xlu0 %v8108_v27, %s5262_s25 }
 0x351   :  { %1319 = vrot.lane.b32.xlu1 %v8073_v17, %s5260_s23 }
 0x355   :  { %1427 = vrot.lane.b32.xlu0 %v8073_v17, %s5263_s26 }
 0x359   :  { %1365 = vrot.lane.b32.xlu1 %v8073_v17, %s5261_s24 }
 0x35d   :  { %1460 = vrot.lane.b32.xlu0 %v8106_v38, %s5264_s27 }
 0x361   :  { %1398 = vrot.lane.b32.xlu1 %v8106_v38, %s5262_s25 }
 0x365   :  { %2740 = vperm.xlu0 %5155, %v2737_v51  }
 0x369   :  { %1425 = vrot.lane.b32.xlu1 %v8037_v36, %s5263_s26 }
 0x36d   :  { %2798 = vperm.xlu0 %5155, %v5040_v60  }
 0x36f   :  { %v8217_v21 = vpop.permute.xlu0 %1229 }
 0x371   :  { %1431 = vrot.lane.b32.xlu1 %v8108_v27, %s5263_s26 }
 0x375   :  { %2891 = vperm.xlu0 %5155, %v5043_v47  }
 0x377   :  { %v8222_v10 = vpop.permute.xlu0 %1231 }
 0x379   :  { %1458 = vrot.lane.b32.xlu1 %v8073_v17, %s5264_s27 }
 0x37f   :  { %v8226_v43 = vpop.permute.xlu0 %1233 }
 0x381   :  { %2767 = vperm.xlu1 %5157, %v5039_v48  }
 0x389   :  { %2860 = vperm.xlu1 %5157, %v5042_v46  }
 0x391   :  { %2953 = vperm.xlu1 %5157, %v5045_v58  }
 0x393   :  { %v2682_v14 = vpop.xlane.xlu1 %2681 }
 0x394   :  { %v2683_v20 = vmul.f32 0.001953125, %v2682_v14 }
 0x396   :  { %v2684_v1 = vsub.f32 %v2670_v12, %v2683_v20  ;;  %v2685_v24 = vsub.f32 %v2671_v61, %v2683_v20  ;;  %v8175_v13 = vsub.f32 %v2672_v35, %v2683_v20  ;;  %v8177_v6 = vsub.f32 %v2673_v41, %v2683_v20  ;;  %v8230_v41 = vpop.permute.xlu0 %1235 }
 0x398   :  { %v2688_v2 = vmul.f32 %v2684_v1, %v2684_v1  ;;  %v2689_v15 = vmul.f32 %v2685_v24, %v2685_v24  ;;  %v2690_v56 = vmul.f32 %v8175_v13, %v8175_v13  ;;  %v2691_v62 = vmul.f32 %v8177_v6, %v8177_v6 }
 0x39a   :  { %v2692_v3 = vsel %vm137_vm11, %v2688_v2, 0.0  ;;  %v2693_v16 = vsel %vm137_vm11, %v2689_v15, 0.0  ;;  %v2695_v31 = vsel %vm137_vm11, %v2690_v56, 0.0  ;;  %v2697_v7 = vsel %vm137_vm11, %v2691_v62, 0.0 }
 0x39b   :  { %v2694_v23 = vadd.f32 %v2693_v16, %v2692_v3 }
 0x39d   :  { %v2696_v29 = vadd.f32 %v2695_v31, %v2694_v23 }
 0x39e   :  { %v1260_v60 = vpop.permute.xlu0 %1259 }
 0x39f   :  { %v2698_v45 = vadd.f32 %v2697_v7, %v2696_v29 }
 0x3a1   :  { %2699 = vadd.xlane.f32.xlu2 %v2698_v45 }
 0x3a6   :  { %v1262_v56 = vpop.permute.xlu0 %1261 }
 0x3ab   :  { %v1258_v14 = vpop.permute.xlu1 %1257 }
 0x3ae   :  { %v1289_v23 = vpop.permute.xlu0 %1288 }
 0x3b3   :  { %v1287_v62 = vpop.permute.xlu1 %1286 }
 0x3b9   :  { %1255 = vrot.lane.b32.xlu2 %v8037_v36, %s5258_s21 }
 0x3bb   :  { %v8268_v31 = vpop.permute.xlu1 %1292 }
 0x3c1   :  { %1290 = vrot.lane.b32.xlu2 %v8106_v38, %s5259_s22 }
 0x3c3   :  { %v1320_v7 = vpop.permute.xlu1 %1319 }
 0x3c9   :  { %1317 = vrot.lane.b32.xlu2 %v8037_v36, %s5260_s23 }
 0x3cb   :  { %v8290_v46 = vpop.permute.xlu1 %1365 }
 0x3d1   :  { %1323 = vrot.lane.b32.xlu2 %v8108_v27, %s5260_s23 }
 0x3d9   :  { %1363 = vrot.lane.b32.xlu2 %v8037_v36, %s5261_s24 }
 0x3e1   :  { %1369 = vrot.lane.b32.xlu2 %v8108_v27, %s5261_s24 }
 0x3e9   :  { %1396 = vrot.lane.b32.xlu2 %v8073_v17, %s5262_s25 }
 0x3f1   :  { %1429 = vrot.lane.b32.xlu2 %v8106_v38, %s5263_s26 }
 0x3f9   :  { %1456 = vrot.lane.b32.xlu2 %v8037_v36, %s5264_s27 }
 0x401   :  { %2829 = vperm.xlu2 %5158, %v5041_v54  }
 0x409   :  { %2922 = vperm.xlu2 %5158, %v5044_v30   ;;  %v8302_v30 = vpop.permute.xlu1 %1398 }
 0x411   :  { %1462 = vrot.lane.b32.xlu2 %v8108_v27, %s5264_s27 }
 0x414   :  { %v2700_v49 = vpop.xlane.xlu2 %2699 }
 0x415   :  { %v2701_v32 = vmul.f32 0.001953125, %v2700_v49 }
 0x417   :  { %v2702_v28 = vadd.f32 1e-05, %v2701_v32 }
 0x419   :  { %5176 = vrsqrt.f32 %v2702_v28  ;;  %vm2709_vm0 = vweird.f32 %v2702_v28 }
 0x41c   :  { %v8228_v12 = vpop.permute.xlu2 %1255 }
 0x41f   :  { %v5177_v61 = vpop.eup %5176 }
 0x420   :  { %v2704_v35 = vmul.f32 %v5177_v61, %v2702_v28  ;;  %vm2710_vm10 = vweird.f32 %v5177_v61  ;;  %v8320_v28 = vpop.permute.xlu1 %1425 }
 0x421   :  { %vm2711_vm4 = vmor %vm2709_vm0, %vm2710_vm10  ;;  %vm11594_vm10 = vcmp.lt.s32.totalorder %v5460_v40, 34  ;;  %vm11595_vm0 = vcmp.lt.s32.totalorder %v5460_v40, 32 }
 0x422   :  { %v2705_v18 = vmul.f32 %v5177_v61, %v2704_v35  ;;  %v1265_v35 = vsel %vm188_vm1, %v8228_v12, %v1258_v14 }
 0x424   :  { %v2706_v63 = vmul.f32 0.5, %v2705_v18  ;;  %v8232_v11 = vpop.permute.xlu2 %1290  ;;  %v1266_v18 = vsel %vm188_vm1, %v1262_v56, %v8228_v12  ;;  %v1263_v12 = vsel %vm188_vm1, %v1260_v60, %v1262_v56  ;;  %v11521_v56 = vld [vmem:[#allocation16_spill] sm:$0xff] }
 0x425   :  { %v1270_v8 = vmul.f32 %v1263_v12, %v11524_v50 }
 0x426   :  { %v2707_v4 = vsub.f32 1.5, %v2706_v63  ;;  %v11516_v63 = vld [vmem:[#allocation14_spill] sm:$0xff] }
 0x428   :  { %v2708_v5 = vmul.f32 %v5177_v61, %v2707_v4  ;;  %v8391_v25 = vpop.permute.xlu1 %1431 }
 0x42a   :  { %v2712_v55 = vsel %vm2711_vm4, %v5177_v61, %v2708_v5  ;;  %v1239_v61 = vsel %vm110_vm5, %v8217_v21, %v8222_v10  ;;  %v1238_v5 = vsel %vm110_vm5, %v8222_v10, %v8226_v43  ;;  %v1264_v10 = vsel %vm188_vm1, %v1258_v14, %v1260_v60  ;;  %v11522_v14 = vld [vmem:[#allocation132_spill] sm:$0xff] }
 0x42b   :  { %v2713_v44 = vmul.f32 %v2712_v55, %v2684_v1  ;;  %v2714_v51 = vmul.f32 %v2712_v55, %v2685_v24  ;;  %v2715_v1 = vmul.f32 %v2712_v55, %v8175_v13  ;;  %v2716_v3 = vmul.f32 %v2712_v55, %v8177_v6  ;;  %v8278_v6 = vpop.permute.xlu0 %1321 }
 0x42c   :  { %v8234_v47 = vpop.permute.xlu2 %1317  ;;  %v1242_v4 = vmul.f32 %v1239_v61, %v11516_v63  ;;  %v1240_v55 = vsel %vm110_vm5, %v8230_v41, %v8217_v21  ;;  %v11518_v61 = vld [vmem:[#allocation18_spill] sm:$0xff]  ;;  %v11519_v21 = vld [vmem:[#allocation15_spill] sm:$0xff]  ;;  %vm11596_vm4 = vcmp.lt.s32.totalorder %v5460_v40, 33 }
 0x42d   :  { %v8236_v20 = vmax.f32 %v2713_v44, 0.0  ;;  %v8238_v2 = vmax.f32 %v2714_v51, 0.0  ;;  %v8249_v15 = vmax.f32 %v2715_v1, 0.0  ;;  %v8260_v13 = vmax.f32 %v2716_v3, 0.0  ;;  %v11517_v1 = vld [vmem:[#allocation147_spill] sm:$0xff] }
 0x42e   :  { %v1237_v51 = vsel %vm110_vm5, %v8226_v43, %v8230_v41  ;;  %v8351_v3 = vmul.f32 %v11517_v1, %v8073_v17  ;;  %v1267_v34 = vmul.f32 %v1266_v18, %v11518_v61  ;;  %v1268_v22 = vmul.f32 %v1265_v35, %v11519_v21  ;;  %v11520_v43 = vld [vmem:[#allocation17_spill] sm:$0xff] }
 0x42f   :  { %2749 = vrot.lane.b32.xlu2 %v8238_v2, %s11510_s5  ;;  %2747 = vrot.lane.b32.xlu1 %v8236_v20, %s11510_s5  ;;  %v1243_v41 = vmul.f32 %v1238_v5, %v11520_v43  ;;  %v1241_v57 = vmul.f32 %v1240_v55, %v11521_v56  ;;  %v1296_v17 = vsel %vm265_vm9, %v1287_v62, %v1289_v23  ;;  %v11523_v18 = vld [vmem:[#allocation13_spill] sm:$0xff] }
 0x430   :  { %2721 = vrot.lane.b32.xlu0 %v8236_v20, %s11511_s29  ;;  %v8367_v60 = vmul.f32 %v11517_v1, %v8037_v36  ;;  %v1252_v35 = vmul.f32 %v11522_v14, %v1242_v4  ;;  %v1244_v37 = vmul.f32 %v1237_v51, %v11523_v18  ;;  %v1297_v5 = vsel %vm265_vm9, %v8268_v31, %v1287_v62 }
 0x431   :  { %v8378_v55 = vmul.f32 %v11517_v1, %v8106_v38  ;;  %v1269_v36 = vmul.f32 %v1264_v10, %v11525_v19  ;;  %v1295_v4 = vsel %vm265_vm9, %v1289_v23, %v8232_v11  ;;  %v1327_v51 = vsel %vm342_vm7, %v8234_v47, %v1320_v7  ;;  %v11527_v38 = vld [vmem:[#allocation56_spill] sm:$0xff] }
 0x432   :  { %v1299_v62 = vmul.f32 %v1296_v17, %v11526_v39  ;;  %v1278_v53 = vmul.f32 %v11527_v38, %v1267_v34  ;;  %v1279_v12 = vmul.f32 %v11527_v38, %v1268_v22  ;;  %v1253_v59 = vmul.f32 %v11522_v14, %v1243_v41 }
 0x433   :  { %v8288_v48 = vpop.permute.xlu0 %1367  ;;  %v1251_v23 = vmul.f32 %v11522_v14, %v1241_v57  ;;  %v1298_v52 = vmul.f32 %v1297_v5, %v11528_v26  ;;  %v1326_v17 = vsel %vm342_vm7, %v1320_v7, %v8278_v6  ;;  %v1294_v22 = vsel %vm265_vm9, %v8232_v11, %v8268_v31  ;;  %v11532_v26 = vld [vmem:[#allocation140_spill] sm:$0xff]  ;;  %v11533_v11 = vld [vmem:[#allocation25_spill] sm:$0xff]  ;;  %v11534_v31 = vld [vmem:[#allocation30_spill] sm:$0xff] }
 0x434   :  { %v8247_v24 = vpop.permute.xlu2 %1323  ;;  %v1372_v34 = vsel %vm419_vm13, %v8290_v46, %v8288_v48  ;;  %v1330_v57 = vmul.f32 %v1327_v51, %v11530_v42  ;;  %v1254_v5 = vmul.f32 %v11522_v14, %v1244_v37  ;;  %v1281_v33 = vmul.f32 %v11527_v38, %v1270_v8 }
 0x435   :  { %v1328_v10 = vsel %vm342_vm7, %v8247_v24, %v8234_v47  ;;  %v11529_v47 = vld [vmem:[#allocation24_spill] sm:$0xff]  ;;  %v1280_v7 = vmul.f32 %v11527_v38, %v1269_v36  ;;  %v1310_v19 = vmul.f32 %v11532_v26, %v1299_v62  ;;  %v1282_v50 = vadd.f32 %v1278_v53, %v1251_v23  ;;  %v11535_v36 = vld [vmem:[#allocation22_spill] sm:$0xff] }
 0x436   :  { %v1300_v41 = vmul.f32 %v1295_v4, %v11529_v47  ;;  %v1329_v39 = vmul.f32 %v1328_v10, %v11531_v9  ;;  %v1283_v61 = vadd.f32 %v1279_v12, %v1252_v35  ;;  %v1309_v37 = vmul.f32 %v11532_v26, %v1298_v52  ;;  %v11536_v35 = vld [vmem:[#allocation63_spill] sm:$0xff] }
 0x437   :  { %2778 = vrot.lane.b32.xlu2 %v8236_v20, %s11512_s8  ;;  %2782 = vrot.lane.b32.xlu1 %v8249_v15, %s11512_s8  ;;  %v1331_v8 = vmul.f32 %v1326_v17, %v11533_v11  ;;  %v1376_v14 = vmul.f32 %v1372_v34, %v11534_v31  ;;  %v1301_v4 = vmul.f32 %v1294_v22, %v11535_v36  ;;  %v11538_v22 = vld [vmem:[#allocation29_spill] sm:$0xff]  ;;  %v5054_v31 = vld [vmem:[%s10689_s10 + $0x40] sm:$0xf] }
 0x438   :  { %2723 = vrot.lane.b32.xlu0 %v8238_v2, %s11511_s29  ;;  %v1311_v53 = vmul.f32 %v11532_v26, %v1300_v41  ;;  %v1341_v51 = vmul.f32 %v11536_v35, %v1330_v57  ;;  %v1325_v62 = vsel %vm342_vm7, %v8278_v6, %v8247_v24  ;;  %v1285_v38 = vadd.f32 %v1281_v33, %v1254_v5  ;;  %v1459_v41 = vpop.permute.xlu1 %1458 }
 0x439   :  { %v1284_v12 = vadd.f32 %v1280_v7, %v1253_v59  ;;  %v1340_v10 = vmul.f32 %v11536_v35, %v1329_v39  ;;  %v8445_v23 = vmul.f32 %v11517_v1, %v8108_v27  ;;  %v1314_v34 = vadd.f32 %v1310_v19, %v1283_v61  ;;  %v11537_v39 = vld [vmem:[#allocation28_spill] sm:$0xff] }
 0x43a   :  { %v1313_v24 = vadd.f32 %v1309_v37, %v1282_v50  ;;  %v1312_v59 = vmul.f32 %v11532_v26, %v1301_v4  ;;  %v1342_v19 = vmul.f32 %v11536_v35, %v1331_v8  ;;  %v11539_v50 = vld [vmem:[#allocation65_spill] sm:$0xff]  ;;  %v11540_v37 = vld [vmem:[#allocation35_spill] sm:$0xff] }
 0x43b   :  { %v8300_v58 = vpop.permute.xlu0 %1394  ;;  %v1387_v61 = vmul.f32 %v11539_v50, %v1376_v14  ;;  %v1315_v57 = vadd.f32 %v1311_v53, %v1284_v12  ;;  %v1345_v5 = vadd.f32 %v1341_v51, %v1314_v34  ;;  %v11541_v4 = vld [vmem:[#allocation31_spill] sm:$0xff] }
 0x43c   :  { %v8258_v16 = vpop.permute.xlu2 %1363 }
 0x43d   :  { %v1373_v52 = vsel %vm419_vm13, %v8258_v16, %v8290_v46  ;;  %v1332_v46 = vmul.f32 %v1325_v62, %v11537_v39  ;;  %v11543_v62 = vld [vmem:[#allocation36_spill] sm:$0xff] }
 0x43e   :  { %v1375_v27 = vmul.f32 %v1373_v52, %v11538_v22 }
 0x43f   :  { %2784 = vrot.lane.b32.xlu2 %v8260_v13, %s11512_s8  ;;  %2809 = vrot.lane.b32.xlu1 %v8236_v20, %s11513_s7 }
 0x440   :  { %2725 = vrot.lane.b32.xlu0 %v8249_v15, %s11511_s29  ;;  %v1386_v53 = vmul.f32 %v11539_v50, %v1375_v27 }
 0x443   :  { %v8316_v32 = vpop.permute.xlu0 %1400 }
 0x444   :  { %v8270_v29 = vpop.permute.xlu2 %1369  ;;  %v1405_v17 = vsel %vm496_vm2, %v8316_v32, %v8300_v58  ;;  %v1402_v26 = vsel %vm496_vm2, %v8302_v30, %v8316_v32 }
 0x445   :  { %v1371_v1 = vsel %vm419_vm13, %v8288_v48, %v8270_v29  ;;  %v1374_v14 = vsel %vm419_vm13, %v8270_v29, %v8258_v16  ;;  %v1346_v16 = vadd.f32 %v1342_v19, %v1315_v57  ;;  %v1360_v29 = vadd.f32 %v8351_v3, %v1345_v5  ;;  %v11548_v19 = vld [vmem:[#allocation37_spill] sm:$0xff] }
 0x446   :  { %v1377_v32 = vmul.f32 %v1371_v1, %v11541_v4 }
 0x447   :  { %2811 = vrot.lane.b32.xlu2 %v8238_v2, %s11513_s7  ;;  %2815 = vrot.lane.b32.xlu1 %v8260_v13, %s11513_s7 }
 0x448   :  { %2727 = vrot.lane.b32.xlu0 %v8260_v13, %s11511_s29  ;;  %v1388_v1 = vmul.f32 %v11539_v50, %v1377_v32 }
 0x44b   :  { %v8382_v0 = vpop.permute.xlu0 %1427 }
 0x44c   :  { %v8280_v45 = vpop.permute.xlu2 %1396  ;;  %v1435_v8 = vsel %vm573_vm3, %v8320_v28, %v8382_v0 }
 0x44d   :  { %v1404_v6 = vsel %vm496_vm2, %v8300_v58, %v8280_v45  ;;  %v1344_v58 = vadd.f32 %v1340_v10, %v1313_v24  ;;  %v1403_v7 = vsel %vm496_vm2, %v8280_v45, %v8302_v30  ;;  %v1316_v45 = vadd.f32 %v1312_v59, %v1285_v38  ;;  %v11544_v10 = vld [vmem:[#allocation32_spill] sm:$0xff]  ;;  %v11545_v24 = vld [vmem:[#allocation58_spill] sm:$0xff] }
 0x44e   :  { %v1406_v48 = vmul.f32 %v1404_v6, %v11540_v37  ;;  %v1343_v30 = vmul.f32 %v11536_v35, %v1332_v46  ;;  %v1407_v52 = vmul.f32 %v1403_v7, %v11543_v62  ;;  %v1378_v34 = vmul.f32 %v1374_v14, %v11544_v10  ;;  %v11546_v59 = vld [vmem:[#allocation34_spill] sm:$0xff]  ;;  %v11550_v14 = vld [vmem:[#allocation33_spill] sm:$0xff]  ;;  %v5052_v10 = vld [vmem:[%s10689_s10 + $0x38] sm:$0xf] }
 0x44f   :  { %2844 = vrot.lane.b32.xlu2 %v8249_v15, %s11514_s9  ;;  %2842 = vrot.lane.b32.xlu1 %v8238_v2, %s11514_s9  ;;  %v1359_v12 = vadd.f32 %v8367_v60, %v1344_v58  ;;  %v1408_v3 = vmul.f32 %v1402_v26, %v11546_v59  ;;  %v11547_v46 = vld [vmem:[#allocation38_spill] sm:$0xff]  ;;  %v11549_v60 = vld [vmem:[#allocation41_spill] sm:$0xff]  ;;  %v1409_v62 = vmul.f32 %v1405_v17, %v11550_v14  ;;  %v11551_v26 = vld [vmem:[#allocation39_spill] sm:$0xff] }
 0x450   :  { %2751 = vrot.lane.b32.xlu0 %v8249_v15, %s11510_s5  ;;  %v1417_v6 = vmul.f32 %v11545_v24, %v1406_v48  ;;  %v1437_v27 = vmul.f32 %v1435_v8, %v11547_v46  ;;  %v1347_v5 = vadd.f32 %v1343_v30, %v1316_v45  ;;  %v1361_v37 = vadd.f32 %v8378_v55, %v1346_v16  ;;  %v8517_v8 = vpop.permute.xlu1 %2767 }
 0x451   :  { %v1390_v7 = vadd.f32 %v1386_v53, %v1359_v12  ;;  %v1389_v30 = vmul.f32 %v11539_v50, %v1378_v34  ;;  %v1391_v53 = vadd.f32 %v1387_v61, %v1360_v29  ;;  %v11552_v12 = vld [vmem:[#allocation150_spill] sm:$0xff]  ;;  %v1419_v16 = vmul.f32 %v11545_v24, %v1408_v3  ;;  %v11554_v50 = vld [vmem:[#allocation67_spill] sm:$0xff] }
 0x453   :  { %v1461_v33 = vpop.permute.xlu0 %1460 }
 0x454   :  { %v8298_v54 = vpop.permute.xlu2 %1429  ;;  %v1465_v45 = vsel %vm650_vm12, %v1459_v41, %v1461_v33 }
 0x455   :  { %v1434_v51 = vsel %vm573_vm3, %v8382_v0, %v8298_v54  ;;  %v1433_v0 = vsel %vm573_vm3, %v8298_v54, %v8391_v25  ;;  %v1418_v54 = vmul.f32 %v11545_v24, %v1407_v52  ;;  %v1448_v52 = vmul.f32 %v11552_v12, %v1437_v27 }
 0x456   :  { %v1438_v57 = vmul.f32 %v1434_v51, %v11548_v19  ;;  %v1439_v59 = vmul.f32 %v1433_v0, %v11551_v26  ;;  %v1421_v51 = vadd.f32 %v1417_v6, %v1390_v7  ;;  %v11553_v19 = vld [vmem:[#allocation44_spill] sm:$0xff] }
 0x457   :  { %2871 = vrot.lane.b32.xlu2 %v8236_v20, %s11515_s2  ;;  %2875 = vrot.lane.b32.xlu1 %v8249_v15, %s11515_s2  ;;  %v1422_v34 = vadd.f32 %v1418_v54, %v1391_v53  ;;  %v11556_v7 = vld [vmem:[#allocation40_spill] sm:$0xff]  ;;  %v11557_v54 = vld [vmem:[#allocation43_spill] sm:$0xff] }
 0x458   :  { %2753 = vrot.lane.b32.xlu0 %v8260_v13, %s11510_s5  ;;  %v1449_v17 = vmul.f32 %v11552_v12, %v1438_v57  ;;  %v1450_v6 = vmul.f32 %v11552_v12, %v1439_v59  ;;  %v1452_v3 = vadd.f32 %v1448_v52, %v1421_v51  ;;  %v8550_v51 = vpop.permute.xlu1 %2860  ;;  %s5288_s5 = smov 36  }
 0x45b   :  { %v8519_v32 = vpop.permute.xlu0 %2740 }
 0x45c   :  { %v8310_v49 = vpop.permute.xlu2 %1456 }
 0x45d   :  { %v1466_v38 = vsel %vm650_vm12, %v8310_v49, %v1459_v41  ;;  %v1436_v41 = vsel %vm573_vm3, %v8391_v25, %v8320_v28 }
 0x45e   :  { %v1468_v58 = vmul.f32 %v1466_v38, %v11549_v60  ;;  %v1392_v38 = vadd.f32 %v1388_v1, %v1361_v37  ;;  %v11555_v37 = vld [vmem:[#allocation42_spill] sm:$0xff]  ;;  %v1453_v1 = vadd.f32 %v1449_v17, %v1422_v34  ;;  %v11560_v34 = vld [vmem:[#allocation60_spill] sm:$0xff] }
 0x45f   :  { %2877 = vrot.lane.b32.xlu2 %v8260_v13, %s11515_s2  ;;  %2902 = vrot.lane.b32.xlu1 %v8236_v20, %s5257_s20  ;;  %v1469_v29 = vmul.f32 %v1465_v45, %v11555_v37 }
 0x460   :  { %2780 = vrot.lane.b32.xlu0 %v8238_v2, %s11512_s8  ;;  %v1479_v61 = vmul.f32 %v11554_v50, %v1468_v58  ;;  %v1423_v27 = vadd.f32 %v1419_v16, %v1392_v38  ;;  %v1440_v58 = vmul.f32 %v1436_v41, %v11556_v7  ;;  %v11559_v41 = vld [vmem:[#allocation157_spill] sm:$0xff]  ;;  %s11564_s8 = smov 126  }
 0x461   :  { %v1480_v28 = vmul.f32 %v11554_v50, %v1469_v29  ;;  %v5056_v7 = vld [vmem:[%s10689_s10 + $0x48] sm:$0xf] }
 0x462   :  { %v1483_v25 = vadd.f32 %v1479_v61, %v1452_v3  ;;  %v5048_v61 = vld [vmem:[%s10689_s10 + $0x28] sm:$0xf] }
 0x464   :  { %v8341_v44 = vpop.permute.xlu2 %2829 }
 0x467   :  { %2904 = vrot.lane.b32.xlu2 %v8238_v2, %s5257_s20  ;;  %2908 = vrot.lane.b32.xlu1 %v8260_v13, %s5257_s20 }
 0x468   :  { %2813 = vrot.lane.b32.xlu0 %v8249_v15, %s11513_s7  ;;  %s5014_s7 = sld [smem:[#allocation2 + $0x5]] }
 0x46c   :  { %v8420_v21 = vpop.permute.xlu2 %2922 }
 0x46f   :  { %2937 = vrot.lane.b32.xlu2 %v8249_v15, %s5258_s21  ;;  %2935 = vrot.lane.b32.xlu1 %v8238_v2, %s5258_s21 }
 0x470   :  { %2840 = vrot.lane.b32.xlu0 %v8236_v20, %s11514_s9 }
 0x474   :  { %v1463_v35 = vpop.permute.xlu2 %1462 }
 0x475   :  { %v1464_v48 = vsel %vm650_vm12, %v1461_v33, %v1463_v35  ;;  %v1362_v33 = vadd.f32 %v8445_v23, %v1347_v5  ;;  %v1467_v23 = vsel %vm650_vm12, %v1463_v35, %v8310_v49  ;;  %v1420_v5 = vmul.f32 %v11545_v24, %v1409_v62  ;;  %v8554_v49 = vpop.permute.xlu0 %2798 }
 0x476   :  { %v1470_v55 = vmul.f32 %v1464_v48, %v11553_v19  ;;  %v1454_v48 = vadd.f32 %v1450_v6, %v1423_v27  ;;  %v1471_v59 = vmul.f32 %v1467_v23, %v11557_v54  ;;  %v1451_v62 = vmul.f32 %v11552_v12, %v1440_v58 }
 0x477   :  { %2964 = vrot.lane.b32.xlu2 %v8236_v20, %s5259_s22  ;;  %2968 = vrot.lane.b32.xlu1 %v8249_v15, %s5259_s22  ;;  %v1393_v0 = vadd.f32 %v1389_v30, %v1362_v33  ;;  %v1484_v30 = vadd.f32 %v1480_v28, %v1453_v1  ;;  %v1493_v35 = vperm.slane %v1483_v25, 0  ;;  %v1505_v24 = vperm.slane %v1483_v25, 1 }
 0x478   :  { %2846 = vrot.lane.b32.xlu0 %v8260_v13, %s11514_s9  ;;  %v1481_v57 = vmul.f32 %v11554_v50, %v1470_v55  ;;  %v1482_v38 = vmul.f32 %v11554_v50, %v1471_v59  ;;  %s4995_s9 = sld [smem:[#allocation2 + $0x2]] }
 0x479   :  { %v1424_v45 = vadd.f32 %v1420_v5, %v1393_v0  ;;  %v1494_v55 = vperm.slane %v1484_v30, 0  ;;  %v1506_v16 = vperm.slane %v1484_v30, 1  ;;  %v1497_v29 = vmul.f32 %v1493_v35, %v11559_v41  ;;  %v8571_v5 = vpop.permute.xlu1 %2953 }
 0x47a   :  { %v1485_v53 = vadd.f32 %v1481_v57, %v1454_v48  ;;  %v1509_v12 = vmul.f32 %v1505_v24, %v11560_v34  ;;  %v1521_v0 = vperm.slane %v1483_v25, 2  ;;  %v1522_v57 = vperm.slane %v1484_v30, 2  ;;  %11561 = vst [vmem:[#allocation121_spill] sm:$0xff] %v8571_v5 }
 0x47b   :  { %v1455_v17 = vadd.f32 %v1451_v62, %v1424_v45  ;;  %v1498_v3 = vmul.f32 %v1494_v55, %v11559_v41  ;;  %v1510_v23 = vmul.f32 %v1506_v16, %v11560_v34  ;;  %v11562_v45 = vld [vmem:[#allocation68_spill] sm:$0xff]  ;;  %v1538_v16 = vperm.slane %v1484_v30, 3 }
 0x47c   :  { %v1495_v52 = vperm.slane %v1485_v53, 0  ;;  %v1507_v33 = vperm.slane %v1485_v53, 1  ;;  %v1513_v1 = vadd.f32 %v1509_v12, %v1497_v29  ;;  %v1523_v48 = vperm.slane %v1485_v53, 2 }
 0x47d   :  { %v1486_v6 = vadd.f32 %v1482_v38, %v1455_v17  ;;  %v8573_v59 = vpop.permute.xlu0 %2891  ;;  %v1525_v62 = vmul.f32 %v1521_v0, %v11562_v45  ;;  %v1514_v35 = vadd.f32 %v1510_v23, %v1498_v3  ;;  %v1537_v38 = vperm.slane %v1483_v25, 3  ;;  %v11563_v3 = vld [vmem:[#allocation72_spill] sm:$0xff] }
 0x47e   :  { %v1499_v50 = vmul.f32 %v1495_v52, %v11559_v41  ;;  %v1511_v27 = vmul.f32 %v1507_v33, %v11560_v34  ;;  %v1526_v17 = vmul.f32 %v1522_v57, %v11562_v45  ;;  %v1539_v29 = vperm.slane %v1485_v53, 3 }
 0x47f   :  { %2970 = vrot.lane.b32.xlu2 %v8260_v13, %s5259_s22  ;;  %2995 = vrot.lane.b32.xlu1 %v8236_v20, %s11542_s17  ;;  %v1496_v58 = vperm.slane %v1486_v6, 0  ;;  %v1508_v28 = vperm.slane %v1486_v6, 1  ;;  %v1529_v55 = vadd.f32 %v1525_v62, %v1513_v1  ;;  %v1524_v12 = vperm.slane %v1486_v6, 2 }
 0x480   :  { %2873 = vrot.lane.b32.xlu0 %v8238_v2, %s11515_s2  ;;  %v1515_v24 = vadd.f32 %v1511_v27, %v1499_v50  ;;  %v1530_v19 = vadd.f32 %v1526_v17, %v1514_v35  ;;  %v1541_v50 = vmul.f32 %v1537_v38, %v11563_v3  ;;  %v1540_v1 = vperm.slane %v1486_v6, 3  ;;  %s11565_s2 = smov 114  }
 0x481   :  { %v1500_v52 = vmul.f32 %v1496_v58, %v11559_v41  ;;  %v1512_v33 = vmul.f32 %v1508_v28, %v11560_v34  ;;  %v1542_v41 = vmul.f32 %v1538_v16, %v11563_v3  ;;  %v1543_v34 = vmul.f32 %v1539_v29, %v11563_v3  ;;  %v5050_v28 = vld [vmem:[%s10689_s10 + $0x30] sm:$0xf] }
 0x482   :  { %v8589_v23 = vadd.f32 %v1541_v50, %v1529_v55  ;;  %v1528_v27 = vmul.f32 %v1524_v12, %v11562_v45 }
 0x483   :  { %v1516_v30 = vadd.f32 %v1512_v33, %v1500_v52  ;;  %v8594_v57 = vadd.f32 %v1542_v41, %v1530_v19 }
 0x484   :  { %v1549_v35 = vsel %vm137_vm11, %v8589_v23, 0.0 }
 0x485   :  { %v1532_v62 = vadd.f32 %v1528_v27, %v1516_v30  ;;  %v1550_v19 = vsel %vm137_vm11, %v8594_v57, 0.0  ;;  %v5047_v27 = vld [vmem:[%s10689_s10 + $0x24] sm:$0xf] }
 0x487   :  { %2997 = vrot.lane.b32.xlu2 %v8238_v2, %s11542_s17  ;;  %3001 = vrot.lane.b32.xlu1 %v8260_v13, %s11542_s17 }
 0x488   :  { %2906 = vrot.lane.b32.xlu0 %v8249_v15, %s5257_s20  ;;  %s11558_s20 = smov 2  }
 0x489   :  { %v8617_v52 = vpop.permute.xlu2 %2749 }
 0x48f   :  { %3028 = vrot.lane.b32.xlu1 %v8238_v2, %s11558_s20 }
 0x490   :  { %2933 = vrot.lane.b32.xlu0 %v8236_v20, %s5258_s21 }
 0x497   :  { %3046 = vperm.xlu1 %5157, %v5048_v61   ;;  %v1527_v61 = vmul.f32 %v1523_v48, %v11562_v45  ;;  %v5046_v48 = vld [vmem:[%s10689_s10 + $0x20] sm:$0xf]  ;;  %v1544_v45 = vmul.f32 %v1540_v1, %v11563_v3 }
 0x498   :  { %2939 = vrot.lane.b32.xlu0 %v8260_v13, %s5258_s21 }
 0x499   :  { %v1531_v0 = vadd.f32 %v1527_v61, %v1515_v24  ;;  %v1551_v24 = vadd.f32 %v1550_v19, %v1549_v35  ;;  %v8613_v17 = vadd.f32 %v1544_v45, %v1532_v62  ;;  %v5053_v62 = vld [vmem:[%s10689_s10 + $0x3c] sm:$0xf]  ;;  %v5049_v35 = vld [vmem:[%s10689_s10 + $0x2c] sm:$0xf] }
 0x49b   :  { %v8596_v58 = vadd.f32 %v1543_v34, %v1531_v0  ;;  %v1554_v33 = vsel %vm137_vm11, %v8613_v17, 0.0  ;;  %v8629_v0 = vpop.permute.xlu2 %2778 }
 0x49d   :  { %v1552_v6 = vsel %vm137_vm11, %v8596_v58, 0.0 }
 0x49e   :  { %v1553_v16 = vadd.f32 %v1552_v6, %v1551_v24 }
 0x49f   :  { %3061 = vrot.lane.b32.xlu1 %v8249_v15, %s5260_s23 }
 0x4a0   :  { %2966 = vrot.lane.b32.xlu0 %v8238_v2, %s5259_s22  ;;  %v1555_v61 = vadd.f32 %v1554_v33, %v1553_v16  ;;  %v5051_v33 = vld [vmem:[%s10689_s10 + $0x34] sm:$0xf] }
 0x4a1   :  { %v8585_v25 = vpop.permute.xlu1 %2747 }
 0x4a2   :  { %v8591_v53 = vpop.permute.xlu0 %2721 }
 0x4a3   :  { %v8643_v30 = vpop.permute.xlu2 %2784 }
 0x4a7   :  { %3092 = vperm.xlu1 %5157, %v5050_v28  }
 0x4a8   :  { %2984 = vperm.xlu0 %5155, %v5046_v48  }
 0x4a9   :  { %v8611_v38 = vpop.permute.xlu1 %2782 }
 0x4aa   :  { %v8615_v55 = vpop.permute.xlu0 %2723 }
 0x4ab   :  { %v8660_v48 = vpop.permute.xlu2 %2811 }
 0x4af   :  { %3107 = vrot.lane.b32.xlu1 %v8249_v15, %s5261_s24 }
 0x4b0   :  { %2999 = vrot.lane.b32.xlu0 %v8249_v15, %s11542_s17  ;;  %1556 = vadd.xlane.f32.xlu2 %v1555_v61 }
 0x4b1   :  { %v8625_v29 = vpop.permute.xlu1 %2809 }
 0x4b2   :  { %v8627_v12 = vpop.permute.xlu0 %2725 }
 0x4b3   :  { %v8674_v6 = vpop.permute.xlu2 %2844 }
 0x4b7   :  { %3134 = vrot.lane.b32.xlu1 %v8236_v20, %s11564_s8 }
 0x4b8   :  { %3026 = vrot.lane.b32.xlu0 %v8236_v20, %s11558_s20 }
 0x4b9   :  { %v8635_v3 = vpop.permute.xlu1 %2815 }
 0x4ba   :  { %v8637_v50 = vpop.permute.xlu0 %2727 }
 0x4bb   :  { %v8689_v61 = vpop.permute.xlu2 %2871 }
 0x4bf   :  { %3140 = vrot.lane.b32.xlu1 %v8260_v13, %s11564_s8 }
 0x4c0   :  { %3032 = vrot.lane.b32.xlu0 %v8260_v13, %s11558_s20 }
 0x4c1   :  { %v8645_v41 = vpop.permute.xlu1 %2842 }
 0x4c2   :  { %v8647_v34 = vpop.permute.xlu0 %2751 }
 0x4c7   :  { %3167 = vrot.lane.b32.xlu1 %v8238_v2, %s11565_s2 }
 0x4c8   :  { %3059 = vrot.lane.b32.xlu0 %v8238_v2, %s5260_s23  ;;  %3015 = vperm.xlu2 %5158, %v5047_v27  }
 0x4c9   :  { %v8656_v1 = vpop.permute.xlu1 %2875 }
 0x4ca   :  { %v8658_v28 = vpop.permute.xlu0 %2753 }
 0x4cf   :  { %3185 = vperm.xlu1 %5157, %v5053_v62  }
 0x4d0   :  { %3077 = vperm.xlu0 %5155, %v5049_v35   ;;  %3030 = vrot.lane.b32.xlu2 %v8249_v15, %s11558_s20  ;;  %v8705_v35 = vpop.permute.xlu2 %2877  ;;  %s5284_s20 = smov 68  }
 0x4d1   :  { %v8670_v45 = vpop.permute.xlu1 %2902 }
 0x4d2   :  { %v8672_v19 = vpop.permute.xlu0 %2780 }
 0x4d7   :  { %3200 = vrot.lane.b32.xlu1 %v8249_v15, %s5262_s25 }
 0x4d8   :  { %3105 = vrot.lane.b32.xlu0 %v8238_v2, %s5261_s24  ;;  %3057 = vrot.lane.b32.xlu2 %v8236_v20, %s5260_s23  ;;  %v8719_v26 = vpop.permute.xlu2 %2904 }
 0x4d9   :  { %v8682_v24 = vpop.permute.xlu1 %2908 }
 0x4da   :  { %v8684_v16 = vpop.permute.xlu0 %2813 }
 0x4df   :  { %3227 = vrot.lane.b32.xlu1 %v8236_v20, %s5263_s26 }
 0x4e0   :  { %3123 = vperm.xlu0 %5155, %v5051_v33   ;;  %3063 = vrot.lane.b32.xlu2 %v8260_v13, %s5260_s23  ;;  %v8732_v46 = vpop.permute.xlu2 %2937 }
 0x4e1   :  { %v8697_v62 = vpop.permute.xlu1 %2935 }
 0x4e2   :  { %v8695_v27 = vpop.permute.xlu0 %2840 }
 0x4e7   :  { %3233 = vrot.lane.b32.xlu1 %v8260_v13, %s5263_s26 }
 0x4e8   :  { %3138 = vrot.lane.b32.xlu0 %v8249_v15, %s11564_s8  ;;  %3103 = vrot.lane.b32.xlu2 %v8236_v20, %s5261_s24  ;;  %v8748_v22 = vpop.permute.xlu2 %2964 }
 0x4e9   :  { %v8709_v33 = vpop.permute.xlu1 %2968  ;;  %11569 = vst [vmem:[#allocation131_spill] sm:$0xff] %v8748_v22 }
 0x4ea   :  { %v8707_v37 = vpop.permute.xlu0 %2846  ;;  %11566 = vst [vmem:[#allocation126_spill] sm:$0xff] %v8709_v33 }
 0x4ef   :  { %3260 = vrot.lane.b32.xlu1 %v8238_v2, %s5264_s27 }
 0x4f0   :  { %3165 = vrot.lane.b32.xlu0 %v8236_v20, %s11565_s2  ;;  %3109 = vrot.lane.b32.xlu2 %v8260_v13, %s5261_s24 }
 0x4f1   :  { %v8724_v60 = vpop.permute.xlu1 %2995 }
 0x4f2   :  { %v8717_v54 = vpop.permute.xlu0 %2873  ;;  %11567 = vst [vmem:[#allocation124_spill] sm:$0xff] %v8724_v60 }
 0x4f7   :  { %3278 = vperm.xlu1 %5157, %v5056_v7  }
 0x4f8   :  { %3171 = vrot.lane.b32.xlu0 %v8260_v13, %s11565_s2  ;;  %3136 = vrot.lane.b32.xlu2 %v8238_v2, %s11564_s8  ;;  %s5294_s8 = smov 60  }
 0x4f9   :  { %v8741_v7 = vpop.permute.xlu1 %3001 }
 0x4fa   :  { %v8730_v14 = vpop.permute.xlu0 %2906  ;;  %11568 = vst [vmem:[#allocation97_spill] sm:$0xff] %v8741_v7  ;;  %v5055_v7 = vld [vmem:[%s10689_s10 + $0x44] sm:$0xf] }
 0x4ff   :  { %3293 = vrot.lane.b32.xlu1 %v8249_v15, %s5278_s28 }
 0x500   :  { %3198 = vrot.lane.b32.xlu0 %v8238_v2, %s5262_s25  ;;  %3154 = vperm.xlu2 %5158, %v5052_v10   ;;  %v8760_v10 = vpop.permute.xlu2 %2970 }
 0x501   :  { %v8754_v42 = vpop.permute.xlu1 %3028  ;;  %11571 = vst [vmem:[#allocation98_spill] sm:$0xff] %v8760_v10 }
 0x502   :  { %v8743_v4 = vpop.permute.xlu0 %2933  ;;  %11570 = vst [vmem:[#allocation69_spill] sm:$0xff] %v8754_v42 }
 0x508   :  { %3216 = vperm.xlu0 %5155, %v5054_v31   ;;  %3169 = vrot.lane.b32.xlu2 %v8249_v15, %s11565_s2  ;;  %v8772_v42 = vpop.permute.xlu2 %2997 }
 0x509   :  { %v8764_v9 = vpop.permute.xlu1 %3046  ;;  %11575 = vst [vmem:[#allocation59_spill] sm:$0xff] %v8772_v42 }
 0x50a   :  { %v8752_v39 = vpop.permute.xlu0 %2939  ;;  %11573 = vst [vmem:[#allocation144_spill] sm:$0xff] %v8764_v9 }
 0x510   :  { %3231 = vrot.lane.b32.xlu0 %v8249_v15, %s5263_s26  ;;  %3196 = vrot.lane.b32.xlu2 %v8236_v20, %s5262_s25 }
 0x511   :  { %v8774_v47 = vpop.permute.xlu1 %3061 }
 0x512   :  { %v8762_v11 = vpop.permute.xlu0 %2966  ;;  %11576 = vst [vmem:[#allocation55_spill] sm:$0xff] %v8774_v47 }
 0x513   :  { %11572 = vst [vmem:[#allocation99_spill] sm:$0xff] %v8762_v11 }
 0x518   :  { %3258 = vrot.lane.b32.xlu0 %v8236_v20, %s5264_s27  ;;  %3202 = vrot.lane.b32.xlu2 %v8260_v13, %s5262_s25 }
 0x51a   :  { %v8770_v31 = vpop.permute.xlu0 %2984 }
 0x51b   :  { %11574 = vst [vmem:[#allocation119_spill] sm:$0xff] %v8770_v31 }
 0x520   :  { %3264 = vrot.lane.b32.xlu0 %v8260_v13, %s5264_s27  ;;  %3229 = vrot.lane.b32.xlu2 %v8238_v2, %s5263_s26 }
 0x522   :  { %v8780_v36 = vpop.permute.xlu0 %2999 }
 0x523   :  { %11577 = vst [vmem:[#allocation104_spill] sm:$0xff] %v8780_v36  ;;  %v1557_v9 = vpop.xlane.xlu2 %1556  ;;  %v8805_v36 = vpop.permute.xlu1 %3092 }
 0x524   :  { %v1558_v5 = vmul.f32 0.001953125, %v1557_v9  ;;  %11582 = vst [vmem:[#allocation88_spill] sm:$0xff] %v8805_v36 }
 0x526   :  { %v8786_v31 = vsub.f32 %v8589_v23, %v1558_v5  ;;  %v8789_v11 = vsub.f32 %v8594_v57, %v1558_v5  ;;  %v8792_v47 = vsub.f32 %v8596_v58, %v1558_v5  ;;  %v8795_v60 = vsub.f32 %v8613_v17, %v1558_v5 }
 0x528   :  { %11578 = vst [vmem:[#allocation160_spill] sm:$0xff] %v8786_v31  ;;  %3291 = vrot.lane.b32.xlu0 %v8238_v2, %s5278_s28  ;;  %3247 = vperm.xlu2 %5158, %v5055_v7   ;;  %v1563_v9 = vmul.f32 %v8786_v31, %v8786_v31  ;;  %v1564_v23 = vmul.f32 %v8789_v11, %v8789_v11 }
 0x529   :  { %11579 = vst [vmem:[#allocation86_spill] sm:$0xff] %v8789_v11  ;;  %v1565_v57 = vmul.f32 %v8792_v47, %v8792_v47  ;;  %v1566_v5 = vmul.f32 %v8795_v60, %v8795_v60 }
 0x52a   :  { %11580 = vst [vmem:[#allocation87_spill] sm:$0xff] %v8792_v47  ;;  %v8807_v58 = vpop.permute.xlu0 %3026  ;;  %v1567_v17 = vsel %vm137_vm11, %v1563_v9, 0.0  ;;  %v1568_v7 = vsel %vm137_vm11, %v1564_v23, 0.0  ;;  %v5057_v47 = vld [vmem:[%s10689_s10 + $0x4c] sm:$0xf] }
 0x52b   :  { %11581 = vst [vmem:[#allocation89_spill] sm:$0xff] %v8795_v60  ;;  %v8813_v42 = vpop.permute.xlu2 %3015  ;;  %v1569_v31 = vadd.f32 %v1568_v7, %v1567_v17  ;;  %v1570_v33 = vsel %vm137_vm11, %v1565_v57, 0.0  ;;  %v1572_v36 = vsel %vm137_vm11, %v1566_v5, 0.0  ;;  %v8824_v23 = vpop.permute.xlu1 %3107  ;;  %v2789_v5 = vsel %vm11595_vm0, %v8643_v30, %v8629_v0 }
 0x52c   :  { %11583 = vst [vmem:[#allocation73_spill] sm:$0xff] %v8807_v58  ;;  %v2757_v7 = vsel %vm11596_vm4, %v8585_v25, %v8617_v52  ;;  %vm11607_vm4 = vcmp.lt.s32.totalorder %v5460_v40, 34 }
 0x52d   :  { %11584 = vst [vmem:[#allocation74_spill] sm:$0xff] %v8813_v42  ;;  %v1571_v11 = vadd.f32 %v1570_v33, %v1569_v31 }
 0x52e   :  { %11586 = vst [vmem:[#allocation76_spill] sm:$0xff] %v8824_v23 }
 0x52f   :  { %v1573_v58 = vadd.f32 %v1572_v36, %v1571_v11 }
 0x530   :  { %3309 = vperm.xlu0 %5155, %v5057_v47   ;;  %3262 = vrot.lane.b32.xlu2 %v8249_v15, %s5264_s27 }
 0x531   :  { %1574 = vadd.xlane.f32.xlu1 %v1573_v58  ;;  %v2731_v58 = vsel %vm11594_vm10, %v8591_v53, %v8615_v55  ;;  %vm11600_vm10 = vmmov %vm11595_vm0  ;;  %vm11602_vm0 = vcmp.lt.s32.totalorder %v5460_v40, 31 }
 0x532   :  { %v8822_v9 = vpop.permute.xlu0 %3032  ;;  %v2819_v42 = vsel %vm11602_vm0, %v8625_v29, %v8660_v48  ;;  %vm11612_vm0 = vmmov %vm11607_vm4 }
 0x533   :  { %11585 = vst [vmem:[#allocation75_spill] sm:$0xff] %v8822_v9  ;;  %v8826_v17 = vpop.permute.xlu2 %3030  ;;  %v8836_v47 = vpop.permute.xlu1 %3134 }
 0x534   :  { %11587 = vst [vmem:[#allocation148_spill] sm:$0xff] %v8826_v17  ;;  %v11605_v17 = vld [vmem:[#allocation137_spill] sm:$0xff] }
 0x535   :  { %11590 = vst [vmem:[#allocation90_spill] sm:$0xff] %v8836_v47  ;;  %v11606_v9 = vperm.slane %v11605_v17, 1 }
 0x537   :  { %v2760_v10 = vmul.f32 %v2757_v7, %v11606_v9  ;;  %v11610_v9 = vld [vmem:[#allocation134_spill] sm:$0xff] }
 0x538   :  { %3324 = vrot.lane.b32.xlu0 %v8249_v15, %s5279_s30  ;;  %3289 = vrot.lane.b32.xlu2 %v8236_v20, %s5278_s28  ;;  %v11611_v7 = vperm.slane %v11610_v9, 1 }
 0x53a   :  { %v8832_v33 = vpop.permute.xlu0 %3059  ;;  %v2822_v22 = vmul.f32 %v2819_v42, %v11611_v7 }
 0x53b   :  { %11588 = vst [vmem:[#allocation162_spill] sm:$0xff] %v8832_v33  ;;  %v8834_v11 = vpop.permute.xlu2 %3057  ;;  %v8846_v57 = vpop.permute.xlu1 %3140 }
 0x53c   :  { %11589 = vst [vmem:[#allocation161_spill] sm:$0xff] %v8834_v11 }
 0x53d   :  { %11593 = vst [vmem:[#allocation92_spill] sm:$0xff] %v8846_v57  ;;  %v11598_v57 = vld [vmem:[#allocation128_spill] sm:$0xff] }
 0x53e   :  { %v11599_v47 = vperm.slane %v11598_v57, 1  ;;  %v11613_v18 = vperm.slane %v11598_v57, 2 }
 0x540   :  { %3351 = vrot.lane.b32.xlu0 %v8236_v20, %s5280_s18  ;;  %3295 = vrot.lane.b32.xlu2 %v8260_v13, %s5278_s28  ;;  %v2734_v23 = vmul.f32 %v2731_v58, %v11599_v47  ;;  %v2730_v47 = vsel %vm11607_vm4, %v8615_v55, %v8627_v12  ;;  %v2732_v55 = vsel %vm11612_vm0, %v8637_v50, %v8591_v53  ;;  %vm11619_vm0 = vcmp.lt.s32.totalorder %v5460_v40, 18  ;;  %s5291_s28 = smov 124  }
 0x541   :  { %v2735_v56 = vmul.f32 %v2730_v47, %v11613_v18  ;;  %v2771_v53 = vmul.f32 %v8517_v8, %v2760_v10  ;;  %v11616_v18 = vperm.slane %v11605_v17, 0 }
 0x542   :  { %v8842_v36 = vpop.permute.xlu0 %3077 }
 0x543   :  { %11591 = vst [vmem:[#allocation91_spill] sm:$0xff] %v8842_v36  ;;  %v8844_v31 = vpop.permute.xlu2 %3063  ;;  %v2786_v36 = vsel %vm11600_vm10, %v8611_v38, %v8643_v30  ;;  %v5058_v30 = vld [vmem:[%s10689_s10 + $0x50] sm:$0xf]  ;;  %vm11609_vm10 = vcmp.lt.s32.totalorder %v5460_v40, 33  ;;  %v8920_v47 = vpop.permute.xlu1 %3167 }
 0x544   :  { %11592 = vst [vmem:[#allocation112_spill] sm:$0xff] %v8844_v31  ;;  %v11603_v31 = vld [vmem:[#allocation133_spill] sm:$0xff]  ;;  %vm11614_vm4 = vmmov %vm11609_vm10 }
 0x545   :  { %v11608_v58 = vperm.slane %v11603_v31, 3  ;;  %11617 = vst [vmem:[#allocation61_spill] sm:$0xff] %v8920_v47  ;;  %v8955_v47 = vmul.f32 %v8341_v44, %v2822_v22  ;;  %v5060_v22 = vld [vmem:[%s10689_s10 + $0x58] sm:$0xf] }
 0x548   :  { %3357 = vrot.lane.b32.xlu0 %v8260_v13, %s5280_s18  ;;  %3322 = vrot.lane.b32.xlu2 %v8238_v2, %s5279_s30 }
 0x54a   :  { %v8864_v60 = vpop.permute.xlu0 %3105  ;;  %3320 = vrot.lane.b32.xlu1 %v8236_v20, %s5279_s30 }
 0x54b   :  { %11597 = vst [vmem:[#allocation116_spill] sm:$0xff] %v8864_v60  ;;  %v8874_v33 = vpop.permute.xlu2 %3103  ;;  %v11604_v60 = vperm.slane %v11603_v31, 0 }
 0x54c   :  { %11601 = vst [vmem:[#allocation102_spill] sm:$0xff] %v8874_v33  ;;  %v2793_v33 = vmul.f32 %v2786_v36, %v11608_v58  ;;  %v2756_v36 = vsel %vm11614_vm4, %v8617_v52, %v8647_v34  ;;  %v11618_v58 = vperm.slane %v11598_v57, 0 }
 0x54d   :  { %v2790_v11 = vmul.f32 %v2789_v5, %v11604_v60  ;;  %v2758_v60 = vsel %vm11609_vm10, %v8658_v28, %v8585_v25  ;;  %v2744_v5 = vmul.f32 %v8519_v32, %v2734_v23  ;;  %vm11615_vm10 = vmmov %vm11614_vm4  ;;  %vm11620_vm4 = vcmp.lt.s32.totalorder %v5460_v40, 31 }
 0x54e   :  { %v2755_v25 = vsel %vm11615_vm10, %v8647_v34, %v8658_v28  ;;  %v2759_v23 = vmul.f32 %v2758_v60, %v11616_v18  ;;  %v8923_v52 = vmul.f32 %v8554_v49, %v2793_v33  ;;  %v2733_v7 = vmul.f32 %v2732_v55, %v11618_v58 }
 0x54f   :  { %v2801_v42 = vmul.f32 %v8554_v49, %v2790_v11  ;;  %v2882_v34 = vsel %vm11619_vm0, %v8705_v35, %v8689_v61  ;;  %v2820_v28 = vsel %vm11620_vm4, %v8635_v3, %v8625_v29  ;;  %vm11622_vm10 = vcmp.lt.s32.totalorder %v5460_v40, 34 }
 0x550   :  { %3384 = vrot.lane.b32.xlu0 %v8238_v2, %s5281_s19  ;;  %3340 = vperm.xlu2 %5158, %v5058_v30   ;;  %v2729_v33 = vsel %vm11622_vm10, %v8627_v12, %v8637_v50  ;;  %v11623_v11 = vperm.slane %v11605_v17, 2  ;;  %v11624_v60 = vperm.slane %v11605_v17, 3  ;;  %vm11625_vm0 = vcmp.lt.s32.totalorder %v5460_v40, 32  ;;  %v11628_v50 = vld [vmem:[#allocation71_spill] sm:$0xff] }
 0x551   :  { %v2788_v29 = vsel %vm11625_vm0, %v8629_v0, %v8672_v19  ;;  %v2775_v58 = vadd.f32 %v2771_v53, %v2744_v5  ;;  %vm11627_vm4 = vcmp.lt.s32.totalorder %v5460_v40, 30  ;;  %v11629_v17 = vperm.slane %v11628_v50, 0  ;;  %vm11631_vm10 = vmmov %vm11625_vm0 }
 0x552   :  { %v8935_v10 = vpop.permute.xlu0 %3123  ;;  %3326 = vrot.lane.b32.xlu1 %v8260_v13, %s5279_s30  ;;  %v2761_v30 = vmul.f32 %v2756_v36, %v11623_v11  ;;  %v2762_v55 = vmul.f32 %v2755_v25, %v11624_v60  ;;  %v2849_v12 = vsel %vm11627_vm4, %v8645_v41, %v8674_v6  ;;  %v11630_v25 = vperm.slane %v11610_v9, 0  ;;  %s5292_s30 = smov 100  }
 0x553   :  { %11621 = vst [vmem:[#allocation105_spill] sm:$0xff] %v8935_v10  ;;  %v8951_v18 = vpop.permute.xlu2 %3109  ;;  %v2745_v10 = vmul.f32 %v8519_v32, %v2735_v56  ;;  %v2883_v36 = vmul.f32 %v2882_v34, %v11629_v17  ;;  %v2770_v0 = vmul.f32 %v8517_v8, %v2759_v23  ;;  %v2787_v56 = vsel %vm11631_vm10, %v8672_v19, %v8611_v38  ;;  %v11635_v38 = vld [vmem:[#allocation129_spill] sm:$0xff] }
 0x554   :  { %11626 = vst [vmem:[#allocation165_spill] sm:$0xff] %v8951_v18  ;;  %v2821_v11 = vmul.f32 %v2820_v28, %v11630_v25  ;;  %v11632_v5 = vperm.slane %v11598_v57, 3  ;;  %v2743_v60 = vmul.f32 %v8519_v32, %v2733_v7  ;;  %vm11633_vm0 = vcmp.lt.s32.totalorder %v5460_v40, 18 }
 0x555   :  { %v2879_v34 = vsel %vm11633_vm0, %v8656_v1, %v8705_v35  ;;  %v11634_v23 = vperm.slane %v11603_v31, 1  ;;  %v2772_v17 = vmul.f32 %v8517_v8, %v2761_v30  ;;  %v11636_v19 = vperm.slane %v11635_v38, 2 }
 0x556   :  { %v2736_v53 = vmul.f32 %v2729_v33, %v11632_v5  ;;  %v2773_v18 = vmul.f32 %v8517_v8, %v2762_v55  ;;  %vm11637_vm4 = vcmp.lt.s32.totalorder %v5460_v40, 31  ;;  %v11638_v7 = vperm.slane %v11603_v31, 2 }
 0x557   :  { %v2791_v28 = vmul.f32 %v2788_v29, %v11634_v23  ;;  %v2854_v25 = vmul.f32 %v2849_v12, %v11636_v19  ;;  %v2818_v57 = vsel %vm11637_vm4, %v8660_v48, %v8684_v16  ;;  %vm11639_vm10 = vmmov %vm11637_vm4  ;;  %vm11640_vm0 = vcmp.lt.s32.totalorder %v5460_v40, 30 }
 0x558   :  { %v2792_v33 = vmul.f32 %v2787_v56, %v11638_v7  ;;  %v2817_v35 = vsel %vm11639_vm10, %v8684_v16, %v8635_v3  ;;  %v2851_v30 = vsel %vm11640_vm0, %v8707_v37, %v8695_v27  ;;  %3402 = vperm.xlu0 %5155, %v5060_v22   ;;  %3355 = vrot.lane.b32.xlu2 %v8249_v15, %s5280_s18  ;;  %v11641_v55 = vperm.slane %v11628_v50, 3  ;;  %vm11644_vm4 = vmmov %vm11640_vm0 }
 0x559   :  { %v9003_v8 = vmul.f32 %v8573_v59, %v2883_v36  ;;  %v2832_v48 = vmul.f32 %v8341_v44, %v2821_v11  ;;  %v2774_v31 = vadd.f32 %v2770_v0, %v2743_v60  ;;  %v2746_v3 = vmul.f32 %v8519_v32, %v2736_v53  ;;  %vm11646_vm10 = vmmov %vm11640_vm0 }
 0x55a   :  { %v2886_v29 = vmul.f32 %v2879_v34, %v11641_v55  ;;  %v2802_v16 = vmul.f32 %v8554_v49, %v2791_v28  ;;  %v2912_v12 = vsel %vm110_vm5, %v8670_v45, %v8719_v26  ;;  %v11642_v56 = vperm.slane %v11610_v9, 2  ;;  %v9016_v36 = vpop.permute.xlu0 %3138  ;;  %3353 = vrot.lane.b32.xlu1 %v8238_v2, %s5280_s18  ;;  %v9029_v34 = vpop.permute.xlu1 %3185  ;;  %s5293_s18 = smov 92  }
 0x55b   :  { %v2865_v11 = vmul.f32 %v8550_v51, %v2854_v25  ;;  %v11643_v0 = vperm.slane %v11610_v9, 3  ;;  %v2848_v5 = vsel %vm11644_vm4, %v8674_v6, %v8707_v37  ;;  %v11645_v53 = vperm.slane %v11635_v38, 0  ;;  %v9031_v23 = vpop.permute.xlu2 %3136 }
 0x55c   :  { %v2823_v22 = vmul.f32 %v2818_v57, %v11642_v56  ;;  %v2776_v28 = vadd.f32 %v2772_v17, %v2745_v10  ;;  %v2777_v19 = vadd.f32 %v2773_v18, %v2746_v3  ;;  %v2803_v57 = vmul.f32 %v8554_v49, %v2792_v33 }
 0x55d   :  { %v2824_v32 = vmul.f32 %v2817_v35, %v11643_v0  ;;  %v2852_v60 = vmul.f32 %v2851_v30, %v11645_v53  ;;  %v2850_v9 = vsel %vm11646_vm10, %v8695_v27, %v8645_v41  ;;  %v2805_v25 = vadd.f32 %v2801_v42, %v2774_v31 }
 0x55e   :  { %v2897_v7 = vmul.f32 %v8573_v59, %v2886_v29  ;;  %v2915_v37 = vmul.f32 %v2912_v12, %v11516_v63  ;;  %vm11647_vm0 = vcmp.lt.s32.totalorder %v5460_v40, 18  ;;  %v2806_v35 = vadd.f32 %v2802_v16, %v2775_v58  ;;  %v5059_v58 = vld [vmem:[%s10689_s10 + $0x54] sm:$0xf] }
 0x55f   :  { %v2880_v6 = vsel %vm11647_vm0, %v8717_v54, %v8656_v1  ;;  %v2834_v10 = vmul.f32 %v8341_v44, %v2823_v22  ;;  %v11648_v49 = vperm.slane %v11635_v38, 3  ;;  %vm11649_vm4 = vmmov %vm11647_vm0  ;;  %v2835_v27 = vmul.f32 %v8341_v44, %v2824_v32 }
 0x560   :  { %v2881_v41 = vsel %vm11649_vm4, %v8689_v61, %v8717_v54  ;;  %v11650_v63 = vperm.slane %v11635_v38, 1  ;;  %v2863_v17 = vmul.f32 %v8550_v51, %v2852_v60  ;;  %v2911_v1 = vsel %vm110_vm5, %v8719_v26, %v8730_v14  ;;  %3417 = vrot.lane.b32.xlu0 %v8249_v15, %s5282_s4  ;;  %3382 = vrot.lane.b32.xlu2 %v8236_v20, %s5281_s19  ;;  %v11655_v60 = vld [vmem:[#allocation13_spill] sm:$0xff] }
 0x561   :  { %v2855_v18 = vmul.f32 %v2848_v5, %v11648_v49  ;;  %v2807_v33 = vadd.f32 %v2803_v57, %v2776_v28  ;;  %v2808_v30 = vadd.f32 %v8923_v52, %v2777_v19  ;;  %v11651_v54 = vperm.slane %v11628_v50, 2  ;;  %v11656_v57 = vld [vmem:[#allocation131_spill] sm:$0xff]  ;;  %v11659_v49 = vld [vmem:[#allocation18_spill] sm:$0xff] }
 0x562   :  { %v2853_v42 = vmul.f32 %v2850_v9, %v11650_v63  ;;  %v2926_v61 = vmul.f32 %v8420_v21, %v2915_v37  ;;  %v2913_v26 = vsel %vm110_vm5, %v8682_v24, %v8670_v45  ;;  %v2836_v38 = vadd.f32 %v2832_v48, %v2805_v25  ;;  %v9083_v56 = vpop.permute.xlu0 %3165  ;;  %3371 = vperm.xlu1 %5157, %v5059_v58   ;;  %v9109_v19 = vpop.permute.xlu1 %3200  ;;  %v11657_v9 = vld [vmem:[#allocation98_spill] sm:$0xff] }
 0x563   :  { %v2885_v44 = vmul.f32 %v2880_v6, %v11651_v54  ;;  %v11652_v31 = vperm.slane %v11628_v50, 1  ;;  %v11653_v55 = vmov 1   ;;  %v2838_v29 = vadd.f32 %v2834_v10, %v2807_v33  ;;  %v9087_v0 = vpop.permute.xlu2 %3154  ;;  %v11663_v33 = vld [vmem:[#allocation59_spill] sm:$0xff] }
 0x564   :  { %5159 = vset.pattern.permute.xlu0 %v11653_v55  ;;  %v2866_v3 = vmul.f32 %v8550_v51, %v2855_v18  ;;  %v2910_v16 = vsel %vm110_vm5, %v8730_v14, %v8682_v24  ;;  %v2916_v12 = vmul.f32 %v2911_v1, %v11520_v43  ;;  %v2839_v45 = vadd.f32 %v2835_v27, %v2808_v30  ;;  %v11654_v24 = vld [vmem:[#allocation16_spill] sm:$0xff]  ;;  %v11661_v18 = vld [vmem:[#allocation19_spill] sm:$0xff] }
 0x565   :  { %v2884_v52 = vmul.f32 %v2881_v41, %v11652_v31  ;;  %v2837_v48 = vadd.f32 %v8955_v47, %v2806_v35  ;;  %v2864_v50 = vmul.f32 %v8550_v51, %v2853_v42  ;;  %v2867_v22 = vadd.f32 %v2863_v17, %v2836_v38  ;;  %v11658_v35 = vld [vmem:[#allocation15_spill] sm:$0xff]  ;;  %v11662_v42 = vld [vmem:[#allocation126_spill] sm:$0xff]  ;;  %v11664_v30 = vld [vmem:[#allocation124_spill] sm:$0xff] }
 0x566   :  { %v2896_v32 = vmul.f32 %v8573_v59, %v2885_v44  ;;  %v2943_v14 = vsel %vm188_vm1, %v8743_v4, %v8697_v62  ;;  %v2941_v43 = vsel %vm188_vm1, %v8732_v46, %v8752_v39  ;;  %v2944_v51 = vsel %vm188_vm1, %v8752_v39, %v8743_v4 }
 0x567   :  { %v2914_v47 = vmul.f32 %v2913_v26, %v11654_v24  ;;  %v2942_v5 = vsel %vm188_vm1, %v8697_v62, %v8732_v46  ;;  %v2895_v53 = vmul.f32 %v8573_v59, %v2884_v52  ;;  %v2917_v28 = vmul.f32 %v2910_v16, %v11655_v60  ;;  %v11660_v62 = vld [vmem:[#allocation20_spill] sm:$0xff]  ;;  %v11666_v26 = vld [vmem:[#allocation99_spill] sm:$0xff]  ;;  %v11667_v52 = vld [vmem:[#allocation97_spill] sm:$0xff] }
 0x568   :  { %v2975_v25 = vsel %vm265_vm9, %v11657_v9, %v11656_v57  ;;  %v2870_v37 = vadd.f32 %v2866_v3, %v2839_v45  ;;  %v2869_v39 = vadd.f32 %v2865_v11, %v2838_v29  ;;  %v2927_v4 = vmul.f32 %v8420_v21, %v2916_v12  ;;  %3444 = vrot.lane.b32.xlu0 %v8236_v20, %s5283_s1  ;;  %v11669_v29 = vld [vmem:[#allocation121_spill] sm:$0xff] }
 0x569   :  { %v2868_v6 = vadd.f32 %v2864_v50, %v2837_v48  ;;  %v2946_v10 = vmul.f32 %v2943_v14, %v11658_v35  ;;  %v2945_v46 = vmul.f32 %v2944_v51, %v11659_v49  ;;  %v2948_v59 = vmul.f32 %v2941_v43, %v11660_v62  ;;  %3388 = vrot.lane.b32.xlu2 %v8260_v13, %s5281_s19  ;;  %v11670_v45 = vld [vmem:[#allocation21_spill] sm:$0xff]  ;;  %v11671_v51 = vld [vmem:[#allocation23_spill] sm:$0xff] }
 0x56a   :  { %v2947_v41 = vmul.f32 %v2942_v5, %v11661_v18  ;;  %v2898_v27 = vadd.f32 %v9003_v8, %v2867_v22  ;;  %v2900_v63 = vadd.f32 %v2896_v32, %v2869_v39  ;;  %v2925_v11 = vmul.f32 %v8420_v21, %v2914_v47  ;;  %v9139_v31 = vpop.permute.xlu0 %3171  ;;  %3386 = vrot.lane.b32.xlu1 %v8249_v15, %s5281_s19  ;;  %v11672_v47 = vld [vmem:[#allocation22_spill] sm:$0xff]  ;;  %v9165_v35 = vpop.permute.xlu1 %3227  ;;  %s9507_s19 = sld [smem:[#allocation2 + $0x3]] }
 0x56b   :  { %v2972_v17 = vsel %vm265_vm9, %v11662_v42, %v11657_v9  ;;  %v2899_v1 = vadd.f32 %v2895_v53, %v2868_v6  ;;  %v2928_v58 = vmul.f32 %v8420_v21, %v2917_v28  ;;  %vm11665_vm1 = vcmp.lt.s32.totalorder %v5460_v40, 14  ;;  %v9150_v12 = vpop.permute.xlu2 %3169  ;;  %v11673_v53 = vld [vmem:[#allocation149_spill] sm:$0xff] }
 0x56c   :  { %v3005_v8 = vsel %vm11665_vm1, %v11664_v30, %v11663_v33  ;;  %v2901_v54 = vadd.f32 %v2897_v7, %v2870_v37  ;;  %v2931_v44 = vadd.f32 %v2927_v4, %v2900_v63  ;;  %v2974_v38 = vsel %vm265_vm9, %v11656_v57, %v11666_v26  ;;  %vm11668_vm5 = vmmov %vm11665_vm1  ;;  %v11681_v63 = vld [vmem:[#allocation69_spill] sm:$0xff] }
 0x56d   :  { %v3006_v21 = vsel %vm11668_vm5, %v11667_v52, %v11664_v30  ;;  %v2957_v3 = vmul.f32 %v11669_v29, %v2946_v10  ;;  %v2956_v7 = vmul.f32 %v11669_v29, %v2945_v46  ;;  %v2959_v16 = vmul.f32 %v11669_v29, %v2948_v59  ;;  %v11677_v10 = vld [vmem:[#allocation24_spill] sm:$0xff]  ;;  %vm11686_vm4 = vmmov %vm11665_vm1 }
 0x56e   :  { %v2976_v48 = vmul.f32 %v2975_v25, %v11670_v45  ;;  %v2958_v50 = vmul.f32 %v11669_v29, %v2947_v41  ;;  %v2929_v22 = vadd.f32 %v2925_v11, %v2898_v27  ;;  %v2932_v32 = vadd.f32 %v2928_v58, %v2901_v54  ;;  %v11678_v46 = vld [vmem:[#allocation88_spill] sm:$0xff]  ;;  %v11682_v11 = vld [vmem:[#allocation73_spill] sm:$0xff] }
 0x56f   :  { %v2930_v14 = vadd.f32 %v2926_v61, %v2899_v1  ;;  %v2973_v43 = vsel %vm265_vm9, %v11666_v26, %v11662_v42  ;;  %v2977_v24 = vmul.f32 %v2974_v38, %v11671_v51  ;;  %v2979_v5 = vmul.f32 %v2972_v17, %v11672_v47  ;;  %v11676_v61 = vld [vmem:[#allocation119_spill] sm:$0xff]  ;;  %v11679_v41 = vld [vmem:[#allocation104_spill] sm:$0xff]  ;;  %vm11680_vm9 = vmmov %vm11665_vm1 }
 0x570   :  { %v11674_v60 = vperm.slane %v11673_v53, 1  ;;  %v2962_v57 = vadd.f32 %v2958_v50, %v2931_v44  ;;  %v11675_v9 = vperm.slane %v11673_v53, 0  ;;  %v2960_v39 = vadd.f32 %v2956_v7, %v2929_v22  ;;  %3450 = vrot.lane.b32.xlu0 %v8260_v13, %s5283_s1  ;;  %v11684_v17 = vld [vmem:[#allocation75_spill] sm:$0xff]  ;;  %v11691_v29 = vld [vmem:[#allocation112_spill] sm:$0xff] }
 0x571   :  { %v2961_v37 = vadd.f32 %v2957_v3, %v2930_v14  ;;  %v2963_v4 = vadd.f32 %v2959_v16, %v2932_v32  ;;  %v2988_v6 = vmul.f32 %v11676_v61, %v2977_v24  ;;  %v2978_v49 = vmul.f32 %v2973_v43, %v11677_v10  ;;  %3415 = vrot.lane.b32.xlu2 %v8238_v2, %s5282_s4  ;;  %v11695_v32 = vld [vmem:[#allocation74_spill] sm:$0xff] }
 0x572   :  { %v3008_v28 = vmul.f32 %v3005_v8, %v11674_v60  ;;  %v3007_v25 = vmul.f32 %v3006_v21, %v11675_v9  ;;  %v9170_v62 = vmul.f32 %v11678_v46, %v8236_v20  ;;  %v9174_v59 = vmul.f32 %v11678_v46, %v8238_v2  ;;  %v11687_v8 = vld [vmem:[#allocation148_spill] sm:$0xff]  ;;  %v9209_v44 = vpop.permute.xlu0 %3198  ;;  %3413 = vrot.lane.b32.xlu1 %v8236_v20, %s5282_s4  ;;  %v11690_v21 = vld [vmem:[#allocation161_spill] sm:$0xff] }
 0x573   :  { %v9182_v18 = vmul.f32 %v11678_v46, %v8249_v15  ;;  %v3004_v27 = vsel %vm11680_vm9, %v11663_v33, %v11679_v41  ;;  %vm11683_vm10 = vcmp.lt.s32.totalorder %v5460_v40, 2  ;;  %v2987_v58 = vmul.f32 %v11676_v61, %v2976_v48  ;;  %v9219_v7 = vpop.permute.xlu2 %3196  ;;  %v11693_v48 = vld [vmem:[#allocation143_spill] sm:$0xff] }
 0x574   :  { %v3036_v42 = vsel %vm11683_vm10, %v11682_v11, %v11681_v63  ;;  %vm11685_vm0 = vmmov %vm11683_vm10  ;;  %v3003_v30 = vsel %vm11686_vm4, %v11679_v41, %v11667_v52  ;;  %v2989_v26 = vmul.f32 %v11676_v61, %v2978_v49  ;;  %v2990_v38 = vmul.f32 %v11676_v61, %v2979_v5  ;;  %v9238_v61 = vld [vmem:[%s10690_s11] sm:$0xf]  ;;  %v11702_v41 = vld [vmem:[#allocation27_spill] sm:$0xff]  ;;  %s5285_s11 = smov 66  }
 0x575   :  { %v3037_v1 = vsel %vm11685_vm0, %v11684_v17, %v11682_v11  ;;  %vm11688_vm1 = vmmov %vm11685_vm0  ;;  %v2992_v52 = vadd.f32 %v2988_v6, %v2961_v37  ;;  %v3068_v3 = vsel %vm342_vm7, %v11691_v29, %v11690_v21  ;;  %v11692_v16 = vperm.slane %v11673_v53, 2  ;;  %v11700_v6 = vld [vmem:[#allocation55_spill] sm:$0xff] }
 0x576   :  { %v3034_v33 = vsel %vm11688_vm1, %v11687_v8, %v11684_v17  ;;  %vm11689_vm5 = vmmov %vm11685_vm0  ;;  %v11694_v50 = vperm.slane %v11693_v48, 1  ;;  %v3019_v20 = vmul.f32 %v11695_v32, %v3008_v28  ;;  %v11696_v14 = vperm.slane %v11693_v48, 0  ;;  %v5061_v28 = vld [vmem:[%s10689_s10 + $0x5c] sm:$0xf] }
 0x577   :  { %v3035_v54 = vsel %vm11689_vm5, %v11681_v63, %v11687_v8  ;;  %v3009_v45 = vmul.f32 %v3004_v27, %v11692_v16  ;;  %v11697_v51 = vperm.slane %v11673_v53, 3  ;;  %v3018_v47 = vmul.f32 %v11695_v32, %v3007_v25  ;;  %v11701_v53 = vld [vmem:[#allocation162_spill] sm:$0xff] }
 0x578   :  { %v3039_v22 = vmul.f32 %v3036_v42, %v11694_v50  ;;  %v3038_v43 = vmul.f32 %v3037_v1, %v11696_v14  ;;  %v11698_v5 = vperm.slane %v11693_v48, 2  ;;  %v11699_v9 = vperm.slane %v11693_v48, 3  ;;  %v11703_v1 = vld [vmem:[#allocation144_spill] sm:$0xff]  ;;  %3490 = vperm.xlu0 %5159, %v9238_v61   ;;  %v11705_v16 = vld [vmem:[#allocation26_spill] sm:$0xff] }
 0x579   :  { %v3010_v24 = vmul.f32 %v3003_v30, %v11697_v51  ;;  %v3066_v25 = vsel %vm342_vm7, %v11701_v53, %v11700_v6  ;;  %v3067_v10 = vsel %vm342_vm7, %v11690_v21, %v11701_v53  ;;  %v3065_v49 = vsel %vm342_vm7, %v11700_v6, %v11691_v29  ;;  %3433 = vperm.xlu2 %5158, %v5061_v28   ;;  %v11704_v21 = vld [vmem:[#allocation25_spill] sm:$0xff]  ;;  %v11709_v51 = vld [vmem:[#allocation102_spill] sm:$0xff] }
 0x57a   :  { %v3040_v60 = vmul.f32 %v3035_v54, %v11698_v5  ;;  %v3041_v37 = vmul.f32 %v3034_v33, %v11699_v9  ;;  %v3069_v27 = vmul.f32 %v3068_v3, %v11702_v41  ;;  %v2991_v63 = vadd.f32 %v2987_v58, %v2960_v39  ;;  %v11706_v39 = vld [vmem:[#allocation28_spill] sm:$0xff]  ;;  %v9265_v58 = vpop.permute.xlu1 %3233  ;;  %3419 = vrot.lane.b32.xlu1 %v8260_v13, %s5282_s4  ;;  %v11711_v9 = vld [vmem:[#allocation165_spill] sm:$0xff]  ;;  %s5286_s4 = smov 64  }
 0x57b   :  { %v2993_v11 = vadd.f32 %v2989_v26, %v2962_v57  ;;  %v3020_v42 = vmul.f32 %v11695_v32, %v3009_v45  ;;  %v3021_v17 = vmul.f32 %v11695_v32, %v3010_v24  ;;  %v3050_v30 = vmul.f32 %v11703_v1, %v3039_v22  ;;  %v9269_v22 = vpop.permute.xlu0 %3216  ;;  %v11710_v5 = vld [vmem:[#allocation76_spill] sm:$0xff] }
 0x57c   :  { %v3023_v8 = vadd.f32 %v3019_v20, %v2992_v52  ;;  %v3049_v33 = vmul.f32 %v11703_v1, %v3038_v43  ;;  %v3051_v54 = vmul.f32 %v11703_v1, %v3040_v60  ;;  %v3071_v29 = vmul.f32 %v3066_v25, %v11704_v21  ;;  %v11707_v52 = vld [vmem:[#allocation91_spill] sm:$0xff]  ;;  %v11708_v43 = vld [vmem:[#allocation116_spill] sm:$0xff]  ;;  %v11712_v25 = vld [vmem:[#allocation90_spill] sm:$0xff] }
 0x57d   :  { %v3070_v3 = vmul.f32 %v3067_v10, %v11705_v16  ;;  %v3072_v57 = vmul.f32 %v3065_v49, %v11706_v39  ;;  %v2994_v26 = vadd.f32 %v2990_v38, %v2963_v4  ;;  %v3022_v45 = vadd.f32 %v3018_v47, %v2991_v63  ;;  %v9279_v38 = vpop.permute.xlu2 %3202  ;;  %v11719_v39 = vld [vmem:[#allocation155_spill] sm:$0xff] }
 0x57e   :  { %v3052_v48 = vmul.f32 %v11703_v1, %v3041_v37  ;;  %v3080_v50 = vmul.f32 %v11707_v52, %v3069_v27  ;;  %v3024_v32 = vadd.f32 %v3020_v42, %v2993_v11  ;;  %v3082_v14 = vmul.f32 %v11707_v52, %v3071_v29  ;;  %v11714_v27 = vld [vmem:[#allocation29_spill] sm:$0xff] }
 0x57f   :  { %v3081_v20 = vmul.f32 %v11707_v52, %v3070_v3  ;;  %v3113_v4 = vsel %vm419_vm13, %v11709_v51, %v11708_v43  ;;  %v3053_v24 = vadd.f32 %v3049_v33, %v3022_v45  ;;  %v3025_v47 = vadd.f32 %v3021_v17, %v2994_v26  ;;  %v11715_v11 = vld [vmem:[#allocation61_spill] sm:$0xff]  ;;  %v9302_v17 = vld [vmem:[%s10692_s13] sm:$0xf]  ;;  %s5287_s13 = smov 62  }
 0x580   :  { %v3112_v60 = vsel %vm419_vm13, %v11708_v43, %v11710_v5  ;;  %v3111_v37 = vsel %vm419_vm13, %v11710_v5, %v11711_v9  ;;  %v3055_v28 = vadd.f32 %v3051_v54, %v3024_v32  ;;  %v3054_v6 = vadd.f32 %v3050_v30, %v3023_v8  ;;  %v11716_v8 = vld [vmem:[#allocation30_spill] sm:$0xff]  ;;  %v11717_v54 = vld [vmem:[#allocation31_spill] sm:$0xff]  ;;  %v11718_v29 = vld [vmem:[#allocation105_spill] sm:$0xff] }
 0x581   :  { %v3083_v53 = vmul.f32 %v11707_v52, %v3072_v57  ;;  %vm11713_vm7 = vcmp.lt.s32.totalorder %v5460_v40, 126  ;;  %v3056_v49 = vadd.f32 %v3052_v48, %v3025_v47  ;;  %v3084_v41 = vadd.f32 %v3080_v50, %v3053_v24  ;;  %3448 = vrot.lane.b32.xlu2 %v8249_v15, %s5283_s1  ;;  %v11722_v48 = vld [vmem:[#allocation92_spill] sm:$0xff] }
 0x582   :  { %v3144_v10 = vsel %vm11713_vm7, %v11712_v25, %v9031_v23  ;;  %v3115_v63 = vmul.f32 %v3113_v4, %v11714_v27  ;;  %v3175_v42 = vsel %vm2208_vm14, %v9083_v56, %v11715_v11  ;;  %v3085_v1 = vadd.f32 %v3081_v20, %v3054_v6  ;;  %vm11723_vm9 = vmmov %vm11713_vm7  ;;  %v11724_v20 = vld [vmem:[#allocation159_spill] sm:$0xff]  ;;  %3446 = vrot.lane.b32.xlu1 %v8238_v2, %s5283_s1 }
 0x583   :  { %v3086_v30 = vadd.f32 %v3082_v14, %v3055_v28  ;;  %v3116_v33 = vmul.f32 %v3112_v60, %v11716_v8  ;;  %v3117_v21 = vmul.f32 %v3111_v37, %v11717_v54  ;;  %v3114_v3 = vsel %vm419_vm13, %v11711_v9, %v11709_v51  ;;  %vm11726_vm13 = vmmov %vm11713_vm7  ;;  %v3232_v47 = vpop.permute.xlu0 %3231  ;;  %v11727_v60 = vld [vmem:[#allocation32_spill] sm:$0xff] }
 0x584   :  { %v3126_v16 = vmul.f32 %v11718_v29, %v3115_v63  ;;  %v11720_v57 = vperm.slane %v11719_v39, 0  ;;  %v11721_v45 = vmov 2   ;;  %v3145_v52 = vsel %vm11723_vm9, %v11722_v48, %v11712_v25  ;;  %vm11729_vm10 = vmmov %vm11713_vm7 }
 0x585   :  { %5165 = vset.pattern.permute.xlu0 %v11721_v45  ;;  %v3087_v50 = vadd.f32 %v3083_v53, %v3056_v49  ;;  %v3127_v32 = vmul.f32 %v11718_v29, %v3116_v33  ;;  %v11725_v14 = vperm.slane %v11724_v20, 0  ;;  %v3098_v51 = vmul.f32 %v11678_v46, %v8260_v13  ;;  %v9337_v13 = vpop.permute.xlu1 %3260 }
 0x586   :  { %v3146_v26 = vmul.f32 %v3144_v10, %v11720_v57  ;;  %3767 = vperm.xlu0 %5165, %v9302_v17   ;;  %v3099_v4 = vadd.f32 %v9170_v62, %v3084_v41  ;;  %v3143_v15 = vsel %vm11726_vm13, %v9031_v23, %v9016_v36  ;;  %v3100_v5 = vadd.f32 %v9174_v59, %v3085_v1  ;;  %v3230_v23 = vpop.permute.xlu2 %3229 }
 0x587   :  { %v3177_v43 = vmul.f32 %v3175_v42, %v11725_v14  ;;  %v3118_v9 = vmul.f32 %v3114_v3, %v11727_v60  ;;  %v3128_v37 = vmul.f32 %v11718_v29, %v3117_v21  ;;  %v3206_v46 = vsel %vm496_vm2, %v9219_v7, %v9209_v44  ;;  %v11731_v42 = vld [vmem:[#allocation35_spill] sm:$0xff] }
 0x588   :  { %v3157_v24 = vmul.f32 %v9087_v0, %v3146_v26  ;;  %v11728_v62 = vperm.slane %v11719_v39, 3  ;;  %v3130_v6 = vadd.f32 %v3126_v16, %v3099_v4  ;;  %v3101_v2 = vadd.f32 %v9182_v18, %v3086_v30 }
 0x589   :  { %v3142_v59 = vsel %vm11729_vm10, %v9016_v36, %v11722_v48  ;;  %v3131_v53 = vadd.f32 %v3127_v32, %v3100_v5  ;;  %v3102_v25 = vadd.f32 %v3098_v51, %v3087_v50  ;;  %v11730_v10 = vperm.slane %v11719_v39, 1  ;;  %3478 = vperm.xlu2 %5158, %v9238_v61   ;;  %v11738_v5 = vld [vmem:[#allocation33_spill] sm:$0xff] }
 0x58a   :  { %v3149_v28 = vmul.f32 %v3145_v52, %v11728_v62  ;;  %v3188_v41 = vmul.f32 %v9029_v34, %v3177_v43  ;;  %v3161_v27 = vadd.f32 %v3157_v24, %v3130_v6  ;;  %v3176_v63 = vsel %vm2208_vm14, %v9139_v31, %v9083_v56  ;;  %v3595_v56 = vld [vmem:[%s10691_s12] sm:$0xf] }
 0x58b   :  { %v3147_v49 = vmul.f32 %v3143_v15, %v11730_v10  ;;  %v3174_v18 = vsel %vm2208_vm14, %v11715_v11, %v9150_v12  ;;  %v3208_v36 = vmul.f32 %v3206_v46, %v11731_v42  ;;  %v3129_v1 = vmul.f32 %v11718_v29, %v3118_v9  ;;  %v5062_v11 = vld [vmem:[%s10689_s10 + $0x60] sm:$0xf]  ;;  %v3259_v14 = vpop.permute.xlu0 %3258  ;;  %v11739_v9 = vld [vmem:[#allocation41_spill] sm:$0xff] }
 0x58c   :  { %v3132_v30 = vadd.f32 %v3128_v37, %v3101_v2  ;;  %v11732_v8 = vperm.slane %v11719_v39, 2  ;;  %v3237_v54 = vsel %vm573_vm3, %v9165_v35, %v3230_v23  ;;  %v3238_v21 = vsel %vm573_vm3, %v9265_v58, %v9165_v35  ;;  %3464 = vperm.xlu1 %5157, %v5062_v11   ;;  %v11740_v2 = vld [vmem:[#allocation34_spill] sm:$0xff] }
 0x58d   :  { %v3158_v29 = vmul.f32 %v9087_v0, %v3147_v49  ;;  %v3173_v16 = vsel %vm2208_vm14, %v9150_v12, %v9139_v31  ;;  %v3219_v3 = vmul.f32 %v9269_v22, %v3208_v36  ;;  %v11733_v57 = vperm.slane %v11724_v20, 3  ;;  %v11736_v12 = vld [vmem:[#allocation38_spill] sm:$0xff]  ;;  %v5064_v36 = vld [vmem:[%s10691_s12 + $0x4] sm:$0xf] }
 0x58e   :  { %v3148_v33 = vmul.f32 %v3142_v59, %v11732_v8  ;;  %v11734_v48 = vperm.slane %v11724_v20, 1  ;;  %v3207_v35 = vsel %vm496_vm2, %v9279_v38, %v9219_v7  ;;  %v11735_v50 = vmov 0   ;;  %v3248_v24 = vpop.permute.xlu2 %3247 }
 0x58f   :  { %v3180_v26 = vmul.f32 %v3176_v63, %v11733_v57  ;;  %5166 = vset.pattern.permute.xlu0 %v11735_v50  ;;  %v3204_v31 = vsel %vm496_vm2, %v9109_v19, %v9279_v38  ;;  %v3239_v32 = vmul.f32 %v3237_v54, %v11736_v12  ;;  %v3192_v43 = vadd.f32 %v3188_v41, %v3161_v27  ;;  %v11741_v41 = vld [vmem:[#allocation40_spill] sm:$0xff]  ;;  %v11744_v54 = vld [vmem:[#allocation39_spill] sm:$0xff] }
 0x590   :  { %v3159_v39 = vmul.f32 %v9087_v0, %v3148_v33  ;;  %v3178_v52 = vmul.f32 %v3174_v18, %v11734_v48  ;;  %3598 = vperm.xlu0 %5166, %v3595_v56   ;;  %v3160_v51 = vmul.f32 %v9087_v0, %v3149_v28  ;;  %v11737_v4 = vperm.slane %v11724_v20, 2  ;;  %v3279_v28 = vpop.permute.xlu1 %3278  ;;  %v11742_v18 = vld [vmem:[#allocation36_spill] sm:$0xff]  ;;  %v11745_v56 = vld [vmem:[#allocation37_spill] sm:$0xff] }
 0x591   :  { %v3205_v7 = vsel %vm496_vm2, %v9209_v44, %v9109_v19  ;;  %v3268_v38 = vsel %vm650_vm12, %v3259_v14, %v9337_v13  ;;  %v3211_v60 = vmul.f32 %v3207_v35, %v11738_v5  ;;  %v3223_v46 = vadd.f32 %v3219_v3, %v3192_v43 }
 0x592   :  { %v3179_v15 = vmul.f32 %v3173_v16, %v11737_v4  ;;  %v3270_v37 = vmul.f32 %v3268_v38, %v11739_v9  ;;  %v3250_v62 = vmul.f32 %v3248_v24, %v3239_v32  ;;  %v3133_v0 = vadd.f32 %v3129_v1, %v3102_v25  ;;  %v5065_v9 = vld [vmem:[%s10691_s12 + $0x8] sm:$0xf] }
 0x593   :  { %v3191_v20 = vmul.f32 %v9029_v34, %v3180_v26  ;;  %v3189_v6 = vmul.f32 %v9029_v34, %v3178_v52  ;;  %v3210_v59 = vmul.f32 %v3204_v31, %v11740_v2  ;;  %v3235_v19 = vsel %vm573_vm3, %v3232_v47, %v9265_v58  ;;  %v11746_v52 = vld [vmem:[#allocation43_spill] sm:$0xff] }
 0x594   :  { %v3236_v44 = vsel %vm573_vm3, %v3230_v23, %v3232_v47  ;;  %v3281_v10 = vmul.f32 %v3279_v28, %v3270_v37  ;;  %v3254_v49 = vadd.f32 %v3250_v62, %v3223_v46  ;;  %v3242_v27 = vmul.f32 %v3238_v21, %v11741_v41  ;;  %5160 = vset.pattern.permute.xlu1 %v11721_v45 }
 0x595   :  { %v3162_v63 = vadd.f32 %v3158_v29, %v3131_v53  ;;  %v3190_v25 = vmul.f32 %v9029_v34, %v3179_v15  ;;  %v3209_v42 = vmul.f32 %v3205_v7, %v11742_v18  ;;  %v3164_v1 = vadd.f32 %v3160_v51, %v3133_v0  ;;  %3506 = vperm.xlu1 %5160, %v9238_v61   ;;  %v11747_v51 = vld [vmem:[#allocation42_spill] sm:$0xff]  ;;  %v11748_v15 = vld [vmem:[#allocation44_spill] sm:$0xff] }
 0x596   :  { %v3163_v8 = vadd.f32 %v3159_v39, %v3132_v30  ;;  %v3222_v58 = vmul.f32 %v9269_v22, %v3211_v60  ;;  %v9427_v33 = vadd.f32 %v3281_v10, %v3254_v49  ;;  %v11743_v47 = vmov 3   ;;  %v3265_v30 = vpop.permute.xlu0 %3264 }
 0x597   :  { %5161 = vset.pattern.permute.xlu2 %v11743_v47  ;;  %v3220_v23 = vmul.f32 %v9269_v22, %v3209_v42  ;;  %v3221_v53 = vmul.f32 %v9269_v22, %v3210_v59  ;;  %v3241_v34 = vmul.f32 %v3235_v19, %v11744_v54  ;;  %v3240_v11 = vmul.f32 %v3236_v44, %v11745_v56  ;;  %v3263_v22 = vpop.permute.xlu2 %3262  ;;  %v5066_v59 = vld [vmem:[%s10691_s12 + $0xc] sm:$0xf]  ;;  %v11751_v19 = vld [vmem:[#allocation158_spill] sm:$0xff]  ;;  %v713_v56 = vld [vmem:[%s10682_s3] sm:$0xf]  ;;  %s9497_s3 = sld [smem:[#allocation2 + $0x1]] }
 0x598   :  { %3522 = vperm.xlu2 %5161, %v9238_v61   ;;  %v3195_v21 = vadd.f32 %v3191_v20, %v3164_v1  ;;  %v3193_v29 = vadd.f32 %v3189_v6, %v3162_v63  ;;  %v3253_v16 = vmul.f32 %v3248_v24, %v3242_v27  ;;  %3609 = vperm.xlu0 %5166, %v5064_v36   ;;  %vm11749_vm2 = vcmp.lt.s32.totalorder %v5460_v40, 110 }
 0x599   :  { %v3194_v3 = vadd.f32 %v3190_v25, %v3163_v8  ;;  %v3251_v39 = vmul.f32 %v3248_v24, %v3240_v11  ;;  %v3252_v57 = vmul.f32 %v3248_v24, %v3241_v34  ;;  %v3269_v26 = vsel %vm650_vm12, %v3265_v30, %v3259_v14  ;;  %vm11750_vm3 = vmmov %vm11749_vm2 }
 0x59a   :  { %v3226_v48 = vadd.f32 %v3222_v58, %v3195_v21  ;;  %v3273_v35 = vmul.f32 %v3269_v26, %v11746_v52  ;;  %v3266_v31 = vsel %vm650_vm12, %v3263_v22, %v3265_v30  ;;  %v3267_v12 = vsel %vm650_vm12, %v9337_v13, %v3263_v22  ;;  %v5068_v13 = vld [vmem:[%s10691_s12 + $0x14] sm:$0xf]  ;;  %vm11754_vm12 = vmmov %vm11749_vm2  ;;  %v9493_v52 = vld.sshfl [vmem:[#allocation1 + $0x8] sm:$0xff pattern:$0x75316420] }
 0x59b   :  { %v3225_v32 = vadd.f32 %v3221_v53, %v3194_v3  ;;  %v3224_v43 = vadd.f32 %v3220_v23, %v3193_v29  ;;  %v3271_v4 = vmul.f32 %v3267_v12, %v11747_v51  ;;  %v3272_v7 = vmul.f32 %v3266_v31, %v11748_v15  ;;  %vm11755_vm14 = vmmov %vm11749_vm2  ;;  %v5069_v3 = vld [vmem:[%s10691_s12 + $0x18] sm:$0xf] }
 0x59c   :  { %v3257_v14 = vadd.f32 %v3253_v16, %v3226_v48  ;;  %v3284_v38 = vmul.f32 %v3279_v28, %v3273_v35  ;;  %v11752_v44 = vperm.slane %v11751_v19, 1  ;;  %v11753_v49 = vperm.slane %v11751_v19, 0  ;;  %v3859_v48 = vld.sshfl [vmem:[#allocation1] sm:$0xff pattern:$0x75316420] }
 0x59d   :  { %v3255_v61 = vadd.f32 %v3251_v39, %v3224_v43  ;;  %v3256_v24 = vadd.f32 %v3252_v57, %v3225_v32  ;;  %v3282_v5 = vmul.f32 %v3279_v28, %v3271_v4  ;;  %v3283_v60 = vmul.f32 %v3279_v28, %v3272_v7  ;;  %5162 = vset.pattern.permute.xlu1 %v11735_v50  ;;  %v3294_v28 = vpop.permute.xlu1 %3293  ;;  %v5070_v43 = vld [vmem:[%s10691_s12 + $0x1c] sm:$0xf]  ;;  %v11759_v4 = vld [vmem:[#allocation52_spill] sm:$0xff]  ;;  %v11760_v7 = vld [vmem:[#allocation50_spill] sm:$0xff] }
 0x59e   :  { %v3288_v37 = vadd.f32 %v3284_v38, %v3257_v14  ;;  %v3292_v0 = vpop.permute.xlu0 %3291  ;;  %v11756_v8 = vperm.slane %v11751_v19, 2  ;;  %v11757_v23 = vperm.slane %v11751_v19, 3  ;;  %v714_v11 = vstv %s4995_s9  ;;  %v3861_v19 = vld.sshfl [vmem:[#allocation1 + $0x10] sm:$0xff pattern:$0x75316420]  ;;  %s5289_s9 = smov 28  }
 0x59f   :  { %v3286_v46 = vadd.f32 %v3282_v5, %v3255_v61  ;;  %v3287_v62 = vadd.f32 %v3283_v60, %v3256_v24  ;;  %v3290_v20 = vpop.permute.xlu2 %3289  ;;  %v3298_v6 = vsel %vm11749_vm2, %v3292_v0, %v3294_v28  ;;  %v715_v39 = vmul.f32 %v714_v11, %v713_v56 }
 0x5a0   :  { %5163 = vset.pattern.permute.xlu2 %v11735_v50  ;;  %3624 = vperm.xlu0 %5166, %v5065_v9   ;;  %v3299_v2 = vsel %vm11750_vm3, %v3290_v20, %v3292_v0  ;;  %v3302_v10 = vmul.f32 %v3298_v6, %v11752_v44  ;;  %v3862_v44 = vld.sshfl [vmem:[#allocation1 + $0x18] sm:$0xff pattern:$0x75316420]  ;;  %vm11772_vm5 = vcmp.lt.s32.totalorder %v5460_v40, 98  ;;  %vm11778_vm10 = vcmp.lt.s32.totalorder %v5460_v40, 97 }
 0x5a1   :  { %3680 = vperm.xlu2 %5163, %v5068_v13   ;;  %v3301_v41 = vmul.f32 %v3299_v2, %v11753_v49  ;;  %v718_v35 = vperm.slane %v715_v39, 1  ;;  %v720_v31 = vperm.slane %v715_v39, 3  ;;  %v717_v24 = vperm.slane %v715_v39, 0  ;;  %vm11775_vm7 = vmmov %vm11772_vm5 }
 0x5a2   :  { %v719_v5 = vperm.slane %v715_v39, 2  ;;  %v1588_v2 = vstv %s9504_s6  ;;  %v11769_v39 = vld [vmem:[#allocation89_spill] sm:$0xff]  ;;  %vm11776_vm9 = vmmov %vm11772_vm5  ;;  %s4983_s6 = sshll.u32 %s10695_s16, 4  ;;  %s4984_s6 = int_to_ptr.hbm [resolvable:$true] %s4983_s6 }
 0x5a3   :  { %v739_v15 = vmul.f32 %v11759_v4, %v718_v35  ;;  %v741_v14 = vmul.f32 %v11760_v7, %v720_v31  ;;  %v11770_v31 = vld [vmem:[#allocation160_spill] sm:$0xff]  ;;  %v11771_v4 = vld [vmem:[#allocation87_spill] sm:$0xff]  ;;  %vm11777_vm13 = vmmov %vm11772_vm5 }
 0x5a4   :  { %vm11781_vm2 = vmmov %vm11778_vm10 }
 0x5a5   :  { %v1575_v1 = vpop.xlane.xlu1 %1574  ;;  %v746_v9 = vrot.slane %v739_v15, 4  ;;  %v747_v13 = vrot.slane %v741_v14, 4  ;;  %vm11783_vm3 = vmmov %vm11781_vm2 }
 0x5a6   :  { %v3310_v27 = vpop.permute.xlu0 %3309  ;;  %v1576_v54 = vmul.f32 0.001953125, %v1575_v1  ;;  %v11765_v1 = vld [vmem:[#allocation45_spill] sm:$0xff] }
 0x5a7   :  { %v3312_v63 = vmul.f32 %v3310_v27, %v3301_v41  ;;  %v3313_v25 = vmul.f32 %v3310_v27, %v3302_v10  ;;  %v3296_v18 = vpop.permute.xlu2 %3295  ;;  %v11763_v41 = vld [vmem:[#allocation48_spill] sm:$0xff] }
 0x5a8   :  { %3639 = vperm.xlu0 %5166, %v5066_v59   ;;  %v3297_v42 = vsel %vm11754_vm12, %v3294_v28, %v3296_v18  ;;  %v3300_v36 = vsel %vm11755_vm14, %v3296_v18, %v3290_v20  ;;  %v1577_v30 = vadd.f32 1e-05, %v1576_v54  ;;  %v5071_v20 = vld [vmem:[%s10691_s12 + $0x20] sm:$0xf]  ;;  %v11762_v28 = vld [vmem:[#allocation49_spill] sm:$0xff]  ;;  %vm11786_vm12 = vmmov %vm11781_vm2 }
 0x5a9   :  { %5164 = vset.pattern.permute.xlu2 %v11653_v55  ;;  %v3303_v58 = vmul.f32 %v3297_v42, %v11756_v8  ;;  %v3304_v53 = vmul.f32 %v3300_v36, %v11757_v23  ;;  %v9476_v34 = vadd.f32 %v3313_v25, %v3286_v46  ;;  %v9482_v21 = vadd.f32 %v3312_v63, %v9427_v33  ;;  %v11758_v33 = vld [vmem:[#allocation47_spill] sm:$0xff]  ;;  %v11764_v63 = vld [vmem:[#allocation46_spill] sm:$0xff]  ;;  %v11766_v54 = vld [vmem:[#allocation12_spill] sm:$0xff] }
 0x5aa   :  { %3751 = vperm.xlu2 %5164, %v9302_v17   ;;  %5178 = vrsqrt.f32 %v1577_v30  ;;  %3904 = vst [vmem:[#allocation1] ss:$2 sm:$0xff] %v11758_v33  ;;  %v709_v46 = vstv %s9497_s3  ;;  %v740_v6 = vmul.f32 %v11762_v28, %v719_v5  ;;  %vm1584_vm4 = vweird.f32 %v1577_v30 }
 0x5ab   :  { %v3314_v29 = vmul.f32 %v3310_v27, %v3303_v58  ;;  %v3315_v16 = vmul.f32 %v3310_v27, %v3304_v53  ;;  %3906 = vst [vmem:[#allocation1 + $0x10] ss:$2 sm:$0xff] %v11763_v41  ;;  %v755_v27 = vstv %s9507_s19  ;;  %v710_v25 = vmul.f32 %v709_v46, %v11764_v63 }
 0x5ac   :  { %v749_v18 = vsel %vm137_vm11, %v740_v6, %v747_v13  ;;  %v711_v8 = vmul.f32 %v709_v46, %v11765_v1  ;;  %v756_v56 = vmul.f32 %v755_v27, %v11766_v54 }
 0x5ad   :  { %v9487_v57 = vadd.f32 %v3314_v29, %v3287_v62  ;;  %v9489_v26 = vadd.f32 %v3315_v16, %v3288_v37  ;;  %v11761_v62 = vld [vmem:[#allocation51_spill] sm:$0xff] }
 0x5ae   :  { %v9491_v22 = vpop.permute.xlu0 %3324  ;;  %v738_v0 = vmul.f32 %v11761_v62, %v717_v24  ;;  %v753_v11 = vadd.f32 %v749_v18, %v711_v8  ;;  %v11767_v29 = vld [vmem:[#allocation11_spill] sm:$0xff]  ;;  %v11773_v8 = vld [vmem:[#allocation94_spill] sm:$0xff] }
 0x5af   :  { %v9499_v32 = vpop.permute.xlu2 %3322  ;;  %v757_v16 = vmul.f32 %v755_v27, %v11767_v29 }
 0x5b0   :  { %3695 = vperm.xlu0 %5166, %v5069_v3   ;;  %v5179_v12 = vpop.eup %5178  ;;  %v748_v10 = vsel %vm137_vm11, %v738_v0, %v746_v9 }
 0x5b1   :  { %v1579_v51 = vmul.f32 %v5179_v12, %v1577_v30  ;;  %vm1585_vm0 = vweird.f32 %v5179_v12  ;;  %v752_v23 = vadd.f32 %v748_v10, %v710_v25  ;;  %v11768_v30 = vld [vmem:[#allocation86_spill] sm:$0xff]  ;;  %v759_v14 = vadd.f32 %v757_v16, %v753_v11 }
 0x5b2   :  { %5168 = vset.pattern.permute.xlu2 %v11735_v50  ;;  %vm1586_vm1 = vmor %vm1584_vm4, %vm1585_vm0  ;;  %v9549_v28 = vld.sshfl [vmem:[#allocation1 + $0x18] sm:$0xff pattern:$0x75316420]  ;;  %vm3923_vm0 = vcmp.lt.s32.totalorder %v5460_v40, 66 }
 0x5b3   :  { %v1580_v38 = vmul.f32 %v5179_v12, %v1579_v51  ;;  %v758_v51 = vadd.f32 %v756_v56, %v752_v23 }
 0x5b5   :  { %v1581_v60 = vmul.f32 0.5, %v1580_v38 }
 0x5b6   :  { %v9510_v61 = vpop.permute.xlu0 %3351 }
 0x5b7   :  { %v1582_v37 = vsub.f32 1.5, %v1581_v60  ;;  %v9520_v49 = vpop.permute.xlu2 %3340 }
 0x5b8   :  { %3710 = vperm.xlu0 %5166, %v5070_v43  }
 0x5b9   :  { %v1583_v59 = vmul.f32 %v5179_v12, %v1582_v37 }
 0x5bb   :  { %v1587_v42 = vsel %vm1586_vm1, %v5179_v12, %v1583_v59  ;;  %v9554_v59 = vld.sshfl [vmem:[#allocation1 + $0x8] sm:$0xff pattern:$0x75316420] }
 0x5bc   :  { %v1589_v58 = vmul.f32 %v1588_v2, %v1587_v42  ;;  %v3321_v53 = vpop.permute.xlu1 %3320  ;;  %v3907_v2 = vld.sshfl [vmem:[#allocation1] sm:$0xff pattern:$0x75316420] }
 0x5bd   :  { %3958 = vst [vmem:[#allocation1] ss:$2 sm:$0xff] %v11758_v33  ;;  %v3330_v54 = vsel %vm11775_vm7, %v3321_v53, %v9499_v32  ;;  %vm3977_vm7 = vcmp.lt.s32.totalorder %v5460_v40, 64 }
 0x5be   :  { %v9526_v36 = vpop.permute.xlu0 %3357  ;;  %v1591_v3 = vmul.f32 %v1589_v58, %v11768_v30  ;;  %v1593_v35 = vmul.f32 %v1589_v58, %v11769_v39  ;;  %v1590_v43 = vmul.f32 %v1589_v58, %v11770_v31  ;;  %v1592_v15 = vmul.f32 %v1589_v58, %v11771_v4 }
 0x5bf   :  { %v3356_v9 = vpop.permute.xlu2 %3355  ;;  %v11774_v58 = vperm.slane %v11773_v8, 1  ;;  %v11779_v39 = vperm.slane %v11773_v8, 0 }
 0x5c0   :  { %3725 = vperm.xlu0 %5166, %v5071_v20   ;;  %v1598_v12 = vrot.slane %v1591_v3, 4  ;;  %v1599_v7 = vrot.slane %v1593_v35, 4  ;;  %v11780_v35 = vperm.slane %v11773_v8, 2 }
 0x5c2   :  { %v1600_v38 = vsel %vm137_vm11, %v1590_v43, %v1598_v12  ;;  %v1601_v5 = vsel %vm137_vm11, %v1592_v15, %v1599_v7  ;;  %v3359_v12 = vsel %vm11781_vm2, %v3356_v9, %v9526_v36  ;;  %vm4292_vm2 = vcmp.lt.s32.totalorder %v5460_v40, 4 }
 0x5c3   :  { %v9538_v60 = vadd.f32 %v1600_v38, %v758_v51  ;;  %v9540_v13 = vadd.f32 %v1601_v5, %v759_v14  ;;  %v11782_v51 = vperm.slane %v11773_v8, 3  ;;  %v11784_v5 = vld [vmem:[#allocation77_spill] sm:$0xff] }
 0x5c4   :  { %v3327_v37 = vpop.permute.xlu1 %3326  ;;  %v9572_v1 = vld.sshfl [vmem:[#allocation1] sm:$0xff pattern:$0x75316420]  ;;  %v9589_v30 = vld.sshfl [vmem:[#allocation1 + $0x8] sm:$0xff pattern:$0x75316420] }
 0x5c5   :  { %v3328_v56 = vsel %vm11776_vm9, %v9491_v22, %v3327_v37  ;;  %v3331_v16 = vsel %vm11777_vm13, %v3327_v37, %v3321_v53  ;;  %4012 = vst [vmem:[#allocation1] ss:$2 sm:$0xff] %v11758_v33  ;;  %v3332_v53 = vmul.f32 %v3330_v54, %v11779_v39  ;;  %v11785_v37 = vperm.slane %v11784_v5, 3 }
 0x5c6   :  { %v3385_v24 = vpop.permute.xlu0 %3384  ;;  %v3334_v31 = vmul.f32 %v3328_v56, %v11780_v35  ;;  %v3335_v4 = vmul.f32 %v3331_v16, %v11782_v51  ;;  %v11788_v54 = vperm.slane %v11784_v5, 1  ;;  %vm4031_vm9 = vcmp.lt.s32.totalorder %v5460_v40, 62 }
 0x5c7   :  { %v3383_v0 = vpop.permute.xlu2 %3382  ;;  %vm4085_vm13 = vcmp.lt.s32.totalorder %v5460_v40, 60 }
 0x5c8   :  { %3867 = vrot.lane.b32.xlu0 %v3859_v48, %s5284_s20  ;;  %v3909_v48 = vld.sshfl [vmem:[#allocation1 + $0x10] sm:$0xff pattern:$0x75316420] }
 0x5c9   :  { %3960 = vst [vmem:[#allocation1 + $0x10] ss:$2 sm:$0xff] %v11763_v41 }
 0x5cc   :  { %v3354_v62 = vpop.permute.xlu1 %3353 }
 0x5cd   :  { %v3360_v7 = vsel %vm11783_vm3, %v3354_v62, %v3356_v9  ;;  %v3343_v9 = vmul.f32 %v9520_v49, %v3332_v53  ;;  %v11792_v53 = vperm.slane %v11784_v5, 0  ;;  %vm4238_vm3 = vcmp.lt.s32.totalorder %v5460_v40, 28 }
 0x5ce   :  { %v9544_v46 = vpop.permute.xlu0 %3402  ;;  %v3364_v56 = vmul.f32 %v3360_v7, %v11788_v54 }
 0x5d0   :  { %3869 = vrot.lane.b32.xlu0 %v9493_v52, %s5284_s20  ;;  %v3389_v52 = vpop.permute.xlu2 %3388  ;;  %v9560_v27 = vld.sshfl [vmem:[#allocation1 + $0x10] sm:$0xff pattern:$0x75316420]  ;;  %v9562_v63 = vld.sshfl [vmem:[#allocation1 + $0x18] sm:$0xff pattern:$0x75316420] }
 0x5d1   :  { %4014 = vst [vmem:[#allocation1 + $0x10] ss:$2 sm:$0xff] %v11763_v41 }
 0x5d4   :  { %v9552_v6 = vpop.permute.xlu1 %3371 }
 0x5d6   :  { %v9547_v20 = vpop.permute.xlu0 %3417 }
 0x5d8   :  { %3871 = vrot.lane.b32.xlu0 %v3861_v19, %s5284_s20  ;;  %v3416_v25 = vpop.permute.xlu2 %3415  ;;  %v9582_v11 = vld.sshfl [vmem:[#allocation1 + $0x10] sm:$0xff pattern:$0x75316420]  ;;  %v9584_v29 = vld.sshfl [vmem:[#allocation1 + $0x18] sm:$0xff pattern:$0x75316420] }
 0x5d9   :  { %4068 = vst [vmem:[#allocation1 + $0x10] ss:$2 sm:$0xff] %v11763_v41 }
 0x5dc   :  { %v3387_v19 = vpop.permute.xlu1 %3386 }
 0x5dd   :  { %v3391_v14 = vsel %vm2469_vm15, %v3385_v24, %v3387_v19  ;;  %v3390_v16 = vsel %vm2469_vm15, %v3387_v19, %v3389_v52 }
 0x5de   :  { %v9558_v10 = vpop.permute.xlu0 %3444 }
 0x5e0   :  { %3873 = vrot.lane.b32.xlu0 %v3862_v44, %s5284_s20  ;;  %v3329_v44 = vsel %vm11772_vm5, %v9499_v32, %v9491_v22  ;;  %v3362_v22 = vsel %vm11778_vm10, %v9526_v36, %v9510_v61  ;;  %v9604_v43 = vpop.permute.xlu2 %3433  ;;  %v3361_v36 = vsel %vm11786_vm12, %v9510_v61, %v3354_v62  ;;  %vm4139_vm10 = vcmp.lt.s32.totalorder %v5460_v40, 36 }
 0x5e1   :  { %v3333_v23 = vmul.f32 %v3329_v44, %v11774_v58  ;;  %v11787_v44 = vperm.slane %v11784_v5, 2  ;;  %v3392_v58 = vsel %vm2469_vm15, %v3383_v0, %v3385_v24  ;;  %v3363_v35 = vmul.f32 %v3361_v36, %v11792_v53 }
 0x5e2   :  { %v3422_v24 = vsel %vm2523_vm6, %v3416_v25, %v9547_v20  ;;  %vm4456_vm12 = vcmp.lt.s32.totalorder %v5460_v40, 100 }
 0x5e3   :  { %v3344_v3 = vmul.f32 %v9520_v49, %v3333_v23  ;;  %v3365_v8 = vmul.f32 %v3359_v12, %v11787_v44  ;;  %v3346_v23 = vmul.f32 %v9520_v49, %v3335_v4 }
 0x5e4   :  { %v3414_v42 = vpop.permute.xlu1 %3413 }
 0x5e5   :  { %v3348_v38 = vadd.f32 %v3344_v3, %v9476_v34  ;;  %v3345_v34 = vmul.f32 %v9520_v49, %v3334_v31  ;;  %v11789_v3 = vld [vmem:[#allocation103_spill] sm:$0xff]  ;;  %v3423_v49 = vsel %vm2523_vm6, %v3414_v42, %v3416_v25  ;;  %v9647_v31 = vld.sshfl [vmem:[#allocation1 + $0x8] sm:$0xff pattern:$0x75316420]  ;;  %v3374_v25 = vmul.f32 %v9552_v6, %v3363_v35 }
 0x5e6   :  { %v9566_v18 = vpop.permute.xlu0 %3450  ;;  %v11790_v61 = vperm.slane %v11789_v3, 1  ;;  %v3376_v51 = vmul.f32 %v9552_v6, %v3365_v8  ;;  %v11793_v7 = vperm.slane %v11789_v3, 2 }
 0x5e7   :  { %v3349_v8 = vadd.f32 %v3345_v34, %v9487_v57 }
 0x5e8   :  { %3915 = vrot.lane.b32.xlu0 %v3907_v2, %s5285_s11  ;;  %v3393_v2 = vsel %vm2469_vm15, %v3389_v52, %v3383_v0  ;;  %v3395_v62 = vmul.f32 %v3391_v14, %v11790_v61  ;;  %v9645_v0 = vld.sshfl [vmem:[#allocation1] sm:$0xff pattern:$0x75316420]  ;;  %v3375_v52 = vmul.f32 %v9552_v6, %v3364_v56  ;;  %v3396_v14 = vmul.f32 %v3390_v16, %v11793_v7 }
 0x5e9   :  { %4066 = vst [vmem:[#allocation1] ss:$2 sm:$0xff] %v11758_v33  ;;  %v3380_v53 = vadd.f32 %v3376_v51, %v3349_v8 }
 0x5ec   :  { %v3420_v15 = vpop.permute.xlu1 %3419 }
 0x5ed   :  { %v3421_v19 = vsel %vm2523_vm6, %v9547_v20, %v3420_v15  ;;  %v3424_v12 = vsel %vm2523_vm6, %v3420_v15, %v3414_v42  ;;  %v3347_v20 = vadd.f32 %v3343_v9, %v9482_v21  ;;  %v11794_v42 = vperm.slane %v11789_v3, 0 }
 0x5ee   :  { %v9593_v32 = vpop.permute.xlu0 %3490  ;;  %vm3875_vm6 = vcmp.lt.s32.totalorder %v5460_v40, 68 }
 0x5ef   :  { %v3394_v15 = vmul.f32 %v3392_v58, %v11794_v42 }
 0x5f0   :  { %3919 = vrot.lane.b32.xlu0 %v3909_v48, %s5285_s11  ;;  %v3366_v48 = vmul.f32 %v3362_v22, %v11785_v37  ;;  %v11791_v22 = vperm.slane %v11789_v3, 3  ;;  %v11795_v37 = vld [vmem:[#allocation111_spill] sm:$0xff] }
 0x5f1   :  { %v11797_v54 = vperm.slane %v11795_v37, 2  ;;  %v11798_v16 = vperm.slane %v11795_v37, 3  ;;  %v3405_v9 = vmul.f32 %v9544_v46, %v3394_v15  ;;  %v11799_v3 = vperm.slane %v11795_v37, 1 }
 0x5f2   :  { %v3397_v39 = vmul.f32 %v3393_v2, %v11791_v22  ;;  %v3377_v4 = vmul.f32 %v9552_v6, %v3366_v48  ;;  %v11796_v2 = vperm.slane %v11795_v37, 0  ;;  %v3350_v6 = vadd.f32 %v3346_v23, %v9489_v26  ;;  %v3449_v48 = vpop.permute.xlu2 %3448 }
 0x5f3   :  { %v3427_v56 = vmul.f32 %v3421_v19, %v11797_v54  ;;  %v3428_v21 = vmul.f32 %v3424_v12, %v11798_v16  ;;  %v3426_v61 = vmul.f32 %v3422_v24, %v11799_v3  ;;  %v3378_v22 = vadd.f32 %v3374_v25, %v3347_v20  ;;  %v9699_v19 = vld.sshfl [vmem:[#allocation1 + $0x8] sm:$0xff pattern:$0x75316420] }
 0x5f4   :  { %v3425_v36 = vmul.f32 %v3423_v49, %v11796_v2  ;;  %v3447_v44 = vpop.permute.xlu1 %3446  ;;  %v3408_v58 = vmul.f32 %v9544_v46, %v3397_v39  ;;  %v3381_v57 = vadd.f32 %v3377_v4, %v3350_v6  ;;  %v3407_v26 = vmul.f32 %v9544_v46, %v3396_v14  ;;  %11800 = vst [vmem:[#allocation54_spill] sm:$0xff] %v9699_v19  ;;  %v11801_v4 = vld [vmem:[#allocation120_spill] sm:$0xff]  ;;  %v9715_v6 = vld.sshfl [vmem:[#allocation1 + $0x10] sm:$0xff pattern:$0x75316420] }
 0x5f5   :  { %v3455_v23 = vsel %vm2577_vm8, %v9566_v18, %v9558_v10  ;;  %v3452_v35 = vsel %vm2577_vm8, %v3449_v48, %v9566_v18  ;;  %v3438_v24 = vmul.f32 %v9604_v43, %v3427_v56  ;;  %v3453_v49 = vsel %vm2577_vm8, %v3447_v44, %v3449_v48  ;;  %v9717_v48 = vld.sshfl [vmem:[#allocation1 + $0x18] sm:$0xff pattern:$0x75316420] }
 0x5f6   :  { %v3436_v39 = vmul.f32 %v9604_v43, %v3425_v36  ;;  %v3437_v18 = vmul.f32 %v9604_v43, %v3426_v61  ;;  %v3411_v12 = vadd.f32 %v3407_v26, %v3380_v53  ;;  %v3409_v25 = vadd.f32 %v3405_v9, %v3378_v22  ;;  %11806 = vst [vmem:[#allocation78_spill] sm:$0xff] %v9717_v48 }
 0x5f7   :  { %v3412_v51 = vadd.f32 %v3408_v58, %v3381_v57  ;;  %v11802_v7 = vperm.slane %v11801_v4, 3  ;;  %v11804_v42 = vperm.slane %v11801_v4, 0  ;;  %4122 = vst [vmem:[#allocation1 + $0x10] ss:$2 sm:$0xff] %v11763_v41 }
 0x5f8   :  { %3921 = vrot.lane.b32.xlu0 %v9549_v28, %s5285_s11  ;;  %v9663_v5 = vpop.permute.xlu0 %3767  ;;  %v3406_v28 = vmul.f32 %v9544_v46, %v3395_v62  ;;  %v3379_v62 = vadd.f32 %v3375_v52, %v3348_v38  ;;  %v3439_v38 = vmul.f32 %v9604_v43, %v3428_v21  ;;  %v3454_v46 = vsel %vm2577_vm8, %v9558_v10, %v3447_v44  ;;  %v9697_v52 = vld.sshfl [vmem:[#allocation1] sm:$0xff pattern:$0x75316420] }
 0x5f9   :  { %4120 = vst [vmem:[#allocation1] ss:$2 sm:$0xff] %v11758_v33  ;;  %v3459_v14 = vmul.f32 %v3455_v23, %v11802_v7  ;;  %v11803_v10 = vperm.slane %v11801_v4, 2  ;;  %v3456_v15 = vmul.f32 %v3454_v46, %v11804_v42  ;;  %v3440_v43 = vadd.f32 %v3436_v39, %v3409_v25 }
 0x5fa   :  { %v3410_v34 = vadd.f32 %v3406_v28, %v3379_v62  ;;  %v11805_v28 = vperm.slane %v11801_v4, 1  ;;  %v3442_v44 = vadd.f32 %v3438_v24, %v3411_v12  ;;  %v3443_v8 = vadd.f32 %v3439_v38, %v3412_v51  ;;  %v3479_v62 = vpop.permute.xlu2 %3478 }
 0x5fb   :  { %v3458_v20 = vmul.f32 %v3452_v35, %v11803_v10 }
 0x5fc   :  { %v3457_v37 = vmul.f32 %v3453_v49, %v11805_v28  ;;  %v3441_v36 = vadd.f32 %v3437_v18, %v3410_v34 }
 0x5fe   :  { %v3465_v2 = vpop.permute.xlu1 %3464 }
 0x5ff   :  { %v3467_v54 = vmul.f32 %v3465_v2, %v3456_v15  ;;  %v3468_v56 = vmul.f32 %v3465_v2, %v3457_v37  ;;  %v3469_v16 = vmul.f32 %v3465_v2, %v3458_v20  ;;  %v3470_v21 = vmul.f32 %v3465_v2, %v3459_v14 }
 0x600   :  { %3969 = vrot.lane.b32.xlu0 %v9572_v1, %s5286_s4 }
 0x601   :  { %v3471_v9 = vadd.f32 %v3467_v54, %v3440_v43  ;;  %v3472_v58 = vadd.f32 %v3468_v56, %v3441_v36  ;;  %v3473_v3 = vadd.f32 %v3469_v16, %v3442_v44  ;;  %v3474_v61 = vadd.f32 %v3470_v21, %v3443_v8 }
 0x602   :  { %v9713_v1 = vpop.permute.xlu0 %3598  ;;  %v3523_v8 = vpop.permute.xlu2 %3522 }
 0x603   :  { %v3481_v22 = vperm.slane %v3471_v9, 0  ;;  %v3482_v53 = vperm.slane %v3472_v58, 0  ;;  %v3483_v57 = vperm.slane %v3473_v3, 0  ;;  %v3484_v26 = vperm.slane %v3474_v61, 0 }
 0x604   :  { %v3493_v34 = vperm.slane %v3471_v9, 1  ;;  %v3494_v23 = vperm.slane %v3472_v58, 1  ;;  %v3495_v35 = vperm.slane %v3473_v3, 1  ;;  %v3496_v39 = vperm.slane %v3474_v61, 1 }
 0x605   :  { %v3485_v38 = vmul.f32 %v3481_v22, %v3479_v62  ;;  %v3486_v49 = vmul.f32 %v3482_v53, %v3479_v62  ;;  %v3487_v46 = vmul.f32 %v3483_v57, %v3479_v62  ;;  %v3488_v18 = vmul.f32 %v3484_v26, %v3479_v62 }
 0x606   :  { %v3497_v12 = vmul.f32 %v3493_v34, %v9593_v32  ;;  %v3498_v25 = vmul.f32 %v3494_v23, %v9593_v32  ;;  %v3500_v51 = vmul.f32 %v3496_v39, %v9593_v32  ;;  %v3509_v42 = vperm.slane %v3471_v9, 2 }
 0x607   :  { %v3507_v20 = vpop.permute.xlu1 %3506  ;;  %v3510_v15 = vperm.slane %v3472_v58, 2  ;;  %v3511_v28 = vperm.slane %v3473_v3, 2  ;;  %v3512_v37 = vperm.slane %v3474_v61, 2  ;;  %v3525_v2 = vperm.slane %v3471_v9, 3 }
 0x608   :  { %3975 = vrot.lane.b32.xlu0 %v9562_v63, %s5286_s4  ;;  %v3499_v63 = vmul.f32 %v3495_v35, %v9593_v32  ;;  %v3501_v4 = vadd.f32 %v3497_v12, %v3485_v38  ;;  %v3502_v7 = vadd.f32 %v3498_v25, %v3486_v49  ;;  %v3504_v10 = vadd.f32 %v3500_v51, %v3488_v18  ;;  %v9749_v18 = vld.sshfl [vmem:[#allocation1 + $0x8] sm:$0xff pattern:$0x75316420] }
 0x609   :  { %v3526_v36 = vperm.slane %v3472_v58, 3  ;;  %v3527_v43 = vperm.slane %v3473_v3, 3  ;;  %v3528_v44 = vperm.slane %v3474_v61, 3  ;;  %v3513_v54 = vmul.f32 %v3509_v42, %v3507_v20  ;;  %11807 = vst [vmem:[#allocation96_spill] sm:$0xff] %v9749_v18 }
 0x60a   :  { %v9722_v24 = vpop.permute.xlu0 %3609  ;;  %v3503_v14 = vadd.f32 %v3499_v63, %v3487_v46  ;;  %v3514_v32 = vmul.f32 %v3510_v15, %v3507_v20  ;;  %v3515_v56 = vmul.f32 %v3511_v28, %v3507_v20  ;;  %v3516_v16 = vmul.f32 %v3512_v37, %v3507_v20  ;;  %v9747_v46 = vld.sshfl [vmem:[#allocation1] sm:$0xff pattern:$0x75316420] }
 0x60b   :  { %v3529_v21 = vmul.f32 %v3525_v2, %v3523_v8  ;;  %v3530_v62 = vmul.f32 %v3526_v36, %v3523_v8  ;;  %v3531_v53 = vmul.f32 %v3527_v43, %v3523_v8  ;;  %v3517_v57 = vadd.f32 %v3513_v54, %v3501_v4  ;;  %4219 = vst [vmem:[#allocation1] ss:$2 sm:$0xff] %v11758_v33  ;;  %v5078_v36 = vld [vmem:[%s10693_s14 + $0x18] sm:$0xf] }
 0x60c   :  { %v3518_v26 = vadd.f32 %v3514_v32, %v3502_v7  ;;  %v3519_v9 = vadd.f32 %v3515_v56, %v3503_v14  ;;  %v3520_v58 = vadd.f32 %v3516_v16, %v3504_v10  ;;  %v3532_v3 = vmul.f32 %v3528_v44, %v3523_v8  ;;  %v5076_v7 = vld [vmem:[%s10693_s14 + $0x10] sm:$0xf]  ;;  %v9761_v10 = vld.sshfl [vmem:[#allocation1 + $0x18] sm:$0xff pattern:$0x75316420] }
 0x60d   :  { %v9732_v34 = vadd.f32 %v3529_v21, %v3517_v57  ;;  %v4125_v14 = vld.sshfl [vmem:[#allocation1 + $0x10] sm:$0xff pattern:$0x75316420] }
 0x60e   :  { %v9734_v23 = vadd.f32 %v3530_v62, %v3518_v26  ;;  %v9739_v61 = vadd.f32 %v3531_v53, %v3519_v9  ;;  %v9741_v35 = vadd.f32 %v3532_v3, %v3520_v58  ;;  %4221 = vst [vmem:[#allocation1 + $0x10] ss:$2 sm:$0xff] %v11763_v41  ;;  %v5067_v56 = vld [vmem:[%s10691_s12 + $0x10] sm:$0xf]  ;;  %s5290_s12 = smov 4  }
 0x60f   :  { %v3537_v39 = vsel %vm137_vm11, %v9732_v34, 0.0 }
 0x610   :  { %4025 = vrot.lane.b32.xlu0 %v9647_v31, %s5287_s13  ;;  %v5075_v31 = vld [vmem:[%s10693_s14 + $0xc] sm:$0xf]  ;;  %v3538_v38 = vsel %vm137_vm11, %v9734_v23, 0.0  ;;  %v3540_v12 = vsel %vm137_vm11, %v9739_v61, 0.0  ;;  %v3542_v51 = vsel %vm137_vm11, %v9741_v35, 0.0 }
 0x611   :  { %v3539_v49 = vadd.f32 %v3538_v38, %v3537_v39 }
 0x612   :  { %v9730_v22 = vpop.permute.xlu0 %3624  ;;  %v4222_v42 = vld.sshfl [vmem:[#allocation1] sm:$0xff pattern:$0x75316420]  ;;  %v9770_v37 = vld.sshfl [vmem:[#allocation1 + $0x8] sm:$0xff pattern:$0x75316420] }
 0x613   :  { %v3541_v63 = vadd.f32 %v3540_v12, %v3539_v49  ;;  %4273 = vst [vmem:[#allocation1] ss:$2 sm:$0xff] %v11758_v33 }
 0x615   :  { %v3543_v4 = vadd.f32 %v3542_v51, %v3541_v63  ;;  %v9766_v15 = vld.sshfl [vmem:[#allocation1 + $0x10] sm:$0xff pattern:$0x75316420]  ;;  %v4225_v28 = vld.sshfl [vmem:[#allocation1 + $0x18] sm:$0xff pattern:$0x75316420] }
 0x616   :  { %11808 = vst [vmem:[#allocation130_spill] sm:$0xff] %v9766_v15 }
 0x617   :  { %3544 = vadd.xlane.f32.xlu1 %v3543_v4  ;;  %4275 = vst [vmem:[#allocation1 + $0x10] ss:$2 sm:$0xff] %v11763_v41 }
 0x618   :  { %4055 = vperm.xlu0 %5166, %v5075_v31  }
 0x61a   :  { %v9754_v25 = vpop.permute.xlu0 %3639  ;;  %v9783_v8 = vld.sshfl [vmem:[#allocation1] sm:$0xff pattern:$0x75316420]  ;;  %v4277_v54 = vld.sshfl [vmem:[#allocation1 + $0x8] sm:$0xff pattern:$0x75316420] }
 0x61b   :  { %11810 = vst [vmem:[#allocation80_spill] sm:$0xff] %v9783_v8  ;;  %v11829_v8 = vld [vmem:[#allocation154_spill] sm:$0xff] }
 0x61c   :  { %4349 = vst [vmem:[#allocation1] ss:$2 sm:$0xff] %v11758_v33  ;;  %v3614_v15 = vmul.f32 %v9722_v24, %v11829_v8 }
 0x61e   :  { %v9778_v43 = vld.sshfl [vmem:[#allocation1 + $0x10] sm:$0xff pattern:$0x75316420]  ;;  %v9780_v44 = vld.sshfl [vmem:[#allocation1 + $0x18] sm:$0xff pattern:$0x75316420] }
 0x61f   :  { %11809 = vst [vmem:[#allocation70_spill] sm:$0xff] %v9780_v44  ;;  %v11828_v44 = vld [vmem:[#allocation152_spill] sm:$0xff] }
 0x620   :  { %4109 = vperm.xlu0 %5166, %v5076_v7   ;;  %4351 = vst [vmem:[#allocation1 + $0x10] ss:$2 sm:$0xff] %v11763_v41 }
 0x622   :  { %v9764_v20 = vpop.permute.xlu0 %3695 }
 0x623   :  { %v9792_v16 = vld.sshfl [vmem:[#allocation1] sm:$0xff pattern:$0x75316420]  ;;  %v9794_v21 = vld.sshfl [vmem:[#allocation1 + $0x8] sm:$0xff pattern:$0x75316420] }
 0x624   :  { %11811 = vst [vmem:[#allocation79_spill] sm:$0xff] %v9792_v16 }
 0x625   :  { %11812 = vst [vmem:[#allocation107_spill] sm:$0xff] %v9794_v21 }
 0x626   :  { %4383 = vst [vmem:[#allocation1] ss:$2 sm:$0xff] %v11758_v33 }
 0x627   :  { %v9797_v53 = vld.sshfl [vmem:[#allocation1 + $0x10] sm:$0xff pattern:$0x75316420]  ;;  %v9799_v57 = vld.sshfl [vmem:[#allocation1 + $0x18] sm:$0xff pattern:$0x75316420] }
 0x628   :  { %4135 = vrot.lane.b32.xlu0 %v4125_v14, %s5288_s5  ;;  %11813 = vst [vmem:[#allocation53_spill] sm:$0xff] %v9797_v53  ;;  %v5085_v14 = vld [vmem:[%s10693_s14 + $0x34] sm:$0xf] }
 0x629   :  { %11814 = vst [vmem:[#allocation100_spill] sm:$0xff] %v9799_v57 }
 0x62a   :  { %v9773_v2 = vpop.permute.xlu0 %3710  ;;  %4385 = vst [vmem:[#allocation1 + $0x10] ss:$2 sm:$0xff] %v11763_v41 }
 0x62d   :  { %v9805_v9 = vld.sshfl [vmem:[#allocation1] sm:$0xff pattern:$0x75316420]  ;;  %v9807_v58 = vld.sshfl [vmem:[#allocation1 + $0x8] sm:$0xff pattern:$0x75316420] }
 0x62e   :  { %11815 = vst [vmem:[#allocation108_spill] sm:$0xff] %v9807_v58  ;;  %v11827_v58 = vld [vmem:[#allocation141_spill] sm:$0xff] }
 0x62f   :  { %4437 = vst [vmem:[#allocation1] ss:$2 sm:$0xff] %v11758_v33  ;;  %v3612_v45 = vmul.f32 %v9722_v24, %v11827_v58  ;;  %v11838_v58 = vld [vmem:[#allocation153_spill] sm:$0xff] }
 0x630   :  { %4178 = vperm.xlu0 %5166, %v5078_v36   ;;  %3654 = vperm.xlu1 %5162, %v5067_v56  }
 0x631   :  { %v4388_v12 = vld.sshfl [vmem:[#allocation1 + $0x10] sm:$0xff pattern:$0x75316420]  ;;  %v9824_v63 = vld.sshfl [vmem:[#allocation1 + $0x18] sm:$0xff pattern:$0x75316420] }
 0x632   :  { %v9785_v32 = vpop.permute.xlu0 %3725  ;;  %4439 = vst [vmem:[#allocation1 + $0x10] ss:$2 sm:$0xff] %v11763_v41 }
 0x636   :  { %v9817_v39 = vld.sshfl [vmem:[#allocation1] sm:$0xff pattern:$0x75316420]  ;;  %v4441_v38 = vld.sshfl [vmem:[#allocation1 + $0x8] sm:$0xff pattern:$0x75316420] }
 0x637   :  { %11816 = vst [vmem:[#allocation109_spill] sm:$0xff] %v9817_v39 }
 0x638   :  { %4230 = vrot.lane.b32.xlu0 %v4222_v42, %s5289_s9  ;;  %3739 = vperm.xlu1 %5162, %v9302_v17   ;;  %4536 = vst [vmem:[#allocation1] ss:$2 sm:$0xff] %v11758_v33 }
 0x639   :  { %v4443_v42 = vld.sshfl [vmem:[#allocation1 + $0x18] sm:$0xff pattern:$0x75316420] }
 0x63a   :  { %v3868_v62 = vpop.permute.xlu0 %3867 }
 0x63f   :  { %v9848_v36 = vld.sshfl [vmem:[#allocation1 + $0x8] sm:$0xff pattern:$0x75316420] }
 0x640   :  { %4236 = vrot.lane.b32.xlu0 %v4225_v28, %s5289_s9  ;;  %5167 = vset.pattern.permute.xlu1 %v11743_v47  ;;  %v9842_v28 = vld.sshfl [vmem:[#allocation1 + $0x10] sm:$0xff pattern:$0x75316420]  ;;  %11817 = vst [vmem:[#allocation110_spill] sm:$0xff] %v9848_v36 }
 0x641   :  { %3783 = vperm.xlu1 %5167, %v9302_v17   ;;  %v5082_v17 = vld [vmem:[%s10693_s14 + $0x28] sm:$0xf]  ;;  %4538 = vst [vmem:[#allocation1 + $0x10] ss:$2 sm:$0xff] %v11763_v41 }
 0x642   :  { %v3870_v26 = vpop.permute.xlu0 %3869 }
 0x643   :  { %v9811_v31 = vsel %vm3875_vm6, %v3868_v62, %v3870_v26 }
 0x648   :  { %4286 = vrot.lane.b32.xlu0 %v4277_v54, %s5290_s12  ;;  %v4541_v54 = vld.sshfl [vmem:[#allocation1 + $0x10] sm:$0xff pattern:$0x75316420]  ;;  %v9851_v56 = vld.sshfl [vmem:[#allocation1 + $0x18] sm:$0xff pattern:$0x75316420] }
 0x649   :  { %5169 = vset.pattern.permute.xlu1 %v11735_v50  ;;  %v9846_v50 = vld.sshfl [vmem:[#allocation1] sm:$0xff pattern:$0x75316420]  ;;  %11818 = vst [vmem:[#allocation164_spill] sm:$0xff] %v9851_v56 }
 0x64a   :  { %v3872_v3 = vpop.permute.xlu0 %3871  ;;  %4590 = vst [vmem:[#allocation1] ss:$2 sm:$0xff] %v11758_v33 }
 0x64b   :  { %v9821_v49 = vsel %vm3875_vm6, %v3870_v26, %v3872_v3  ;;  %4592 = vst [vmem:[#allocation1 + $0x10] ss:$2 sm:$0xff] %v11763_v41 }
 0x650   :  { %4316 = vperm.xlu0 %5166, %v5082_v17  }
 0x651   :  { %v4593_v26 = vld.sshfl [vmem:[#allocation1] sm:$0xff pattern:$0x75316420] }
 0x652   :  { %v3874_v51 = vpop.permute.xlu0 %3873 }
 0x653   :  { %v9833_v4 = vsel %vm3875_vm6, %v3872_v3, %v3874_v51  ;;  %v9837_v7 = vsel %vm3875_vm6, %v3874_v51, %v3868_v62  ;;  %v5089_v62 = vld [vmem:[%s10693_s14 + $0x44] sm:$0xf]  ;;  %v9859_v3 = vld.sshfl [vmem:[#allocation1 + $0x8] sm:$0xff pattern:$0x75316420] }
 0x654   :  { %11819 = vst [vmem:[#allocation127_spill] sm:$0xff] %v9859_v3  ;;  %v9865_v51 = vld.sshfl [vmem:[#allocation1 + $0x10] sm:$0xff pattern:$0x75316420]  ;;  %v11846_v3 = vld [vmem:[#allocation115_spill] sm:$0xff] }
 0x655   :  { %4643 = vst [vmem:[#allocation1] ss:$2 sm:$0xff] %v11758_v33 }
 0x656   :  { %11821 = vst [vmem:[#allocation147_spill] sm:$0xff] %v9865_v51 }
 0x658   :  { %4372 = vperm.xlu0 %5166, %v5085_v14  }
 0x65c   :  { %v4647_v17 = vld.sshfl [vmem:[#allocation1 + $0x8] sm:$0xff pattern:$0x75316420] }
 0x660   :  { %4398 = vrot.lane.b32.xlu0 %v4388_v12, %s5291_s28  ;;  %v9862_v12 = vld.sshfl [vmem:[#allocation1] sm:$0xff pattern:$0x75316420] }
 0x661   :  { %11820 = vst [vmem:[#allocation14_spill] sm:$0xff] %v9862_v12 }
 0x662   :  { %4696 = vst [vmem:[#allocation1] ss:$2 sm:$0xff] %v11758_v33 }
 0x668   :  { %4450 = vrot.lane.b32.xlu0 %v4441_v38, %s5292_s30  ;;  %v9868_v38 = vld.sshfl [vmem:[#allocation1 + $0x18] sm:$0xff pattern:$0x75316420] }
 0x669   :  { %11822 = vst [vmem:[#allocation17_spill] sm:$0xff] %v9868_v38  ;;  %v9878_v57 = vld.sshfl [vmem:[#allocation1] sm:$0xff pattern:$0x75316420] }
 0x66a   :  { %4645 = vst [vmem:[#allocation1 + $0x10] ss:$2 sm:$0xff] %v11763_v41  ;;  %v9880_v53 = vld.sshfl [vmem:[#allocation1 + $0x8] sm:$0xff pattern:$0x75316420] }
 0x66b   :  { %11824 = vst [vmem:[#allocation56_spill] sm:$0xff] %v9878_v57 }
 0x66c   :  { %11825 = vst [vmem:[#allocation140_spill] sm:$0xff] %v9880_v53 }
 0x66d   :  { %4749 = vst [vmem:[#allocation1] ss:$2 sm:$0xff] %v11758_v33 }
 0x670   :  { %4454 = vrot.lane.b32.xlu0 %v4443_v42, %s5292_s30 }
 0x671   :  { %v4649_v14 = vld.sshfl [vmem:[#allocation1 + $0x18] sm:$0xff pattern:$0x75316420]  ;;  %v9872_v42 = vld.sshfl [vmem:[#allocation1 + $0x10] sm:$0xff pattern:$0x75316420] }
 0x672   :  { %11823 = vst [vmem:[#allocation132_spill] sm:$0xff] %v9872_v42 }
 0x673   :  { %4698 = vst [vmem:[#allocation1 + $0x10] ss:$2 sm:$0xff] %v11763_v41 }
 0x678   :  { %4510 = vperm.xlu0 %5166, %v5089_v62   ;;  %v5091_v62 = vld [vmem:[%s10693_s14 + $0x4c] sm:$0xf] }
 0x67a   :  { %v4701_v21 = vld.sshfl [vmem:[#allocation1 + $0x10] sm:$0xff pattern:$0x75316420] }
 0x680   :  { %4551 = vrot.lane.b32.xlu0 %v4541_v54, %s5293_s18 }
 0x688   :  { %4601 = vrot.lane.b32.xlu0 %v4593_v26, %s5284_s20  ;;  %v9883_v26 = vld.sshfl [vmem:[#allocation1 + $0x18] sm:$0xff pattern:$0x75316420] }
 0x689   :  { %11826 = vst [vmem:[#allocation63_spill] sm:$0xff] %v9883_v26 }
 0x68a   :  { %v3545_v54 = vpop.xlane.xlu1 %3544  ;;  %4751 = vst [vmem:[#allocation1 + $0x10] ss:$2 sm:$0xff] %v11763_v41 }
 0x68b   :  { %v3546_v16 = vmul.f32 0.001953125, %v3545_v54 }
 0x68d   :  { %v9887_v47 = vsub.f32 %v9732_v34, %v3546_v16  ;;  %v9890_v12 = vsub.f32 %v9734_v23, %v3546_v16  ;;  %v9893_v51 = vsub.f32 %v9739_v61, %v3546_v16 }
 0x68f   :  { %v3551_v53 = vmul.f32 %v9887_v47, %v9887_v47  ;;  %v3552_v54 = vmul.f32 %v9890_v12, %v9890_v12  ;;  %v3553_v26 = vmul.f32 %v9893_v51, %v9893_v51 }
 0x690   :  { %4579 = vperm.xlu0 %5166, %v5091_v62   ;;  %v9896_v62 = vsub.f32 %v9741_v35, %v3546_v16 }
 0x691   :  { %v3555_v23 = vsel %vm137_vm11, %v3551_v53, 0.0  ;;  %v3556_v61 = vsel %vm137_vm11, %v3552_v54, 0.0  ;;  %v3558_v16 = vsel %vm137_vm11, %v3553_v26, 0.0  ;;  %v11830_v53 = vld [vmem:[#allocation142_spill] sm:$0xff]  ;;  %v11831_v26 = vld [vmem:[#allocation145_spill] sm:$0xff] }
 0x692   :  { %v3554_v34 = vmul.f32 %v9896_v62, %v9896_v62  ;;  %v3557_v35 = vadd.f32 %v3556_v61, %v3555_v23  ;;  %v3615_v54 = vmul.f32 %v9722_v24, %v11830_v53  ;;  %v3601_v23 = vmul.f32 %v9713_v1, %v11831_v26  ;;  %v11834_v61 = vld [vmem:[#allocation146_spill] sm:$0xff]  ;;  %v11837_v53 = vld [vmem:[#allocation151_spill] sm:$0xff] }
 0x693   :  { %v3630_v26 = vmul.f32 %v9730_v22, %v11838_v58 }
 0x694   :  { %v3559_v56 = vadd.f32 %v3558_v16, %v3557_v35  ;;  %v3560_v36 = vsel %vm137_vm11, %v3554_v34, 0.0  ;;  %v11832_v34 = vld [vmem:[#allocation135_spill] sm:$0xff]  ;;  %v3604_v35 = vmul.f32 %v9713_v1, %v11834_v61  ;;  %v11835_v16 = vld [vmem:[#allocation136_spill] sm:$0xff]  ;;  %v3616_v57 = vadd.f32 %v3612_v45, %v3601_v23  ;;  %v3681_v45 = vpop.permute.xlu2 %3680 }
 0x695   :  { %v3627_v8 = vmul.f32 %v9730_v22, %v11835_v16  ;;  %v11841_v16 = vld [vmem:[#allocation95_spill] sm:$0xff] }
 0x696   :  { %v3561_v39 = vadd.f32 %v3560_v36, %v3559_v56  ;;  %v11833_v36 = vld [vmem:[#allocation138_spill] sm:$0xff]  ;;  %v3619_v42 = vadd.f32 %v3615_v54, %v3604_v35  ;;  %v3644_v48 = vmul.f32 %v9754_v25, %v11841_v16 }
 0x697   :  { %v3603_v56 = vmul.f32 %v9713_v1, %v11833_v36  ;;  %v11839_v36 = vld [vmem:[#allocation66_spill] sm:$0xff] }
 0x698   :  { %4656 = vrot.lane.b32.xlu0 %v4647_v17, %s5285_s11  ;;  %3562 = vadd.xlane.f32.xlu2 %v3561_v39  ;;  %v3613_v17 = vmul.f32 %v9722_v24, %v11828_v44  ;;  %v3602_v39 = vmul.f32 %v9713_v1, %v11832_v34  ;;  %v11836_v44 = vld [vmem:[#allocation64_spill] sm:$0xff]  ;;  %v3642_v41 = vmul.f32 %v9754_v25, %v11839_v36  ;;  %v11844_v36 = vld [vmem:[#allocation101_spill] sm:$0xff]  ;;  %v11845_v16 = vld [vmem:[#allocation114_spill] sm:$0xff] }
 0x699   :  { %v3628_v24 = vmul.f32 %v9730_v22, %v11836_v44  ;;  %v3618_v18 = vadd.f32 %v3614_v15, %v3603_v56  ;;  %v11840_v1 = vld [vmem:[#allocation156_spill] sm:$0xff]  ;;  %v11842_v44 = vld [vmem:[#allocation106_spill] sm:$0xff]  ;;  %v11843_v56 = vld [vmem:[#allocation81_spill] sm:$0xff] }
 0x69a   :  { %v3617_v34 = vadd.f32 %v3613_v17, %v3602_v39  ;;  %v3643_v61 = vmul.f32 %v9754_v25, %v11840_v1  ;;  %v3645_v38 = vmul.f32 %v9754_v25, %v11842_v44 }
 0x69c   :  { %v3632_v33 = vadd.f32 %v3628_v24, %v3617_v34  ;;  %v11853_v24 = vld [vmem:[#allocation117_spill] sm:$0xff] }
 0x69e   :  { %v3647_v17 = vadd.f32 %v3643_v61, %v3632_v33 }
 0x6a0   :  { %4660 = vrot.lane.b32.xlu0 %v4649_v14, %s5285_s11  ;;  %v3629_v14 = vmul.f32 %v9730_v22, %v11837_v53  ;;  %v3631_v53 = vadd.f32 %v3627_v8, %v3616_v57  ;;  %v3634_v22 = vadd.f32 %v3630_v26, %v3619_v42  ;;  %v11847_v8 = vld [vmem:[#allocation57_spill] sm:$0xff]  ;;  %v11849_v26 = vld [vmem:[#allocation62_spill] sm:$0xff] }
 0x6a1   :  { %v3683_v57 = vmul.f32 %v3681_v45, %v11847_v8  ;;  %v3685_v34 = vmul.f32 %v3681_v45, %v11849_v26 }
 0x6a2   :  { %v3633_v19 = vadd.f32 %v3629_v14, %v3618_v18  ;;  %v3646_v15 = vadd.f32 %v3642_v41, %v3631_v53  ;;  %v3649_v23 = vadd.f32 %v3645_v38, %v3634_v22  ;;  %v3655_v39 = vpop.permute.xlu1 %3654  ;;  %v11848_v18 = vld [vmem:[#allocation122_spill] sm:$0xff]  ;;  %v11851_v53 = vld [vmem:[#allocation163_spill] sm:$0xff] }
 0x6a3   :  { %v3668_v35 = vmul.f32 %v11843_v56, %v3655_v39  ;;  %v3669_v1 = vmul.f32 %v11844_v36, %v3655_v39  ;;  %v3670_v58 = vmul.f32 %v11845_v16, %v3655_v39  ;;  %v3671_v25 = vmul.f32 %v11846_v3, %v3655_v39  ;;  %v11852_v36 = vld [vmem:[#allocation113_spill] sm:$0xff]  ;;  %v11854_v14 = vld [vmem:[#allocation166_spill] sm:$0xff]  ;;  %v4752_v39 = vld.sshfl [vmem:[#allocation1] sm:$0xff pattern:$0x75316420] }
 0x6a4   :  { %v3648_v54 = vadd.f32 %v3644_v48, %v3633_v19  ;;  %v3684_v42 = vmul.f32 %v3681_v45, %v11848_v18  ;;  %v3698_v61 = vmul.f32 %v9764_v20, %v11851_v53  ;;  %v3699_v16 = vmul.f32 %v9764_v20, %v11852_v36 }
 0x6a5   :  { %v3672_v33 = vadd.f32 %v3668_v35, %v3646_v15  ;;  %v3673_v19 = vadd.f32 %v3669_v1, %v3647_v17  ;;  %v3675_v38 = vadd.f32 %v3671_v25, %v3649_v23  ;;  %v3700_v3 = vmul.f32 %v9764_v20, %v11853_v24  ;;  %v11855_v1 = vld [vmem:[#allocation118_spill] sm:$0xff]  ;;  %v11857_v23 = vld [vmem:[#allocation125_spill] sm:$0xff]  ;;  %v11858_v25 = vld [vmem:[#allocation139_spill] sm:$0xff] }
 0x6a6   :  { %v3674_v48 = vadd.f32 %v3670_v58, %v3648_v54  ;;  %v3701_v22 = vmul.f32 %v9764_v20, %v11854_v14  ;;  %v3713_v58 = vmul.f32 %v9773_v2, %v11855_v1  ;;  %v11856_v17 = vld [vmem:[#allocation82_spill] sm:$0xff]  ;;  %v3715_v35 = vmul.f32 %v9773_v2, %v11857_v23 }
 0x6a7   :  { %v3687_v56 = vadd.f32 %v3683_v57, %v3672_v33  ;;  %v3688_v26 = vadd.f32 %v3684_v42, %v3673_v19  ;;  %v3714_v54 = vmul.f32 %v9773_v2, %v11856_v17  ;;  %v3716_v24 = vmul.f32 %v9773_v2, %v11858_v25  ;;  %v11859_v57 = vld [vmem:[#allocation85_spill] sm:$0xff]  ;;  %v11861_v33 = vld [vmem:[#allocation83_spill] sm:$0xff]  ;;  %v3752_v25 = vpop.permute.xlu2 %3751 }
 0x6a8   :  { %4711 = vrot.lane.b32.xlu0 %v4701_v21, %s5286_s4  ;;  %v11850_v21 = vld [vmem:[#allocation93_spill] sm:$0xff]  ;;  %v3728_v42 = vmul.f32 %v9785_v32, %v11859_v57  ;;  %v3730_v19 = vmul.f32 %v9785_v32, %v11861_v33 }
 0x6a9   :  { %v3686_v41 = vmul.f32 %v3681_v45, %v11850_v21  ;;  %v3689_v45 = vadd.f32 %v3685_v34, %v3674_v48  ;;  %v3702_v36 = vadd.f32 %v3698_v61, %v3687_v56  ;;  %v3703_v53 = vadd.f32 %v3699_v16, %v3688_v26  ;;  %v11860_v34 = vld [vmem:[#allocation84_spill] sm:$0xff]  ;;  %v11862_v48 = vld [vmem:[#allocation123_spill] sm:$0xff] }
 0x6aa   :  { %v3740_v23 = vpop.permute.xlu1 %3739 }
 0x6ab   :  { %v3690_v15 = vadd.f32 %v3686_v41, %v3675_v38  ;;  %v3704_v20 = vadd.f32 %v3700_v3, %v3689_v45  ;;  %v3729_v41 = vmul.f32 %v9785_v32, %v11860_v34  ;;  %v3731_v38 = vmul.f32 %v9785_v32, %v11862_v48  ;;  %v5094_v45 = vld [vmem:[%s10693_s14 + $0x58] sm:$0xf] }
 0x6ac   :  { %v3717_v2 = vadd.f32 %v3713_v58, %v3702_v36  ;;  %v3718_v61 = vadd.f32 %v3714_v54, %v3703_v53 }
 0x6ad   :  { %v3705_v14 = vadd.f32 %v3701_v22, %v3690_v15  ;;  %v3719_v26 = vadd.f32 %v3715_v35, %v3704_v20 }
 0x6ae   :  { %v3732_v3 = vadd.f32 %v3728_v42, %v3717_v2  ;;  %v3733_v22 = vadd.f32 %v3729_v41, %v3718_v61 }
 0x6af   :  { %v3720_v16 = vadd.f32 %v3716_v24, %v3705_v14 }
 0x6b0   :  { %4760 = vrot.lane.b32.xlu0 %v4752_v39, %s5287_s13  ;;  %v3734_v39 = vadd.f32 %v3730_v19, %v3719_v26  ;;  %v3742_v15 = vperm.slane %v3732_v3, 0  ;;  %v3743_v34 = vperm.slane %v3733_v22, 0  ;;  %v3754_v17 = vperm.slane %v3732_v3, 1 }
 0x6b1   :  { %v3735_v56 = vadd.f32 %v3731_v38, %v3720_v16  ;;  %v3755_v32 = vperm.slane %v3733_v22, 1  ;;  %v3770_v41 = vperm.slane %v3732_v3, 2  ;;  %v3771_v19 = vperm.slane %v3733_v22, 2 }
 0x6b2   :  { %v3744_v57 = vperm.slane %v3734_v39, 0  ;;  %v3756_v48 = vperm.slane %v3734_v39, 1  ;;  %v3746_v53 = vmul.f32 %v3742_v15, %v3740_v23  ;;  %v3747_v58 = vmul.f32 %v3743_v34, %v3740_v23 }
 0x6b3   :  { %v3745_v33 = vperm.slane %v3735_v56, 0  ;;  %v3757_v36 = vperm.slane %v3735_v56, 1  ;;  %v3758_v54 = vmul.f32 %v3754_v17, %v3752_v25  ;;  %v3759_v35 = vmul.f32 %v3755_v32, %v3752_v25  ;;  %v3784_v61 = vpop.permute.xlu1 %3783 }
 0x6b4   :  { %v3748_v24 = vmul.f32 %v3744_v57, %v3740_v23  ;;  %v3760_v20 = vmul.f32 %v3756_v48, %v3752_v25  ;;  %v3772_v38 = vperm.slane %v3734_v39, 2  ;;  %v3786_v2 = vperm.slane %v3732_v3, 3 }
 0x6b5   :  { %v3749_v14 = vmul.f32 %v3745_v33, %v3740_v23  ;;  %v3761_v42 = vmul.f32 %v3757_v36, %v3752_v25  ;;  %v3762_v26 = vadd.f32 %v3758_v54, %v3746_v53  ;;  %v3763_v16 = vadd.f32 %v3759_v35, %v3747_v58 }
 0x6b6   :  { %v3764_v1 = vadd.f32 %v3760_v20, %v3748_v24  ;;  %v3774_v18 = vmul.f32 %v3770_v41, %v9663_v5  ;;  %v3775_v34 = vmul.f32 %v3771_v19, %v9663_v5  ;;  %v3776_v23 = vmul.f32 %v3772_v38, %v9663_v5  ;;  %v5074_v41 = vld [vmem:[%s10693_s14 + $0x8] sm:$0xf] }
 0x6b7   :  { %v3765_v21 = vadd.f32 %v3761_v42, %v3749_v14  ;;  %v3787_v57 = vperm.slane %v3733_v22, 3  ;;  %v3788_v17 = vperm.slane %v3734_v39, 3  ;;  %v3789_v33 = vperm.slane %v3735_v56, 3  ;;  %v5073_v42 = vld [vmem:[%s10693_s14 + $0x4] sm:$0xf] }
 0x6b8   :  { %4738 = vperm.xlu0 %5166, %v5094_v45   ;;  %v3790_v48 = vmul.f32 %v3786_v2, %v3784_v61  ;;  %v3773_v25 = vperm.slane %v3735_v56, 2  ;;  %v3778_v45 = vadd.f32 %v3774_v18, %v3762_v26  ;;  %v3779_v15 = vadd.f32 %v3775_v34, %v3763_v16 }
 0x6b9   :  { %v3780_v32 = vadd.f32 %v3776_v23, %v3764_v1  ;;  %v3791_v3 = vmul.f32 %v3787_v57, %v3784_v61  ;;  %v3792_v36 = vmul.f32 %v3788_v17, %v3784_v61  ;;  %v3793_v53 = vmul.f32 %v3789_v33, %v3784_v61 }
 0x6ba   :  { %v3777_v58 = vmul.f32 %v3773_v25, %v9663_v5  ;;  %v9985_v24 = vadd.f32 %v3790_v48, %v3778_v45 }
 0x6bb   :  { %v9987_v14 = vadd.f32 %v3791_v3, %v3779_v15  ;;  %v9990_v54 = vadd.f32 %v3792_v36, %v3780_v32  ;;  %v10038_v36 = vpop.permute.xlu0 %3915 }
 0x6bc   :  { %v3781_v22 = vadd.f32 %v3777_v58, %v3765_v21  ;;  %v3798_v39 = vsel %vm137_vm11, %v9985_v24, 0.0  ;;  %v3894_v21 = vld [vmem:[%s10693_s14] sm:$0xf] }
 0x6bd   :  { %v3799_v18 = vsel %vm137_vm11, %v9987_v14, 0.0  ;;  %v3801_v5 = vsel %vm137_vm11, %v9990_v54, 0.0 }
 0x6be   :  { %v9996_v1 = vadd.f32 %v3793_v53, %v3781_v22  ;;  %v3800_v56 = vadd.f32 %v3799_v18, %v3798_v39 }
 0x6c0   :  { %5170 = vset.pattern.permute.xlu0 %v11653_v55  ;;  %v3802_v35 = vadd.f32 %v3801_v5, %v3800_v56  ;;  %v3803_v20 = vsel %vm137_vm11, %v9996_v1, 0.0 }
 0x6c2   :  { %v3804_v55 = vadd.f32 %v3803_v20, %v3802_v35 }
 0x6c4   :  { %3805 = vadd.xlane.f32.xlu2 %v3804_v55 }
 0x6dc   :  { %3897 = vperm.xlu2 %5168, %v3894_v21   ;;  %v10063_v21 = vld [vmem:[#allocation6 + $0x2] ss:$8 sm:$0xf] }
 0x6e4   :  { %3947 = vperm.xlu2 %5168, %v5073_v42  }
 0x6ec   :  { %3971 = vrot.lane.b32.xlu2 %v9589_v30, %s5286_s4 }
 0x6f4   :  { %4001 = vperm.xlu2 %5168, %v5074_v41  }
 0x6fc   :  { %4027 = vrot.lane.b32.xlu2 %v9582_v11, %s5287_s13 }
 0x704   :  { %4077 = vrot.lane.b32.xlu2 %v9697_v52, %s5294_s8  ;;  %v3576_v52 = vstv %s5014_s7 }
 0x70b   :  { %v3563_v19 = vpop.xlane.xlu2 %3562 }
 0x70c   :  { %4081 = vrot.lane.b32.xlu2 %v9715_v6, %s5294_s8  ;;  %v3564_v38 = vmul.f32 0.001953125, %v3563_v19  ;;  %v5079_v6 = vld [vmem:[%s10693_s14 + $0x1c] sm:$0xf] }
 0x70e   :  { %v3565_v2 = vadd.f32 1e-05, %v3564_v38 }
 0x710   :  { %5180 = vrsqrt.f32 %v3565_v2  ;;  %vm3572_vm15 = vweird.f32 %v3565_v2 }
 0x714   :  { %4131 = vrot.lane.b32.xlu2 %v9747_v46, %s5288_s5 }
 0x716   :  { %v5181_v30 = vpop.eup %5180 }
 0x717   :  { %v3567_v61 = vmul.f32 %v5181_v30, %v3565_v2  ;;  %vm3573_vm8 = vweird.f32 %v5181_v30 }
 0x718   :  { %vm3574_vm14 = vmor %vm3572_vm15, %vm3573_vm8  ;;  %vm4402_vm8 = vcmp.lt.s32.totalorder %v5460_v40, 124  ;;  %vm4555_vm15 = vcmp.lt.s32.totalorder %v5460_v40, 92 }
 0x719   :  { %v3568_v26 = vmul.f32 %v5181_v30, %v3567_v61 }
 0x71b   :  { %v3569_v11 = vmul.f32 0.5, %v3568_v26 }
 0x71c   :  { %4137 = vrot.lane.b32.xlu2 %v9761_v10, %s5288_s5 }
 0x71d   :  { %v3570_v16 = vsub.f32 1.5, %v3569_v11 }
 0x71f   :  { %v3571_v34 = vmul.f32 %v5181_v30, %v3570_v16  ;;  %v5083_v16 = vld [vmem:[%s10693_s14 + $0x2c] sm:$0xf] }
 0x721   :  { %v3575_v23 = vsel %vm3574_vm14, %v5181_v30, %v3571_v34 }
 0x722   :  { %v3577_v46 = vmul.f32 %v3576_v52, %v3575_v23 }
 0x724   :  { %4193 = vperm.xlu2 %5168, %v5079_v6   ;;  %v3579_v57 = vmul.f32 %v3577_v46, %v9890_v12  ;;  %v3581_v17 = vmul.f32 %v3577_v46, %v9896_v62  ;;  %v3578_v10 = vmul.f32 %v3577_v46, %v9887_v47  ;;  %v3580_v33 = vmul.f32 %v3577_v46, %v9893_v51  ;;  %v5081_v47 = vld [vmem:[%s10693_s14 + $0x24] sm:$0xf]  ;;  %v3880_v12 = vld [vmem:[#allocation6] ss:$8 sm:$0xf]  ;;  %v10045_v51 = vpop.permute.xlu0 %3919 }
 0x725   :  { %v3883_v62 = vperm.slane %v3880_v12, 1  ;;  %v3884_v53 = vperm.slane %v3880_v12, 2  ;;  %v3885_v22 = vperm.slane %v3880_v12, 3 }
 0x726   :  { %v3586_v48 = vrot.slane %v3579_v57, 4  ;;  %v3587_v25 = vrot.slane %v3581_v17, 4 }
 0x727   :  { %v3891_v5 = vmul.f32 %v3883_v62, %v9811_v31  ;;  %v3892_v35 = vmul.f32 %v3884_v53, %v9821_v49  ;;  %v3893_v55 = vmul.f32 %v3885_v22, %v9833_v4  ;;  %v11870_v62 = vld [vmem:[#allocation96_spill] sm:$0xff] }
 0x728   :  { %v3588_v45 = vsel %vm137_vm11, %v3578_v10, %v3586_v48  ;;  %v3589_v15 = vsel %vm137_vm11, %v3580_v33, %v3587_v25  ;;  %v5087_v25 = vld [vmem:[%s10693_s14 + $0x3c] sm:$0xf] }
 0x729   :  { %v10033_v32 = vadd.f32 %v3588_v45, %v9538_v60  ;;  %v10036_v3 = vadd.f32 %v3589_v15, %v9540_v13  ;;  %v3882_v60 = vperm.slane %v3880_v12, 0  ;;  %v10134_v45 = vld.sshfl [vmem:[#allocation1 + $0x10] sm:$0xff pattern:$0x75316420]  ;;  %v11869_v12 = vld [vmem:[#allocation132_spill] sm:$0xff] }
 0x72a   :  { %v4755_v15 = vld.sshfl [vmem:[#allocation1 + $0x18] sm:$0xff pattern:$0x75316420] }
 0x72b   :  { %v3890_v20 = vmul.f32 %v3882_v60, %v9837_v7  ;;  %v5077_v60 = vld [vmem:[%s10693_s14 + $0x14] sm:$0xf] }
 0x72c   :  { %4232 = vrot.lane.b32.xlu2 %v9770_v37, %s5289_s9  ;;  %v3922_v19 = vpop.permute.xlu0 %3921 }
 0x72d   :  { %v3924_v26 = vsel %vm3923_vm0, %v10045_v51, %v3922_v19  ;;  %v3927_v11 = vsel %vm3923_vm0, %v3922_v19, %v10038_v36 }
 0x734   :  { %4262 = vperm.xlu2 %5168, %v5081_v47  }
 0x737   :  { %v3806_v58 = vpop.xlane.xlu2 %3805 }
 0x738   :  { %v3807_v13 = vmul.f32 0.001953125, %v3806_v58  ;;  %v11871_v58 = vld [vmem:[#allocation56_spill] sm:$0xff] }
 0x73a   :  { %v10048_v39 = vsub.f32 %v9985_v24, %v3807_v13  ;;  %v10051_v18 = vsub.f32 %v9987_v14, %v3807_v13  ;;  %v10054_v37 = vsub.f32 %v9990_v54, %v3807_v13  ;;  %v10057_v56 = vsub.f32 %v9996_v1, %v3807_v13  ;;  %v5093_v13 = vld [vmem:[%s10693_s14 + $0x54] sm:$0xf] }
 0x73b   :  { %v3931_v54 = vperm.slane %v10063_v21, 0  ;;  %v3934_v1 = vperm.slane %v10063_v21, 3 }
 0x73c   :  { %v3812_v24 = vmul.f32 %v10048_v39, %v10048_v39  ;;  %v3813_v14 = vmul.f32 %v10051_v18, %v10051_v18  ;;  %4288 = vrot.lane.b32.xlu2 %v9778_v43, %s5290_s12  ;;  %v3814_v31 = vmul.f32 %v10054_v37, %v10054_v37  ;;  %v3815_v49 = vmul.f32 %v10057_v56, %v10057_v56 }
 0x73d   :  { %v3939_v23 = vmul.f32 %v3931_v54, %v3927_v11  ;;  %v3942_v46 = vmul.f32 %v3934_v1, %v3924_v26  ;;  %v11874_v54 = vld [vmem:[#allocation70_spill] sm:$0xff] }
 0x73e   :  { %v3816_v4 = vsel %vm137_vm11, %v3812_v24, 0.0  ;;  %v3817_v7 = vsel %vm137_vm11, %v3813_v14, 0.0  ;;  %v3819_v43 = vsel %vm137_vm11, %v3814_v31, 0.0  ;;  %v3821_v34 = vsel %vm137_vm11, %v3815_v49, 0.0  ;;  %v11872_v24 = vld [vmem:[#allocation130_spill] sm:$0xff]  ;;  %v11873_v31 = vld [vmem:[#allocation80_spill] sm:$0xff] }
 0x73f   :  { %v3898_v42 = vpop.permute.xlu2 %3897  ;;  %v3818_v41 = vadd.f32 %v3817_v7, %v3816_v4 }
 0x740   :  { %v3900_v38 = vmul.f32 %v3898_v42, %v3890_v20  ;;  %v10081_v2 = vmul.f32 %v3898_v42, %v3891_v5  ;;  %v10083_v30 = vmul.f32 %v3898_v42, %v3892_v35  ;;  %v3903_v61 = vmul.f32 %v3898_v42, %v3893_v55  ;;  %v5080_v5 = vld [vmem:[%s10693_s14 + $0x20] sm:$0xf]  ;;  %v10156_v35 = vpop.permute.xlu0 %3969 }
 0x741   :  { %v3820_v52 = vadd.f32 %v3819_v43, %v3818_v41  ;;  %v5096_v41 = vld [vmem:[%s10693_s14 + $0x60] sm:$0xf] }
 0x743   :  { %v3822_v6 = vadd.f32 %v3821_v34, %v3820_v52  ;;  %v11875_v52 = vmov 2  }
 0x744   :  { %4331 = vperm.xlu2 %5168, %v5083_v16  }
 0x745   :  { %3823 = vadd.xlane.f32.xlu1 %v3822_v6  ;;  %v11876_v6 = vld [vmem:[#allocation108_spill] sm:$0xff] }
 0x747   :  { %v10095_v57 = vpop.permute.xlu2 %3947 }
 0x748   :  { %v3950_v17 = vmul.f32 %v10095_v57, %v3939_v23  ;;  %v3953_v10 = vmul.f32 %v10095_v57, %v3942_v46  ;;  %v10161_v55 = vpop.permute.xlu0 %3975 }
 0x74a   :  { %v10099_v33 = vadd.f32 %v3950_v17, %v3900_v38  ;;  %v10101_v48 = vadd.f32 %v3953_v10, %v3903_v61  ;;  %v5084_v38 = vld [vmem:[%s10693_s14 + $0x30] sm:$0xf] }
 0x74c   :  { %4394 = vrot.lane.b32.xlu2 %v9805_v9, %s5291_s28  ;;  %v5090_v9 = vld [vmem:[%s10693_s14 + $0x48] sm:$0xf] }
 0x74f   :  { %v10148_v22 = vpop.permute.xlu2 %3971 }
 0x750   :  { %v10170_v49 = vpop.permute.xlu0 %4025 }
 0x754   :  { %4400 = vrot.lane.b32.xlu2 %v9824_v63, %s5291_s28  ;;  %v11864_v63 = vld [vmem:[#allocation54_spill] sm:$0xff] }
 0x757   :  { %v10158_v20 = vpop.permute.xlu2 %4001 }
 0x758   :  { %v10180_v43 = vpop.permute.xlu0 %4055 }
 0x75c   :  { %4452 = vrot.lane.b32.xlu2 %v9842_v28, %s5292_s30  ;;  %v11865_v28 = vld [vmem:[#allocation47_spill] sm:$0xff] }
 0x75e   :  { %3917 = vrot.lane.b32.xlu1 %v9554_v59, %s5285_s11  ;;  %v11863_v59 = vld [vmem:[#allocation127_spill] sm:$0xff] }
 0x75f   :  { %v10165_v14 = vpop.permute.xlu2 %4027 }
 0x760   :  { %v10187_v11 = vpop.permute.xlu0 %4109 }
 0x764   :  { %4480 = vperm.xlu2 %5168, %v5087_v25  }
 0x766   :  { %3973 = vrot.lane.b32.xlu1 %v9560_v27, %s5286_s4  ;;  %v4753_v27 = vld.sshfl [vmem:[#allocation1 + $0x8] sm:$0xff pattern:$0x75316420] }
 0x767   :  { %4802 = vst [vmem:[#allocation1] ss:$2 sm:$0xff] %v11865_v28  ;;  %v10172_v7 = vpop.permute.xlu2 %4077  ;;  %v3933_v28 = vperm.slane %v10063_v21, 2 }
 0x76c   :  { %4547 = vrot.lane.b32.xlu2 %v9846_v50, %s5293_s18  ;;  %v11866_v50 = vld [vmem:[#allocation17_spill] sm:$0xff] }
 0x76e   :  { %4023 = vrot.lane.b32.xlu1 %v9645_v0, %s5287_s13  ;;  %v11867_v0 = vld [vmem:[#allocation78_spill] sm:$0xff]  ;;  %v4806_v47 = vld.sshfl [vmem:[#allocation1 + $0x8] sm:$0xff pattern:$0x75316420] }
 0x76f   :  { %4815 = vrot.lane.b32.xlu0 %v4806_v47, %s5294_s8  ;;  %v10185_v61 = vpop.permute.xlu2 %4081 }
 0x774   :  { %4525 = vperm.xlu2 %5168, %v5090_v9   ;;  %v10194_v9 = vpop.permute.xlu0 %4135 }
 0x776   :  { %4029 = vrot.lane.b32.xlu1 %v9584_v29, %s5287_s13  ;;  %v11868_v29 = vld [vmem:[#allocation48_spill] sm:$0xff] }
 0x777   :  { %4804 = vst [vmem:[#allocation1 + $0x10] ss:$2 sm:$0xff] %v11868_v29  ;;  %v10192_v23 = vpop.permute.xlu2 %4131 }
 0x77c   :  { %4603 = vrot.lane.b32.xlu2 %v11863_v59, %s5284_s20 }
 0x77e   :  { %4079 = vrot.lane.b32.xlu1 %v11864_v63, %s5294_s8  ;;  %v4808_v53 = vld.sshfl [vmem:[#allocation1 + $0x18] sm:$0xff pattern:$0x75316420]  ;;  %v4807_v4 = vld.sshfl [vmem:[#allocation1 + $0x10] sm:$0xff pattern:$0x75316420] }
 0x77f   :  { %4819 = vrot.lane.b32.xlu0 %v4808_v53, %s5294_s8  ;;  %v11877_v63 = vld [vmem:[#allocation109_spill] sm:$0xff]  ;;  %v10206_v29 = vpop.permute.xlu2 %4137  ;;  %v5086_v53 = vld [vmem:[%s10693_s14 + $0x38] sm:$0xf] }
 0x784   :  { %4607 = vrot.lane.b32.xlu2 %v11866_v50, %s5284_s20 }
 0x786   :  { %4083 = vrot.lane.b32.xlu1 %v11867_v0, %s5294_s8 }
 0x78c   :  { %4658 = vrot.lane.b32.xlu2 %v11869_v12, %s5285_s11 }
 0x78e   :  { %4133 = vrot.lane.b32.xlu1 %v11870_v62, %s5288_s5 }
 0x794   :  { %4707 = vrot.lane.b32.xlu2 %v11871_v58, %s5286_s4 }
 0x796   :  { %4163 = vperm.xlu1 %5169, %v5077_v60  }
 0x79c   :  { %4685 = vperm.xlu2 %5168, %v5093_v13   ;;  %v3983_v13 = vld [vmem:[#allocation6 + $0x4] ss:$8 sm:$0xf] }
 0x79e   :  { %4208 = vperm.xlu1 %5169, %v5080_v5  }
 0x7a4   :  { %4762 = vrot.lane.b32.xlu2 %v4753_v27, %s5287_s13  ;;  %v3932_v27 = vperm.slane %v10063_v21, 1 }
 0x7a6   :  { %4234 = vrot.lane.b32.xlu1 %v11872_v24, %s5289_s9 }
 0x7ac   :  { %4766 = vrot.lane.b32.xlu2 %v4755_v15, %s5287_s13 }
 0x7ae   :  { %4284 = vrot.lane.b32.xlu1 %v11873_v31, %s5290_s12 }
 0x7b4   :  { %4817 = vrot.lane.b32.xlu2 %v4807_v4, %s5294_s8 }
 0x7b6   :  { %4290 = vrot.lane.b32.xlu1 %v11874_v54, %s5290_s12  ;;  %s5063_s12 = sld [smem:[#allocation2 + $0x6]] }
 0x7b8   :  { %v3824_v1 = vpop.xlane.xlu1 %3823 }
 0x7b9   :  { %v3825_v42 = vmul.f32 0.001953125, %v3824_v1  ;;  %v3987_v1 = vperm.slane %v3983_v13, 2 }
 0x7bb   :  { %v3826_v19 = vadd.f32 1e-05, %v3825_v42 }
 0x7bc   :  { %4844 = vperm.xlu2 %5168, %v5096_v41   ;;  %v3837_v10 = vstv %s5063_s12  ;;  %v3986_v41 = vperm.slane %v3983_v13, 1 }
 0x7bd   :  { %5182 = vrsqrt.f32 %v3826_v19  ;;  %vm3833_vm1 = vweird.f32 %v3826_v19 }
 0x7be   :  { %4346 = vperm.xlu1 %5169, %v5084_v38  }
 0x7c3   :  { %v5183_v26 = vpop.eup %5182 }
 0x7c4   :  { %v3828_v16 = vmul.f32 %v5183_v26, %v3826_v19  ;;  %5171 = vset.pattern.permute.xlu2 %v11875_v52  ;;  %vm3834_vm4 = vweird.f32 %v5183_v26  ;;  %v5088_v52 = vld [vmem:[%s10693_s14 + $0x40] sm:$0xf] }
 0x7c5   :  { %vm3835_vm5 = vmor %vm3833_vm1, %vm3834_vm4 }
 0x7c6   :  { %v3829_v34 = vmul.f32 %v5183_v26, %v3828_v16  ;;  %4396 = vrot.lane.b32.xlu1 %v11876_v6, %s5291_s28  ;;  %v3980_v16 = vsel %vm3977_vm7, %v10156_v35, %v10148_v22 }
 0x7c8   :  { %v3830_v46 = vmul.f32 0.5, %v3829_v34  ;;  %v10243_v34 = vpop.permute.xlu2 %4193 }
 0x7ca   :  { %v3831_v17 = vsub.f32 1.5, %v3830_v46  ;;  %v4037_v46 = vld [vmem:[#allocation6 + $0x6] ss:$8 sm:$0xf] }
 0x7cc   :  { %v3832_v25 = vmul.f32 %v5183_v26, %v3831_v17  ;;  %v3994_v17 = vmul.f32 %v3986_v41, %v3980_v16 }
 0x7ce   :  { %v3836_v59 = vsel %vm3835_vm5, %v5183_v26, %v3832_v25  ;;  %4448 = vrot.lane.b32.xlu1 %v11877_v63, %s5292_s30  ;;  %v4040_v25 = vperm.slane %v4037_v46, 1  ;;  %v3981_v63 = vsel %vm3977_vm7, %v10161_v55, %v10156_v35  ;;  %v4039_v35 = vperm.slane %v4037_v46, 0 }
 0x7cf   :  { %v3838_v50 = vmul.f32 %v3837_v10, %v3836_v59  ;;  %v3985_v59 = vperm.slane %v3983_v13, 0 }
 0x7d0   :  { %v3918_v0 = vpop.permute.xlu1 %3917 }
 0x7d1   :  { %v3925_v15 = vsel %vm3923_vm0, %v3918_v0, %v10045_v51  ;;  %v3926_v47 = vsel %vm3923_vm0, %v10038_v36, %v3918_v0  ;;  %v3840_v21 = vmul.f32 %v3838_v50, %v10051_v18  ;;  %v3842_v60 = vmul.f32 %v3838_v50, %v10057_v56 }
 0x7d2   :  { %v3940_v12 = vmul.f32 %v3932_v27, %v3926_v47  ;;  %v3941_v62 = vmul.f32 %v3933_v28, %v3925_v15  ;;  %v3839_v5 = vmul.f32 %v3838_v50, %v10048_v39  ;;  %v3841_v36 = vmul.f32 %v3838_v50, %v10054_v37 }
 0x7d3   :  { %v3847_v24 = vrot.slane %v3840_v21, 4  ;;  %v3848_v31 = vrot.slane %v3842_v60, 4  ;;  %v3988_v18 = vperm.slane %v3983_v13, 3  ;;  %v4005_v50 = vmul.f32 %v10158_v20, %v3994_v17 }
 0x7d4   :  { %v3951_v58 = vmul.f32 %v10095_v57, %v3940_v12  ;;  %v3952_v51 = vmul.f32 %v10095_v57, %v3941_v62  ;;  %v10222_v57 = vpop.permute.xlu0 %4178  ;;  %v3993_v0 = vmul.f32 %v3985_v59, %v3981_v63  ;;  %v10260_v12 = vpop.permute.xlu2 %4232 }
 0x7d5   :  { %v3849_v56 = vsel %vm137_vm11, %v3839_v5, %v3847_v24  ;;  %v3850_v42 = vsel %vm137_vm11, %v3841_v36, %v3848_v31  ;;  %v4033_v5 = vsel %vm4031_vm9, %v10170_v49, %v10165_v14  ;;  %v4091_v31 = vld [vmem:[#allocation6 + $0x20] ss:$8 sm:$0xf] }
 0x7d6   :  { %v3955_v4 = vadd.f32 %v3951_v58, %v10081_v2  ;;  %v3956_v54 = vadd.f32 %v3952_v51, %v10083_v30  ;;  %4426 = vperm.xlu1 %5169, %v5086_v53   ;;  %v10231_v30 = vadd.f32 %v3849_v56, %v10033_v32  ;;  %v10234_v26 = vadd.f32 %v3850_v42, %v10036_v3  ;;  %v11878_v53 = vld [vmem:[#allocation110_spill] sm:$0xff] }
 0x7d7   :  { %v4004_v21 = vmul.f32 %v10158_v20, %v3993_v0  ;;  %v4041_v58 = vperm.slane %v4037_v46, 2  ;;  %v4093_v59 = vperm.slane %v4091_v31, 0 }
 0x7d8   :  { %v3974_v39 = vpop.permute.xlu1 %3973  ;;  %v4009_v15 = vadd.f32 %v4005_v50, %v3955_v4 }
 0x7d9   :  { %v3978_v37 = vsel %vm3977_vm7, %v3974_v39, %v10161_v55  ;;  %v3979_v2 = vsel %vm3977_vm7, %v10148_v22, %v3974_v39  ;;  %v4042_v55 = vperm.slane %v4037_v46, 3  ;;  %v11879_v39 = vld [vmem:[#allocation164_spill] sm:$0xff] }
 0x7da   :  { %v3995_v19 = vmul.f32 %v3987_v1, %v3979_v2  ;;  %v3996_v38 = vmul.f32 %v3988_v18, %v3978_v37  ;;  %v4049_v18 = vmul.f32 %v4041_v58, %v4033_v5 }
 0x7dc   :  { %v4006_v32 = vmul.f32 %v10158_v20, %v3995_v19  ;;  %v4007_v6 = vmul.f32 %v10158_v20, %v3996_v38  ;;  %v10256_v28 = vpop.permute.xlu0 %4230  ;;  %v4008_v20 = vadd.f32 %v4004_v21, %v10099_v33  ;;  %v10282_v37 = vpop.permute.xlu2 %4262  ;;  %v4060_v19 = vmul.f32 %v10180_v43, %v4049_v18 }
 0x7de   :  { %v4010_v10 = vadd.f32 %v4006_v32, %v3956_v54  ;;  %v4011_v3 = vadd.f32 %v4007_v6, %v10101_v48  ;;  %4495 = vperm.xlu1 %5169, %v5088_v52  }
 0x7e0   :  { %v4024_v22 = vpop.permute.xlu1 %4023  ;;  %v4064_v52 = vadd.f32 %v4060_v19, %v4010_v10 }
 0x7e1   :  { %v4034_v27 = vsel %vm4031_vm9, %v4024_v22, %v10170_v49  ;;  %v4095_v49 = vperm.slane %v4091_v31, 2 }
 0x7e2   :  { %v4048_v48 = vmul.f32 %v4040_v25, %v4034_v27  ;;  %v11880_v25 = vld [vmem:[#allocation147_spill] sm:$0xff] }
 0x7e4   :  { %v4059_v47 = vmul.f32 %v10180_v43, %v4048_v48  ;;  %v10274_v4 = vpop.permute.xlu0 %4236  ;;  %v10303_v27 = vpop.permute.xlu2 %4288 }
 0x7e6   :  { %v4063_v62 = vadd.f32 %v4059_v47, %v4009_v15  ;;  %4549 = vrot.lane.b32.xlu1 %v11878_v53, %s5293_s18  ;;  %v11881_v53 = vld [vmem:[#allocation14_spill] sm:$0xff] }
 0x7e8   :  { %v4030_v60 = vpop.permute.xlu1 %4029 }
 0x7e9   :  { %v4032_v51 = vsel %vm4031_vm9, %v10165_v14, %v4030_v60  ;;  %v4035_v13 = vsel %vm4031_vm9, %v4030_v60, %v4024_v22  ;;  %v4094_v14 = vperm.slane %v4091_v31, 1  ;;  %v4096_v22 = vperm.slane %v4091_v31, 3 }
 0x7ea   :  { %v4047_v36 = vmul.f32 %v4039_v35, %v4035_v13  ;;  %v4050_v24 = vmul.f32 %v4042_v55, %v4032_v51  ;;  %v4140_v60 = vsel %vm4139_vm10, %v10194_v9, %v10206_v29  ;;  %v4143_v13 = vsel %vm4139_vm10, %v10206_v29, %v10192_v23 }
 0x7ec   :  { %v4058_v54 = vmul.f32 %v10180_v43, %v4047_v36  ;;  %v4061_v1 = vmul.f32 %v10180_v43, %v4050_v24  ;;  %v10293_v46 = vpop.permute.xlu0 %4286  ;;  %v10319_v5 = vpop.permute.xlu2 %4331 }
 0x7ee   :  { %v4062_v56 = vadd.f32 %v4058_v54, %v4008_v20  ;;  %v4065_v42 = vadd.f32 %v4061_v1, %v4011_v3  ;;  %4553 = vrot.lane.b32.xlu1 %v11879_v39, %s5293_s18 }
 0x7f0   :  { %v4080_v2 = vpop.permute.xlu1 %4079 }
 0x7f1   :  { %v4087_v33 = vsel %vm4085_vm13, %v4080_v2, %v10185_v61  ;;  %v4088_v41 = vsel %vm4085_vm13, %v10172_v7, %v4080_v2  ;;  %v11883_v2 = vld [vmem:[#allocation135_spill] sm:$0xff] }
 0x7f2   :  { %v4102_v38 = vmul.f32 %v4094_v14, %v4088_v41  ;;  %v4103_v16 = vmul.f32 %v4095_v49, %v4087_v33  ;;  %v11882_v14 = vld [vmem:[#allocation145_spill] sm:$0xff]  ;;  %v4182_v29 = vmul.f32 %v10222_v57, %v11883_v2  ;;  %v11884_v41 = vld [vmem:[#allocation138_spill] sm:$0xff] }
 0x7f3   :  { %v4181_v49 = vmul.f32 %v10222_v57, %v11882_v14  ;;  %v11895_v14 = vld [vmem:[#allocation63_spill] sm:$0xff] }
 0x7f4   :  { %v4113_v32 = vmul.f32 %v10187_v11, %v4102_v38  ;;  %v4114_v6 = vmul.f32 %v10187_v11, %v4103_v16  ;;  %v10309_v35 = vpop.permute.xlu0 %4316 }
 0x7f6   :  { %v4117_v17 = vadd.f32 %v4113_v32, %v4063_v62  ;;  %v4118_v3 = vadd.f32 %v4114_v6, %v4064_v52  ;;  %4605 = vrot.lane.b32.xlu1 %v11880_v25, %s5284_s20  ;;  %v11885_v52 = vld [vmem:[#allocation146_spill] sm:$0xff]  ;;  %v11886_v6 = vld [vmem:[#allocation141_spill] sm:$0xff] }
 0x7f7   :  { %v4184_v32 = vmul.f32 %v10222_v57, %v11885_v52  ;;  %v4196_v25 = vmul.f32 %v10243_v34, %v11886_v6 }
 0x7f8   :  { %v4084_v63 = vpop.permute.xlu1 %4083 }
 0x7f9   :  { %v4086_v43 = vsel %vm4085_vm13, %v10185_v61, %v4084_v63  ;;  %v4089_v10 = vsel %vm4085_vm13, %v4084_v63, %v10172_v7  ;;  %v4145_v61 = vld [vmem:[#allocation6 + $0x42] ss:$8 sm:$0xf] }
 0x7fa   :  { %v4101_v50 = vmul.f32 %v4093_v59, %v4089_v10  ;;  %v4104_v48 = vmul.f32 %v4096_v22, %v4086_v43  ;;  %v4150_v7 = vperm.slane %v4145_v61, 3  ;;  %v4147_v21 = vperm.slane %v4145_v61, 0  ;;  %v11887_v59 = vld [vmem:[#allocation152_spill] sm:$0xff]  ;;  %v11888_v43 = vld [vmem:[#allocation154_spill] sm:$0xff] }
 0x7fb   :  { %v4148_v58 = vperm.slane %v4145_v61, 1  ;;  %v4149_v51 = vperm.slane %v4145_v61, 2  ;;  %v4197_v22 = vmul.f32 %v10243_v34, %v11887_v59  ;;  %v4198_v10 = vmul.f32 %v10243_v34, %v11888_v43 }
 0x7fc   :  { %v4112_v0 = vmul.f32 %v10187_v11, %v4101_v50  ;;  %v4115_v15 = vmul.f32 %v10187_v11, %v4104_v48  ;;  %v5092_v11 = vld [vmem:[%s10693_s14 + $0x50] sm:$0xf]  ;;  %v4158_v31 = vmul.f32 %v4150_v7, %v4140_v60  ;;  %v4155_v20 = vmul.f32 %v4147_v21, %v4143_v13  ;;  %v10327_v33 = vpop.permute.xlu0 %4372  ;;  %v11891_v21 = vld [vmem:[#allocation136_spill] sm:$0xff] }
 0x7fe   :  { %v4116_v47 = vadd.f32 %v4112_v0, %v4062_v56  ;;  %v4119_v62 = vadd.f32 %v4115_v15, %v4065_v42  ;;  %4654 = vrot.lane.b32.xlu1 %v11881_v53, %s5285_s11  ;;  %v11889_v15 = vld [vmem:[#allocation142_spill] sm:$0xff] }
 0x800   :  { %v4134_v55 = vpop.permute.xlu1 %4133 }
 0x801   :  { %v4141_v36 = vsel %vm4139_vm10, %v4134_v55, %v10194_v9  ;;  %v4142_v24 = vsel %vm4139_vm10, %v10192_v23, %v4134_v55  ;;  %v4183_v23 = vmul.f32 %v10222_v57, %v11884_v41  ;;  %v11890_v57 = vld [vmem:[#allocation140_spill] sm:$0xff] }
 0x802   :  { %v4156_v54 = vmul.f32 %v4148_v58, %v4142_v24  ;;  %v4157_v1 = vmul.f32 %v4149_v51, %v4141_v36  ;;  %v11892_v58 = vld [vmem:[#allocation64_spill] sm:$0xff]  ;;  %v11894_v36 = vld [vmem:[#allocation153_spill] sm:$0xff] }
 0x806   :  { %4632 = vperm.xlu1 %5169, %v5092_v11   ;;  %v11893_v11 = vld [vmem:[#allocation151_spill] sm:$0xff] }
 0x808   :  { %v4164_v18 = vpop.permute.xlu1 %4163 }
 0x809   :  { %v4166_v56 = vmul.f32 %v4164_v18, %v4155_v20  ;;  %v4167_v42 = vmul.f32 %v4164_v18, %v4156_v54  ;;  %v4168_v39 = vmul.f32 %v4164_v18, %v4157_v1  ;;  %v4169_v9 = vmul.f32 %v4164_v18, %v4158_v31  ;;  %v10356_v1 = vld [vmem:[%s10694_s15] sm:$0xf]  ;;  %v10358_v18 = vpop.permute.xlu0 %4398 }
 0x80a   :  { %4870 = vperm.xlu0 %5170, %v10356_v1   ;;  %4886 = vperm.xlu2 %5171, %v10356_v1  }
 0x80b   :  { %v4170_v19 = vadd.f32 %v4166_v56, %v4116_v47  ;;  %v4171_v38 = vadd.f32 %v4167_v42, %v4117_v17  ;;  %v4172_v16 = vadd.f32 %v4168_v39, %v4118_v3  ;;  %v4173_v63 = vadd.f32 %v4169_v9, %v4119_v62  ;;  %v10341_v3 = vpop.permute.xlu2 %4394  ;;  %v4244_v42 = vld [vmem:[#allocation6 + $0x62] ss:$8 sm:$0xf] }
 0x80c   :  { %v4199_v17 = vmul.f32 %v10243_v34, %v11889_v15  ;;  %v10349_v34 = vld [vmem:[#allocation6 + $0x84] ss:$8 sm:$0xf]  ;;  %v4249_v2 = vperm.slane %v4244_v42, 3 }
 0x80d   :  { %v4185_v50 = vadd.f32 %v4181_v49, %v4170_v19  ;;  %v4186_v48 = vadd.f32 %v4182_v29, %v4171_v38  ;;  %v4187_v0 = vadd.f32 %v4183_v23, %v4172_v16  ;;  %v4188_v47 = vadd.f32 %v4184_v32, %v4173_v63 }
 0x80e   :  { %4709 = vrot.lane.b32.xlu1 %v11890_v57, %s5286_s4  ;;  %v4302_v39 = vperm.slane %v10349_v34, 2  ;;  %v4248_v49 = vperm.slane %v4244_v42, 2  ;;  %v4294_v29 = vsel %vm4292_vm2, %v10293_v46, %v10303_v27  ;;  %v4247_v23 = vperm.slane %v4244_v42, 1 }
 0x80f   :  { %v4200_v53 = vadd.f32 %v4196_v25, %v4185_v50  ;;  %v4201_v61 = vadd.f32 %v4197_v22, %v4186_v48  ;;  %v4202_v55 = vadd.f32 %v4198_v10, %v4187_v0  ;;  %v4203_v62 = vadd.f32 %v4199_v17, %v4188_v47  ;;  %v11897_v0 = vld [vmem:[#allocation95_spill] sm:$0xff] }
 0x810   :  { %v4209_v7 = vpop.permute.xlu1 %4208  ;;  %v4241_v16 = vsel %vm4238_vm3, %v10256_v28, %v10260_v12  ;;  %v4310_v52 = vmul.f32 %v4302_v39, %v4294_v29  ;;  %v11896_v22 = vmov 3   ;;  %v4336_v15 = vmul.f32 %v10319_v5, %v11897_v0  ;;  %v11904_v0 = vld [vmem:[#allocation122_spill] sm:$0xff] }
 0x811   :  { %v4211_v60 = vmul.f32 %v4209_v7, %v11891_v21  ;;  %v4212_v51 = vmul.f32 %v4209_v7, %v11892_v58  ;;  %v4213_v13 = vmul.f32 %v4209_v7, %v11893_v11  ;;  %v4214_v24 = vmul.f32 %v4209_v7, %v11894_v36  ;;  %v10386_v43 = vpop.permute.xlu0 %4450  ;;  %v4805_v21 = vld.sshfl [vmem:[#allocation1] sm:$0xff pattern:$0x75316420] }
 0x812   :  { %5173 = vset.pattern.permute.xlu0 %v11896_v22  ;;  %v4255_v63 = vmul.f32 %v4247_v23, %v4241_v16  ;;  %v4321_v10 = vmul.f32 %v10309_v35, %v4310_v52  ;;  %v4246_v57 = vperm.slane %v4244_v42, 0  ;;  %v11898_v11 = vld [vmem:[#allocation156_spill] sm:$0xff]  ;;  %v4300_v36 = vperm.slane %v10349_v34, 0 }
 0x813   :  { %v10351_v31 = vadd.f32 %v4211_v60, %v4200_v53  ;;  %v4216_v20 = vadd.f32 %v4212_v51, %v4201_v61  ;;  %v4217_v54 = vadd.f32 %v4213_v13, %v4202_v55  ;;  %v4218_v56 = vadd.f32 %v4214_v24, %v4203_v62  ;;  %v10371_v9 = vpop.permute.xlu2 %4400 }
 0x814   :  { %v4242_v61 = vsel %vm4238_vm3, %v10274_v4, %v10256_v28  ;;  %v4266_v55 = vmul.f32 %v10282_v37, %v4255_v63  ;;  %v4335_v13 = vmul.f32 %v10319_v5, %v11898_v11  ;;  %v4303_v28 = vperm.slane %v10349_v34, 3  ;;  %v11902_v63 = vld [vmem:[#allocation53_spill] sm:$0xff] }
 0x815   :  { %v4254_v51 = vmul.f32 %v4246_v57, %v4242_v61 }
 0x816   :  { %4713 = vrot.lane.b32.xlu1 %v11895_v14, %s5286_s4  ;;  %v4270_v60 = vadd.f32 %v4266_v55, %v4216_v20 }
 0x817   :  { %v4265_v42 = vmul.f32 %v10282_v37, %v4254_v51 }
 0x818   :  { %v4235_v41 = vpop.permute.xlu1 %4234 }
 0x819   :  { %v4239_v19 = vsel %vm4238_vm3, %v4235_v41, %v10274_v4  ;;  %v4240_v38 = vsel %vm4238_vm3, %v10260_v12, %v4235_v41  ;;  %v4301_v12 = vperm.slane %v10349_v34, 1  ;;  %v4455_v4 = vpop.permute.xlu0 %4454  ;;  %v4269_v34 = vadd.f32 %v4265_v42, %v10351_v31 }
 0x81a   :  { %v4256_v32 = vmul.f32 %v4248_v49, %v4240_v38  ;;  %v4257_v6 = vmul.f32 %v4249_v2, %v4239_v19  ;;  %v5095_v49 = vld [vmem:[%s10693_s14 + $0x5c] sm:$0xf]  ;;  %s5072_s14 = sld [smem:[#allocation2 + $0x7]] }
 0x81c   :  { %v4267_v25 = vmul.f32 %v10282_v37, %v4256_v32  ;;  %v4268_v59 = vmul.f32 %v10282_v37, %v4257_v6  ;;  %v4337_v37 = vmul.f32 %v10319_v5, %v11842_v44  ;;  %v11900_v6 = vld [vmem:[#allocation79_spill] sm:$0xff]  ;;  %v4376_v44 = vmul.f32 %v10327_v33, %v11904_v0 }
 0x81e   :  { %v4271_v50 = vadd.f32 %v4267_v25, %v4217_v54  ;;  %v4272_v48 = vadd.f32 %v4268_v59, %v4218_v56  ;;  %4764 = vrot.lane.b32.xlu1 %v10134_v45, %s5287_s13  ;;  %v10402_v45 = vpop.permute.xlu2 %4452  ;;  %v11901_v59 = vld [vmem:[#allocation107_spill] sm:$0xff]  ;;  %s5295_s13 = smov [#allocation7]  }
 0x820   :  { %v4325_v17 = vadd.f32 %v4321_v10, %v4271_v50  ;;  %v4285_v47 = vpop.permute.xlu1 %4284  ;;  %v11903_v50 = vld [vmem:[#allocation100_spill] sm:$0xff] }
 0x821   :  { %v4295_v53 = vsel %vm4292_vm2, %v4285_v47, %v10293_v46 }
 0x822   :  { %v4309_v7 = vmul.f32 %v4301_v12, %v4295_v53  ;;  %v4340_v62 = vadd.f32 %v4336_v15, %v4325_v17  ;;  %v4375_v12 = vmul.f32 %v10327_v33, %v11847_v8  ;;  %v11906_v15 = vld [vmem:[#allocation93_spill] sm:$0xff] }
 0x823   :  { %v4378_v17 = vmul.f32 %v10327_v33, %v11906_v15 }
 0x824   :  { %v4320_v58 = vmul.f32 %v10309_v35, %v4309_v7 }
 0x826   :  { %v4324_v46 = vadd.f32 %v4320_v58, %v4270_v60  ;;  %4813 = vrot.lane.b32.xlu1 %v4805_v21, %s5294_s8  ;;  %v10419_v2 = vpop.permute.xlu2 %4480  ;;  %s4981_s8 = sshll.u32 %s5295_s13, 4  ;;  %s4982_s8 = int_to_ptr.vmem [resolvable:$true] %s4981_s8 }
 0x828   :  { %v4339_v24 = vadd.f32 %v4335_v13, %v4324_v46  ;;  %v4291_v54 = vpop.permute.xlu1 %4290  ;;  %v4408_v13 = vld [vmem:[#allocation6 + $0xa4] ss:$8 sm:$0xf]  ;;  %v4462_v46 = vld [vmem:[#allocation6 + $0xc6] ss:$8 sm:$0xf] }
 0x829   :  { %v4293_v20 = vsel %vm4292_vm2, %v10303_v27, %v4291_v54  ;;  %v4296_v56 = vsel %vm4292_vm2, %v4291_v54, %v4285_v47  ;;  %v11899_v27 = vld [vmem:[#allocation66_spill] sm:$0xff]  ;;  %v10440_v47 = vpop.permute.xlu0 %4510  ;;  %v4466_v54 = vperm.slane %v4462_v46, 2  ;;  %v4410_v42 = vperm.slane %v4408_v13, 0 }
 0x82a   :  { %v4308_v39 = vmul.f32 %v4300_v36, %v4296_v56  ;;  %v4311_v14 = vmul.f32 %v4303_v28, %v4293_v20  ;;  %v4334_v23 = vmul.f32 %v10319_v5, %v11899_v27  ;;  %v11905_v5 = vld [vmem:[#allocation62_spill] sm:$0xff]  ;;  %v4412_v36 = vperm.slane %v4408_v13, 2 }
 0x82b   :  { %v4413_v28 = vperm.slane %v4408_v13, 3  ;;  %v4457_v20 = vsel %vm4456_vm12, %v10402_v45, %v4455_v4  ;;  %v4464_v56 = vperm.slane %v4462_v46, 0 }
 0x82c   :  { %v4319_v29 = vmul.f32 %v10309_v35, %v4308_v39  ;;  %v4322_v41 = vmul.f32 %v10309_v35, %v4311_v14  ;;  %v4411_v39 = vperm.slane %v4408_v13, 1  ;;  %v4474_v27 = vmul.f32 %v4466_v54, %v4457_v20  ;;  %v11909_v13 = vld [vmem:[#allocation117_spill] sm:$0xff] }
 0x82e   :  { %v4323_v19 = vadd.f32 %v4319_v29, %v4269_v34  ;;  %v4326_v38 = vadd.f32 %v4322_v41, %v4272_v48  ;;  %4791 = vperm.xlu1 %5169, %v5095_v49   ;;  %v4377_v48 = vmul.f32 %v10327_v33, %v11905_v5  ;;  %v10442_v8 = vpop.permute.xlu2 %4547  ;;  %v4403_v34 = vsel %vm4402_vm8, %v10358_v18, %v10371_v9 }
 0x830   :  { %v4338_v16 = vadd.f32 %v4334_v23, %v4323_v19  ;;  %v4341_v52 = vadd.f32 %v4337_v37, %v4326_v38  ;;  %v4347_v32 = vpop.permute.xlu1 %4346  ;;  %v4420_v19 = vmul.f32 %v4412_v36, %v4403_v34 }
 0x831   :  { %v4360_v25 = vmul.f32 %v11900_v6, %v4347_v32  ;;  %v4361_v31 = vmul.f32 %v11901_v59, %v4347_v32  ;;  %v4362_v10 = vmul.f32 %v11902_v63, %v4347_v32  ;;  %v4363_v35 = vmul.f32 %v11903_v50, %v4347_v32  ;;  %v10445_v11 = vpop.permute.xlu0 %4551 }
 0x833   :  { %v4364_v57 = vadd.f32 %v4360_v25, %v4338_v16  ;;  %v4365_v53 = vadd.f32 %v4361_v31, %v4339_v24  ;;  %v4366_v61 = vadd.f32 %v4362_v10, %v4340_v62  ;;  %v4367_v55 = vadd.f32 %v4363_v35, %v4341_v52 }
 0x834   :  { %v4465_v24 = vperm.slane %v4462_v46, 1  ;;  %v4485_v31 = vmul.f32 %v10419_v2, %v4474_v27 }
 0x835   :  { %v4379_v7 = vadd.f32 %v4375_v12, %v4364_v57  ;;  %v4380_v21 = vadd.f32 %v4376_v44, %v4365_v53  ;;  %v4381_v60 = vadd.f32 %v4377_v48, %v4366_v61  ;;  %v4382_v58 = vadd.f32 %v4378_v17, %v4367_v55  ;;  %v11907_v53 = vld [vmem:[#allocation163_spill] sm:$0xff]  ;;  %v11908_v55 = vld [vmem:[#allocation113_spill] sm:$0xff] }
 0x836   :  { %4858 = vperm.xlu1 %5169, %v10356_v1   ;;  %v10451_v33 = vpop.permute.xlu2 %4525 }
 0x838   :  { %v4397_v51 = vpop.permute.xlu1 %4396 }
 0x839   :  { %v4404_v29 = vsel %vm4402_vm8, %v4397_v51, %v10358_v18  ;;  %v10479_v41 = vpop.permute.xlu0 %4601 }
 0x83a   :  { %v4419_v52 = vmul.f32 %v4411_v39, %v4404_v29  ;;  %v11915_v39 = vld [vmem:[#allocation123_spill] sm:$0xff] }
 0x83e   :  { %5172 = vset.pattern.permute.xlu1 %v11896_v22  ;;  %v4458_v22 = vsel %vm4456_vm12, %v10386_v43, %v10402_v45  ;;  %v4406_v45 = vsel %vm4402_vm8, %v10371_v9, %v10341_v3 }
 0x83f   :  { %4902 = vperm.xlu1 %5172, %v10356_v1   ;;  %v4467_v1 = vperm.slane %v4462_v46, 3  ;;  %v4421_v38 = vmul.f32 %v4413_v28, %v4406_v45 }
 0x840   :  { %v4449_v62 = vpop.permute.xlu1 %4448 }
 0x841   :  { %v4459_v14 = vsel %vm4456_vm12, %v4449_v62, %v10386_v43  ;;  %v4460_v49 = vsel %vm4456_vm12, %v4455_v4, %v4449_v62  ;;  %v4405_v43 = vsel %vm4402_vm8, %v10341_v3, %v4397_v51  ;;  %v4473_v4 = vmul.f32 %v4465_v24, %v4458_v22  ;;  %v10483_v3 = vpop.permute.xlu2 %4603  ;;  %v10487_v17 = vpop.permute.xlu0 %4579  ;;  %v11910_v62 = vld [vmem:[#allocation166_spill] sm:$0xff]  ;;  %v11914_v24 = vld [vmem:[#allocation139_spill] sm:$0xff] }
 0x842   :  { %v4472_v23 = vmul.f32 %v4464_v56, %v4459_v14  ;;  %v4475_v37 = vmul.f32 %v4467_v1, %v4460_v49  ;;  %v4418_v16 = vmul.f32 %v4410_v42, %v4405_v43  ;;  %v4516_v54 = vmul.f32 %v10440_v47, %v11914_v24  ;;  %v10501_v42 = vld [vmem:[#allocation6 + $0xe6] ss:$8 sm:$0xf] }
 0x843   :  { %v4484_v18 = vmul.f32 %v10419_v2, %v4473_v4  ;;  %v4531_v14 = vmul.f32 %v10451_v33, %v11915_v39  ;;  %v4564_v4 = vperm.slane %v10501_v42, 1  ;;  %v10560_v39 = vld [vmem:[#allocation6 + $0x126] ss:$8 sm:$0xf] }
 0x844   :  { %v4483_v63 = vmul.f32 %v10419_v2, %v4472_v23  ;;  %v4486_v10 = vmul.f32 %v10419_v2, %v4475_v37  ;;  %v11911_v2 = vld [vmem:[#allocation118_spill] sm:$0xff] }
 0x848   :  { %v4427_v32 = vpop.permute.xlu1 %4426 }
 0x849   :  { %v4429_v9 = vmul.f32 %v4427_v32, %v4418_v16  ;;  %v4430_v6 = vmul.f32 %v4427_v32, %v4419_v52  ;;  %v4431_v25 = vmul.f32 %v4427_v32, %v4420_v19  ;;  %v4432_v59 = vmul.f32 %v4427_v32, %v4421_v38  ;;  %v10505_v49 = vpop.permute.xlu2 %4607  ;;  %v10518_v38 = vpop.permute.xlu0 %4656  ;;  %v11916_v16 = vld [vmem:[#allocation85_spill] sm:$0xff]  ;;  %v11917_v32 = vld [vmem:[#allocation84_spill] sm:$0xff] }
 0x84a   :  { %v4528_v52 = vmul.f32 %v10451_v33, %v11916_v16  ;;  %v4775_v16 = vperm.slane %v10560_v39, 0 }
 0x84b   :  { %v4433_v50 = vadd.f32 %v4429_v9, %v4379_v7  ;;  %v4434_v35 = vadd.f32 %v4430_v6, %v4380_v21  ;;  %v4435_v12 = vadd.f32 %v4431_v25, %v4381_v60  ;;  %v4436_v0 = vadd.f32 %v4432_v59, %v4382_v58  ;;  %v11912_v21 = vld [vmem:[#allocation82_spill] sm:$0xff]  ;;  %v11913_v58 = vld [vmem:[#allocation125_spill] sm:$0xff] }
 0x84c   :  { %v4513_v7 = vmul.f32 %v10440_v47, %v11911_v2  ;;  %v4514_v60 = vmul.f32 %v10440_v47, %v11912_v21  ;;  %v4515_v28 = vmul.f32 %v10440_v47, %v11913_v58  ;;  %v4563_v47 = vperm.slane %v10501_v42, 0  ;;  %v4614_v21 = vld [vmem:[#allocation6 + $0x120] ss:$8 sm:$0xf] }
 0x84d   :  { %v4487_v44 = vadd.f32 %v4483_v63, %v4433_v50  ;;  %v4488_v5 = vadd.f32 %v4484_v18, %v4434_v35  ;;  %v4489_v48 = vadd.f32 %v4485_v31, %v4435_v12  ;;  %v4490_v15 = vadd.f32 %v4486_v10, %v4436_v0 }
 0x84e   :  { %v4529_v9 = vmul.f32 %v10451_v33, %v11917_v32  ;;  %v4566_v12 = vperm.slane %v10501_v42, 3 }
 0x850   :  { %v4496_v57 = vpop.permute.xlu1 %4495 }
 0x851   :  { %v4498_v61 = vmul.f32 %v4496_v57, %v11907_v53  ;;  %v4499_v51 = vmul.f32 %v4496_v57, %v11908_v55  ;;  %v4500_v46 = vmul.f32 %v4496_v57, %v11909_v13  ;;  %v4501_v36 = vmul.f32 %v4496_v57, %v11910_v62  ;;  %v4659_v10 = vpop.permute.xlu2 %4658 }
 0x853   :  { %v4502_v20 = vadd.f32 %v4498_v61, %v4487_v44  ;;  %v4503_v22 = vadd.f32 %v4499_v51, %v4488_v5  ;;  %v4504_v56 = vadd.f32 %v4500_v46, %v4489_v48  ;;  %v4505_v1 = vadd.f32 %v4501_v36, %v4490_v15  ;;  %v4661_v48 = vpop.permute.xlu0 %4660 }
 0x854   :  { %v4662_v24 = vsel %vm3923_vm0, %v4659_v10, %v4661_v48 }
 0x855   :  { %v4517_v34 = vadd.f32 %v4513_v7, %v4502_v20  ;;  %v4518_v45 = vadd.f32 %v4514_v60, %v4503_v22  ;;  %v10507_v29 = vadd.f32 %v4515_v28, %v4504_v56  ;;  %v4520_v43 = vadd.f32 %v4516_v54, %v4505_v1  ;;  %v4667_v7 = vld [vmem:[#allocation6 + $0x122] ss:$8 sm:$0xf] }
 0x856   :  { %v4670_v58 = vperm.slane %v4667_v7, 1  ;;  %v4671_v28 = vperm.slane %v4667_v7, 2  ;;  %v4663_v54 = vsel %vm3923_vm0, %v10518_v38, %v4659_v10  ;;  %v4616_v22 = vperm.slane %v4614_v21, 0 }
 0x857   :  { %v4535_v27 = vadd.f32 %v4531_v14, %v4520_v43  ;;  %v4532_v59 = vadd.f32 %v4528_v52, %v4517_v34  ;;  %v4533_v18 = vadd.f32 %v4529_v9, %v4518_v45  ;;  %v4611_v56 = vsel %vm3875_vm6, %v10479_v41, %v10483_v3 }
 0x858   :  { %v4550_v23 = vpop.permute.xlu1 %4549  ;;  %v4619_v1 = vperm.slane %v4614_v21, 3  ;;  %v4565_v34 = vperm.slane %v10501_v42, 2  ;;  %v4612_v45 = vsel %vm3875_vm6, %v10505_v49, %v10479_v41  ;;  %v4678_v43 = vmul.f32 %v4670_v58, %v4663_v54 }
 0x859   :  { %v4557_v37 = vsel %vm4555_vm15, %v4550_v23, %v10445_v11  ;;  %v4558_v19 = vsel %vm4555_vm15, %v10442_v8, %v4550_v23  ;;  %v10537_v53 = vpop.permute.xlu2 %4707  ;;  %v11918_v23 = vld [vmem:[#allocation83_spill] sm:$0xff]  ;;  %v4778_v52 = vperm.slane %v10560_v39, 3 }
 0x85a   :  { %v4571_v6 = vmul.f32 %v4563_v47, %v4558_v19  ;;  %v4572_v25 = vmul.f32 %v4564_v4, %v4557_v37  ;;  %v4679_v47 = vmul.f32 %v4671_v28, %v4662_v24  ;;  %v10569_v4 = vld [vmem:[#allocation6 + $0x140] ss:$8 sm:$0xf]  ;;  %v4530_v37 = vmul.f32 %v10451_v33, %v11918_v23 }
 0x85b   :  { %v10539_v55 = vpop.permute.xlu0 %4711  ;;  %v4624_v19 = vmul.f32 %v4616_v22, %v4611_v56  ;;  %v4627_v42 = vmul.f32 %v4619_v1, %v4612_v45  ;;  %v4829_v32 = vperm.slane %v10569_v4, 1 }
 0x85c   :  { %v4582_v31 = vmul.f32 %v10487_v17, %v4571_v6  ;;  %v4583_v63 = vmul.f32 %v10487_v17, %v4572_v25  ;;  %v4617_v25 = vperm.slane %v4614_v21, 1 }
 0x85e   :  { %v10526_v50 = vadd.f32 %v4582_v31, %v4532_v59  ;;  %v10528_v35 = vadd.f32 %v4583_v63, %v4533_v18  ;;  %v4720_v59 = vld [vmem:[#allocation6 + $0x124] ss:$8 sm:$0xf]  ;;  %v4618_v63 = vperm.slane %v4614_v21, 2 }
 0x85f   :  { %v4722_v21 = vperm.slane %v4720_v59, 0  ;;  %v4723_v28 = vperm.slane %v4720_v59, 1  ;;  %v4724_v22 = vperm.slane %v4720_v59, 2 }
 0x860   :  { %v4554_v0 = vpop.permute.xlu1 %4553 }
 0x861   :  { %v4559_v44 = vsel %vm4555_vm15, %v4554_v0, %v10442_v8  ;;  %v10541_v13 = vpop.permute.xlu2 %4685 }
 0x862   :  { %v4574_v5 = vmul.f32 %v4566_v12, %v4559_v44  ;;  %v10580_v9 = vmul.f32 %v10541_v13, %v4678_v43  ;;  %v10583_v6 = vmul.f32 %v10541_v13, %v4679_v47 }
 0x863   :  { %v4761_v46 = vpop.permute.xlu0 %4760 }
 0x864   :  { %v4585_v15 = vmul.f32 %v10487_v17, %v4574_v5  ;;  %v4669_v5 = vperm.slane %v4667_v7, 0 }
 0x866   :  { %v10535_v57 = vadd.f32 %v4585_v15, %v4535_v27  ;;  %v4556_v27 = vsel %vm4555_vm15, %v10445_v11, %v4554_v0  ;;  %v4830_v11 = vperm.slane %v10569_v4, 2  ;;  %v4672_v15 = vperm.slane %v4667_v7, 3 }
 0x867   :  { %v4573_v41 = vmul.f32 %v4565_v34, %v4556_v27 }
 0x868   :  { %v4606_v61 = vpop.permute.xlu1 %4605 }
 0x869   :  { %v10545_v36 = vpop.permute.xlu2 %4762  ;;  %v4610_v10 = vsel %vm3875_vm6, %v10483_v3, %v4606_v61  ;;  %v4609_v44 = vsel %vm3875_vm6, %v4606_v61, %v10505_v49  ;;  %v4584_v58 = vmul.f32 %v10487_v17, %v4573_v41  ;;  %v4777_v41 = vperm.slane %v10560_v39, 2 }
 0x86a   :  { %v10589_v33 = vsel %vm4031_vm9, %v4761_v46, %v10545_v36  ;;  %v4625_v24 = vmul.f32 %v4617_v25, %v4610_v10  ;;  %v4626_v1 = vmul.f32 %v4618_v63, %v4609_v44 }
 0x86b   :  { %v10547_v2 = vpop.permute.xlu0 %4738 }
 0x870   :  { %v4655_v51 = vpop.permute.xlu1 %4654 }
 0x871   :  { %v10549_v60 = vpop.permute.xlu2 %4766  ;;  %v4664_v3 = vsel %vm3923_vm0, %v4655_v51, %v10518_v38  ;;  %v4665_v54 = vsel %vm3923_vm0, %v4661_v48, %v4655_v51 }
 0x872   :  { %v10594_v18 = vsel %vm4031_vm9, %v10549_v60, %v4761_v46  ;;  %v4534_v46 = vadd.f32 %v4530_v37, %v10507_v29  ;;  %v4725_v29 = vperm.slane %v4720_v59, 3  ;;  %v4677_v51 = vmul.f32 %v4669_v5, %v4664_v3 }
 0x873   :  { %v10562_v14 = vpop.permute.xlu0 %4815  ;;  %v4680_v34 = vmul.f32 %v4672_v15, %v4665_v54  ;;  %v4828_v59 = vperm.slane %v10569_v4, 0  ;;  %v4786_v40 = vmul.f32 %v4778_v52, %v10594_v18 }
 0x874   :  { %v4588_v47 = vadd.f32 %v4584_v58, %v4534_v46 }
 0x878   :  { %v10543_v62 = vpop.permute.xlu1 %4632 }
 0x879   :  { %v4818_v31 = vpop.permute.xlu2 %4817  ;;  %v4635_v61 = vmul.f32 %v10543_v62, %v4624_v19  ;;  %v4636_v7 = vmul.f32 %v10543_v62, %v4625_v24  ;;  %v4637_v45 = vmul.f32 %v10543_v62, %v4626_v1  ;;  %v4638_v43 = vmul.f32 %v10543_v62, %v4627_v42 }
 0x87a   :  { %v4822_v0 = vsel %vm4085_vm13, %v10562_v14, %v4818_v31  ;;  %v4831_v62 = vperm.slane %v10569_v4, 3  ;;  %v4688_v42 = vmul.f32 %v10541_v13, %v4677_v51 }
 0x87b   :  { %v4820_v56 = vpop.permute.xlu0 %4819  ;;  %v4641_v63 = vadd.f32 %v4637_v45, %v4588_v47  ;;  %v4642_v10 = vadd.f32 %v4638_v43, %v10535_v57  ;;  %v4837_v58 = vmul.f32 %v4829_v32, %v4822_v0 }
 0x87d   :  { %v4694_v24 = vadd.f32 %v10583_v6, %v4641_v63 }
 0x880   :  { %v4710_v8 = vpop.permute.xlu1 %4709 }
 0x881   :  { %v4716_v49 = vsel %vm3977_vm7, %v4710_v8, %v10539_v55  ;;  %v4717_v17 = vsel %vm3977_vm7, %v10537_v53, %v4710_v8  ;;  %v4821_v8 = vsel %vm4085_vm13, %v4818_v31, %v4820_v56  ;;  %v4691_v31 = vmul.f32 %v10541_v13, %v4680_v34 }
 0x882   :  { %v4730_v27 = vmul.f32 %v4722_v21, %v4717_v17  ;;  %v4731_v23 = vmul.f32 %v4723_v28, %v4716_v49  ;;  %v4838_v21 = vmul.f32 %v4830_v11, %v4821_v8 }
 0x883   :  { %v4695_v3 = vadd.f32 %v4691_v31, %v4642_v10  ;;  %v4871_v34 = vpop.permute.xlu0 %4870 }
 0x884   :  { %v4741_v44 = vmul.f32 %v10547_v2, %v4730_v27  ;;  %v4742_v5 = vmul.f32 %v10547_v2, %v4731_v23 }
 0x888   :  { %v4714_v20 = vpop.permute.xlu1 %4713 }
 0x889   :  { %v4715_v38 = vsel %vm3977_vm7, %v10539_v55, %v4714_v20  ;;  %v4718_v48 = vsel %vm3977_vm7, %v4714_v20, %v10537_v53  ;;  %v4776_v55 = vperm.slane %v10560_v39, 1  ;;  %v4639_v53 = vadd.f32 %v4635_v61, %v10526_v50 }
 0x88a   :  { %v4732_v37 = vmul.f32 %v4724_v22, %v4715_v38  ;;  %v4733_v19 = vmul.f32 %v4725_v29, %v4718_v48  ;;  %v4640_v20 = vadd.f32 %v4636_v7, %v10528_v35 }
 0x88c   :  { %v4743_v15 = vmul.f32 %v10547_v2, %v4732_v37  ;;  %v4744_v46 = vmul.f32 %v10547_v2, %v4733_v19  ;;  %v4693_v28 = vadd.f32 %v10580_v9, %v4640_v20 }
 0x88e   :  { %v4747_v0 = vadd.f32 %v4743_v15, %v4694_v24  ;;  %v4748_v9 = vadd.f32 %v4744_v46, %v4695_v3 }
 0x890   :  { %v4765_v12 = vpop.permute.xlu1 %4764 }
 0x891   :  { %v4768_v13 = vsel %vm4031_vm9, %v4765_v12, %v10549_v60  ;;  %v4769_v57 = vsel %vm4031_vm9, %v10545_v36, %v4765_v12  ;;  %v4783_v60 = vmul.f32 %v4775_v16, %v10589_v33  ;;  %v4845_v36 = vpop.permute.xlu2 %4844  ;;  %v4746_v12 = vadd.f32 %v4742_v5, %v4693_v28 }
 0x892   :  { %v4784_v4 = vmul.f32 %v4776_v55, %v4769_v57  ;;  %v4785_v32 = vmul.f32 %v4777_v41, %v4768_v13  ;;  %v4848_v17 = vmul.f32 %v4845_v36, %v4837_v58  ;;  %v4849_v29 = vmul.f32 %v4845_v36, %v4838_v21 }
 0x898   :  { %v4814_v25 = vpop.permute.xlu1 %4813 }
 0x899   :  { %v4823_v50 = vsel %vm4085_vm13, %v4814_v25, %v10562_v14  ;;  %v4824_v35 = vsel %vm4085_vm13, %v4820_v56, %v4814_v25  ;;  %v4692_v14 = vadd.f32 %v4688_v42, %v4639_v53  ;;  %v4887_v5 = vpop.permute.xlu2 %4886 }
 0x89a   :  { %v4836_v54 = vmul.f32 %v4828_v59, %v4823_v50  ;;  %v4839_v2 = vmul.f32 %v4831_v62, %v4824_v35 }
 0x89b   :  { %v4745_v11 = vadd.f32 %v4741_v44, %v4692_v14 }
 0x89c   :  { %v4847_v61 = vmul.f32 %v4845_v36, %v4836_v54  ;;  %v4850_v16 = vmul.f32 %v4845_v36, %v4839_v2 }
 0x8a0   :  { %v4792_v22 = vpop.permute.xlu1 %4791 }
 0x8a1   :  { %v4794_v6 = vmul.f32 %v4792_v22, %v4783_v60  ;;  %v4795_v56 = vmul.f32 %v4792_v22, %v4784_v4  ;;  %v4796_v1 = vmul.f32 %v4792_v22, %v4785_v32  ;;  %v4797_v49 = vmul.f32 %v4792_v22, %v4786_v40 }
 0x8a3   :  { %v4798_v33 = vadd.f32 %v4794_v6, %v4745_v11  ;;  %v4799_v7 = vadd.f32 %v4795_v56, %v4746_v12  ;;  %v4800_v39 = vadd.f32 %v4796_v1, %v4747_v0  ;;  %v4801_v52 = vadd.f32 %v4797_v49, %v4748_v9 }
 0x8a5   :  { %v4851_v18 = vadd.f32 %v4847_v61, %v4798_v33  ;;  %v4852_v38 = vadd.f32 %v4848_v17, %v4799_v7  ;;  %v4853_v48 = vadd.f32 %v4849_v29, %v4800_v39  ;;  %v4854_v51 = vadd.f32 %v4850_v16, %v4801_v52 }
 0x8a7   :  { %v4873_v45 = vperm.slane %v4851_v18, 1  ;;  %v4874_v43 = vperm.slane %v4852_v38, 1  ;;  %v4875_v8 = vperm.slane %v4853_v48, 1  ;;  %v4876_v47 = vperm.slane %v4854_v51, 1 }
 0x8a8   :  { %v4859_v27 = vpop.permute.xlu1 %4858  ;;  %v4861_v23 = vperm.slane %v4851_v18, 0  ;;  %v4862_v37 = vperm.slane %v4852_v38, 0  ;;  %v4863_v19 = vperm.slane %v4853_v48, 0  ;;  %v4864_v55 = vperm.slane %v4854_v51, 0 }
 0x8a9   :  { %v4877_v41 = vmul.f32 %v4873_v45, %v4871_v34  ;;  %v4878_v25 = vmul.f32 %v4874_v43, %v4871_v34  ;;  %v4879_v53 = vmul.f32 %v4875_v8, %v4871_v34  ;;  %v4880_v20 = vmul.f32 %v4876_v47, %v4871_v34 }
 0x8aa   :  { %v4865_v59 = vmul.f32 %v4861_v23, %v4859_v27  ;;  %v4866_v62 = vmul.f32 %v4862_v37, %v4859_v27  ;;  %v4867_v42 = vmul.f32 %v4863_v19, %v4859_v27  ;;  %v4868_v31 = vmul.f32 %v4864_v55, %v4859_v27 }
 0x8ab   :  { %v4889_v63 = vperm.slane %v4851_v18, 2  ;;  %v4890_v10 = vperm.slane %v4852_v38, 2  ;;  %v4891_v44 = vperm.slane %v4853_v48, 2  ;;  %v4892_v46 = vperm.slane %v4854_v51, 2 }
 0x8ac   :  { %v4881_v50 = vadd.f32 %v4877_v41, %v4865_v59  ;;  %v4882_v35 = vadd.f32 %v4878_v25, %v4866_v62  ;;  %v4883_v15 = vadd.f32 %v4879_v53, %v4867_v42  ;;  %v4884_v13 = vadd.f32 %v4880_v20, %v4868_v31 }
 0x8ad   :  { %v4893_v57 = vmul.f32 %v4889_v63, %v4887_v5  ;;  %v4894_v58 = vmul.f32 %v4890_v10, %v4887_v5  ;;  %v4895_v21 = vmul.f32 %v4891_v44, %v4887_v5  ;;  %v4905_v14 = vperm.slane %v4851_v18, 3 }
 0x8ae   :  { %v4906_v28 = vperm.slane %v4852_v38, 3  ;;  %v4907_v24 = vperm.slane %v4853_v48, 3  ;;  %v4908_v3 = vperm.slane %v4854_v51, 3  ;;  %v4896_v54 = vmul.f32 %v4892_v46, %v4887_v5 }
 0x8af   :  { %v4897_v2 = vadd.f32 %v4893_v57, %v4881_v50  ;;  %v4898_v60 = vadd.f32 %v4894_v58, %v4882_v35  ;;  %v4899_v40 = vadd.f32 %v4895_v21, %v4883_v15  ;;  %v4956_v63 = vstv %s5072_s14 }
 0x8b0   :  { %v4900_v0 = vadd.f32 %v4896_v54, %v4884_v13 }
 0x8b1   :  { %v4903_v36 = vpop.permute.xlu1 %4902 }
 0x8b2   :  { %v4909_v4 = vmul.f32 %v4905_v14, %v4903_v36  ;;  %v4910_v32 = vmul.f32 %v4906_v28, %v4903_v36  ;;  %v4911_v11 = vmul.f32 %v4907_v24, %v4903_v36  ;;  %v4912_v12 = vmul.f32 %v4908_v3, %v4903_v36 }
 0x8b4   :  { %v4913_v9 = vadd.f32 %v4909_v4, %v4897_v2  ;;  %v4914_v22 = vadd.f32 %v4910_v32, %v4898_v60  ;;  %v4915_v6 = vadd.f32 %v4911_v11, %v4899_v40  ;;  %v4916_v56 = vadd.f32 %v4912_v12, %v4900_v0 }
 0x8b6   :  { %v4917_v1 = vsel %vm137_vm11, %v4913_v9, 0.0  ;;  %v4918_v49 = vsel %vm137_vm11, %v4914_v22, 0.0  ;;  %v4920_v29 = vsel %vm137_vm11, %v4915_v6, 0.0  ;;  %v4922_v16 = vsel %vm137_vm11, %v4916_v56, 0.0 }
 0x8b7   :  { %v4919_v17 = vadd.f32 %v4918_v49, %v4917_v1 }
 0x8b9   :  { %v4921_v61 = vadd.f32 %v4920_v29, %v4919_v17 }
 0x8bb   :  { %v4923_v33 = vadd.f32 %v4922_v16, %v4921_v61 }
 0x8bd   :  { %4924 = vadd.xlane.f32.xlu2 %v4923_v33 }
 0x930   :  { %v4925_v7 = vpop.xlane.xlu2 %4924 }
 0x931   :  { %v4926_v39 = vmul.f32 0.001953125, %v4925_v7 }
 0x933   :  { %v4927_v52 = vsub.f32 %v4913_v9, %v4926_v39  ;;  %v4928_v18 = vsub.f32 %v4914_v22, %v4926_v39  ;;  %v4929_v38 = vsub.f32 %v4915_v6, %v4926_v39  ;;  %v4930_v48 = vsub.f32 %v4916_v56, %v4926_v39 }
 0x935   :  { %v4931_v51 = vmul.f32 %v4927_v52, %v4927_v52  ;;  %v4932_v34 = vmul.f32 %v4928_v18, %v4928_v18  ;;  %v4933_v45 = vmul.f32 %v4929_v38, %v4929_v38  ;;  %v4934_v43 = vmul.f32 %v4930_v48, %v4930_v48 }
 0x937   :  { %v4935_v8 = vsel %vm137_vm11, %v4931_v51, 0.0  ;;  %v4936_v47 = vsel %vm137_vm11, %v4932_v34, 0.0  ;;  %v4938_v23 = vsel %vm137_vm11, %v4933_v45, 0.0  ;;  %v4940_v19 = vsel %vm137_vm11, %v4934_v43, 0.0 }
 0x938   :  { %v4937_v27 = vadd.f32 %v4936_v47, %v4935_v8 }
 0x93a   :  { %v4939_v37 = vadd.f32 %v4938_v23, %v4937_v27 }
 0x93c   :  { %v4941_v55 = vadd.f32 %v4940_v19, %v4939_v37 }
 0x93e   :  { %4942 = vadd.xlane.f32.xlu1 %v4941_v55 }
 0x9b1   :  { %v4943_v41 = vpop.xlane.xlu1 %4942 }
 0x9b2   :  { %v4944_v25 = vmul.f32 0.001953125, %v4943_v41 }
 0x9b4   :  { %v4945_v53 = vadd.f32 1e-05, %v4944_v25 }
 0x9b6   :  { %5184 = vrsqrt.f32 %v4945_v53  ;;  %vm4952_vm14 = vweird.f32 %v4945_v53 }
 0x9bc   :  { %v5185_v20 = vpop.eup %5184 }
 0x9bd   :  { %v4947_v59 = vmul.f32 %v5185_v20, %v4945_v53  ;;  %vm4953_vm6 = vweird.f32 %v5185_v20 }
 0x9be   :  { %vm4954_vm0 = vmor %vm4952_vm14, %vm4953_vm6 }
 0x9bf   :  { %v4948_v62 = vmul.f32 %v5185_v20, %v4947_v59 }
 0x9c1   :  { %v4949_v42 = vmul.f32 0.5, %v4948_v62 }
 0x9c3   :  { %v4950_v31 = vsub.f32 1.5, %v4949_v42 }
 0x9c5   :  { %v4951_v10 = vmul.f32 %v5185_v20, %v4950_v31 }
 0x9c7   :  { %v4955_v44 = vsel %vm4954_vm0, %v5185_v20, %v4951_v10 }
 0x9c8   :  { %v4957_v5 = vmul.f32 %v4956_v63, %v4955_v44 }
 0x9ca   :  { %v4959_v50 = vmul.f32 %v4957_v5, %v4928_v18  ;;  %v4961_v35 = vmul.f32 %v4957_v5, %v4930_v48  ;;  %v4958_v15 = vmul.f32 %v4957_v5, %v4927_v52  ;;  %v4960_v46 = vmul.f32 %v4957_v5, %v4929_v38 }
 0x9cc   :  { %v4966_v13 = vrot.slane %v4959_v50, 4  ;;  %v4967_v57 = vrot.slane %v4961_v35, 4 }
 0x9ce   :  { %v4968_v58 = vsel %vm137_vm11, %v4958_v15, %v4966_v13  ;;  %v4969_v21 = vsel %vm137_vm11, %v4960_v46, %v4967_v57 }
 0x9cf   :  { %v4972_v14 = vadd.f32 %v4968_v58, %v10231_v30  ;;  %v4973_v28 = vadd.f32 %v4969_v21, %v10234_v26 }
 0x9d1   :  { %4974 = vst [vmem:[#allocation7] sm:$0xff] %v4972_v14 }
 0x9d2   :  { %4975 = vst [vmem:[#allocation7 + $0x8] sm:$0xff] %v4973_v28 }
 0x9d3   :  { %4986 = dma.vmem_to_hbm [thread:$0]  %s4982_s8, 256, %s4984_s6, [#allocation4]  }
 0x9d4   :  { %5251 = dma.done.wait [#allocation4], 256  }
 0x9d5   :  { %5252 = vsyncadd [#allocation4], 4294967040 }
 0x9d6   :  { %4991 = vsyncpa [#allocation3], 1 }
 0x9d7   :  { %4992 = vsyncpa [#allocation4], 1 }
 0x9d8   :  { %4993 = vsyncpa [#allocation5], 1 }

</bundles_post_ra>
